<compile_context>
chip_gen: v7x
topology: tpu7x:2x2x1
jax: 0.10.0
libtpu: 0.0.40
codegen_flags: <defaults>
</compile_context>

<pallas_src>
import functools

import jax
import jax.numpy as jnp
from jax.experimental import pallas as pl
from jax.experimental.pallas import tpu as pltpu

C_PAD = 128       # padded channel width for the small intermediate stages
HEAD_C = 2560     # EfficientNet-B7 head feature width (already a multiple of 128)


def _round_up(x, m):
    return (x + m - 1) // m * m


def _pick_tile(dim, candidates):
    for t in candidates:
        if dim % t == 0:
            return t
    return dim  # fall back to full extent (allowed: block dim == full array dim)


# --------------------------------------------------------------------------------------
# Pallas kernels
# --------------------------------------------------------------------------------------

def _mm_kernel(*refs, act, has_res):
    """(tm, tk) @ (tk, tn) tiles, f32 accumulator, fused BN-scale/shift + act + residual epilogue."""
    if has_res:
        x_ref, w_ref, s_ref, b_ref, r_ref, o_ref, acc_ref = refs
    else:
        x_ref, w_ref, s_ref, b_ref, o_ref, acc_ref = refs
        r_ref = None

    k = pl.program_id(2)

    @pl.when(k == 0)
    def _():
        acc_ref[...] = jnp.zeros_like(acc_ref)

    acc_ref[...] += jnp.dot(x_ref[...], w_ref[...], preferred_element_type=jnp.float32)

    @pl.when(k == pl.num_programs(2) - 1)
    def _():
        y = acc_ref[...] * s_ref[...] + b_ref[...]     # folded BN / bias in f32
        if act == "silu":
            y = y * jax.nn.sigmoid(y)
        elif act == "sigmoid":
            y = jax.nn.sigmoid(y)
        if has_res:
            y = y + r_ref[...].astype(jnp.float32)
        o_ref[...] = y.astype(o_ref.dtype)


def matmul_fused(x, w, scale, shift, act="none", res=None, out_dtype=jnp.bfloat16):
    """Tiled (M, N, K) matmul on the MXU with fused epilogue. x:(M,K), w:(K,N) in bf16."""
    M, K = x.shape
    N = w.shape[1]
    tm = _pick_tile(M, (256, 128, 64, 32, 16, 8))
    tn = _pick_tile(N, (256, 128))                      # 256-wide tiles on the head conv
    if K % 128 == 0 and K >= 1024:
        tk = 512 if K % 512 == 0 else (256 if K % 256 == 0 else 128)
    else:
        tk = K                                          # small K: single un-tiled K step

    has_res = res is not None
    in_specs = [
        pl.BlockSpec((tm, tk), lambda i, j, k: (i, k)),
        pl.BlockSpec((tk, tn), lambda i, j, k: (k, j)),
        pl.BlockSpec((1, tn), lambda i, j, k: (0, j)),
        pl.BlockSpec((1, tn), lambda i, j, k: (0, j)),
    ]
    args = [x.astype(jnp.bfloat16), w.astype(jnp.bfloat16),
            scale.astype(jnp.float32), shift.astype(jnp.float32)]
    if has_res:
        in_specs.append(pl.BlockSpec((tm, tn), lambda i, j, k: (i, j)))
        args.append(res.astype(jnp.bfloat16))

    return pl.pallas_call(
        functools.partial(_mm_kernel, act=act, has_res=has_res),
        out_shape=jax.ShapeDtypeStruct((M, N), out_dtype),
        grid_spec=pltpu.PrefetchScalarGridSpec(
            num_scalar_prefetch=0,
            grid=(M // tm, N // tn, K // tk),
            in_specs=in_specs,
            out_specs=pl.BlockSpec((tm, tn), lambda i, j, k: (i, j)),
            scratch_shapes=[pltpu.VMEM((tm, tn), jnp.float32)],
        ),
        compiler_params=pltpu.CompilerParams(
            dimension_semantics=("parallel", "parallel", "arbitrary")),
    )(*args)


def _dwconv_kernel(x_ref, w_ref, s_ref, b_ref, o_ref, *, k, H, W):
    """Depthwise 3x3 conv: accumulate k*k shifted taps of a halo tile, fused folded-BN + SiLU."""
    x = x_ref[0].astype(jnp.float32)                     # (H+2, W+2, C)
    C = x.shape[-1]
    acc = jnp.zeros((H, W, C), jnp.float32)
    for i in range(k):
        for j in range(k):
            acc = acc + x[i:i + H, j:j + W, :] * w_ref[i * k + j].astype(jnp.float32)[None, None, :]
    y = acc * s_ref[0][None, None, :] + b_ref[0][None, None, :]
    o_ref[0] = (y * jax.nn.sigmoid(y)).astype(o_ref.dtype)


def dwconv_fused(x, w, scale, shift, stride):
    """x: (N, H, W, C) bf16; w: (9, C); folded BN scale/shift: (1, C). 3x3, pad=1."""
    Nb, H, W, C = x.shape
    k = 3
    xp = jnp.pad(x, ((0, 0), (1, 1), (1, 1), (0, 0)))
    out = pl.pallas_call(
        functools.partial(_dwconv_kernel, k=k, H=H, W=W),
        out_shape=jax.ShapeDtypeStruct((Nb, H, W, C), jnp.bfloat16),
        grid_spec=pltpu.PrefetchScalarGridSpec(
            num_scalar_prefetch=0,
            grid=(Nb,),
            in_specs=[
                pl.BlockSpec((1, H + 2, W + 2, C), lambda n: (n, 0, 0, 0)),
                pl.BlockSpec((k * k, C), lambda n: (0, 0)),
                pl.BlockSpec((1, C), lambda n: (0, 0)),
                pl.BlockSpec((1, C), lambda n: (0, 0)),
            ],
            out_specs=pl.BlockSpec((1, H, W, C), lambda n: (n, 0, 0, 0)),
        ),
        compiler_params=pltpu.CompilerParams(dimension_semantics=("parallel",)),
    )(xp, w, scale, shift)
    if stride == 2:
        # TODO(synk): stride-2 handled by subsampling the stride-1 output (4x extra VPU work on the
        # single strided block); an in-kernel strided tap read would avoid it.
        out = out[:, ::2, ::2, :]
    return out


def _se_kernel(x_ref, w1_ref, b1_ref, w2_ref, b2_ref, o_ref):
    """Fused squeeze-excite for one batch row: GAP -> FC -> SiLU -> FC -> sigmoid -> scale x."""
    x = x_ref[0].astype(jnp.float32)                     # (L, C)
    pooled = jnp.mean(x, axis=0, keepdims=True)          # (1, C)
    h = jnp.dot(pooled, w1_ref[...], preferred_element_type=jnp.float32) + b1_ref[...]
    h = h * jax.nn.sigmoid(h)
    g = jnp.dot(h, w2_ref[...], preferred_element_type=jnp.float32) + b2_ref[...]
    g = jax.nn.sigmoid(g)
    o_ref[0] = (x * g).astype(o_ref.dtype)


def se_fused(x, w1, b1, w2, b2):
    Nb, H, W, C = x.shape
    L = H * W
    Cse = w1.shape[1]
    out = pl.pallas_call(
        _se_kernel,
        out_shape=jax.ShapeDtypeStruct((Nb, L, C), jnp.bfloat16),
        grid_spec=pltpu.PrefetchScalarGridSpec(
            num_scalar_prefetch=0,
            grid=(Nb,),
            in_specs=[
                pl.BlockSpec((1, L, C), lambda n: (n, 0, 0)),
                pl.BlockSpec((C, Cse), lambda n: (0, 0)),
                pl.BlockSpec((1, Cse), lambda n: (0, 0)),
                pl.BlockSpec((Cse, C), lambda n: (0, 0)),
                pl.BlockSpec((1, C), lambda n: (0, 0)),
            ],
            out_specs=pl.BlockSpec((1, L, C), lambda n: (n, 0, 0)),
        ),
        compiler_params=pltpu.CompilerParams(dimension_semantics=("parallel",)),
    )(x.reshape(Nb, L, C), w1, b1, w2, b2)
    return out.reshape(Nb, H, W, C)


def _gap_kernel(x_ref, o_ref):
    o_ref[0] = jnp.mean(x_ref[0].astype(jnp.float32), axis=0, keepdims=True).astype(o_ref.dtype)


def gap_fused(x):
    """Global average pool. x: (N, L, C) -> (N, C) f32."""
    Nb, L, C = x.shape
    out = pl.pallas_call(
        _gap_kernel,
        out_shape=jax.ShapeDtypeStruct((Nb, 1, C), jnp.float32),
        grid_spec=pltpu.PrefetchScalarGridSpec(
            num_scalar_prefetch=0,
            grid=(Nb,),
            in_specs=[pl.BlockSpec((1, L, C), lambda n: (n, 0, 0))],
            out_specs=pl.BlockSpec((1, 1, C), lambda n: (n, 0, 0)),
        ),
        compiler_params=pltpu.CompilerParams(dimension_semantics=("parallel",)),
    )(x)
    return out.reshape(Nb, C)


# --------------------------------------------------------------------------------------
# Glue: im2col for the stem only, BN folding, one-time channel padding
# --------------------------------------------------------------------------------------

def extract_patches(x, k, stride, padding):
    # x: (N, H, W, C) -> (N, Ho, Wo, k*k, C)   (used only for the tiny stem conv)
    N, H, W, C = x.shape
    xpad = jnp.pad(x, ((0, 0), (padding, padding), (padding, padding), (0, 0)))
    Ho = (H + 2 * padding - k) // stride + 1
    Wo = (W + 2 * padding - k) // stride + 1
    taps = []
    for i in range(k):
        for j in range(k):
            taps.append(xpad[:, i:i + stride * Ho:stride, j:j + stride * Wo:stride, :])
    return jnp.stack(taps, axis=3), Ho, Wo


def _bn_fold(bn, eps=1e-3):
    scale = bn["gamma"] / jnp.sqrt(bn["var"] + eps)
    shift = bn["beta"] - bn["mean"] * scale
    return scale, shift


def _pad_vec(v, n):
    return jnp.zeros((1, n), jnp.float32).at[0, :v.shape[0]].set(v.astype(jnp.float32))


def _pad_mat(w, r, c, dtype=jnp.bfloat16):
    return jnp.zeros((r, c), jnp.float32).at[:w.shape[0], :w.shape[1]].set(
        w.astype(jnp.float32)).astype(dtype)


def prepare_params(params):
    """Fold BN into f32 scale/shift, pad all channel dims to 128 once, cast matmul weights to bf16."""
    p = {}
    sc, sh = _bn_fold(params["stem"]["bn"])
    p["stem_w"] = _pad_mat(params["stem"]["w"].reshape(27, -1), 27, C_PAD)
    p["stem_scale"], p["stem_shift"] = _pad_vec(sc, C_PAD), _pad_vec(sh, C_PAD)

    for name in ("b1", "b2"):
        b = params[name]
        if "exp" in b:
            sc, sh = _bn_fold(b["bn_exp"])
            p[f"{name}_exp_w"] = _pad_mat(b["exp"], C_PAD, C_PAD)
            p[f"{name}_exp_scale"], p[f"{name}_exp_shift"] = _pad_vec(sc, C_PAD), _pad_vec(sh, C_PAD)
        sc, sh = _bn_fold(b["bn_dw"])
        p[f"{name}_dw_w"] = _pad_mat(b["dw"].reshape(9, -1), 9, C_PAD, jnp.float32)
        p[f"{name}_dw_scale"], p[f"{name}_dw_shift"] = _pad_vec(sc, C_PAD), _pad_vec(sh, C_PAD)
        p[f"{name}_se_w1"] = _pad_mat(b["se_w1"], C_PAD, C_PAD, jnp.float32)
        p[f"{name}_se_b1"] = _pad_vec(b["se_b1"], C_PAD)
        p[f"{name}_se_w2"] = _pad_mat(b["se_w2"], C_PAD, C_PAD, jnp.float32)
        p[f"{name}_se_b2"] = _pad_vec(b["se_b2"], C_PAD)
        sc, sh = _bn_fold(b["bn_proj"])
        p[f"{name}_proj_w"] = _pad_mat(b["proj"], C_PAD, C_PAD)
        p[f"{name}_proj_scale"], p[f"{name}_proj_shift"] = _pad_vec(sc, C_PAD), _pad_vec(sh, C_PAD)

    sc, sh = _bn_fold(params["head"]["bn"])
    p["head_w"] = _pad_mat(params["head"]["w"], C_PAD, HEAD_C)
    p["head_scale"], p["head_shift"] = _pad_vec(sc, HEAD_C), _pad_vec(sh, HEAD_C)

    embed = params["cls"]["w"].shape[1]
    n_cls = _round_up(max(embed, 128), 128)
    p["cls_w"] = _pad_mat(params["cls"]["w"], HEAD_C, n_cls)
    p["cls_scale"] = jnp.ones((1, n_cls), jnp.float32)
    p["cls_shift"] = _pad_vec(params["cls"]["b"], n_cls)
    p["embed"] = embed
    return p


# --------------------------------------------------------------------------------------
# Forward pass
# --------------------------------------------------------------------------------------

def cnn_efficientnet_forward(params, images_nchw):
    p = prepare_params(params)
    x = jnp.transpose(images_nchw, (0, 2, 3, 1)).astype(jnp.float32)   # NHWC
    Nb = x.shape[0]

    # stem: 3x3 s2 conv + BN + SiLU (im2col on the tiny raw image only)
    patches, Ho, Wo = extract_patches(x, 3, 2, 1)
    xm = patches.reshape(Nb * Ho * Wo, 27).astype(jnp.bfloat16)
    h = matmul_fused(xm, p["stem_w"], p["stem_scale"], p["stem_shift"], act="silu")
    h = h.reshape(Nb, Ho, Wo, C_PAD)
    M = Nb * Ho * Wo

    # MBConv block 1: depthwise s1 -> SE -> 1x1 projection (+ residual fused into epilogue)
    inp = h
    d = dwconv_fused(h, p["b1_dw_w"], p["b1_dw_scale"], p["b1_dw_shift"], stride=1)
    s = se_fused(d, p["b1_se_w1"], p["b1_se_b1"], p["b1_se_w2"], p["b1_se_b2"])
    h = matmul_fused(s.reshape(M, C_PAD), p["b1_proj_w"], p["b1_proj_scale"],
                     p["b1_proj_shift"], act="none",
                     res=inp.reshape(M, C_PAD)).reshape(Nb, Ho, Wo, C_PAD)

    # MBConv block 2: 1x1 expand -> depthwise s2 -> SE -> 1x1 projection (no residual)
    e = matmul_fused(h.reshape(M, C_PAD), p["b2_exp_w"], p["b2_exp_scale"],
                     p["b2_exp_shift"], act="silu").reshape(Nb, Ho, Wo, C_PAD)
    d = dwconv_fused(e, p["b2_dw_w"], p["b2_dw_scale"], p["b2_dw_shift"], stride=2)
    s = se_fused(d, p["b2_se_w1"], p["b2_se_b1"], p["b2_se_w2"], p["b2_se_b2"])
    H2, W2 = d.shape[1] // 2, d.shape[2] // 2
    H2, W2 = s.shape[1], s.shape[2]
    M2 = Nb * H2 * W2
    h = matmul_fused(s.reshape(M2, C_PAD), p["b2_proj_w"], p["b2_proj_scale"],
                     p["b2_proj_shift"], act="none")

    # head: 1x1 conv to 2560 + BN + SiLU, global average pool, Linear(2560, embed_size)
    h = matmul_fused(h, p["head_w"], p["head_scale"], p["head_shift"], act="silu")
    feat = gap_fused(h.reshape(Nb, H2 * W2, HEAD_C))                    # (Nb, 2560) f32
    out = matmul_fused(feat.astype(jnp.bfloat16), p["cls_w"], p["cls_scale"],
                       p["cls_shift"], act="none", out_dtype=jnp.float32)
    return out[:, :p["embed"]]


# --------------------------------------------------------------------------------------
# Deterministic parameter init (synthetic; shapes follow the module structure)
# --------------------------------------------------------------------------------------

def init_params(key, embed_size):
    keys = iter(jax.random.split(key, 64))

    def nrm(shape, scale=0.1):
        return jax.random.normal(next(keys), shape, jnp.float32) * scale

    def bn(c):
        return dict(gamma=1.0 + nrm((c,)), beta=nrm((c,)),
                    mean=nrm((c,)), var=1.0 + jnp.abs(nrm((c,))))

    return {
        "stem": dict(w=nrm((3, 3, 3, 16)), bn=bn(16)),
        "b1": dict(dw=nrm((3, 3, 16)), bn_dw=bn(16),
                   se_w1=nrm((16, 4)), se_b1=nrm((4,)),
                   se_w2=nrm((4, 16)), se_b2=nrm((16,)),
                   proj=nrm((16, 16)), bn_proj=bn(16)),
        "b2": dict(exp=nrm((16, 96)), bn_exp=bn(96),
                   dw=nrm((3, 3, 96)), bn_dw=bn(96),
                   se_w1=nrm((96, 4)), se_b1=nrm((4,)),
                   se_w2=nrm((4, 96)), se_b2=nrm((96,)),
                   proj=nrm((96, 24)), bn_proj=bn(24)),
        "head": dict(w=nrm((24, 2560)), bn=bn(2560)),
        "cls": dict(w=nrm((2560, embed_size)), b=nrm((embed_size,))),
    }


if __name__ == "__main__":
    embed_size = 32
    key = jax.random.PRNGKey(0)
    k_param, k_img = jax.random.split(key)
    params = init_params(k_param, embed_size)
    images = jax.random.normal(k_img, (2, 3, 32, 32), jnp.float32)   # NCHW, like PyTorch

    fwd = jax.jit(cnn_efficientnet_forward)
    out = fwd(params, images)
    out = jax.block_until_ready(out)
    assert out.shape == (2, embed_size), out.shape
    print("KERNEL_OK")
</pallas_src>

<mosaic_0001>
module attributes {stable_mosaic.version = 11 : i64} {
  func.func @_mm_kernel(%arg0: i32, %arg1: i32, %arg2: i32, %arg3: memref<256x27xbf16, #tpu.memory_space<vmem>>, %arg4: memref<27x128xbf16, #tpu.memory_space<vmem>>, %arg5: memref<1x128xf32, #tpu.memory_space<vmem>>, %arg6: memref<1x128xf32, #tpu.memory_space<vmem>>, %arg7: memref<256x128xbf16, #tpu.memory_space<vmem>>, %arg8: memref<256x128xf32, #tpu.memory_space<vmem>>) attributes {dimension_semantics = [#tpu.dimension_semantics<parallel>, #tpu.dimension_semantics<parallel>, #tpu.dimension_semantics<arbitrary>], iteration_bounds = array<i64: 2, 1, 1>, scalar_prefetch = 0 : i64, scratch_operands = 1 : i64, tpu.core_type = #tpu.core_type<tc>, window_params = [{transform_indices = @transform_0, window_bounds = array<i64: 256, 27>}, {transform_indices = @transform_1, window_bounds = array<i64: 27, 128>}, {transform_indices = @transform_2, window_bounds = array<i64: 1, 128>}, {transform_indices = @transform_3, window_bounds = array<i64: 1, 128>}, {transform_indices = @transform_4, window_bounds = array<i64: 256, 128>}]} {
    %c0_i32 = arith.constant 0 : i32
    %0 = arith.cmpi eq, %arg2, %c0_i32 : i32
    %1 = arith.extui %0 : i1 to i32
    %c0_i32_0 = arith.constant 0 : i32
    %2 = arith.cmpi ne, %1, %c0_i32_0 : i32
    scf.if %2 {
      %cst_10 = arith.constant 0.000000e+00 : f32
      %12 = vector.broadcast %cst_10 : f32 to vector<256x128xf32>
      %c0_11 = arith.constant 0 : index
      %c0_12 = arith.constant 0 : index
      %13 = vector.load %arg8[%c0_11, %c0_12] : memref<256x128xf32, #tpu.memory_space<vmem>>, vector<256x128xf32>
      tpu.vector_store %arg8[%c0_11, %c0_12], %12 {strides = array<i32>} : memref<256x128xf32, #tpu.memory_space<vmem>>, vector<256x128xf32>,
    } else {
    }
    %c0 = arith.constant 0 : index
    %c0_1 = arith.constant 0 : index
    %3 = vector.load %arg8[%c0, %c0_1] : memref<256x128xf32, #tpu.memory_space<vmem>>, vector<256x128xf32>
    %c0_2 = arith.constant 0 : index
    %c0_3 = arith.constant 0 : index
    %4 = vector.load %arg3[%c0_2, %c0_3] : memref<256x27xbf16, #tpu.memory_space<vmem>>, vector<256x27xbf16>
    %c0_4 = arith.constant 0 : index
    %c0_5 = arith.constant 0 : index
    %5 = vector.load %arg4[%c0_4, %c0_5] : memref<27x128xbf16, #tpu.memory_space<vmem>>, vector<27x128xbf16>
    %cst = arith.constant dense<0.000000e+00> : vector<256x128xf32>
    %6 = tpu.matmul %4, %5, %cst {dimension_numbers = #tpu.dot_dimension_numbers<[1], [0], [0], [1], [0, 0, 1, 1], [], []>} : vector<256x27xbf16>, vector<27x128xbf16>, vector<256x128xf32> -> vector<256x128xf32>
    %7 = arith.addf %3, %6 : vector<256x128xf32>
    %c0_6 = arith.constant 0 : index
    %c0_7 = arith.constant 0 : index
    %8 = vector.load %arg8[%c0_6, %c0_7] : memref<256x128xf32, #tpu.memory_space<vmem>>, vector<256x128xf32>
    tpu.vector_store %arg8[%c0_6, %c0_7], %7 {strides = array<i32>} : memref<256x128xf32, #tpu.memory_space<vmem>>, vector<256x128xf32>,
    %c0_i32_8 = arith.constant 0 : i32
    %9 = arith.cmpi eq, %arg2, %c0_i32_8 : i32
    %10 = arith.extui %9 : i1 to i32
    %c0_i32_9 = arith.constant 0 : i32
    %11 = arith.cmpi ne, %10, %c0_i32_9 : i32
    scf.if %11 {
      %c0_10 = arith.constant 0 : index
      %c0_11 = arith.constant 0 : index
      %12 = vector.load %arg8[%c0_10, %c0_11] : memref<256x128xf32, #tpu.memory_space<vmem>>, vector<256x128xf32>
      %c0_12 = arith.constant 0 : index
      %c0_13 = arith.constant 0 : index
      %13 = vector.load %arg5[%c0_12, %c0_13] : memref<1x128xf32, #tpu.memory_space<vmem>>, vector<1x128xf32>
      %14 = vector.broadcast %13 : vector<1x128xf32> to vector<256x128xf32>
      %15 = arith.mulf %12, %14 : vector<256x128xf32>
      %c0_14 = arith.constant 0 : index
      %c0_15 = arith.constant 0 : index
      %16 = vector.load %arg6[%c0_14, %c0_15] : memref<1x128xf32, #tpu.memory_space<vmem>>, vector<1x128xf32>
      %17 = vector.broadcast %16 : vector<1x128xf32> to vector<256x128xf32>
      %18 = arith.addf %15, %17 : vector<256x128xf32>
      %19 = arith.negf %18 : vector<256x128xf32>
      %20 = math.exp %19 : vector<256x128xf32>
      %cst_16 = arith.constant 1.000000e+00 : f32
      %21 = vector.broadcast %cst_16 : f32 to vector<256x128xf32>
      %22 = arith.addf %21, %20 : vector<256x128xf32>
      %23 = arith.divf %21, %22 : vector<256x128xf32>
      %24 = arith.mulf %18, %23 : vector<256x128xf32>
      %25 = arith.truncf %24 : vector<256x128xf32> to vector<256x128xbf16>
      %c0_17 = arith.constant 0 : index
      %c0_18 = arith.constant 0 : index
      %26 = vector.load %arg7[%c0_17, %c0_18] : memref<256x128xbf16, #tpu.memory_space<vmem>>, vector<256x128xbf16>
      tpu.vector_store %arg7[%c0_17, %c0_18], %25 {strides = array<i32>} : memref<256x128xbf16, #tpu.memory_space<vmem>>, vector<256x128xbf16>,
    } else {
    }
    return
  }
  func.func @transform_0(%arg0: i32, %arg1: i32, %arg2: i32) -> (i32, i32) {
    %c0_i32 = arith.constant 0 : i32
    return %arg0, %arg2 : i32, i32
  }
  func.func @transform_1(%arg0: i32, %arg1: i32, %arg2: i32) -> (i32, i32) {
    %c0_i32 = arith.constant 0 : i32
    return %arg2, %arg1 : i32, i32
  }
  func.func @transform_2(%arg0: i32, %arg1: i32, %arg2: i32) -> (i32, i32) {
    %c0_i32 = arith.constant 0 : i32
    %c0_i32_0 = arith.constant 0 : i32
    return %c0_i32, %arg1 : i32, i32
  }
  func.func @transform_3(%arg0: i32, %arg1: i32, %arg2: i32) -> (i32, i32) {
    %c0_i32 = arith.constant 0 : i32
    %c0_i32_0 = arith.constant 0 : i32
    return %c0_i32, %arg1 : i32, i32
  }
  func.func @transform_4(%arg0: i32, %arg1: i32, %arg2: i32) -> (i32, i32) {
    %c0_i32 = arith.constant 0 : i32
    return %arg0, %arg1 : i32, i32
  }
}

module attributes {stable_mosaic.version = 11 : i64} {
  func.func @_dwconv_kernel(%arg0: i32, %arg1: memref<1x18x18x128xbf16, #tpu.memory_space<vmem>>, %arg2: memref<9x128xf32, #tpu.memory_space<vmem>>, %arg3: memref<1x128xf32, #tpu.memory_space<vmem>>, %arg4: memref<1x128xf32, #tpu.memory_space<vmem>>, %arg5: memref<1x16x16x128xbf16, #tpu.memory_space<vmem>>) attributes {dimension_semantics = [#tpu.dimension_semantics<parallel>], iteration_bounds = array<i64: 2>, scalar_prefetch = 0 : i64, scratch_operands = 0 : i64, tpu.core_type = #tpu.core_type<tc>, window_params = [{transform_indices = @transform_0, window_bounds = array<i64: 1, 18, 18, 128>}, {pipeline_mode = #tpu.pipeline_mode<synchronous>, transform_indices = @transform_1, window_bounds = array<i64: 9, 128>}, {pipeline_mode = #tpu.pipeline_mode<synchronous>, transform_indices = @transform_2, window_bounds = array<i64: 1, 128>}, {pipeline_mode = #tpu.pipeline_mode<synchronous>, transform_indices = @transform_3, window_bounds = array<i64: 1, 128>}, {transform_indices = @transform_4, window_bounds = array<i64: 1, 16, 16, 128>}]} {
    %c0 = arith.constant 0 : index
    %c0_0 = arith.constant 0 : index
    %c0_1 = arith.constant 0 : index
    %c0_2 = arith.constant 0 : index
    %0 = vector.load %arg1[%c0, %c0_0, %c0_1, %c0_2] : memref<1x18x18x128xbf16, #tpu.memory_space<vmem>>, vector<1x18x18x128xbf16>
    %1 = vector.shape_cast %0 : vector<1x18x18x128xbf16> to vector<18x18x128xbf16>
    %2 = arith.extf %1 : vector<18x18x128xbf16> to vector<18x18x128xf32>
    %cst = arith.constant 0.000000e+00 : f32
    %3 = vector.broadcast %cst : f32 to vector<16x16x128xf32>
    %4 = vector.extract_strided_slice %2 {offsets = [0, 0, 0], sizes = [16, 16, 128], strides = [1, 1, 1]} : vector<18x18x128xf32> to vector<16x16x128xf32>
    %c0_3 = arith.constant 0 : index
    %c0_4 = arith.constant 0 : index
    %5 = vector.load %arg2[%c0_3, %c0_4] : memref<9x128xf32, #tpu.memory_space<vmem>>, vector<1x128xf32>
    %6 = vector.shape_cast %5 : vector<1x128xf32> to vector<128xf32>
    %7 = vector.shape_cast %6 : vector<128xf32> to vector<1x1x128xf32>
    %8 = vector.broadcast %7 : vector<1x1x128xf32> to vector<16x16x128xf32>
    %9 = arith.mulf %4, %8 : vector<16x16x128xf32>
    %10 = arith.addf %3, %9 : vector<16x16x128xf32>
    %11 = vector.extract_strided_slice %2 {offsets = [0, 1, 0], sizes = [16, 16, 128], strides = [1, 1, 1]} : vector<18x18x128xf32> to vector<16x16x128xf32>
    %c1 = arith.constant 1 : index
    %c0_5 = arith.constant 0 : index
    %12 = vector.load %arg2[%c1, %c0_5] : memref<9x128xf32, #tpu.memory_space<vmem>>, vector<1x128xf32>
    %13 = vector.shape_cast %12 : vector<1x128xf32> to vector<128xf32>
    %14 = vector.shape_cast %13 : vector<128xf32> to vector<1x1x128xf32>
    %15 = vector.broadcast %14 : vector<1x1x128xf32> to vector<16x16x128xf32>
    %16 = arith.mulf %11, %15 : vector<16x16x128xf32>
    %17 = arith.addf %10, %16 : vector<16x16x128xf32>
    %18 = vector.extract_strided_slice %2 {offsets = [0, 2, 0], sizes = [16, 16, 128], strides = [1, 1, 1]} : vector<18x18x128xf32> to vector<16x16x128xf32>
    %c2 = arith.constant 2 : index
    %c0_6 = arith.constant 0 : index
    %19 = vector.load %arg2[%c2, %c0_6] : memref<9x128xf32, #tpu.memory_space<vmem>>, vector<1x128xf32>
    %20 = vector.shape_cast %19 : vector<1x128xf32> to vector<128xf32>
    %21 = vector.shape_cast %20 : vector<128xf32> to vector<1x1x128xf32>
    %22 = vector.broadcast %21 : vector<1x1x128xf32> to vector<16x16x128xf32>
    %23 = arith.mulf %18, %22 : vector<16x16x128xf32>
    %24 = arith.addf %17, %23 : vector<16x16x128xf32>
    %25 = vector.extract_strided_slice %2 {offsets = [1, 0, 0], sizes = [16, 16, 128], strides = [1, 1, 1]} : vector<18x18x128xf32> to vector<16x16x128xf32>
    %c3 = arith.constant 3 : index
    %c0_7 = arith.constant 0 : index
    %26 = vector.load %arg2[%c3, %c0_7] : memref<9x128xf32, #tpu.memory_space<vmem>>, vector<1x128xf32>
    %27 = vector.shape_cast %26 : vector<1x128xf32> to vector<128xf32>
    %28 = vector.shape_cast %27 : vector<128xf32> to vector<1x1x128xf32>
    %29 = vector.broadcast %28 : vector<1x1x128xf32> to vector<16x16x128xf32>
    %30 = arith.mulf %25, %29 : vector<16x16x128xf32>
    %31 = arith.addf %24, %30 : vector<16x16x128xf32>
    %32 = vector.extract_strided_slice %2 {offsets = [1, 1, 0], sizes = [16, 16, 128], strides = [1, 1, 1]} : vector<18x18x128xf32> to vector<16x16x128xf32>
    %c4 = arith.constant 4 : index
    %c0_8 = arith.constant 0 : index
    %33 = vector.load %arg2[%c4, %c0_8] : memref<9x128xf32, #tpu.memory_space<vmem>>, vector<1x128xf32>
    %34 = vector.shape_cast %33 : vector<1x128xf32> to vector<128xf32>
    %35 = vector.shape_cast %34 : vector<128xf32> to vector<1x1x128xf32>
    %36 = vector.broadcast %35 : vector<1x1x128xf32> to vector<16x16x128xf32>
    %37 = arith.mulf %32, %36 : vector<16x16x128xf32>
    %38 = arith.addf %31, %37 : vector<16x16x128xf32>
    %39 = vector.extract_strided_slice %2 {offsets = [1, 2, 0], sizes = [16, 16, 128], strides = [1, 1, 1]} : vector<18x18x128xf32> to vector<16x16x128xf32>
    %c5 = arith.constant 5 : index
    %c0_9 = arith.constant 0 : index
    %40 = vector.load %arg2[%c5, %c0_9] : memref<9x128xf32, #tpu.memory_space<vmem>>, vector<1x128xf32>
    %41 = vector.shape_cast %40 : vector<1x128xf32> to vector<128xf32>
    %42 = vector.shape_cast %41 : vector<128xf32> to vector<1x1x128xf32>
    %43 = vector.broadcast %42 : vector<1x1x128xf32> to vector<16x16x128xf32>
    %44 = arith.mulf %39, %43 : vector<16x16x128xf32>
    %45 = arith.addf %38, %44 : vector<16x16x128xf32>
    %46 = vector.extract_strided_slice %2 {offsets = [2, 0, 0], sizes = [16, 16, 128], strides = [1, 1, 1]} : vector<18x18x128xf32> to vector<16x16x128xf32>
    %c6 = arith.constant 6 : index
    %c0_10 = arith.constant 0 : index
    %47 = vector.load %arg2[%c6, %c0_10] : memref<9x128xf32, #tpu.memory_space<vmem>>, vector<1x128xf32>
    %48 = vector.shape_cast %47 : vector<1x128xf32> to vector<128xf32>
    %49 = vector.shape_cast %48 : vector<128xf32> to vector<1x1x128xf32>
    %50 = vector.broadcast %49 : vector<1x1x128xf32> to vector<16x16x128xf32>
    %51 = arith.mulf %46, %50 : vector<16x16x128xf32>
    %52 = arith.addf %45, %51 : vector<16x16x128xf32>
    %53 = vector.extract_strided_slice %2 {offsets = [2, 1, 0], sizes = [16, 16, 128], strides = [1, 1, 1]} : vector<18x18x128xf32> to vector<16x16x128xf32>
    %c7 = arith.constant 7 : index
    %c0_11 = arith.constant 0 : index
    %54 = vector.load %arg2[%c7, %c0_11] : memref<9x128xf32, #tpu.memory_space<vmem>>, vector<1x128xf32>
    %55 = vector.shape_cast %54 : vector<1x128xf32> to vector<128xf32>
    %56 = vector.shape_cast %55 : vector<128xf32> to vector<1x1x128xf32>
    %57 = vector.broadcast %56 : vector<1x1x128xf32> to vector<16x16x128xf32>
    %58 = arith.mulf %53, %57 : vector<16x16x128xf32>
    %59 = arith.addf %52, %58 : vector<16x16x128xf32>
    %60 = vector.extract_strided_slice %2 {offsets = [2, 2, 0], sizes = [16, 16, 128], strides = [1, 1, 1]} : vector<18x18x128xf32> to vector<16x16x128xf32>
    %c8 = arith.constant 8 : index
    %c0_12 = arith.constant 0 : index
    %61 = vector.load %arg2[%c8, %c0_12] : memref<9x128xf32, #tpu.memory_space<vmem>>, vector<1x128xf32>
    %62 = vector.shape_cast %61 : vector<1x128xf32> to vector<128xf32>
    %63 = vector.shape_cast %62 : vector<128xf32> to vector<1x1x128xf32>
    %64 = vector.broadcast %63 : vector<1x1x128xf32> to vector<16x16x128xf32>
    %65 = arith.mulf %60, %64 : vector<16x16x128xf32>
    %66 = arith.addf %59, %65 : vector<16x16x128xf32>
    %c0_13 = arith.constant 0 : index
    %c0_14 = arith.constant 0 : index
    %67 = vector.load %arg3[%c0_13, %c0_14] : memref<1x128xf32, #tpu.memory_space<vmem>>, vector<1x128xf32>
    %68 = vector.shape_cast %67 : vector<1x128xf32> to vector<128xf32>
    %69 = vector.shape_cast %68 : vector<128xf32> to vector<1x1x128xf32>
    %70 = vector.broadcast %69 : vector<1x1x128xf32> to vector<16x16x128xf32>
    %71 = arith.mulf %66, %70 : vector<16x16x128xf32>
    %c0_15 = arith.constant 0 : index
    %c0_16 = arith.constant 0 : index
    %72 = vector.load %arg4[%c0_15, %c0_16] : memref<1x128xf32, #tpu.memory_space<vmem>>, vector<1x128xf32>
    %73 = vector.shape_cast %72 : vector<1x128xf32> to vector<128xf32>
    %74 = vector.shape_cast %73 : vector<128xf32> to vector<1x1x128xf32>
    %75 = vector.broadcast %74 : vector<1x1x128xf32> to vector<16x16x128xf32>
    %76 = arith.addf %71, %75 : vector<16x16x128xf32>
    %77 = arith.negf %76 : vector<16x16x128xf32>
    %78 = math.exp %77 : vector<16x16x128xf32>
    %cst_17 = arith.constant 1.000000e+00 : f32
    %79 = vector.broadcast %cst_17 : f32 to vector<16x16x128xf32>
    %80 = arith.addf %79, %78 : vector<16x16x128xf32>
    %81 = arith.divf %79, %80 : vector<16x16x128xf32>
    %82 = arith.mulf %76, %81 : vector<16x16x128xf32>
    %83 = arith.truncf %82 : vector<16x16x128xf32> to vector<16x16x128xbf16>
    %c0_18 = arith.constant 0 : index
    %c0_19 = arith.constant 0 : index
    %c0_20 = arith.constant 0 : index
    %c0_21 = arith.constant 0 : index
    %84 = vector.load %arg5[%c0_18, %c0_19, %c0_20, %c0_21] : memref<1x16x16x128xbf16, #tpu.memory_space<vmem>>, vector<1x16x16x128xbf16>
    %85 = vector.shape_cast %84 : vector<1x16x16x128xbf16> to vector<16x16x128xbf16>
    %86 = vector.shape_cast %83 : vector<16x16x128xbf16> to vector<1x16x16x128xbf16>
    tpu.vector_store %arg5[%c0_18, %c0_19, %c0_20, %c0_21], %86 {strides = array<i32>} : memref<1x16x16x128xbf16, #tpu.memory_space<vmem>>, vector<1x16x16x128xbf16>,
    return
  }
  func.func @transform_0(%arg0: i32) -> (i32, i32, i32, i32) {
    %c0_i32 = arith.constant 0 : i32
    %c0_i32_0 = arith.constant 0 : i32
    %c0_i32_1 = arith.constant 0 : i32
    %c0_i32_2 = arith.constant 0 : i32
    return %arg0, %c0_i32, %c0_i32_0, %c0_i32_1 : i32, i32, i32, i32
  }
  func.func @transform_1(%arg0: i32) -> (i32, i32) {
    %c0_i32 = arith.constant 0 : i32
    %c0_i32_0 = arith.constant 0 : i32
    %c0_i32_1 = arith.constant 0 : i32
    return %c0_i32, %c0_i32_0 : i32, i32
  }
  func.func @transform_2(%arg0: i32) -> (i32, i32) {
    %c0_i32 = arith.constant 0 : i32
    %c0_i32_0 = arith.constant 0 : i32
    %c0_i32_1 = arith.constant 0 : i32
    return %c0_i32, %c0_i32_0 : i32, i32
  }
  func.func @transform_3(%arg0: i32) -> (i32, i32) {
    %c0_i32 = arith.constant 0 : i32
    %c0_i32_0 = arith.constant 0 : i32
    %c0_i32_1 = arith.constant 0 : i32
    return %c0_i32, %c0_i32_0 : i32, i32
  }
  func.func @transform_4(%arg0: i32) -> (i32, i32, i32, i32) {
    %c0_i32 = arith.constant 0 : i32
    %c0_i32_0 = arith.constant 0 : i32
    %c0_i32_1 = arith.constant 0 : i32
    %c0_i32_2 = arith.constant 0 : i32
    return %arg0, %c0_i32, %c0_i32_0, %c0_i32_1 : i32, i32, i32, i32
  }
}

module attributes {stable_mosaic.version = 11 : i64} {
  func.func @_se_kernel(%arg0: i32, %arg1: memref<1x256x128xbf16, #tpu.memory_space<vmem>>, %arg2: memref<128x128xf32, #tpu.memory_space<vmem>>, %arg3: memref<1x128xf32, #tpu.memory_space<vmem>>, %arg4: memref<128x128xf32, #tpu.memory_space<vmem>>, %arg5: memref<1x128xf32, #tpu.memory_space<vmem>>, %arg6: memref<1x256x128xbf16, #tpu.memory_space<vmem>>) attributes {dimension_semantics = [#tpu.dimension_semantics<parallel>], iteration_bounds = array<i64: 2>, scalar_prefetch = 0 : i64, scratch_operands = 0 : i64, tpu.core_type = #tpu.core_type<tc>, window_params = [{transform_indices = @transform_0, window_bounds = array<i64: 1, 256, 128>}, {pipeline_mode = #tpu.pipeline_mode<synchronous>, transform_indices = @transform_1, window_bounds = array<i64: 128, 128>}, {pipeline_mode = #tpu.pipeline_mode<synchronous>, transform_indices = @transform_2, window_bounds = array<i64: 1, 128>}, {pipeline_mode = #tpu.pipeline_mode<synchronous>, transform_indices = @transform_3, window_bounds = array<i64: 128, 128>}, {pipeline_mode = #tpu.pipeline_mode<synchronous>, transform_indices = @transform_4, window_bounds = array<i64: 1, 128>}, {transform_indices = @transform_5, window_bounds = array<i64: 1, 256, 128>}]} {
    %c0 = arith.constant 0 : index
    %c0_0 = arith.constant 0 : index
    %c0_1 = arith.constant 0 : index
    %0 = vector.load %arg1[%c0, %c0_0, %c0_1] : memref<1x256x128xbf16, #tpu.memory_space<vmem>>, vector<1x256x128xbf16>
    %1 = vector.shape_cast %0 : vector<1x256x128xbf16> to vector<256x128xbf16>
    %2 = arith.extf %1 : vector<256x128xbf16> to vector<256x128xf32>
    %cst = arith.constant dense<0.000000e+00> : vector<128xf32>
    %3 = vector.multi_reduction <add>, %2, %cst [0] : vector<256x128xf32> to vector<128xf32>
    %4 = vector.shape_cast %3 : vector<128xf32> to vector<1x128xf32>
    %cst_2 = arith.constant 2.560000e+02 : f32
    %5 = vector.broadcast %cst_2 : f32 to vector<1x128xf32>
    %6 = arith.divf %4, %5 : vector<1x128xf32>
    %c0_3 = arith.constant 0 : index
    %c0_4 = arith.constant 0 : index
    %7 = vector.load %arg2[%c0_3, %c0_4] : memref<128x128xf32, #tpu.memory_space<vmem>>, vector<128x128xf32>
    %cst_5 = arith.constant dense<0.000000e+00> : vector<1x128xf32>
    %8 = tpu.matmul %6, %7, %cst_5 {dimension_numbers = #tpu.dot_dimension_numbers<[1], [0], [0], [1], [0, 0, 1, 1], [], []>} : vector<1x128xf32>, vector<128x128xf32>, vector<1x128xf32> -> vector<1x128xf32>
    %c0_6 = arith.constant 0 : index
    %c0_7 = arith.constant 0 : index
    %9 = vector.load %arg3[%c0_6, %c0_7] : memref<1x128xf32, #tpu.memory_space<vmem>>, vector<1x128xf32>
    %10 = arith.addf %8, %9 : vector<1x128xf32>
    %11 = arith.negf %10 : vector<1x128xf32>
    %12 = math.exp %11 : vector<1x128xf32>
    %cst_8 = arith.constant 1.000000e+00 : f32
    %13 = vector.broadcast %cst_8 : f32 to vector<1x128xf32>
    %14 = arith.addf %13, %12 : vector<1x128xf32>
    %15 = arith.divf %13, %14 : vector<1x128xf32>
    %16 = arith.mulf %10, %15 : vector<1x128xf32>
    %c0_9 = arith.constant 0 : index
    %c0_10 = arith.constant 0 : index
    %17 = vector.load %arg4[%c0_9, %c0_10] : memref<128x128xf32, #tpu.memory_space<vmem>>, vector<128x128xf32>
    %cst_11 = arith.constant dense<0.000000e+00> : vector<1x128xf32>
    %18 = tpu.matmul %16, %17, %cst_11 {dimension_numbers = #tpu.dot_dimension_numbers<[1], [0], [0], [1], [0, 0, 1, 1], [], []>} : vector<1x128xf32>, vector<128x128xf32>, vector<1x128xf32> -> vector<1x128xf32>
    %c0_12 = arith.constant 0 : index
    %c0_13 = arith.constant 0 : index
    %19 = vector.load %arg5[%c0_12, %c0_13] : memref<1x128xf32, #tpu.memory_space<vmem>>, vector<1x128xf32>
    %20 = arith.addf %18, %19 : vector<1x128xf32>
    %21 = arith.negf %20 : vector<1x128xf32>
    %22 = math.exp %21 : vector<1x128xf32>
    %cst_14 = arith.constant 1.000000e+00 : f32
    %23 = vector.broadcast %cst_14 : f32 to vector<1x128xf32>
    %24 = arith.addf %23, %22 : vector<1x128xf32>
    %25 = arith.divf %23, %24 : vector<1x128xf32>
    %26 = vector.broadcast %25 : vector<1x128xf32> to vector<256x128xf32>
    %27 = arith.mulf %2, %26 : vector<256x128xf32>
    %28 = arith.truncf %27 : vector<256x128xf32> to vector<256x128xbf16>
    %c0_15 = arith.constant 0 : index
    %c0_16 = arith.constant 0 : index
    %c0_17 = arith.constant 0 : index
    %29 = vector.load %arg6[%c0_15, %c0_16, %c0_17] : memref<1x256x128xbf16, #tpu.memory_space<vmem>>, vector<1x256x128xbf16>
    %30 = vector.shape_cast %29 : vector<1x256x128xbf16> to vector<256x128xbf16>
    %31 = vector.shape_cast %28 : vector<256x128xbf16> to vector<1x256x128xbf16>
    tpu.vector_store %arg6[%c0_15, %c0_16, %c0_17], %31 {strides = array<i32>} : memref<1x256x128xbf16, #tpu.memory_space<vmem>>, vector<1x256x128xbf16>,
    return
  }
  func.func @transform_0(%arg0: i32) -> (i32, i32, i32) {
    %c0_i32 = arith.constant 0 : i32
    %c0_i32_0 = arith.constant 0 : i32
    %c0_i32_1 = arith.constant 0 : i32
    return %arg0, %c0_i32, %c0_i32_0 : i32, i32, i32
  }
  func.func @transform_1(%arg0: i32) -> (i32, i32) {
    %c0_i32 = arith.constant 0 : i32
    %c0_i32_0 = arith.constant 0 : i32
    %c0_i32_1 = arith.constant 0 : i32
    return %c0_i32, %c0_i32_0 : i32, i32
  }
  func.func @transform_2(%arg0: i32) -> (i32, i32) {
    %c0_i32 = arith.constant 0 : i32
    %c0_i32_0 = arith.constant 0 : i32
    %c0_i32_1 = arith.constant 0 : i32
    return %c0_i32, %c0_i32_0 : i32, i32
  }
  func.func @transform_3(%arg0: i32) -> (i32, i32) {
    %c0_i32 = arith.constant 0 : i32
    %c0_i32_0 = arith.constant 0 : i32
    %c0_i32_1 = arith.constant 0 : i32
    return %c0_i32, %c0_i32_0 : i32, i32
  }
  func.func @transform_4(%arg0: i32) -> (i32, i32) {
    %c0_i32 = arith.constant 0 : i32
    %c0_i32_0 = arith.constant 0 : i32
    %c0_i32_1 = arith.constant 0 : i32
    return %c0_i32, %c0_i32_0 : i32, i32
  }
  func.func @transform_5(%arg0: i32) -> (i32, i32, i32) {
    %c0_i32 = arith.constant 0 : i32
    %c0_i32_0 = arith.constant 0 : i32
    %c0_i32_1 = arith.constant 0 : i32
    return %arg0, %c0_i32, %c0_i32_0 : i32, i32, i32
  }
}

module attributes {stable_mosaic.version = 11 : i64} {
  func.func @_mm_kernel(%arg0: i32, %arg1: i32, %arg2: i32, %arg3: memref<256x128xbf16, #tpu.memory_space<vmem>>, %arg4: memref<128x128xbf16, #tpu.memory_space<vmem>>, %arg5: memref<1x128xf32, #tpu.memory_space<vmem>>, %arg6: memref<1x128xf32, #tpu.memory_space<vmem>>, %arg7: memref<256x128xbf16, #tpu.memory_space<vmem>>, %arg8: memref<256x128xbf16, #tpu.memory_space<vmem>>, %arg9: memref<256x128xf32, #tpu.memory_space<vmem>>) attributes {dimension_semantics = [#tpu.dimension_semantics<parallel>, #tpu.dimension_semantics<parallel>, #tpu.dimension_semantics<arbitrary>], iteration_bounds = array<i64: 2, 1, 1>, scalar_prefetch = 0 : i64, scratch_operands = 1 : i64, tpu.core_type = #tpu.core_type<tc>, window_params = [{transform_indices = @transform_0, window_bounds = array<i64: 256, 128>}, {transform_indices = @transform_1, window_bounds = array<i64: 128, 128>}, {transform_indices = @transform_2, window_bounds = array<i64: 1, 128>}, {transform_indices = @transform_3, window_bounds = array<i64: 1, 128>}, {transform_indices = @transform_4, window_bounds = array<i64: 256, 128>}, {transform_indices = @transform_5, window_bounds = array<i64: 256, 128>}]} {
    %c0_i32 = arith.constant 0 : i32
    %0 = arith.cmpi eq, %arg2, %c0_i32 : i32
    %1 = arith.extui %0 : i1 to i32
    %c0_i32_0 = arith.constant 0 : i32
    %2 = arith.cmpi ne, %1, %c0_i32_0 : i32
    scf.if %2 {
      %cst_10 = arith.constant 0.000000e+00 : f32
      %12 = vector.broadcast %cst_10 : f32 to vector<256x128xf32>
      %c0_11 = arith.constant 0 : index
      %c0_12 = arith.constant 0 : index
      %13 = vector.load %arg9[%c0_11, %c0_12] : memref<256x128xf32, #tpu.memory_space<vmem>>, vector<256x128xf32>
      tpu.vector_store %arg9[%c0_11, %c0_12], %12 {strides = array<i32>} : memref<256x128xf32, #tpu.memory_space<vmem>>, vector<256x128xf32>,
    } else {
    }
    %c0 = arith.constant 0 : index
    %c0_1 = arith.constant 0 : index
    %3 = vector.load %arg9[%c0, %c0_1] : memref<256x128xf32, #tpu.memory_space<vmem>>, vector<256x128xf32>
    %c0_2 = arith.constant 0 : index
    %c0_3 = arith.constant 0 : index
    %4 = vector.load %arg3[%c0_2, %c0_3] : memref<256x128xbf16, #tpu.memory_space<vmem>>, vector<256x128xbf16>
    %c0_4 = arith.constant 0 : index
    %c0_5 = arith.constant 0 : index
    %5 = vector.load %arg4[%c0_4, %c0_5] : memref<128x128xbf16, #tpu.memory_space<vmem>>, vector<128x128xbf16>
    %cst = arith.constant dense<0.000000e+00> : vector<256x128xf32>
    %6 = tpu.matmul %4, %5, %cst {dimension_numbers = #tpu.dot_dimension_numbers<[1], [0], [0], [1], [0, 0, 1, 1], [], []>} : vector<256x128xbf16>, vector<128x128xbf16>, vector<256x128xf32> -> vector<256x128xf32>
    %7 = arith.addf %3, %6 : vector<256x128xf32>
    %c0_6 = arith.constant 0 : index
    %c0_7 = arith.constant 0 : index
    %8 = vector.load %arg9[%c0_6, %c0_7] : memref<256x128xf32, #tpu.memory_space<vmem>>, vector<256x128xf32>
    tpu.vector_store %arg9[%c0_6, %c0_7], %7 {strides = array<i32>} : memref<256x128xf32, #tpu.memory_space<vmem>>, vector<256x128xf32>,
    %c0_i32_8 = arith.constant 0 : i32
    %9 = arith.cmpi eq, %arg2, %c0_i32_8 : i32
    %10 = arith.extui %9 : i1 to i32
    %c0_i32_9 = arith.constant 0 : i32
    %11 = arith.cmpi ne, %10, %c0_i32_9 : i32
    scf.if %11 {
      %c0_10 = arith.constant 0 : index
      %c0_11 = arith.constant 0 : index
      %12 = vector.load %arg9[%c0_10, %c0_11] : memref<256x128xf32, #tpu.memory_space<vmem>>, vector<256x128xf32>
      %c0_12 = arith.constant 0 : index
      %c0_13 = arith.constant 0 : index
      %13 = vector.load %arg5[%c0_12, %c0_13] : memref<1x128xf32, #tpu.memory_space<vmem>>, vector<1x128xf32>
      %14 = vector.broadcast %13 : vector<1x128xf32> to vector<256x128xf32>
      %15 = arith.mulf %12, %14 : vector<256x128xf32>
      %c0_14 = arith.constant 0 : index
      %c0_15 = arith.constant 0 : index
      %16 = vector.load %arg6[%c0_14, %c0_15] : memref<1x128xf32, #tpu.memory_space<vmem>>, vector<1x128xf32>
      %17 = vector.broadcast %16 : vector<1x128xf32> to vector<256x128xf32>
      %18 = arith.addf %15, %17 : vector<256x128xf32>
      %c0_16 = arith.constant 0 : index
      %c0_17 = arith.constant 0 : index
      %19 = vector.load %arg7[%c0_16, %c0_17] : memref<256x128xbf16, #tpu.memory_space<vmem>>, vector<256x128xbf16>
      %20 = arith.extf %19 : vector<256x128xbf16> to vector<256x128xf32>
      %21 = arith.addf %18, %20 : vector<256x128xf32>
      %22 = arith.truncf %21 : vector<256x128xf32> to vector<256x128xbf16>
      %c0_18 = arith.constant 0 : index
      %c0_19 = arith.constant 0 : index
      %23 = vector.load %arg8[%c0_18, %c0_19] : memref<256x128xbf16, #tpu.memory_space<vmem>>, vector<256x128xbf16>
      tpu.vector_store %arg8[%c0_18, %c0_19], %22 {strides = array<i32>} : memref<256x128xbf16, #tpu.memory_space<vmem>>, vector<256x128xbf16>,
    } else {
    }
    return
  }
  func.func @transform_0(%arg0: i32, %arg1: i32, %arg2: i32) -> (i32, i32) {
    %c0_i32 = arith.constant 0 : i32
    return %arg0, %arg2 : i32, i32
  }
  func.func @transform_1(%arg0: i32, %arg1: i32, %arg2: i32) -> (i32, i32) {
    %c0_i32 = arith.constant 0 : i32
    return %arg2, %arg1 : i32, i32
  }
  func.func @transform_2(%arg0: i32, %arg1: i32, %arg2: i32) -> (i32, i32) {
    %c0_i32 = arith.constant 0 : i32
    %c0_i32_0 = arith.constant 0 : i32
    return %c0_i32, %arg1 : i32, i32
  }
  func.func @transform_3(%arg0: i32, %arg1: i32, %arg2: i32) -> (i32, i32) {
    %c0_i32 = arith.constant 0 : i32
    %c0_i32_0 = arith.constant 0 : i32
    return %c0_i32, %arg1 : i32, i32
  }
  func.func @transform_4(%arg0: i32, %arg1: i32, %arg2: i32) -> (i32, i32) {
    %c0_i32 = arith.constant 0 : i32
    return %arg0, %arg1 : i32, i32
  }
  func.func @transform_5(%arg0: i32, %arg1: i32, %arg2: i32) -> (i32, i32) {
    %c0_i32 = arith.constant 0 : i32
    return %arg0, %arg1 : i32, i32
  }
}

module attributes {stable_mosaic.version = 11 : i64} {
  func.func @_mm_kernel(%arg0: i32, %arg1: i32, %arg2: i32, %arg3: memref<256x128xbf16, #tpu.memory_space<vmem>>, %arg4: memref<128x128xbf16, #tpu.memory_space<vmem>>, %arg5: memref<1x128xf32, #tpu.memory_space<vmem>>, %arg6: memref<1x128xf32, #tpu.memory_space<vmem>>, %arg7: memref<256x128xbf16, #tpu.memory_space<vmem>>, %arg8: memref<256x128xf32, #tpu.memory_space<vmem>>) attributes {dimension_semantics = [#tpu.dimension_semantics<parallel>, #tpu.dimension_semantics<parallel>, #tpu.dimension_semantics<arbitrary>], iteration_bounds = array<i64: 2, 1, 1>, scalar_prefetch = 0 : i64, scratch_operands = 1 : i64, tpu.core_type = #tpu.core_type<tc>, window_params = [{transform_indices = @transform_0, window_bounds = array<i64: 256, 128>}, {transform_indices = @transform_1, window_bounds = array<i64: 128, 128>}, {transform_indices = @transform_2, window_bounds = array<i64: 1, 128>}, {transform_indices = @transform_3, window_bounds = array<i64: 1, 128>}, {transform_indices = @transform_4, window_bounds = array<i64: 256, 128>}]} {
    %c0_i32 = arith.constant 0 : i32
    %0 = arith.cmpi eq, %arg2, %c0_i32 : i32
    %1 = arith.extui %0 : i1 to i32
    %c0_i32_0 = arith.constant 0 : i32
    %2 = arith.cmpi ne, %1, %c0_i32_0 : i32
    scf.if %2 {
      %cst_10 = arith.constant 0.000000e+00 : f32
      %12 = vector.broadcast %cst_10 : f32 to vector<256x128xf32>
      %c0_11 = arith.constant 0 : index
      %c0_12 = arith.constant 0 : index
      %13 = vector.load %arg8[%c0_11, %c0_12] : memref<256x128xf32, #tpu.memory_space<vmem>>, vector<256x128xf32>
      tpu.vector_store %arg8[%c0_11, %c0_12], %12 {strides = array<i32>} : memref<256x128xf32, #tpu.memory_space<vmem>>, vector<256x128xf32>,
    } else {
    }
    %c0 = arith.constant 0 : index
    %c0_1 = arith.constant 0 : index
    %3 = vector.load %arg8[%c0, %c0_1] : memref<256x128xf32, #tpu.memory_space<vmem>>, vector<256x128xf32>
    %c0_2 = arith.constant 0 : index
    %c0_3 = arith.constant 0 : index
    %4 = vector.load %arg3[%c0_2, %c0_3] : memref<256x128xbf16, #tpu.memory_space<vmem>>, vector<256x128xbf16>
    %c0_4 = arith.constant 0 : index
    %c0_5 = arith.constant 0 : index
    %5 = vector.load %arg4[%c0_4, %c0_5] : memref<128x128xbf16, #tpu.memory_space<vmem>>, vector<128x128xbf16>
    %cst = arith.constant dense<0.000000e+00> : vector<256x128xf32>
    %6 = tpu.matmul %4, %5, %cst {dimension_numbers = #tpu.dot_dimension_numbers<[1], [0], [0], [1], [0, 0, 1, 1], [], []>} : vector<256x128xbf16>, vector<128x128xbf16>, vector<256x128xf32> -> vector<256x128xf32>
    %7 = arith.addf %3, %6 : vector<256x128xf32>
    %c0_6 = arith.constant 0 : index
    %c0_7 = arith.constant 0 : index
    %8 = vector.load %arg8[%c0_6, %c0_7] : memref<256x128xf32, #tpu.memory_space<vmem>>, vector<256x128xf32>
    tpu.vector_store %arg8[%c0_6, %c0_7], %7 {strides = array<i32>} : memref<256x128xf32, #tpu.memory_space<vmem>>, vector<256x128xf32>,
    %c0_i32_8 = arith.constant 0 : i32
    %9 = arith.cmpi eq, %arg2, %c0_i32_8 : i32
    %10 = arith.extui %9 : i1 to i32
    %c0_i32_9 = arith.constant 0 : i32
    %11 = arith.cmpi ne, %10, %c0_i32_9 : i32
    scf.if %11 {
      %c0_10 = arith.constant 0 : index
      %c0_11 = arith.constant 0 : index
      %12 = vector.load %arg8[%c0_10, %c0_11] : memref<256x128xf32, #tpu.memory_space<vmem>>, vector<256x128xf32>
      %c0_12 = arith.constant 0 : index
      %c0_13 = arith.constant 0 : index
      %13 = vector.load %arg5[%c0_12, %c0_13] : memref<1x128xf32, #tpu.memory_space<vmem>>, vector<1x128xf32>
      %14 = vector.broadcast %13 : vector<1x128xf32> to vector<256x128xf32>
      %15 = arith.mulf %12, %14 : vector<256x128xf32>
      %c0_14 = arith.constant 0 : index
      %c0_15 = arith.constant 0 : index
      %16 = vector.load %arg6[%c0_14, %c0_15] : memref<1x128xf32, #tpu.memory_space<vmem>>, vector<1x128xf32>
      %17 = vector.broadcast %16 : vector<1x128xf32> to vector<256x128xf32>
      %18 = arith.addf %15, %17 : vector<256x128xf32>
      %19 = arith.negf %18 : vector<256x128xf32>
      %20 = math.exp %19 : vector<256x128xf32>
      %cst_16 = arith.constant 1.000000e+00 : f32
      %21 = vector.broadcast %cst_16 : f32 to vector<256x128xf32>
      %22 = arith.addf %21, %20 : vector<256x128xf32>
      %23 = arith.divf %21, %22 : vector<256x128xf32>
      %24 = arith.mulf %18, %23 : vector<256x128xf32>
      %25 = arith.truncf %24 : vector<256x128xf32> to vector<256x128xbf16>
      %c0_17 = arith.constant 0 : index
      %c0_18 = arith.constant 0 : index
      %26 = vector.load %arg7[%c0_17, %c0_18] : memref<256x128xbf16, #tpu.memory_space<vmem>>, vector<256x128xbf16>
      tpu.vector_store %arg7[%c0_17, %c0_18], %25 {strides = array<i32>} : memref<256x128xbf16, #tpu.memory_space<vmem>>, vector<256x128xbf16>,
    } else {
    }
    return
  }
  func.func @transform_0(%arg0: i32, %arg1: i32, %arg2: i32) -> (i32, i32) {
    %c0_i32 = arith.constant 0 : i32
    return %arg0, %arg2 : i32, i32
  }
  func.func @transform_1(%arg0: i32, %arg1: i32, %arg2: i32) -> (i32, i32) {
    %c0_i32 = arith.constant 0 : i32
    return %arg2, %arg1 : i32, i32
  }
  func.func @transform_2(%arg0: i32, %arg1: i32, %arg2: i32) -> (i32, i32) {
    %c0_i32 = arith.constant 0 : i32
    %c0_i32_0 = arith.constant 0 : i32
    return %c0_i32, %arg1 : i32, i32
  }
  func.func @transform_3(%arg0: i32, %arg1: i32, %arg2: i32) -> (i32, i32) {
    %c0_i32 = arith.constant 0 : i32
    %c0_i32_0 = arith.constant 0 : i32
    return %c0_i32, %arg1 : i32, i32
  }
  func.func @transform_4(%arg0: i32, %arg1: i32, %arg2: i32) -> (i32, i32) {
    %c0_i32 = arith.constant 0 : i32
    return %arg0, %arg1 : i32, i32
  }
}

module attributes {stable_mosaic.version = 11 : i64} {
  func.func @_se_kernel(%arg0: i32, %arg1: memref<1x64x128xbf16, #tpu.memory_space<vmem>>, %arg2: memref<128x128xf32, #tpu.memory_space<vmem>>, %arg3: memref<1x128xf32, #tpu.memory_space<vmem>>, %arg4: memref<128x128xf32, #tpu.memory_space<vmem>>, %arg5: memref<1x128xf32, #tpu.memory_space<vmem>>, %arg6: memref<1x64x128xbf16, #tpu.memory_space<vmem>>) attributes {dimension_semantics = [#tpu.dimension_semantics<parallel>], iteration_bounds = array<i64: 2>, scalar_prefetch = 0 : i64, scratch_operands = 0 : i64, tpu.core_type = #tpu.core_type<tc>, window_params = [{transform_indices = @transform_0, window_bounds = array<i64: 1, 64, 128>}, {pipeline_mode = #tpu.pipeline_mode<synchronous>, transform_indices = @transform_1, window_bounds = array<i64: 128, 128>}, {pipeline_mode = #tpu.pipeline_mode<synchronous>, transform_indices = @transform_2, window_bounds = array<i64: 1, 128>}, {pipeline_mode = #tpu.pipeline_mode<synchronous>, transform_indices = @transform_3, window_bounds = array<i64: 128, 128>}, {pipeline_mode = #tpu.pipeline_mode<synchronous>, transform_indices = @transform_4, window_bounds = array<i64: 1, 128>}, {transform_indices = @transform_5, window_bounds = array<i64: 1, 64, 128>}]} {
    %c0 = arith.constant 0 : index
    %c0_0 = arith.constant 0 : index
    %c0_1 = arith.constant 0 : index
    %0 = vector.load %arg1[%c0, %c0_0, %c0_1] : memref<1x64x128xbf16, #tpu.memory_space<vmem>>, vector<1x64x128xbf16>
    %1 = vector.shape_cast %0 : vector<1x64x128xbf16> to vector<64x128xbf16>
    %2 = arith.extf %1 : vector<64x128xbf16> to vector<64x128xf32>
    %cst = arith.constant dense<0.000000e+00> : vector<128xf32>
    %3 = vector.multi_reduction <add>, %2, %cst [0] : vector<64x128xf32> to vector<128xf32>
    %4 = vector.shape_cast %3 : vector<128xf32> to vector<1x128xf32>
    %cst_2 = arith.constant 6.400000e+01 : f32
    %5 = vector.broadcast %cst_2 : f32 to vector<1x128xf32>
    %6 = arith.divf %4, %5 : vector<1x128xf32>
    %c0_3 = arith.constant 0 : index
    %c0_4 = arith.constant 0 : index
    %7 = vector.load %arg2[%c0_3, %c0_4] : memref<128x128xf32, #tpu.memory_space<vmem>>, vector<128x128xf32>
    %cst_5 = arith.constant dense<0.000000e+00> : vector<1x128xf32>
    %8 = tpu.matmul %6, %7, %cst_5 {dimension_numbers = #tpu.dot_dimension_numbers<[1], [0], [0], [1], [0, 0, 1, 1], [], []>} : vector<1x128xf32>, vector<128x128xf32>, vector<1x128xf32> -> vector<1x128xf32>
    %c0_6 = arith.constant 0 : index
    %c0_7 = arith.constant 0 : index
    %9 = vector.load %arg3[%c0_6, %c0_7] : memref<1x128xf32, #tpu.memory_space<vmem>>, vector<1x128xf32>
    %10 = arith.addf %8, %9 : vector<1x128xf32>
    %11 = arith.negf %10 : vector<1x128xf32>
    %12 = math.exp %11 : vector<1x128xf32>
    %cst_8 = arith.constant 1.000000e+00 : f32
    %13 = vector.broadcast %cst_8 : f32 to vector<1x128xf32>
    %14 = arith.addf %13, %12 : vector<1x128xf32>
    %15 = arith.divf %13, %14 : vector<1x128xf32>
    %16 = arith.mulf %10, %15 : vector<1x128xf32>
    %c0_9 = arith.constant 0 : index
    %c0_10 = arith.constant 0 : index
    %17 = vector.load %arg4[%c0_9, %c0_10] : memref<128x128xf32, #tpu.memory_space<vmem>>, vector<128x128xf32>
    %cst_11 = arith.constant dense<0.000000e+00> : vector<1x128xf32>
    %18 = tpu.matmul %16, %17, %cst_11 {dimension_numbers = #tpu.dot_dimension_numbers<[1], [0], [0], [1], [0, 0, 1, 1], [], []>} : vector<1x128xf32>, vector<128x128xf32>, vector<1x128xf32> -> vector<1x128xf32>
    %c0_12 = arith.constant 0 : index
    %c0_13 = arith.constant 0 : index
    %19 = vector.load %arg5[%c0_12, %c0_13] : memref<1x128xf32, #tpu.memory_space<vmem>>, vector<1x128xf32>
    %20 = arith.addf %18, %19 : vector<1x128xf32>
    %21 = arith.negf %20 : vector<1x128xf32>
    %22 = math.exp %21 : vector<1x128xf32>
    %cst_14 = arith.constant 1.000000e+00 : f32
    %23 = vector.broadcast %cst_14 : f32 to vector<1x128xf32>
    %24 = arith.addf %23, %22 : vector<1x128xf32>
    %25 = arith.divf %23, %24 : vector<1x128xf32>
    %26 = vector.broadcast %25 : vector<1x128xf32> to vector<64x128xf32>
    %27 = arith.mulf %2, %26 : vector<64x128xf32>
    %28 = arith.truncf %27 : vector<64x128xf32> to vector<64x128xbf16>
    %c0_15 = arith.constant 0 : index
    %c0_16 = arith.constant 0 : index
    %c0_17 = arith.constant 0 : index
    %29 = vector.load %arg6[%c0_15, %c0_16, %c0_17] : memref<1x64x128xbf16, #tpu.memory_space<vmem>>, vector<1x64x128xbf16>
    %30 = vector.shape_cast %29 : vector<1x64x128xbf16> to vector<64x128xbf16>
    %31 = vector.shape_cast %28 : vector<64x128xbf16> to vector<1x64x128xbf16>
    tpu.vector_store %arg6[%c0_15, %c0_16, %c0_17], %31 {strides = array<i32>} : memref<1x64x128xbf16, #tpu.memory_space<vmem>>, vector<1x64x128xbf16>,
    return
  }
  func.func @transform_0(%arg0: i32) -> (i32, i32, i32) {
    %c0_i32 = arith.constant 0 : i32
    %c0_i32_0 = arith.constant 0 : i32
    %c0_i32_1 = arith.constant 0 : i32
    return %arg0, %c0_i32, %c0_i32_0 : i32, i32, i32
  }
  func.func @transform_1(%arg0: i32) -> (i32, i32) {
    %c0_i32 = arith.constant 0 : i32
    %c0_i32_0 = arith.constant 0 : i32
    %c0_i32_1 = arith.constant 0 : i32
    return %c0_i32, %c0_i32_0 : i32, i32
  }
  func.func @transform_2(%arg0: i32) -> (i32, i32) {
    %c0_i32 = arith.constant 0 : i32
    %c0_i32_0 = arith.constant 0 : i32
    %c0_i32_1 = arith.constant 0 : i32
    return %c0_i32, %c0_i32_0 : i32, i32
  }
  func.func @transform_3(%arg0: i32) -> (i32, i32) {
    %c0_i32 = arith.constant 0 : i32
    %c0_i32_0 = arith.constant 0 : i32
    %c0_i32_1 = arith.constant 0 : i32
    return %c0_i32, %c0_i32_0 : i32, i32
  }
  func.func @transform_4(%arg0: i32) -> (i32, i32) {
    %c0_i32 = arith.constant 0 : i32
    %c0_i32_0 = arith.constant 0 : i32
    %c0_i32_1 = arith.constant 0 : i32
    return %c0_i32, %c0_i32_0 : i32, i32
  }
  func.func @transform_5(%arg0: i32) -> (i32, i32, i32) {
    %c0_i32 = arith.constant 0 : i32
    %c0_i32_0 = arith.constant 0 : i32
    %c0_i32_1 = arith.constant 0 : i32
    return %arg0, %c0_i32, %c0_i32_0 : i32, i32, i32
  }
}

module attributes {stable_mosaic.version = 11 : i64} {
  func.func @_mm_kernel(%arg0: i32, %arg1: i32, %arg2: i32, %arg3: memref<128x128xbf16, #tpu.memory_space<vmem>>, %arg4: memref<128x128xbf16, #tpu.memory_space<vmem>>, %arg5: memref<1x128xf32, #tpu.memory_space<vmem>>, %arg6: memref<1x128xf32, #tpu.memory_space<vmem>>, %arg7: memref<128x128xbf16, #tpu.memory_space<vmem>>, %arg8: memref<128x128xf32, #tpu.memory_space<vmem>>) attributes {dimension_semantics = [#tpu.dimension_semantics<parallel>, #tpu.dimension_semantics<parallel>, #tpu.dimension_semantics<arbitrary>], iteration_bounds = array<i64: 1, 1, 1>, scalar_prefetch = 0 : i64, scratch_operands = 1 : i64, tpu.core_type = #tpu.core_type<tc>, window_params = [{transform_indices = @transform_0, window_bounds = array<i64: 128, 128>}, {transform_indices = @transform_1, window_bounds = array<i64: 128, 128>}, {transform_indices = @transform_2, window_bounds = array<i64: 1, 128>}, {transform_indices = @transform_3, window_bounds = array<i64: 1, 128>}, {transform_indices = @transform_4, window_bounds = array<i64: 128, 128>}]} {
    %c0_i32 = arith.constant 0 : i32
    %0 = arith.cmpi eq, %arg2, %c0_i32 : i32
    %1 = arith.extui %0 : i1 to i32
    %c0_i32_0 = arith.constant 0 : i32
    %2 = arith.cmpi ne, %1, %c0_i32_0 : i32
    scf.if %2 {
      %cst_10 = arith.constant 0.000000e+00 : f32
      %12 = vector.broadcast %cst_10 : f32 to vector<128x128xf32>
      %c0_11 = arith.constant 0 : index
      %c0_12 = arith.constant 0 : index
      %13 = vector.load %arg8[%c0_11, %c0_12] : memref<128x128xf32, #tpu.memory_space<vmem>>, vector<128x128xf32>
      tpu.vector_store %arg8[%c0_11, %c0_12], %12 {strides = array<i32>} : memref<128x128xf32, #tpu.memory_space<vmem>>, vector<128x128xf32>,
    } else {
    }
    %c0 = arith.constant 0 : index
    %c0_1 = arith.constant 0 : index
    %3 = vector.load %arg8[%c0, %c0_1] : memref<128x128xf32, #tpu.memory_space<vmem>>, vector<128x128xf32>
    %c0_2 = arith.constant 0 : index
    %c0_3 = arith.constant 0 : index
    %4 = vector.load %arg3[%c0_2, %c0_3] : memref<128x128xbf16, #tpu.memory_space<vmem>>, vector<128x128xbf16>
    %c0_4 = arith.constant 0 : index
    %c0_5 = arith.constant 0 : index
    %5 = vector.load %arg4[%c0_4, %c0_5] : memref<128x128xbf16, #tpu.memory_space<vmem>>, vector<128x128xbf16>
    %cst = arith.constant dense<0.000000e+00> : vector<128x128xf32>
    %6 = tpu.matmul %4, %5, %cst {dimension_numbers = #tpu.dot_dimension_numbers<[1], [0], [0], [1], [0, 0, 1, 1], [], []>} : vector<128x128xbf16>, vector<128x128xbf16>, vector<128x128xf32> -> vector<128x128xf32>
    %7 = arith.addf %3, %6 : vector<128x128xf32>
    %c0_6 = arith.constant 0 : index
    %c0_7 = arith.constant 0 : index
    %8 = vector.load %arg8[%c0_6, %c0_7] : memref<128x128xf32, #tpu.memory_space<vmem>>, vector<128x128xf32>
    tpu.vector_store %arg8[%c0_6, %c0_7], %7 {strides = array<i32>} : memref<128x128xf32, #tpu.memory_space<vmem>>, vector<128x128xf32>,
    %c0_i32_8 = arith.constant 0 : i32
    %9 = arith.cmpi eq, %arg2, %c0_i32_8 : i32
    %10 = arith.extui %9 : i1 to i32
    %c0_i32_9 = arith.constant 0 : i32
    %11 = arith.cmpi ne, %10, %c0_i32_9 : i32
    scf.if %11 {
      %c0_10 = arith.constant 0 : index
      %c0_11 = arith.constant 0 : index
      %12 = vector.load %arg8[%c0_10, %c0_11] : memref<128x128xf32, #tpu.memory_space<vmem>>, vector<128x128xf32>
      %c0_12 = arith.constant 0 : index
      %c0_13 = arith.constant 0 : index
      %13 = vector.load %arg5[%c0_12, %c0_13] : memref<1x128xf32, #tpu.memory_space<vmem>>, vector<1x128xf32>
      %14 = vector.broadcast %13 : vector<1x128xf32> to vector<128x128xf32>
      %15 = arith.mulf %12, %14 : vector<128x128xf32>
      %c0_14 = arith.constant 0 : index
      %c0_15 = arith.constant 0 : index
      %16 = vector.load %arg6[%c0_14, %c0_15] : memref<1x128xf32, #tpu.memory_space<vmem>>, vector<1x128xf32>
      %17 = vector.broadcast %16 : vector<1x128xf32> to vector<128x128xf32>
      %18 = arith.addf %15, %17 : vector<128x128xf32>
      %19 = arith.truncf %18 : vector<128x128xf32> to vector<128x128xbf16>
      %c0_16 = arith.constant 0 : index
      %c0_17 = arith.constant 0 : index
      %20 = vector.load %arg7[%c0_16, %c0_17] : memref<128x128xbf16, #tpu.memory_space<vmem>>, vector<128x128xbf16>
      tpu.vector_store %arg7[%c0_16, %c0_17], %19 {strides = array<i32>} : memref<128x128xbf16, #tpu.memory_space<vmem>>, vector<128x128xbf16>,
    } else {
    }
    return
  }
  func.func @transform_0(%arg0: i32, %arg1: i32, %arg2: i32) -> (i32, i32) {
    %c0_i32 = arith.constant 0 : i32
    return %arg0, %arg2 : i32, i32
  }
  func.func @transform_1(%arg0: i32, %arg1: i32, %arg2: i32) -> (i32, i32) {
    %c0_i32 = arith.constant 0 : i32
    return %arg2, %arg1 : i32, i32
  }
  func.func @transform_2(%arg0: i32, %arg1: i32, %arg2: i32) -> (i32, i32) {
    %c0_i32 = arith.constant 0 : i32
    %c0_i32_0 = arith.constant 0 : i32
    return %c0_i32, %arg1 : i32, i32
  }
  func.func @transform_3(%arg0: i32, %arg1: i32, %arg2: i32) -> (i32, i32) {
    %c0_i32 = arith.constant 0 : i32
    %c0_i32_0 = arith.constant 0 : i32
    return %c0_i32, %arg1 : i32, i32
  }
  func.func @transform_4(%arg0: i32, %arg1: i32, %arg2: i32) -> (i32, i32) {
    %c0_i32 = arith.constant 0 : i32
    return %arg0, %arg1 : i32, i32
  }
}

module attributes {stable_mosaic.version = 11 : i64} {
  func.func @_mm_kernel(%arg0: i32, %arg1: i32, %arg2: i32, %arg3: memref<128x128xbf16, #tpu.memory_space<vmem>>, %arg4: memref<128x256xbf16, #tpu.memory_space<vmem>>, %arg5: memref<1x256xf32, #tpu.memory_space<vmem>>, %arg6: memref<1x256xf32, #tpu.memory_space<vmem>>, %arg7: memref<128x256xbf16, #tpu.memory_space<vmem>>, %arg8: memref<128x256xf32, #tpu.memory_space<vmem>>) attributes {dimension_semantics = [#tpu.dimension_semantics<parallel>, #tpu.dimension_semantics<parallel>, #tpu.dimension_semantics<arbitrary>], iteration_bounds = array<i64: 1, 10, 1>, scalar_prefetch = 0 : i64, scratch_operands = 1 : i64, tpu.core_type = #tpu.core_type<tc>, window_params = [{transform_indices = @transform_0, window_bounds = array<i64: 128, 128>}, {transform_indices = @transform_1, window_bounds = array<i64: 128, 256>}, {transform_indices = @transform_2, window_bounds = array<i64: 1, 256>}, {transform_indices = @transform_3, window_bounds = array<i64: 1, 256>}, {transform_indices = @transform_4, window_bounds = array<i64: 128, 256>}]} {
    %c0_i32 = arith.constant 0 : i32
    %0 = arith.cmpi eq, %arg2, %c0_i32 : i32
    %1 = arith.extui %0 : i1 to i32
    %c0_i32_0 = arith.constant 0 : i32
    %2 = arith.cmpi ne, %1, %c0_i32_0 : i32
    scf.if %2 {
      %cst_10 = arith.constant 0.000000e+00 : f32
      %12 = vector.broadcast %cst_10 : f32 to vector<128x256xf32>
      %c0_11 = arith.constant 0 : index
      %c0_12 = arith.constant 0 : index
      %13 = vector.load %arg8[%c0_11, %c0_12] : memref<128x256xf32, #tpu.memory_space<vmem>>, vector<128x256xf32>
      tpu.vector_store %arg8[%c0_11, %c0_12], %12 {strides = array<i32>} : memref<128x256xf32, #tpu.memory_space<vmem>>, vector<128x256xf32>,
    } else {
    }
    %c0 = arith.constant 0 : index
    %c0_1 = arith.constant 0 : index
    %3 = vector.load %arg8[%c0, %c0_1] : memref<128x256xf32, #tpu.memory_space<vmem>>, vector<128x256xf32>
    %c0_2 = arith.constant 0 : index
    %c0_3 = arith.constant 0 : index
    %4 = vector.load %arg3[%c0_2, %c0_3] : memref<128x128xbf16, #tpu.memory_space<vmem>>, vector<128x128xbf16>
    %c0_4 = arith.constant 0 : index
    %c0_5 = arith.constant 0 : index
    %5 = vector.load %arg4[%c0_4, %c0_5] : memref<128x256xbf16, #tpu.memory_space<vmem>>, vector<128x256xbf16>
    %cst = arith.constant dense<0.000000e+00> : vector<128x256xf32>
    %6 = tpu.matmul %4, %5, %cst {dimension_numbers = #tpu.dot_dimension_numbers<[1], [0], [0], [1], [0, 0, 1, 1], [], []>} : vector<128x128xbf16>, vector<128x256xbf16>, vector<128x256xf32> -> vector<128x256xf32>
    %7 = arith.addf %3, %6 : vector<128x256xf32>
    %c0_6 = arith.constant 0 : index
    %c0_7 = arith.constant 0 : index
    %8 = vector.load %arg8[%c0_6, %c0_7] : memref<128x256xf32, #tpu.memory_space<vmem>>, vector<128x256xf32>
    tpu.vector_store %arg8[%c0_6, %c0_7], %7 {strides = array<i32>} : memref<128x256xf32, #tpu.memory_space<vmem>>, vector<128x256xf32>,
    %c0_i32_8 = arith.constant 0 : i32
    %9 = arith.cmpi eq, %arg2, %c0_i32_8 : i32
    %10 = arith.extui %9 : i1 to i32
    %c0_i32_9 = arith.constant 0 : i32
    %11 = arith.cmpi ne, %10, %c0_i32_9 : i32
    scf.if %11 {
      %c0_10 = arith.constant 0 : index
      %c0_11 = arith.constant 0 : index
      %12 = vector.load %arg8[%c0_10, %c0_11] : memref<128x256xf32, #tpu.memory_space<vmem>>, vector<128x256xf32>
      %c0_12 = arith.constant 0 : index
      %c0_13 = arith.constant 0 : index
      %13 = vector.load %arg5[%c0_12, %c0_13] : memref<1x256xf32, #tpu.memory_space<vmem>>, vector<1x256xf32>
      %14 = vector.broadcast %13 : vector<1x256xf32> to vector<128x256xf32>
      %15 = arith.mulf %12, %14 : vector<128x256xf32>
      %c0_14 = arith.constant 0 : index
      %c0_15 = arith.constant 0 : index
      %16 = vector.load %arg6[%c0_14, %c0_15] : memref<1x256xf32, #tpu.memory_space<vmem>>, vector<1x256xf32>
      %17 = vector.broadcast %16 : vector<1x256xf32> to vector<128x256xf32>
      %18 = arith.addf %15, %17 : vector<128x256xf32>
      %19 = arith.negf %18 : vector<128x256xf32>
      %20 = math.exp %19 : vector<128x256xf32>
      %cst_16 = arith.constant 1.000000e+00 : f32
      %21 = vector.broadcast %cst_16 : f32 to vector<128x256xf32>
      %22 = arith.addf %21, %20 : vector<128x256xf32>
      %23 = arith.divf %21, %22 : vector<128x256xf32>
      %24 = arith.mulf %18, %23 : vector<128x256xf32>
      %25 = arith.truncf %24 : vector<128x256xf32> to vector<128x256xbf16>
      %c0_17 = arith.constant 0 : index
      %c0_18 = arith.constant 0 : index
      %26 = vector.load %arg7[%c0_17, %c0_18] : memref<128x256xbf16, #tpu.memory_space<vmem>>, vector<128x256xbf16>
      tpu.vector_store %arg7[%c0_17, %c0_18], %25 {strides = array<i32>} : memref<128x256xbf16, #tpu.memory_space<vmem>>, vector<128x256xbf16>,
    } else {
    }
    return
  }
  func.func @transform_0(%arg0: i32, %arg1: i32, %arg2: i32) -> (i32, i32) {
    %c0_i32 = arith.constant 0 : i32
    return %arg0, %arg2 : i32, i32
  }
  func.func @transform_1(%arg0: i32, %arg1: i32, %arg2: i32) -> (i32, i32) {
    %c0_i32 = arith.constant 0 : i32
    return %arg2, %arg1 : i32, i32
  }
  func.func @transform_2(%arg0: i32, %arg1: i32, %arg2: i32) -> (i32, i32) {
    %c0_i32 = arith.constant 0 : i32
    %c0_i32_0 = arith.constant 0 : i32
    return %c0_i32, %arg1 : i32, i32
  }
  func.func @transform_3(%arg0: i32, %arg1: i32, %arg2: i32) -> (i32, i32) {
    %c0_i32 = arith.constant 0 : i32
    %c0_i32_0 = arith.constant 0 : i32
    return %c0_i32, %arg1 : i32, i32
  }
  func.func @transform_4(%arg0: i32, %arg1: i32, %arg2: i32) -> (i32, i32) {
    %c0_i32 = arith.constant 0 : i32
    return %arg0, %arg1 : i32, i32
  }
}

module attributes {stable_mosaic.version = 11 : i64} {
  func.func @_gap_kernel(%arg0: i32, %arg1: memref<1x64x2560xbf16, #tpu.memory_space<vmem>>, %arg2: memref<1x1x2560xf32, #tpu.memory_space<vmem>>) attributes {dimension_semantics = [#tpu.dimension_semantics<parallel>], iteration_bounds = array<i64: 2>, scalar_prefetch = 0 : i64, scratch_operands = 0 : i64, tpu.core_type = #tpu.core_type<tc>, window_params = [{transform_indices = @transform_0, window_bounds = array<i64: 1, 64, 2560>}, {transform_indices = @transform_1, window_bounds = array<i64: 1, 1, 2560>}]} {
    %c0 = arith.constant 0 : index
    %c0_0 = arith.constant 0 : index
    %c0_1 = arith.constant 0 : index
    %0 = vector.load %arg1[%c0, %c0_0, %c0_1] : memref<1x64x2560xbf16, #tpu.memory_space<vmem>>, vector<1x64x2560xbf16>
    %1 = vector.shape_cast %0 : vector<1x64x2560xbf16> to vector<64x2560xbf16>
    %2 = arith.extf %1 : vector<64x2560xbf16> to vector<64x2560xf32>
    %cst = arith.constant dense<0.000000e+00> : vector<2560xf32>
    %3 = vector.multi_reduction <add>, %2, %cst [0] : vector<64x2560xf32> to vector<2560xf32>
    %4 = vector.shape_cast %3 : vector<2560xf32> to vector<1x2560xf32>
    %cst_2 = arith.constant 6.400000e+01 : f32
    %5 = vector.broadcast %cst_2 : f32 to vector<1x2560xf32>
    %6 = arith.divf %4, %5 : vector<1x2560xf32>
    %c0_3 = arith.constant 0 : index
    %c0_4 = arith.constant 0 : index
    %c0_5 = arith.constant 0 : index
    %7 = vector.load %arg2[%c0_3, %c0_4, %c0_5] : memref<1x1x2560xf32, #tpu.memory_space<vmem>>, vector<1x1x2560xf32>
    %8 = vector.shape_cast %7 : vector<1x1x2560xf32> to vector<1x2560xf32>
    %9 = vector.shape_cast %6 : vector<1x2560xf32> to vector<1x1x2560xf32>
    tpu.vector_store %arg2[%c0_3, %c0_4, %c0_5], %9 {strides = array<i32>} : memref<1x1x2560xf32, #tpu.memory_space<vmem>>, vector<1x1x2560xf32>,
    return
  }
  func.func @transform_0(%arg0: i32) -> (i32, i32, i32) {
    %c0_i32 = arith.constant 0 : i32
    %c0_i32_0 = arith.constant 0 : i32
    %c0_i32_1 = arith.constant 0 : i32
    return %arg0, %c0_i32, %c0_i32_0 : i32, i32, i32
  }
  func.func @transform_1(%arg0: i32) -> (i32, i32, i32) {
    %c0_i32 = arith.constant 0 : i32
    %c0_i32_0 = arith.constant 0 : i32
    %c0_i32_1 = arith.constant 0 : i32
    return %arg0, %c0_i32, %c0_i32_0 : i32, i32, i32
  }
}

module attributes {stable_mosaic.version = 11 : i64} {
  func.func @_mm_kernel(%arg0: i32, %arg1: i32, %arg2: i32, %arg3: memref<2x512xbf16, #tpu.memory_space<vmem>>, %arg4: memref<512x128xbf16, #tpu.memory_space<vmem>>, %arg5: memref<1x128xf32, #tpu.memory_space<vmem>>, %arg6: memref<1x128xf32, #tpu.memory_space<vmem>>, %arg7: memref<2x128xf32, #tpu.memory_space<vmem>>, %arg8: memref<2x128xf32, #tpu.memory_space<vmem>>) attributes {dimension_semantics = [#tpu.dimension_semantics<parallel>, #tpu.dimension_semantics<parallel>, #tpu.dimension_semantics<arbitrary>], iteration_bounds = array<i64: 1, 1, 5>, scalar_prefetch = 0 : i64, scratch_operands = 1 : i64, tpu.core_type = #tpu.core_type<tc>, window_params = [{transform_indices = @transform_0, window_bounds = array<i64: 2, 512>}, {transform_indices = @transform_1, window_bounds = array<i64: 512, 128>}, {transform_indices = @transform_2, window_bounds = array<i64: 1, 128>}, {transform_indices = @transform_3, window_bounds = array<i64: 1, 128>}, {transform_indices = @transform_4, window_bounds = array<i64: 2, 128>}]} {
    %c0_i32 = arith.constant 0 : i32
    %0 = arith.cmpi eq, %arg2, %c0_i32 : i32
    %1 = arith.extui %0 : i1 to i32
    %c0_i32_0 = arith.constant 0 : i32
    %2 = arith.cmpi ne, %1, %c0_i32_0 : i32
    scf.if %2 {
      %cst_9 = arith.constant 0.000000e+00 : f32
      %12 = vector.broadcast %cst_9 : f32 to vector<2x128xf32>
      %c0_10 = arith.constant 0 : index
      %c0_11 = arith.constant 0 : index
      %13 = vector.load %arg8[%c0_10, %c0_11] : memref<2x128xf32, #tpu.memory_space<vmem>>, vector<2x128xf32>
      tpu.vector_store %arg8[%c0_10, %c0_11], %12 {strides = array<i32>} : memref<2x128xf32, #tpu.memory_space<vmem>>, vector<2x128xf32>,
    } else {
    }
    %c0 = arith.constant 0 : index
    %c0_1 = arith.constant 0 : index
    %3 = vector.load %arg8[%c0, %c0_1] : memref<2x128xf32, #tpu.memory_space<vmem>>, vector<2x128xf32>
    %c0_2 = arith.constant 0 : index
    %c0_3 = arith.constant 0 : index
    %4 = vector.load %arg3[%c0_2, %c0_3] : memref<2x512xbf16, #tpu.memory_space<vmem>>, vector<2x512xbf16>
    %c0_4 = arith.constant 0 : index
    %c0_5 = arith.constant 0 : index
    %5 = vector.load %arg4[%c0_4, %c0_5] : memref<512x128xbf16, #tpu.memory_space<vmem>>, vector<512x128xbf16>
    %cst = arith.constant dense<0.000000e+00> : vector<2x128xf32>
    %6 = tpu.matmul %4, %5, %cst {dimension_numbers = #tpu.dot_dimension_numbers<[1], [0], [0], [1], [0, 0, 1, 1], [], []>} : vector<2x512xbf16>, vector<512x128xbf16>, vector<2x128xf32> -> vector<2x128xf32>
    %7 = arith.addf %3, %6 : vector<2x128xf32>
    %c0_6 = arith.constant 0 : index
    %c0_7 = arith.constant 0 : index
    %8 = vector.load %arg8[%c0_6, %c0_7] : memref<2x128xf32, #tpu.memory_space<vmem>>, vector<2x128xf32>
    tpu.vector_store %arg8[%c0_6, %c0_7], %7 {strides = array<i32>} : memref<2x128xf32, #tpu.memory_space<vmem>>, vector<2x128xf32>,
    %c4_i32 = arith.constant 4 : i32
    %9 = arith.cmpi eq, %arg2, %c4_i32 : i32
    %10 = arith.extui %9 : i1 to i32
    %c0_i32_8 = arith.constant 0 : i32
    %11 = arith.cmpi ne, %10, %c0_i32_8 : i32
    scf.if %11 {
      %c0_9 = arith.constant 0 : index
      %c0_10 = arith.constant 0 : index
      %12 = vector.load %arg8[%c0_9, %c0_10] : memref<2x128xf32, #tpu.memory_space<vmem>>, vector<2x128xf32>
      %c0_11 = arith.constant 0 : index
      %c0_12 = arith.constant 0 : index
      %13 = vector.load %arg5[%c0_11, %c0_12] : memref<1x128xf32, #tpu.memory_space<vmem>>, vector<1x128xf32>
      %14 = vector.broadcast %13 : vector<1x128xf32> to vector<2x128xf32>
      %15 = arith.mulf %12, %14 : vector<2x128xf32>
      %c0_13 = arith.constant 0 : index
      %c0_14 = arith.constant 0 : index
      %16 = vector.load %arg6[%c0_13, %c0_14] : memref<1x128xf32, #tpu.memory_space<vmem>>, vector<1x128xf32>
      %17 = vector.broadcast %16 : vector<1x128xf32> to vector<2x128xf32>
      %18 = arith.addf %15, %17 : vector<2x128xf32>
      %c0_15 = arith.constant 0 : index
      %c0_16 = arith.constant 0 : index
      %19 = vector.load %arg7[%c0_15, %c0_16] : memref<2x128xf32, #tpu.memory_space<vmem>>, vector<2x128xf32>
      tpu.vector_store %arg7[%c0_15, %c0_16], %18 {strides = array<i32>} : memref<2x128xf32, #tpu.memory_space<vmem>>, vector<2x128xf32>,
    } else {
    }
    return
  }
  func.func @transform_0(%arg0: i32, %arg1: i32, %arg2: i32) -> (i32, i32) {
    %c0_i32 = arith.constant 0 : i32
    return %arg0, %arg2 : i32, i32
  }
  func.func @transform_1(%arg0: i32, %arg1: i32, %arg2: i32) -> (i32, i32) {
    %c0_i32 = arith.constant 0 : i32
    return %arg2, %arg1 : i32, i32
  }
  func.func @transform_2(%arg0: i32, %arg1: i32, %arg2: i32) -> (i32, i32) {
    %c0_i32 = arith.constant 0 : i32
    %c0_i32_0 = arith.constant 0 : i32
    return %c0_i32, %arg1 : i32, i32
  }
  func.func @transform_3(%arg0: i32, %arg1: i32, %arg2: i32) -> (i32, i32) {
    %c0_i32 = arith.constant 0 : i32
    %c0_i32_0 = arith.constant 0 : i32
    return %c0_i32, %arg1 : i32, i32
  }
  func.func @transform_4(%arg0: i32, %arg1: i32, %arg2: i32) -> (i32, i32) {
    %c0_i32 = arith.constant 0 : i32
    return %arg0, %arg1 : i32, i32
  }
}

</mosaic_0001>

<bundles_post_ra>
// kernel: cnn_efficientnet_forward.11
= control target key start
LH: loop header
LB: loop body
LE: loop exit
PB: predicated region body
PF: predicated region fallthrough
CT: control target
= control target key end

     0   :  { %s1917_s15 = smov 0   ;;  %s1919_s16 = smov 0   ;;  %s2244_s0 = inlined_call_operand.vmem [shape: bf16[512,27], index: 0, kind: input, shape index: {}]   ;;  %s2245_s1 = inlined_call_operand.vmem [shape: bf16[27,128], index: 1, kind: input, shape index: {}]   ;;  %s2246_s2 = inlined_call_operand.vmem [shape: f32[1,128], index: 2, kind: input, shape index: {}]   ;;  %s2247_s3 = inlined_call_operand.vmem [shape: f32[1,128], index: 3, kind: input, shape index: {}]   ;;  %s2248_s4 = inlined_call_operand.vmem [shape: bf16[512,128], index: 4, kind: output, shape index: {}]  }
   0x1   :  { %s1921_s17 = smov 0  }
   0x2 LB: > { %s33_s18 = sadd.s32 1, %s1885_s16  ;;  %p1404_p0 = scmp.ge.s32.totalorder %s1889_s17, 1  ;;  %s1889_s17 = sphi %s1921_s17, %s14_s17   ;;  %s1885_s16 = sphi %s1919_s16, %s2250_s16   ;;  %s1881_s15 = sphi %s1917_s15, %s2249_s15  }
   0x3   : > { %p35_p1 = scmp.ge.s32.totalorder %s33_s18, 2  ;;  %p221_p2 = scmp.lt.s32.totalorder %s1889_s17, 3 }
   0x5   : > { %s2252_s18 = smov (%p35_p1, %s33_s18), 0  ;;  %p222_p3 = pnand %p1404_p0, %p221_p2 }
   0x6   : > { %v1721_v0 = vld [vmem:[%s2245_s1] sm:$0xff] (!%p222_p3)   ;;  %vm545_vm0 = vcmask (!%p222_p3), 1044480   ;;  %v1722_v1 = vld [vmem:[%s2245_s1 + $0x8] sm:$0x3f] (!%p222_p3)   ;;  %vm546_vm1 = vcmask (!%p222_p3), 1045504   ;;  %s1405_s23 = sshll.u32 (!%p222_p3), %s1881_s15, 5 }
   0x7   : > { %225 = sbr.rel (%p222_p3) target bundleno = 323 (0x143), region = 36  ;;  %1656 = vmatprep.subr.bf16.mxu0 (!%p222_p3), %v1721_v0  ;;  %1692 = vmatprep.subr.bf16.mxu1 (!%p222_p3), %v1721_v0  ;;  %v1891_v2 = vmov (!%p222_p3), 65535   ;;  %p268_p4 = scmp.lt.s32.totalorder (!%p222_p3), %s1405_s23, 63  ;;  %vm496_vm2 = vcmask (!%p222_p3), 220160   ;;  %v1986_v22 = vld [vmem:[%s2246_s2] ss:$0 sm:$0xff] (!%p222_p3) }
   0x8   : > { %1657 = vmatpush3.bf16.msra.mxu0 (!%p222_p3), %v1721_v0  ;;  %1694 = vmatpush3.bf16.msra.mxu1 (!%p222_p3), %v1721_v0  ;;  %v547_v3 = vsel (!%p222_p3), %vm545_vm0, 4294967295, %v1891_v2  ;;  %v1991_v24 = vld [vmem:[%s2247_s3] ss:$0 sm:$0xff] (!%p222_p3) }
   0x9   : > { %v548_v4 = vsel (!%p222_p3), %vm546_vm1, %v547_v3, 0 }
   0xa   : > { %v550_v5 = vand.u32 (!%p222_p3), %v1722_v1, %v548_v4 }
   0xc   : > { %1658 = vmatprep.subr.bf16.mxu0 (!%p222_p3), %v550_v5  ;;  %1693 = vmatprep.subr.bf16.mxu1 (!%p222_p3), %v550_v5 }
   0xd   : > { %1659 = vmatpush3.bf16.msra.mxu0 (!%p222_p3), %v550_v5  ;;  %1695 = vmatpush3.bf16.msra.mxu1 (!%p222_p3), %v550_v5 }
   0xe   : > { %s2254_s23 = smov (!%p268_p4, %s1405_s23), 63 }
   0xf   : > { %s1406_s24 = sshll.u32 %s2254_s23, 2 }
  0x10   : > { %s1949_s27 = scalar_lea.vmem %s2244_s0, %s1406_s24  ;;  %s2137_s8 = scalar_lea.vmem %s2248_s4, %s1406_s24 }
  0x11   : > { %v1723_v6 = vld [vmem:[%s1949_s27] sm:$0xff]   ;;  %v1725_v8 = vld [vmem:[%s1949_s27 + $0x8] sm:$0xff]   ;;  %v1727_v10 = vld [vmem:[%s1949_s27 + $0x10] sm:$0xff]  }
  0x12   : > { %v1724_v7 = vld [vmem:[%s1949_s27 + $0x40] sm:$0xff]   ;;  %1660 = vmatprep.mubr.msk.bf16.mxu0 %vm496_vm2, %v1723_v6  ;;  %v1726_v9 = vld [vmem:[%s1949_s27 + $0x48] sm:$0xff]   ;;  %v1728_v11 = vld [vmem:[%s1949_s27 + $0x50] sm:$0xff]  }
  0x13   : > { %1676 = vmatprep.mubr.msk.bf16.mxu1 %vm496_vm2, %v1724_v7  ;;  %1661 = vmatmul.mubr.msk.bf16.vlgmr.msra.gmra.mrb[0].mxu0 %vm496_vm2, %v1725_v8  ;;  %v1729_v12 = vld [vmem:[%s1949_s27 + $0x18] sm:$0xff]   ;;  %v1731_v14 = vld [vmem:[%s1949_s27 + $0x20] sm:$0xff]   ;;  %v1733_v16 = vld [vmem:[%s1949_s27 + $0x28] sm:$0xff]  }
  0x14   : > { %1677 = vmatmul.mubr.msk.bf16.vlgmr.msra.gmra.mrb[0].mxu1 %vm496_vm2, %v1726_v9  ;;  %1664 = vmatprep.mubr.msk.bf16.mxu0 %vm496_vm2, %v1727_v10  ;;  %v1730_v13 = vld [vmem:[%s1949_s27 + $0x58] sm:$0xff]   ;;  %v1732_v15 = vld [vmem:[%s1949_s27 + $0x60] sm:$0xff]   ;;  %v1734_v17 = vld [vmem:[%s1949_s27 + $0x68] sm:$0xff]  }
  0x15   : > { %1680 = vmatprep.mubr.msk.bf16.mxu1 %vm496_vm2, %v1728_v11  ;;  %v1735_v18 = vld [vmem:[%s1949_s27 + $0x30] sm:$0xff]   ;;  %v1737_v20 = vld [vmem:[%s1949_s27 + $0x38] sm:$0xff]  }
  0x16   : > { %v1736_v19 = vld [vmem:[%s1949_s27 + $0x70] sm:$0xff]   ;;  %v1738_v21 = vld [vmem:[%s1949_s27 + $0x78] sm:$0xff]  }
  0x1b   : > { %1665 = vmatmul.mubr.msk.bf16.gmra.mrb[4].mxu0 %vm496_vm2, %v1729_v12 }
  0x1c   : > { %1681 = vmatmul.mubr.msk.bf16.gmra.mrb[4].mxu1 %vm496_vm2, %v1730_v13  ;;  %1668 = vmatprep.mubr.msk.bf16.mxu0 %vm496_vm2, %v1731_v14 }
  0x1d   : > { %1684 = vmatprep.mubr.msk.bf16.mxu1 %vm496_vm2, %v1732_v15 }
  0x23   : > { %1669 = vmatmul.mubr.msk.bf16.gmra.mrb[8].mxu0 %vm496_vm2, %v1733_v16 }
  0x24   : > { %1685 = vmatmul.mubr.msk.bf16.gmra.mrb[8].mxu1 %vm496_vm2, %v1734_v17  ;;  %1672 = vmatprep.mubr.msk.bf16.mxu0 %vm496_vm2, %v1735_v18 }
  0x25   : > { %1688 = vmatprep.mubr.msk.bf16.mxu1 %vm496_vm2, %v1736_v19 }
  0x2b   : > { %1673 = vmatmul.mubr.msk.bf16.gmra.mrb[12].mxu0 %vm496_vm2, %v1737_v20 }
  0x2c   : > { %1689 = vmatmul.mubr.msk.bf16.gmra.mrb[12].mxu1 %vm496_vm2, %v1738_v21 }
  0xe6   : > { %v1662_v23 = vpop.f32.mrb[0].mxu0 }
  0xe7   : > { %v821_v25 = vmul.f32 %v1662_v23, %v1986_v22  ;;  %v1678_v26 = vpop.f32.mrb[0].mxu1  ;;  %v586_v27 = vpop.f32.mrb[1].mxu0 }
  0xe8   : > { %v837_v28 = vmul.f32 %v1678_v26, %v1986_v22  ;;  %v819_v29 = vmul.f32 %v1986_v22, %v586_v27  ;;  %v650_v30 = vpop.f32.mrb[1].mxu1  ;;  %v1663_v31 = vpop.f32.mrb[2].mxu0 }
  0xe9   : > { %v1997_v32 = vadd.f32 %v1991_v24, %v821_v25  ;;  %v835_v33 = vmul.f32 %v1986_v22, %v650_v30  ;;  %v822_v34 = vmul.f32 %v1663_v31, %v1986_v22  ;;  %v1679_v35 = vpop.f32.mrb[2].mxu1  ;;  %v589_v36 = vpop.f32.mrb[3].mxu0 }
  0xea   : > { %v2002_v37 = vadd.f32 %v1991_v24, %v837_v28  ;;  %v2005_v38 = vadd.f32 %v1991_v24, %v819_v29  ;;  %v838_v39 = vmul.f32 %v1679_v35, %v1986_v22  ;;  %v820_v40 = vmul.f32 %v1986_v22, %v589_v36  ;;  %v653_v41 = vpop.f32.mrb[3].mxu1 }
  0xeb   : > { %v1447_v42 = vmul.f32 -1.442695, %v1997_v32  ;;  %v2011_v43 = vadd.f32 %v1991_v24, %v835_v33  ;;  %v2014_v44 = vadd.f32 %v1991_v24, %v822_v34  ;;  %v836_v45 = vmul.f32 %v1986_v22, %v653_v41 }
  0xec   : > { %v1463_v46 = vmul.f32 -1.442695, %v2002_v37  ;;  %v1445_v47 = vmul.f32 -1.442695, %v2005_v38  ;;  %v2020_v48 = vadd.f32 %v1991_v24, %v838_v39  ;;  %v2023_v49 = vadd.f32 %v1991_v24, %v820_v40 }
  0xed   : > { %1739 = vpow2.f32 %v1447_v42  ;;  %v1461_v50 = vmul.f32 -1.442695, %v2011_v43  ;;  %v1448_v51 = vmul.f32 -1.442695, %v2014_v44  ;;  %v2028_v52 = vadd.f32 %v1991_v24, %v836_v45 }
  0xee   : > { %1741 = vpow2.f32 %v1463_v46  ;;  %v1464_v53 = vmul.f32 -1.442695, %v2020_v48  ;;  %v1666_v54 = vpop.f32.mrb[4].mxu0  ;;  %v1446_v55 = vmul.f32 -1.442695, %v2023_v49 }
  0xef   : > { %1743 = vpow2.f32 %v1445_v47  ;;  %v825_v56 = vmul.f32 %v1666_v54, %v1986_v22  ;;  %v1682_v57 = vpop.f32.mrb[4].mxu1  ;;  %v602_v58 = vpop.f32.mrb[5].mxu0  ;;  %v1462_v59 = vmul.f32 -1.442695, %v2028_v52 }
  0xf0   : > { %1745 = vpow2.f32 %v1461_v50  ;;  %v841_v60 = vmul.f32 %v1682_v57, %v1986_v22  ;;  %v823_v61 = vmul.f32 %v1986_v22, %v602_v58  ;;  %v666_v62 = vpop.f32.mrb[5].mxu1  ;;  %v1667_v63 = vpop.f32.mrb[6].mxu0 }
  0xf1   : > { %1747 = vpow2.f32 %v1448_v51  ;;  %v2037_v0 = vadd.f32 %v1991_v24, %v825_v56  ;;  %v839_v1 = vmul.f32 %v1986_v22, %v666_v62  ;;  %v826_v2 = vmul.f32 %v1667_v63, %v1986_v22  ;;  %v1683_v3 = vpop.f32.mrb[6].mxu1  ;;  %v605_v4 = vpop.f32.mrb[7].mxu0 }
  0xf2   : > { %1749 = vpow2.f32 %v1464_v53  ;;  %v2042_v5 = vadd.f32 %v1991_v24, %v841_v60  ;;  %v2045_v6 = vadd.f32 %v1991_v24, %v823_v61  ;;  %v669_v7 = vpop.f32.mrb[7].mxu1  ;;  %v842_v13 = vmul.f32 %v1683_v3, %v1986_v22 }
  0xf3   : > { %1751 = vpow2.f32 %v1446_v55  ;;  %v1451_v8 = vmul.f32 -1.442695, %v2037_v0  ;;  %v2049_v9 = vadd.f32 %v1991_v24, %v839_v1  ;;  %v2052_v10 = vadd.f32 %v1991_v24, %v826_v2 }
  0xf4   : > { %1753 = vpow2.f32 %v1462_v59  ;;  %v1467_v11 = vmul.f32 -1.442695, %v2042_v5  ;;  %v1449_v12 = vmul.f32 -1.442695, %v2045_v6  ;;  %v2060_v23 = vadd.f32 %v1991_v24, %v842_v13 }
  0xf5   : > { %1755 = vpow2.f32 %v1451_v8  ;;  %v1465_v14 = vmul.f32 -1.442695, %v2049_v9  ;;  %v1452_v15 = vmul.f32 -1.442695, %v2052_v10  ;;  %v824_v25 = vmul.f32 %v1986_v22, %v605_v4 }
  0xf6   : > { %1757 = vpow2.f32 %v1467_v11  ;;  %v1670_v16 = vpop.f32.mrb[8].mxu0  ;;  %v840_v30 = vmul.f32 %v1986_v22, %v669_v7  ;;  %v1468_v45 = vmul.f32 -1.442695, %v2060_v23 }
  0xf7   : > { %v1740_v17 = vpop.eup %1739  ;;  %1759 = vpow2.f32 %v1449_v12  ;;  %v1686_v18 = vpop.f32.mrb[8].mxu1  ;;  %v2066_v46 = vadd.f32 %v1991_v24, %v824_v25  ;;  %v829_v53 = vmul.f32 %v1670_v16, %v1986_v22 }
  0xf8   : > { %v618_v19 = vpop.f32.mrb[9].mxu0  ;;  %v1742_v20 = vpop.eup %1741  ;;  %v988_v21 = vadd.f32 1.0, %v1740_v17  ;;  %1761 = vpow2.f32 %v1465_v14  ;;  %v2069_v51 = vadd.f32 %v1991_v24, %v840_v30  ;;  %v845_v56 = vmul.f32 %v1686_v18, %v1986_v22 }
  0xf9   : > { %v682_v26 = vpop.f32.mrb[9].mxu1  ;;  %v1671_v27 = vpop.f32.mrb[10].mxu0  ;;  %v1004_v29 = vadd.f32 1.0, %v1742_v20  ;;  %1763 = vpow2.f32 %v1452_v15  ;;  %v827_v57 = vmul.f32 %v1986_v22, %v618_v19  ;;  %v1450_v4 = vmul.f32 -1.442695, %v2066_v46 }
  0xfa   : > { %v1744_v28 = vpop.eup %1743  ;;  %v1687_v31 = vpop.f32.mrb[10].mxu1  ;;  %1765 = vrcp.f32 %v988_v21  ;;  %v843_v61 = vmul.f32 %v1986_v22, %v682_v26  ;;  %v830_v62 = vmul.f32 %v1671_v27, %v1986_v22  ;;  %v2085_v14 = vadd.f32 %v1991_v24, %v829_v53 }
  0xfb   : > { %v621_v33 = vpop.f32.mrb[11].mxu0  ;;  %v1746_v34 = vpop.eup %1745  ;;  %v986_v35 = vadd.f32 1.0, %v1744_v28  ;;  %1767 = vrcp.f32 %v1004_v29  ;;  %v846_v7 = vmul.f32 %v1687_v31, %v1986_v22  ;;  %v2093_v20 = vadd.f32 %v1991_v24, %v845_v56 }
  0xfc   : > { %v685_v36 = vpop.f32.mrb[11].mxu1  ;;  %v1748_v39 = vpop.eup %1747  ;;  %v1002_v40 = vadd.f32 1.0, %v1746_v34  ;;  %v828_v15 = vmul.f32 %v1986_v22, %v621_v33  ;;  %v2096_v21 = vadd.f32 %v1991_v24, %v827_v57  ;;  %v2101_v28 = vadd.f32 %v1991_v24, %v843_v61 }
  0xfd   : > { %v1750_v41 = vpop.eup %1749  ;;  %1769 = vrcp.f32 %v986_v35  ;;  %v989_v42 = vadd.f32 1.0, %v1748_v39  ;;  %v2104_v29 = vadd.f32 %v1991_v24, %v830_v62  ;;  %v2107_v33 = vadd.f32 %v1991_v24, %v846_v7 }
  0xfe   : > { %v1752_v47 = vpop.eup %1751  ;;  %1771 = vrcp.f32 %v1002_v40  ;;  %v1005_v50 = vadd.f32 1.0, %v1750_v41  ;;  %v1674_v58 = vpop.f32.mrb[12].mxu0  ;;  %v844_v34 = vmul.f32 %v1986_v22, %v685_v36  ;;  %v1466_v39 = vmul.f32 -1.442695, %v2069_v51 }
  0xff   : > { %v1754_v54 = vpop.eup %1753  ;;  %1773 = vrcp.f32 %v989_v42  ;;  %v987_v55 = vadd.f32 1.0, %v1752_v47  ;;  %v1690_v63 = vpop.f32.mrb[12].mxu1  ;;  %v2112_v40 = vadd.f32 %v1991_v24, %v828_v15  ;;  %v833_v41 = vmul.f32 %v1674_v58, %v1986_v22 }
 0x100   : > { %v1756_v59 = vpop.eup %1755  ;;  %1775 = vrcp.f32 %v1005_v50  ;;  %v1003_v60 = vadd.f32 1.0, %v1754_v54  ;;  %v2076_v1 = vpop.f32.mrb[13].mxu0  ;;  %v1455_v47 = vmul.f32 -1.442695, %v2085_v14  ;;  %v1471_v50 = vmul.f32 -1.442695, %v2093_v20 }
 0x101   : > { %v1758_v2 = vpop.eup %1757  ;;  %1777 = vrcp.f32 %v987_v55  ;;  %v992_v3 = vadd.f32 1.0, %v1756_v59  ;;  %v2080_v8 = vpop.f32.mrb[13].mxu1  ;;  %v849_v53 = vmul.f32 %v1690_v63, %v1986_v22  ;;  %v1453_v36 = vmul.f32 -1.442695, %v2096_v21 }
 0x102   : > { %v2082_v11 = vpop.f32.mrb[14].mxu0  ;;  %v1760_v12 = vpop.eup %1759  ;;  %1779 = vrcp.f32 %v1003_v60  ;;  %v1008_v13 = vadd.f32 1.0, %v1758_v2  ;;  %v1469_v55 = vmul.f32 -1.442695, %v2101_v28  ;;  %v1456_v56 = vmul.f32 -1.442695, %v2104_v29 }
 0x103   : > { %v2088_v16 = vpop.f32.mrb[14].mxu1  ;;  %v2090_v17 = vpop.f32.mrb[15].mxu0  ;;  %1781 = vrcp.f32 %v992_v3  ;;  %v990_v19 = vadd.f32 1.0, %v1760_v12  ;;  %v1472_v59 = vmul.f32 -1.442695, %v2107_v33  ;;  %v2124_v60 = vadd.f32 %v1991_v24, %v844_v34 }
 0x104   : > { %v1762_v18 = vpop.eup %1761  ;;  %v2098_v25 = vpop.f32.mrb[15].mxu1  ;;  %1783 = vrcp.f32 %v1008_v13  ;;  %v2129_v63 = vadd.f32 %v1991_v24, %v833_v41 }
 0x105   : > { %v1764_v26 = vpop.eup %1763  ;;  %v1006_v27 = vadd.f32 1.0, %v1762_v18  ;;  %1785 = vrcp.f32 %v990_v19 }
 0x106   : > { %v1766_v30 = vpop.eup %1765  ;;  %v993_v31 = vadd.f32 1.0, %v1764_v26 }
 0x107   : > { %v1768_v35 = vpop.eup %1767  ;;  %1787 = vrcp.f32 %v1006_v27  ;;  %v1084_v58 = vmul.f32 %v1766_v30, %v1997_v32  ;;  %v1459_v30 = vmul.f32 -1.442695, %v2129_v63 }
 0x108   : > { %v1770_v42 = vpop.eup %1769  ;;  %1789 = vrcp.f32 %v993_v31  ;;  %v1100_v3 = vmul.f32 %v1768_v35, %v2002_v37 }
 0x109   : > { %v1772_v54 = vpop.eup %1771  ;;  %1791 = vpow2.f32 %v1468_v45  ;;  %v1454_v45 = vmul.f32 -1.442695, %v2112_v40  ;;  %v1082_v7 = vmul.f32 %v1770_v42, %v2005_v38  ;;  %v1470_v38 = vmul.f32 -1.442695, %v2124_v60 }
 0x10a   : > { %v1774_v57 = vpop.eup %1773  ;;  %1793 = vpow2.f32 %v1450_v4  ;;  %v1098_v15 = vmul.f32 %v1772_v54, %v2011_v43 }
 0x10b   : > { %v1776_v61 = vpop.eup %1775  ;;  %v1085_v62 = vmul.f32 %v1774_v57, %v2014_v44  ;;  %1795 = vpow2.f32 %v1466_v39  ;;  %v2141_v44 = vadd.f32 %v1991_v24, %v849_v53 }
 0x10c   : > { %v1778_v2 = vpop.eup %1777  ;;  %v1101_v32 = vmul.f32 %v1776_v61, %v2020_v48  ;;  %1797 = vpow2.f32 %v1455_v47 }
 0x10d   : > { %v1780_v4 = vpop.eup %1779  ;;  %v1551_v12 = vpack.c.bf16 %v1085_v62, %v1084_v58  ;;  %v1083_v37 = vmul.f32 %v1778_v2, %v2023_v49  ;;  %1799 = vpow2.f32 %v1471_v50  ;;  %v847_v58 = vmul.f32 %v1986_v22, %v2080_v8 }
 0x10e   : > { %v1782_v13 = vpop.eup %1781  ;;  %v1591_v18 = vpack.c.bf16 %v1101_v32, %v1100_v3  ;;  %v1099_v19 = vmul.f32 %v1780_v4, %v2028_v52  ;;  %1801 = vpow2.f32 %v1453_v36  ;;  %v1475_v52 = vmul.f32 -1.442695, %v2141_v44 }
 0x10f   : > { %v2147_v48 = vpop.eup %1783  ;;  %1623 = vst [vmem:[%s2137_s8 + $0x8] sm:$0xff] %v1551_v12   ;;  %v1546_v26 = vpack.c.bf16 %v1083_v37, %v1082_v7  ;;  %1803 = vpow2.f32 %v1469_v55  ;;  %v1088_v35 = vmul.f32 %v1782_v13, %v2037_v0  ;;  %v831_v0 = vmul.f32 %v1986_v22, %v2076_v1 }
 0x110   : > { %v2151_v27 = vpop.eup %1785  ;;  %1631 = vst [vmem:[%s2137_s8 + $0x48] sm:$0xff] %v1591_v18   ;;  %v1586_v49 = vpack.c.bf16 %v1099_v19, %v1098_v15  ;;  %1805 = vpow2.f32 %v1456_v56  ;;  %v834_v62 = vmul.f32 %v2082_v11, %v1986_v22  ;;  %v850_v3 = vmul.f32 %v2088_v16, %v1986_v22 }
 0x111   : > { %v2155_v43 = vpop.eup %1787  ;;  %1547 = vst [vmem:[%s2137_s8] sm:$0xff] %v1546_v26   ;;  %1807 = vpow2.f32 %v1472_v59  ;;  %v2172_v4 = vadd.f32 %v1991_v24, %v831_v0  ;;  %v832_v8 = vmul.f32 %v1986_v22, %v2090_v17  ;;  %v2177_v11 = vadd.f32 %v1991_v24, %v847_v58 }
 0x112   : > { %v1790_v31 = vpop.eup %1789  ;;  %1630 = vst [vmem:[%s2137_s8 + $0x40] sm:$0xff] %v1586_v49   ;;  %1809 = vpow2.f32 %v1454_v45  ;;  %v848_v37 = vmul.f32 %v1986_v22, %v2098_v25  ;;  %v2182_v15 = vadd.f32 %v1991_v24, %v834_v62  ;;  %v2185_v17 = vadd.f32 %v1991_v24, %v850_v3 }
 0x113   : > { %v1792_v34 = vpop.eup %1791  ;;  %v1089_v39 = vmul.f32 %v1790_v31, %v2052_v10  ;;  %1811 = vpow2.f32 %v1470_v38  ;;  %v1457_v38 = vmul.f32 -1.442695, %v2172_v4  ;;  %v2189_v49 = vadd.f32 %v1991_v24, %v832_v8 }
 0x114   : > { %v1794_v41 = vpop.eup %1793  ;;  %v1009_v42 = vadd.f32 1.0, %v1792_v34  ;;  %1813 = vpow2.f32 %v1459_v30  ;;  %v1473_v25 = vmul.f32 -1.442695, %v2177_v11  ;;  %v2193_v30 = vadd.f32 %v1991_v24, %v848_v37 }
 0x115   : > { %v1796_v47 = vpop.eup %1795  ;;  %v1561_v50 = vpack.c.bf16 %v1089_v39, %v1088_v35  ;;  %v991_v53 = vadd.f32 1.0, %v1794_v41  ;;  %1815 = vpow2.f32 %v1475_v52  ;;  %v1104_v31 = vmul.f32 %v2147_v48, %v2042_v5 }
 0x116   : > { %v1798_v54 = vpop.eup %1797  ;;  %1817 = vrcp.f32 %v1009_v42  ;;  %v1007_v36 = vadd.f32 1.0, %v1796_v47  ;;  %v1460_v35 = vmul.f32 -1.442695, %v2182_v15  ;;  %v1086_v41 = vmul.f32 %v2151_v27, %v2045_v6 }
 0x117   : > { %v1800_v55 = vpop.eup %1799  ;;  %1625 = vst [vmem:[%s2137_s8 + $0x18] sm:$0xff] %v1561_v50   ;;  %1819 = vrcp.f32 %v991_v53  ;;  %v996_v56 = vadd.f32 1.0, %v1798_v54  ;;  %v1102_v42 = vmul.f32 %v2155_v43, %v2049_v9  ;;  %v1476_v24 = vmul.f32 -1.442695, %v2185_v17 }
 0x118   : > { %v1802_v57 = vpop.eup %1801  ;;  %1821 = vrcp.f32 %v1007_v36  ;;  %v1012_v10 = vadd.f32 1.0, %v1800_v55  ;;  %v1474_v6 = vmul.f32 -1.442695, %v2193_v30 }
 0x119   : > { %v1804_v59 = vpop.eup %1803  ;;  %1823 = vrcp.f32 %v996_v56  ;;  %v994_v61 = vadd.f32 1.0, %v1802_v57 }
 0x11a   : > { %v1806_v45 = vpop.eup %1805  ;;  %1825 = vrcp.f32 %v1012_v10  ;;  %v1010_v2 = vadd.f32 1.0, %v1804_v59 }
 0x11b   : > { %v1808_v32 = vpop.eup %1807  ;;  %1827 = vrcp.f32 %v994_v61  ;;  %v997_v1 = vadd.f32 1.0, %v1806_v45 }
 0x11c   : > { %v1810_v7 = vpop.eup %1809  ;;  %1829 = vrcp.f32 %v1010_v2  ;;  %v1013_v12 = vadd.f32 1.0, %v1808_v32 }
 0x11d   : > { %v1812_v13 = vpop.eup %1811  ;;  %1831 = vrcp.f32 %v997_v1  ;;  %v995_v16 = vadd.f32 1.0, %v1810_v7 }
 0x11e   : > { %v1814_v18 = vpop.eup %1813  ;;  %1833 = vrcp.f32 %v1013_v12  ;;  %v1011_v19 = vadd.f32 1.0, %v1812_v13 }
 0x11f   : > { %v1816_v26 = vpop.eup %1815  ;;  %1835 = vrcp.f32 %v995_v16  ;;  %v1000_v62 = vadd.f32 1.0, %v1814_v18 }
 0x120   : > { %v1818_v22 = vpop.eup %1817  ;;  %1837 = vrcp.f32 %v1011_v19  ;;  %v1016_v2 = vadd.f32 1.0, %v1816_v26 }
 0x121   : > { %v1820_v52 = vpop.eup %1819  ;;  %v1105_v34 = vmul.f32 %v1818_v22, %v2060_v23  ;;  %1839 = vpow2.f32 %v1457_v38  ;;  %v1458_v23 = vmul.f32 -1.442695, %v2189_v49 }
 0x122   : > { %v1822_v39 = vpop.eup %1821  ;;  %v1087_v47 = vmul.f32 %v1820_v52, %v2066_v46  ;;  %1841 = vpow2.f32 %v1473_v25 }
 0x123   : > { %v1824_v50 = vpop.eup %1823  ;;  %v1601_v53 = vpack.c.bf16 %v1105_v34, %v1104_v31  ;;  %v1103_v5 = vmul.f32 %v1822_v39, %v2069_v51  ;;  %1843 = vpow2.f32 %v1460_v35 }
 0x124   : > { %v1826_v48 = vpop.eup %1825  ;;  %v1556_v54 = vpack.c.bf16 %v1087_v47, %v1086_v41  ;;  %1845 = vpow2.f32 %v1476_v24  ;;  %v1092_v51 = vmul.f32 %v1824_v50, %v2085_v14 }
 0x125   : > { %v1828_v27 = vpop.eup %1827  ;;  %1633 = vst [vmem:[%s2137_s8 + $0x58] sm:$0xff] %v1601_v53   ;;  %v1596_v9 = vpack.c.bf16 %v1103_v5, %v1102_v42  ;;  %1847 = vpow2.f32 %v1458_v23  ;;  %v1108_v0 = vmul.f32 %v1826_v48, %v2093_v20 }
 0x126   : > { %v1830_v46 = vpop.eup %1829  ;;  %1624 = vst [vmem:[%s2137_s8 + $0x10] sm:$0xff] %v1556_v54   ;;  %1849 = vpow2.f32 %v1474_v6  ;;  %v1090_v58 = vmul.f32 %v1828_v27, %v2096_v21 }
 0x127   : > { %v1832_v43 = vpop.eup %1831  ;;  %1632 = vst [vmem:[%s2137_s8 + $0x50] sm:$0xff] %v1596_v9   ;;  %v1106_v14 = vmul.f32 %v1830_v46, %v2101_v28  ;;  %1851 = vrcp.f32 %v1000_v62 }
 0x128   : > { %v1834_v36 = vpop.eup %1833  ;;  %v1093_v55 = vmul.f32 %v1832_v43, %v2104_v29  ;;  %1853 = vrcp.f32 %v1016_v2 }
 0x129   : > { %v1836_v56 = vpop.eup %1835  ;;  %v1109_v57 = vmul.f32 %v1834_v36, %v2107_v33 }
 0x12a   : > { %v1838_v10 = vpop.eup %1837  ;;  %v1571_v59 = vpack.c.bf16 %v1093_v55, %v1092_v51  ;;  %v1091_v61 = vmul.f32 %v1836_v56, %v2112_v40 }
 0x12b   : > { %v1611_v45 = vpack.c.bf16 %v1109_v57, %v1108_v0  ;;  %v1107_v29 = vmul.f32 %v1838_v10, %v2124_v60  ;;  %v1840_v20 = vpop.eup %1839 }
 0x12c   : > { %1627 = vst [vmem:[%s2137_s8 + $0x28] sm:$0xff] %v1571_v59   ;;  %v1566_v3 = vpack.c.bf16 %v1091_v61, %v1090_v58  ;;  %v1842_v32 = vpop.eup %1841  ;;  %v998_v21 = vadd.f32 1.0, %v1840_v20 }
 0x12d   : > { %1635 = vst [vmem:[%s2137_s8 + $0x68] sm:$0xff] %v1611_v45   ;;  %v1606_v33 = vpack.c.bf16 %v1107_v29, %v1106_v14  ;;  %v1844_v1 = vpop.eup %1843  ;;  %v1014_v40 = vadd.f32 1.0, %v1842_v32 }
 0x12e   : > { %1626 = vst [vmem:[%s2137_s8 + $0x20] sm:$0xff] %v1566_v3   ;;  %v1846_v8 = vpop.eup %1845  ;;  %1855 = vrcp.f32 %v998_v21  ;;  %v1001_v28 = vadd.f32 1.0, %v1844_v1 }
 0x12f   : > { %1634 = vst [vmem:[%s2137_s8 + $0x60] sm:$0xff] %v1606_v33   ;;  %v1848_v7 = vpop.eup %1847  ;;  %1857 = vrcp.f32 %v1014_v40  ;;  %v1017_v60 = vadd.f32 1.0, %v1846_v8 }
 0x130   : > { %v1850_v12 = vpop.eup %1849  ;;  %1859 = vrcp.f32 %v1001_v28  ;;  %v999_v37 = vadd.f32 1.0, %v1848_v7 }
 0x131   : > { %1861 = vrcp.f32 %v1017_v60  ;;  %v1015_v13 = vadd.f32 1.0, %v1850_v12  ;;  %v1852_v16 = vpop.eup %1851 }
 0x132   : > { %1863 = vrcp.f32 %v999_v37  ;;  %v1854_v18 = vpop.eup %1853  ;;  %v1096_v25 = vmul.f32 %v1852_v16, %v2129_v63 }
 0x133   : > { %1865 = vrcp.f32 %v1015_v13  ;;  %v1112_v34 = vmul.f32 %v1854_v18, %v2141_v44 }
 0x138   : > { %v1856_v19 = vpop.eup %1855 }
 0x139   : > { %v1858_v26 = vpop.eup %1857  ;;  %v1094_v41 = vmul.f32 %v1856_v19, %v2172_v4 }
 0x13a   : > { %v1860_v38 = vpop.eup %1859  ;;  %v1110_v24 = vmul.f32 %v1858_v26, %v2177_v11 }
 0x13b   : > { %v1862_v22 = vpop.eup %1861  ;;  %v1097_v52 = vmul.f32 %v1860_v38, %v2182_v15 }
 0x13c   : > { %v1864_v31 = vpop.eup %1863  ;;  %v1113_v35 = vmul.f32 %v1862_v22, %v2185_v17 }
 0x13d   : > { %v1866_v39 = vpop.eup %1865  ;;  %v1581_v42 = vpack.c.bf16 %v1097_v52, %v1096_v25  ;;  %v1095_v47 = vmul.f32 %v1864_v31, %v2189_v49 }
 0x13e   : > { %v1621_v50 = vpack.c.bf16 %v1113_v35, %v1112_v34  ;;  %v1111_v63 = vmul.f32 %v1866_v39, %v2193_v30 }
 0x13f   : > { %1629 = vst [vmem:[%s2137_s8 + $0x38] sm:$0xff] %v1581_v42   ;;  %v1576_v53 = vpack.c.bf16 %v1095_v47, %v1094_v41 }
 0x140   : > { %1637 = vst [vmem:[%s2137_s8 + $0x78] sm:$0xff] %v1621_v50   ;;  %v1616_v15 = vpack.c.bf16 %v1111_v63, %v1110_v24 }
 0x141   : > { %1628 = vst [vmem:[%s2137_s8 + $0x30] sm:$0xff] %v1576_v53  }
 0x142   : > { %1636 = vst [vmem:[%s2137_s8 + $0x70] sm:$0xff] %v1616_v15  }
 0x143 PF: > { %s14_s17 = sadd.s32 1, %s1889_s17   ;;  %s2249_s15 = smov %s1885_s16 }
 0x144   : > { %p11_p5 = scmp.ge.s32.totalorder %s14_s17, 4   ;;  %s2250_s16 = smov %s2252_s18 }
 0x146   :  { %13 = sbr.rel (!%p11_p5) target bundleno = 2 (0x2), region = 83 }

// kernel: cnn_efficientnet_forward.13
= control target key start
LH: loop header
LB: loop body
LE: loop exit
PB: predicated region body
PF: predicated region fallthrough
CT: control target
= control target key end

     0   :  { %s1231_s18 = smov 0   ;;  %s1601_s0 = inlined_call_operand.vmem [shape: bf16[2,256,128], index: 0, kind: input, shape index: {}]   ;;  %s1602_s1 = inlined_call_operand.vmem [shape: f32[128,128], index: 1, kind: input, shape index: {}]   ;;  %s1603_s2 = inlined_call_operand.vmem [shape: f32[1,128], index: 2, kind: input, shape index: {}]   ;;  %s1604_s3 = inlined_call_operand.vmem [shape: f32[128,128], index: 3, kind: input, shape index: {}]   ;;  %s1605_s4 = inlined_call_operand.vmem [shape: f32[1,128], index: 4, kind: input, shape index: {}]   ;;  %s1606_s5 = inlined_call_operand.vmem [shape: bf16[2,256,128], index: 5, kind: output, shape index: {}]  }
   0x1 LB: > { %s766_s19 = sadd.s32 4294967295, %s1196_s18   ;;  %p770_p0 = scmp.ge.s32.totalorder %s1196_s18, 1  ;;  %s1196_s18 = sphi %s1231_s18, %s15_s18  }
   0x2   : > { %p187_p1 = scmp.lt.s32.totalorder %s1196_s18, 3 }
   0x4   : > { %p188_p2 = pnand %p770_p0, %p187_p1 }
   0x5   : > { %v328_v0 = vld [vmem:[%s1602_s1] sm:$0xff] (!%p188_p2)  ;;  %v329_v1 = vld [vmem:[%s1602_s1 + $0x8] sm:$0xff] (!%p188_p2)  ;;  %v330_v2 = vld [vmem:[%s1602_s1 + $0x10] sm:$0xff] (!%p188_p2)  ;;  %v1198_v3 = vmov (!%p188_p2), 0.0|0.0   ;;  %vm1199_vm0 = vmmov (!%p188_p2), 0   ;;  %v1200_v6 = vmov (!%p188_p2), 0.0  }
   0x6   : > { %191 = sbr.rel (%p188_p2) target bundleno = 597 (0x255), region = 40  ;;  %1123 = vmatprep.subr.bf16.mxu0 (!%p188_p2), %v1198_v3  ;;  %v1124_v4 = vpack.c.bf16 (!%p188_p2), %v329_v1, %v328_v0  ;;  %v331_v5 = vld [vmem:[%s1602_s1 + $0x18] sm:$0xff] (!%p188_p2)  ;;  %1085 = vmatprep.mubr.msk.f32.mxu0 (!%p188_p2), %vm1199_vm0, %v1200_v6  ;;  %p215_p3 = scmp.lt.s32.totalorder (!%p188_p2), %s766_s19, 1  ;;  %v332_v8 = vld [vmem:[%s1602_s1 + $0x20] sm:$0xff] (!%p188_p2)  ;;  %v333_v9 = vld [vmem:[%s1602_s1 + $0x28] sm:$0xff] (!%p188_p2) }
   0x7   : > { %1147 = vmatprep.subr.bf16.mxu1 (!%p188_p2), %v1198_v3  ;;  %1120 = vmatprep.mubr.msk.f32.mxu1 (!%p188_p2), %vm1199_vm0, %v1200_v6  ;;  %v1127_v7 = vpack.c.bf16 (!%p188_p2), %v331_v5, %v330_v2  ;;  %v1130_v10 = vpack.c.bf16 (!%p188_p2), %v333_v9, %v332_v8  ;;  %v334_v11 = vld [vmem:[%s1602_s1 + $0x30] sm:$0xff] (!%p188_p2)  ;;  %v335_v12 = vld [vmem:[%s1602_s1 + $0x38] sm:$0xff] (!%p188_p2)  ;;  %v336_v16 = vld [vmem:[%s1602_s1 + $0x40] sm:$0xff] (!%p188_p2) }
   0x8   : > { %1125 = vmatpush3.bf16.msra.mxu0 (!%p188_p2), %v1124_v4  ;;  %v1133_v14 = vpack.c.bf16 (!%p188_p2), %v335_v12, %v334_v11  ;;  %v337_v17 = vld [vmem:[%s1602_s1 + $0x48] sm:$0xff] (!%p188_p2)  ;;  %v338_v23 = vld [vmem:[%s1602_s1 + $0x50] sm:$0xff] (!%p188_p2)  ;;  %v339_v24 = vld [vmem:[%s1602_s1 + $0x58] sm:$0xff] (!%p188_p2) }
   0x9   : > { %1126 = vmatprep.subr.bf16.mxu0 (!%p188_p2), %v1198_v3  ;;  %v1136_v21 = vpack.c.bf16 (!%p188_p2), %v337_v17, %v336_v16  ;;  %v1139_v29 = vpack.c.bf16 (!%p188_p2), %v339_v24, %v338_v23  ;;  %v340_v31 = vld [vmem:[%s1602_s1 + $0x60] sm:$0xff] (!%p188_p2)  ;;  %v341_v32 = vld [vmem:[%s1602_s1 + $0x68] sm:$0xff] (!%p188_p2)  ;;  %v342_v39 = vld [vmem:[%s1602_s1 + $0x70] sm:$0xff] (!%p188_p2) }
   0xa   : > { %v1142_v37 = vpack.c.bf16 (!%p188_p2), %v341_v32, %v340_v31  ;;  %v343_v40 = vld [vmem:[%s1602_s1 + $0x78] sm:$0xff] (!%p188_p2) }
   0xb   : > { %v1145_v45 = vpack.c.bf16 (!%p188_p2), %v343_v40, %v342_v39 }
   0xc   : > { %1128 = vmatpush3.bf16.msra.mxu0 (!%p188_p2), %v1127_v7 }
   0xd   : > { %s1608_s19 = smov (!%p215_p3, %s766_s19), 1  ;;  %1129 = vmatprep.subr.bf16.mxu0 %v1198_v3 }
   0xe   : > { %s811_s7 = sshll.u32 %s1608_s19, 7 }
   0xf   : > { %s1268_s10 = scalar_lea.vmem %s1601_s0, %s811_s7  ;;  %s1572_s27 = scalar_lea.vmem %s1606_s5, %s811_s7 }
  0x10   : > { %v1278_v13 = vld [vmem:[%s1268_s10] sm:$0xff]   ;;  %1131 = vmatpush3.bf16.msra.mxu0 %v1130_v10  ;;  %v1281_v15 = vld [vmem:[%s1268_s10 + $0x8] sm:$0xff]   ;;  %v1294_v22 = vld [vmem:[%s1268_s10 + $0x10] sm:$0xff]  }
  0x11   : > { %1132 = vmatprep.subr.bf16.mxu0 %v1198_v3  ;;  %v847_v18 = vunpack.c.l.bf16 %v1278_v13  ;;  %v848_v19 = vunpack.c.h.bf16 %v1278_v13  ;;  %v851_v20 = vunpack.c.l.bf16 %v1281_v15  ;;  %v852_v25 = vunpack.c.h.bf16 %v1281_v15  ;;  %v1312_v30 = vld [vmem:[%s1268_s10 + $0x18] sm:$0xff]   ;;  %v1328_v38 = vld [vmem:[%s1268_s10 + $0x20] sm:$0xff]   ;;  %v1344_v46 = vld [vmem:[%s1268_s10 + $0x28] sm:$0xff]  }
  0x12   : > { %v855_v27 = vunpack.c.l.bf16 %v1294_v22  ;;  %v856_v33 = vunpack.c.h.bf16 %v1294_v22  ;;  %v859_v35 = vunpack.c.l.bf16 %v1312_v30  ;;  %v860_v41 = vunpack.c.h.bf16 %v1312_v30  ;;  %v1354_v51 = vld [vmem:[%s1268_s10 + $0x30] sm:$0xff]   ;;  %v1363_v56 = vld [vmem:[%s1268_s10 + $0x38] sm:$0xff]   ;;  %v1372_v61 = vld [vmem:[%s1268_s10 + $0x40] sm:$0xff]  }
  0x13   : > { %v289_v26 = vadd.f32 %v848_v19, %v847_v18  ;;  %v863_v43 = vunpack.c.l.bf16 %v1328_v38  ;;  %v864_v47 = vunpack.c.h.bf16 %v1328_v38  ;;  %v867_v49 = vunpack.c.l.bf16 %v1344_v46  ;;  %v1381_v2 = vld [vmem:[%s1268_s10 + $0x48] sm:$0xff]   ;;  %v1390_v8 = vld [vmem:[%s1268_s10 + $0x50] sm:$0xff]   ;;  %v1408_v24 = vld [vmem:[%s1268_s10 + $0x60] sm:$0xff]  }
  0x14   : > { %1134 = vmatpush3.bf16.msra.mxu0 %v1133_v14  ;;  %v868_v52 = vunpack.c.h.bf16 %v1344_v46  ;;  %v871_v54 = vunpack.c.l.bf16 %v1354_v51  ;;  %v872_v57 = vunpack.c.h.bf16 %v1354_v51  ;;  %v875_v59 = vunpack.c.l.bf16 %v1363_v56  ;;  %v1399_v14 = vld [vmem:[%s1268_s10 + $0x58] sm:$0xff]   ;;  %v1417_v32 = vld [vmem:[%s1268_s10 + $0x68] sm:$0xff]   ;;  %v1426_v40 = vld [vmem:[%s1268_s10 + $0x70] sm:$0xff]  }
  0x15   : > { %1135 = vmatprep.subr.bf16.mxu0 %v1198_v3  ;;  %v290_v28 = vadd.f32 %v851_v20, %v289_v26  ;;  %v876_v62 = vunpack.c.h.bf16 %v1363_v56  ;;  %v879_v0 = vunpack.c.l.bf16 %v1372_v61  ;;  %v880_v4 = vunpack.c.h.bf16 %v1372_v61 }
  0x16   : > { %v883_v6 = vunpack.c.l.bf16 %v1381_v2  ;;  %v884_v9 = vunpack.c.h.bf16 %v1381_v2  ;;  %v887_v11 = vunpack.c.l.bf16 %v1390_v8  ;;  %v888_v16 = vunpack.c.h.bf16 %v1390_v8 }
  0x17   : > { %v291_v34 = vadd.f32 %v852_v25, %v290_v28  ;;  %v892_v26 = vunpack.c.h.bf16 %v1399_v14 }
  0x18   : > { %1137 = vmatpush3.bf16.msra.mxu0 %v1136_v21  ;;  %v891_v21 = vunpack.c.l.bf16 %v1399_v14 }
  0x19   : > { %1138 = vmatprep.subr.bf16.mxu0 %v1198_v3  ;;  %v292_v36 = vadd.f32 %v855_v27, %v291_v34  ;;  %v896_v34 = vunpack.c.h.bf16 %v1408_v24 }
  0x1b   : > { %v293_v42 = vadd.f32 %v856_v33, %v292_v36 }
  0x1c   : > { %1140 = vmatpush3.bf16.msra.mxu0 %v1139_v29  ;;  %v895_v29 = vunpack.c.l.bf16 %v1408_v24 }
  0x1d   : > { %1141 = vmatprep.subr.bf16.mxu0 %v1198_v3  ;;  %v294_v44 = vadd.f32 %v859_v35, %v293_v42  ;;  %v900_v42 = vunpack.c.h.bf16 %v1417_v32 }
  0x1f   : > { %v295_v48 = vadd.f32 %v860_v41, %v294_v44 }
  0x20   : > { %1143 = vmatpush3.bf16.msra.mxu0 %v1142_v37  ;;  %v899_v37 = vunpack.c.l.bf16 %v1417_v32 }
  0x21   : > { %1144 = vmatprep.subr.bf16.mxu0 %v1198_v3  ;;  %v296_v50 = vadd.f32 %v863_v43, %v295_v48 }
  0x23   : > { %v297_v53 = vadd.f32 %v864_v47, %v296_v50  ;;  %v1435_v50 = vld [vmem:[%s1268_s10 + $0x78] sm:$0xff]  }
  0x24   : > { %1146 = vmatpush3.bf16.msra.mxu0 %v1145_v45  ;;  %v903_v45 = vunpack.c.l.bf16 %v1426_v40 }
  0x25   : > { %v298_v55 = vadd.f32 %v867_v49, %v297_v53  ;;  %v904_v53 = vunpack.c.h.bf16 %v1426_v40 }
  0x27   : > { %v299_v58 = vadd.f32 %v868_v52, %v298_v55 }
  0x29   : > { %v300_v60 = vadd.f32 %v871_v54, %v299_v58  ;;  %v907_v58 = vunpack.c.l.bf16 %v1435_v50 }
  0x2b   : > { %v301_v63 = vadd.f32 %v872_v57, %v300_v60 }
  0x2d   : > { %v302_v1 = vadd.f32 %v875_v59, %v301_v63  ;;  %v908_v63 = vunpack.c.h.bf16 %v1435_v50 }
  0x2f   : > { %v303_v5 = vadd.f32 %v876_v62, %v302_v1 }
  0x31   : > { %v304_v7 = vadd.f32 %v879_v0, %v303_v5 }
  0x33   : > { %v305_v10 = vadd.f32 %v880_v4, %v304_v7 }
  0x35   : > { %v306_v12 = vadd.f32 %v883_v6, %v305_v10 }
  0x37   : > { %v307_v17 = vadd.f32 %v884_v9, %v306_v12 }
  0x39   : > { %v308_v23 = vadd.f32 %v887_v11, %v307_v17 }
  0x3b   : > { %v309_v28 = vadd.f32 %v888_v16, %v308_v23 }
  0x3d   : > { %v310_v31 = vadd.f32 %v891_v21, %v309_v28 }
  0x3f   : > { %v311_v36 = vadd.f32 %v892_v26, %v310_v31 }
  0x41   : > { %v312_v39 = vadd.f32 %v895_v29, %v311_v36 }
  0x43   : > { %v313_v44 = vadd.f32 %v896_v34, %v312_v39  ;;  %v422_v39 = vld [vmem:[%s1604_s3] sm:$0xff] }
  0x45   : > { %v314_v48 = vadd.f32 %v899_v37, %v313_v44  ;;  %v423_v44 = vld [vmem:[%s1604_s3 + $0x8] sm:$0xff] }
  0x47   : > { %v315_v55 = vadd.f32 %v900_v42, %v314_v48  ;;  %v1148_v48 = vpack.c.bf16 %v423_v44, %v422_v39  ;;  %v432_v39 = vld [vmem:[%s1604_s3 + $0x50] sm:$0xff]  ;;  %v433_v44 = vld [vmem:[%s1604_s3 + $0x58] sm:$0xff] }
  0x49   : > { %v316_v60 = vadd.f32 %v903_v45, %v315_v55  ;;  %1149 = vmatpush3.bf16.msra.mxu1 %v1148_v48  ;;  %v424_v55 = vld [vmem:[%s1604_s3 + $0x10] sm:$0xff]  ;;  %v1163_v48 = vpack.c.bf16 %v433_v44, %v432_v39 }
  0x4a   : > { %1150 = vmatprep.subr.bf16.mxu1 %v1198_v3 }
  0x4b   : > { %v317_v1 = vadd.f32 %v904_v53, %v316_v60  ;;  %v425_v60 = vld [vmem:[%s1604_s3 + $0x18] sm:$0xff] }
  0x4d   : > { %v318_v5 = vadd.f32 %v907_v58, %v317_v1  ;;  %v1151_v1 = vpack.c.bf16 %v425_v60, %v424_v55  ;;  %v434_v55 = vld [vmem:[%s1604_s3 + $0x60] sm:$0xff]  ;;  %v435_v60 = vld [vmem:[%s1604_s3 + $0x68] sm:$0xff] }
  0x4f   : > { %v319_v7 = vadd.f32 %v908_v63, %v318_v5  ;;  %1152 = vmatpush3.bf16.msra.mxu1 %v1151_v1  ;;  %v426_v5 = vld [vmem:[%s1604_s3 + $0x20] sm:$0xff]  ;;  %v1166_v1 = vpack.c.bf16 %v435_v60, %v434_v55 }
  0x50   : > { %1153 = vmatprep.subr.bf16.mxu1 %v1198_v3 }
  0x51   : > { %v320_v10 = vrot.slane %v319_v7, 4 }
  0x53   : > { %v321_v12 = vadd.f32 %v320_v10, %v319_v7  ;;  %v427_v7 = vld [vmem:[%s1604_s3 + $0x28] sm:$0xff] }
  0x54   : > { %v1154_v10 = vpack.c.bf16 %v427_v7, %v426_v5  ;;  %v436_v5 = vld [vmem:[%s1604_s3 + $0x70] sm:$0xff]  ;;  %v437_v7 = vld [vmem:[%s1604_s3 + $0x78] sm:$0xff] }
  0x55   : > { %v322_v17 = vrot.slane %v321_v12, 2 }
  0x56   : > { %1155 = vmatpush3.bf16.msra.mxu1 %v1154_v10  ;;  %v1169_v10 = vpack.c.bf16 %v437_v7, %v436_v5 }
  0x57   : > { %v323_v23 = vadd.f32 %v322_v17, %v321_v12  ;;  %1156 = vmatprep.subr.bf16.mxu1 %v1198_v3  ;;  %v428_v12 = vld [vmem:[%s1604_s3 + $0x30] sm:$0xff]  ;;  %v429_v17 = vld [vmem:[%s1604_s3 + $0x38] sm:$0xff] }
  0x59   : > { %v324_v28 = vrot.slane %v323_v23, 1 }
  0x5b   : > { %v325_v31 = vadd.f32 %v324_v28, %v323_v23  ;;  %v1157_v23 = vpack.c.bf16 %v429_v17, %v428_v12  ;;  %v430_v28 = vld [vmem:[%s1604_s3 + $0x40] sm:$0xff] }
  0x5c   : > { %v344_v12 = vld [vmem:[%s1603_s2] sm:$0x1] }
  0x5d   : > { %v327_v36 = vmul.f32 0.00390625, %v325_v31  ;;  %1158 = vmatpush3.bf16.msra.mxu1 %v1157_v23  ;;  %v431_v31 = vld [vmem:[%s1604_s3 + $0x48] sm:$0xff] }
  0x5e   : > { %1159 = vmatprep.subr.bf16.mxu1 %v1198_v3 }
  0x5f   : > { %1086 = vmatmul.mubr.f32.vlgmr.msra.gmra.mrb[0].mxu0 %v327_v36  ;;  %v1160_v36 = vpack.c.bf16 %v431_v31, %v430_v28 }
  0x61   : > { %1161 = vmatpush3.bf16.msra.mxu1 %v1160_v36 }
  0x62   : > { %1162 = vmatprep.subr.bf16.mxu1 %v1198_v3 }
  0x65   : > { %1164 = vmatpush3.bf16.msra.mxu1 %v1163_v48  ;;  %v438_v48 = vld [vmem:[%s1605_s4] sm:$0x1] }
  0x66   : > { %1165 = vmatprep.subr.bf16.mxu1 %v1198_v3 }
  0x69   : > { %1167 = vmatpush3.bf16.msra.mxu1 %v1166_v1 }
  0x6a   : > { %1168 = vmatprep.subr.bf16.mxu1 %v1198_v3 }
  0x6d   : > { %1170 = vmatpush3.bf16.msra.mxu1 %v1169_v10 }
 0x132   : > { %v411_v17 = vpop.f32.mrb[0].mxu0 }
 0x133   : > { %v412_v23 = vadd.f32 %v411_v17, %v344_v12  ;;  %v1087_v28 = vpop.f32.mrb[1].mxu0  ;;  %v515_v12 = vlaneseq }
 0x135   : > { %v775_v31 = vmul.f32 -1.442695, %v412_v23  ;;  %v516_v17 = vshrl.u32 %v515_v12, 7 }
 0x137   : > { %1182 = vpow2.f32 %v775_v31  ;;  %v517_v28 = vsub.s32 0, %v516_v17 }
 0x141   : > { %v1183_v3 = vpop.eup %1182 }
 0x142   : > { %v418_v36 = vadd.f32 1.0, %v1183_v3 }
 0x144   : > { %1184 = vrcp.f32 %v418_v36 }
 0x14e   : > { %v1185_v39 = vpop.eup %1184 }
 0x14f   : > { %v421_v44 = vmul.f32 %v1185_v39, %v412_v23 }
 0x151   : > { %1121 = vmatmul.mubr.f32.vlgmr.msra.gmra.mrb[0].mxu1 %v421_v44 }
 0x224   : > { %v505_v55 = vpop.f32.mrb[0].mxu1 }
 0x225   : > { %v506_v60 = vadd.f32 %v505_v55, %v438_v48  ;;  %v1122_v1 = vpop.f32.mrb[1].mxu1 }
 0x227   : > { %v776_v5 = vmul.f32 -1.442695, %v506_v60 }
 0x229   : > { %1186 = vpow2.f32 %v776_v5 }
 0x233   : > { %v1187_v7 = vpop.eup %1186 }
 0x234   : > { %v512_v10 = vadd.f32 1.0, %v1187_v7 }
 0x236   : > { %1188 = vrcp.f32 %v512_v10 }
 0x240   : > { %v1189_v31 = vpop.eup %1188 }
 0x241   : > { %v518_v3 = vrot.slane %v1189_v31, %v517_v28 }
 0x243   : > { %v519_v23 = vmul.f32 %v847_v18, %v518_v3  ;;  %v520_v36 = vmul.f32 %v848_v19, %v518_v3  ;;  %v521_v39 = vmul.f32 %v851_v20, %v518_v3  ;;  %v522_v44 = vmul.f32 %v852_v25, %v518_v3 }
 0x244   : > { %v523_v48 = vmul.f32 %v855_v27, %v518_v3  ;;  %v524_v55 = vmul.f32 %v856_v33, %v518_v3  ;;  %v525_v60 = vmul.f32 %v859_v35, %v518_v3  ;;  %v526_v18 = vmul.f32 %v860_v41, %v518_v3 }
 0x245   : > { %v527_v13 = vmul.f32 %v863_v43, %v518_v3  ;;  %v528_v19 = vmul.f32 %v864_v47, %v518_v3  ;;  %v529_v15 = vmul.f32 %v867_v49, %v518_v3  ;;  %v530_v20 = vmul.f32 %v868_v52, %v518_v3 }
 0x246   : > { %v531_v22 = vmul.f32 %v871_v54, %v518_v3  ;;  %v532_v25 = vmul.f32 %v872_v57, %v518_v3  ;;  %v533_v27 = vmul.f32 %v875_v59, %v518_v3  ;;  %v534_v30 = vmul.f32 %v876_v62, %v518_v3 }
 0x247   : > { %v535_v33 = vmul.f32 %v879_v0, %v518_v3  ;;  %v536_v35 = vmul.f32 %v880_v4, %v518_v3  ;;  %v537_v38 = vmul.f32 %v883_v6, %v518_v3  ;;  %v538_v41 = vmul.f32 %v884_v9, %v518_v3 }
 0x248   : > { %v539_v43 = vmul.f32 %v887_v11, %v518_v3  ;;  %v540_v46 = vmul.f32 %v888_v16, %v518_v3  ;;  %v541_v47 = vmul.f32 %v891_v21, %v518_v3  ;;  %v542_v49 = vmul.f32 %v892_v26, %v518_v3 }
 0x249   : > { %v543_v51 = vmul.f32 %v895_v29, %v518_v3  ;;  %v544_v52 = vmul.f32 %v896_v34, %v518_v3  ;;  %v545_v54 = vmul.f32 %v899_v37, %v518_v3  ;;  %v546_v56 = vmul.f32 %v900_v42, %v518_v3 }
 0x24a   : > { %v547_v57 = vmul.f32 %v903_v45, %v518_v3  ;;  %v548_v59 = vmul.f32 %v904_v53, %v518_v3  ;;  %v549_v61 = vmul.f32 %v907_v58, %v518_v3  ;;  %v550_v62 = vmul.f32 %v908_v63, %v518_v3 }
 0x24b   : > { %v912_v0 = vpack.c.bf16 %v520_v36, %v519_v23  ;;  %v917_v2 = vpack.c.bf16 %v522_v44, %v521_v39  ;;  %v922_v4 = vpack.c.bf16 %v524_v55, %v523_v48  ;;  %v927_v6 = vpack.c.bf16 %v526_v18, %v525_v60 }
 0x24c   : > { %v932_v8 = vpack.c.bf16 %v528_v19, %v527_v13  ;;  %v937_v9 = vpack.c.bf16 %v530_v20, %v529_v15  ;;  %v942_v11 = vpack.c.bf16 %v532_v25, %v531_v22  ;;  %v947_v14 = vpack.c.bf16 %v534_v30, %v533_v27 }
 0x24d   : > { %913 = vst [vmem:[%s1572_s27] sm:$0xff] %v912_v0   ;;  %1004 = vst [vmem:[%s1572_s27 + $0x8] sm:$0xff] %v917_v2   ;;  %v952_v16 = vpack.c.bf16 %v536_v35, %v535_v33  ;;  %v957_v21 = vpack.c.bf16 %v538_v41, %v537_v38  ;;  %v962_v24 = vpack.c.bf16 %v540_v46, %v539_v43 }
 0x24e   : > { %1005 = vst [vmem:[%s1572_s27 + $0x10] sm:$0xff] %v922_v4   ;;  %1006 = vst [vmem:[%s1572_s27 + $0x18] sm:$0xff] %v927_v6   ;;  %v967_v26 = vpack.c.bf16 %v542_v49, %v541_v47  ;;  %v972_v29 = vpack.c.bf16 %v544_v52, %v543_v51  ;;  %v977_v32 = vpack.c.bf16 %v546_v56, %v545_v54 }
 0x24f   : > { %1007 = vst [vmem:[%s1572_s27 + $0x20] sm:$0xff] %v932_v8   ;;  %1008 = vst [vmem:[%s1572_s27 + $0x28] sm:$0xff] %v937_v9   ;;  %v982_v34 = vpack.c.bf16 %v548_v59, %v547_v57  ;;  %v987_v37 = vpack.c.bf16 %v550_v62, %v549_v61 }
 0x250   : > { %1009 = vst [vmem:[%s1572_s27 + $0x30] sm:$0xff] %v942_v11   ;;  %1010 = vst [vmem:[%s1572_s27 + $0x38] sm:$0xff] %v947_v14  }
 0x251   : > { %1011 = vst [vmem:[%s1572_s27 + $0x40] sm:$0xff] %v952_v16   ;;  %1012 = vst [vmem:[%s1572_s27 + $0x48] sm:$0xff] %v957_v21  }
 0x252   : > { %1013 = vst [vmem:[%s1572_s27 + $0x50] sm:$0xff] %v962_v24   ;;  %1014 = vst [vmem:[%s1572_s27 + $0x58] sm:$0xff] %v967_v26  }
 0x253   : > { %1015 = vst [vmem:[%s1572_s27 + $0x60] sm:$0xff] %v972_v29   ;;  %1016 = vst [vmem:[%s1572_s27 + $0x68] sm:$0xff] %v977_v32  }
 0x254   : > { %1017 = vst [vmem:[%s1572_s27 + $0x70] sm:$0xff] %v982_v34   ;;  %1018 = vst [vmem:[%s1572_s27 + $0x78] sm:$0xff] %v987_v37  }
 0x255 PF: > { %s15_s18 = sadd.s32 1, %s1196_s18  }
 0x256   : > { %p12_p4 = scmp.ge.s32.totalorder %s15_s18, 4  }
 0x258   :  { %14 = sbr.rel (!%p12_p4) target bundleno = 1 (0x1), region = 70 }

// kernel: cnn_efficientnet_forward.12
= control target key start
LH: loop header
LB: loop body
LE: loop exit
PB: predicated region body
PF: predicated region fallthrough
CT: control target
= control target key end

     0   :  { %s2929_s15 = smov 0   ;;  %s5717_s0 = inlined_call_operand.vmem [shape: bf16[2,18,18,128], index: 0, kind: input, shape index: {}]   ;;  %s5718_s1 = inlined_call_operand.vmem [shape: f32[9,128], index: 1, kind: input, shape index: {}]   ;;  %s5719_s2 = inlined_call_operand.vmem [shape: f32[1,128], index: 2, kind: input, shape index: {}]   ;;  %s5720_s3 = inlined_call_operand.vmem [shape: f32[1,128], index: 3, kind: input, shape index: {}]   ;;  %s5721_s4 = inlined_call_operand.vmem [shape: bf16[2,16,16,128], index: 4, kind: output, shape index: {}]  }
   0x1 LB: > { %s2502_s16 = sadd.s32 4294967295, %s2902_s15   ;;  %p2506_p0 = scmp.ge.s32.totalorder %s2902_s15, 1  ;;  %s2902_s15 = sphi %s2929_s15, %s14_s15  }
   0x2   : > { %p162_p1 = scmp.lt.s32.totalorder %s2902_s15, 3 }
   0x4   : > { %p163_p2 = pnand %p2506_p0, %p162_p1 }
   0x6   : > { %166 = sbr.rel (%p163_p2) target bundleno = 447 (0x1bf), region = 36 }
   0xd   : > { %p188_p3 = scmp.lt.s32.totalorder %s2502_s16, 1  ;;  %vm476_vm0 = vcmask 1046528   ;;  %vm722_vm1 = vcmask 1045504  }
   0xf   : > { %s6539_s16 = smov (!%p188_p3, %s2502_s16), 1 }
  0x10   : > { %s2759_s17 = smul.u32 216, %s6539_s16  ;;  %s2587_s19 = sshll.u32 %s6539_s16, 7 }
  0x11   : > { %s5655_s22 = scalar_lea.vmem %s5721_s4, %s2587_s19 }
  0x12   : > { %s2943_s20 = scalar_lea.vmem %s5717_s0, %s2759_s17 }
  0x13   : > { %v2621_v0 = vld [vmem:[%s2943_s20] sm:$0xff]   ;;  %v2947_v1 = vld [vmem:[%s2943_s20 + $0x8] sm:$0x1]  ;;  %v201_v2 = vld [vmem:[%s2943_s20 + $0xc] sm:$0xff]  }
  0x14   : > { %5832 = vst [vmem:[#allocation2_spill] sm:$0xff] %v2947_v1  ;;  %v2736_v3 = vld [vmem:[%s2943_s20 + $0x18] sm:$0xff]   ;;  %v203_v4 = vld [vmem:[%s2943_s20 + $0x14] sm:$0x1]  ;;  %v2953_v6 = vunpack.c.l.bf16 %v2621_v0  ;;  %v2955_v7 = vunpack.c.h.bf16 %v2621_v0  ;;  %v206_v8 = vld [vmem:[%s2943_s20 + $0x20] sm:$0x1]  ;;  %v2968_v17 = vunpack.c.l.bf16 %v201_v2  ;;  %v2976_v22 = vunpack.c.h.bf16 %v201_v2 }
  0x15   : > { %v2737_v5 = vld [vmem:[%s2943_s20 + $0x30] sm:$0xff]   ;;  %v207_v9 = vld [vmem:[%s2943_s20 + $0x24] sm:$0xff]   ;;  %v209_v10 = vld [vmem:[%s2943_s20 + $0x2c] sm:$0x1]  ;;  %v2960_v11 = vunpack.c.l.bf16 %v2736_v3  ;;  %v2962_v12 = vunpack.c.h.bf16 %v2736_v3  ;;  %v2978_v23 = vunpack.c.l.bf16 %v203_v4  ;;  %v2983_v27 = vunpack.c.l.bf16 %v206_v8 }
  0x16   : > { %5833 = vst [vmem:[#allocation3_spill] sm:$0xff] %v2953_v6  ;;  %5834 = vst [vmem:[#allocation4_spill] sm:$0xff] %v2955_v7  ;;  %v212_v13 = vld [vmem:[%s2943_s20 + $0x38] sm:$0x1]  ;;  %v213_v14 = vld [vmem:[%s2943_s20 + $0x3c] sm:$0xff]   ;;  %v2970_v18 = vunpack.c.l.bf16 %v2737_v5  ;;  %v2972_v19 = vunpack.c.h.bf16 %v2737_v5  ;;  %v2985_v28 = vunpack.c.l.bf16 %v207_v9  ;;  %v2987_v29 = vunpack.c.h.bf16 %v207_v9 }
  0x17   : > { %5835 = vst [vmem:[#allocation5_spill] sm:$0xff] %v2960_v11  ;;  %5836 = vst [vmem:[#allocation6_spill] sm:$0xff] %v2962_v12  ;;  %v2738_v15 = vld [vmem:[%s2943_s20 + $0x48] sm:$0xff]   ;;  %v215_v20 = vld [vmem:[%s2943_s20 + $0x44] sm:$0x1]  ;;  %v2989_v30 = vunpack.c.l.bf16 %v209_v10  ;;  %v2998_v36 = vunpack.c.l.bf16 %v212_v13  ;;  %v3000_v37 = vunpack.c.l.bf16 %v213_v14  ;;  %v3008_v42 = vunpack.c.h.bf16 %v213_v14 }
  0x18   : > { %5837 = vst [vmem:[#allocation7_spill] sm:$0xff] %v2968_v17  ;;  %5838 = vst [vmem:[#allocation8_spill] sm:$0xff] %v2970_v18  ;;  %v2739_v21 = vld [vmem:[%s2943_s20 + $0x60] sm:$0xff]   ;;  %v218_v24 = vld [vmem:[%s2943_s20 + $0x50] sm:$0x1]  ;;  %v2991_v31 = vunpack.c.l.bf16 %v2738_v15  ;;  %v2993_v32 = vunpack.c.h.bf16 %v2738_v15  ;;  %v3010_v43 = vunpack.c.l.bf16 %v215_v20 }
  0x19   : > { %5839 = vst [vmem:[#allocation9_spill] sm:$0xff] %v2972_v19  ;;  %5840 = vst [vmem:[#allocation10_spill] sm:$0xff] %v2976_v22  ;;  %v219_v25 = vld [vmem:[%s2943_s20 + $0x54] sm:$0xff]   ;;  %v221_v33 = vld [vmem:[%s2943_s20 + $0x5c] sm:$0x1]  ;;  %v3002_v38 = vunpack.c.l.bf16 %v2739_v21  ;;  %v3004_v39 = vunpack.c.h.bf16 %v2739_v21  ;;  %v3019_v49 = vunpack.c.l.bf16 %v218_v24 }
  0x1a   : > { %5841 = vst [vmem:[#allocation11_spill] sm:$0xff] %v2978_v23  ;;  %v2740_v26 = vld [vmem:[%s2943_s20 + $0x78] sm:$0xff]   ;;  %5842 = vst [vmem:[#allocation12_spill] sm:$0xff] %v2983_v27  ;;  %v224_v34 = vld [vmem:[%s2943_s20 + $0x68] sm:$0x1]  ;;  %v3021_v50 = vunpack.c.l.bf16 %v219_v25  ;;  %v3025_v53 = vunpack.c.h.bf16 %v219_v25  ;;  %v3027_v54 = vunpack.c.l.bf16 %v221_v33 }
  0x1b   : > { %5843 = vst [vmem:[#allocation13_spill] sm:$0xff] %v2985_v28  ;;  %5844 = vst [vmem:[#allocation14_spill] sm:$0xff] %v2987_v29  ;;  %v225_v35 = vld [vmem:[%s2943_s20 + $0x6c] sm:$0xff]   ;;  %v227_v40 = vld [vmem:[%s2943_s20 + $0x74] sm:$0x1]  ;;  %v3012_v44 = vunpack.c.l.bf16 %v2740_v26  ;;  %v3014_v45 = vunpack.c.h.bf16 %v2740_v26  ;;  %v3029_v55 = vunpack.c.l.bf16 %v224_v34 }
  0x1c   : > { %5845 = vst [vmem:[#allocation15_spill] sm:$0xff] %v2989_v30  ;;  %5846 = vst [vmem:[#allocation16_spill] sm:$0xff] %v2991_v31  ;;  %v2741_v41 = vld [vmem:[%s2943_s20 + $0x90] sm:$0xff]   ;;  %v230_v46 = vld [vmem:[%s2943_s20 + $0x80] sm:$0x1]  ;;  %v3031_v56 = vunpack.c.l.bf16 %v225_v35  ;;  %v3040_v62 = vunpack.c.h.bf16 %v225_v35  ;;  %v3042_v63 = vunpack.c.l.bf16 %v227_v40 }
  0x1d   : > { %5847 = vst [vmem:[#allocation17_spill] sm:$0xff] %v2993_v32  ;;  %5848 = vst [vmem:[#allocation18_spill] sm:$0xff] %v2998_v36  ;;  %v231_v47 = vld [vmem:[%s2943_s20 + $0x84] sm:$0xff]   ;;  %v233_v51 = vld [vmem:[%s2943_s20 + $0x8c] sm:$0x1]  ;;  %v3033_v57 = vunpack.c.l.bf16 %v2741_v41  ;;  %v3035_v58 = vunpack.c.h.bf16 %v2741_v41  ;;  %v3051_v8 = vunpack.c.l.bf16 %v230_v46 }
  0x1e   : > { %5849 = vst [vmem:[#allocation19_spill] sm:$0xff] %v3000_v37  ;;  %5850 = vst [vmem:[#allocation20_spill] sm:$0xff] %v3002_v38  ;;  %v2742_v48 = vld [vmem:[%s2943_s20 + $0xa8] sm:$0xff]   ;;  %v2743_v52 = vld [vmem:[%s2943_s20 + $0xc0] sm:$0xff]   ;;  %v3053_v9 = vunpack.c.l.bf16 %v231_v47  ;;  %v3064_v21 = vunpack.c.h.bf16 %v231_v47  ;;  %v3066_v24 = vunpack.c.l.bf16 %v233_v51 }
  0x1f   : > { %5851 = vst [vmem:[#allocation21_spill] sm:$0xff] %v3004_v39  ;;  %5852 = vst [vmem:[#allocation22_spill] sm:$0xff] %v3008_v42  ;;  %v236_v59 = vld [vmem:[%s2943_s20 + $0x98] sm:$0x1]  ;;  %v237_v60 = vld [vmem:[%s2943_s20 + $0x9c] sm:$0xff]   ;;  %v3044_v0 = vunpack.c.l.bf16 %v2742_v48  ;;  %v3046_v2 = vunpack.c.h.bf16 %v2742_v48  ;;  %v3055_v10 = vunpack.c.l.bf16 %v2743_v52  ;;  %v3057_v13 = vunpack.c.h.bf16 %v2743_v52 }
  0x20   : > { %5853 = vst [vmem:[#allocation23_spill] sm:$0xff] %v3010_v43  ;;  %5854 = vst [vmem:[#allocation24_spill] sm:$0xff] %v3012_v44  ;;  %v239_v61 = vld [vmem:[%s2943_s20 + $0xa4] sm:$0x1]  ;;  %v242_v3 = vld [vmem:[%s2943_s20 + $0xb0] sm:$0x1]  ;;  %v3068_v25 = vunpack.c.l.bf16 %v236_v59  ;;  %v3070_v26 = vunpack.c.l.bf16 %v237_v60  ;;  %v3072_v33 = vunpack.c.h.bf16 %v237_v60 }
  0x21   : > { %5855 = vst [vmem:[#allocation25_spill] sm:$0xff] %v3014_v45  ;;  %5856 = vst [vmem:[#allocation26_spill] sm:$0xff] %v3019_v49  ;;  %v243_v4 = vld [vmem:[%s2943_s20 + $0xb4] sm:$0xff]   ;;  %v245_v5 = vld [vmem:[%s2943_s20 + $0xbc] sm:$0x1]  ;;  %v3074_v34 = vunpack.c.l.bf16 %v239_v61  ;;  %v3079_v40 = vunpack.c.l.bf16 %v242_v3 }
  0x22   : > { %5857 = vst [vmem:[#allocation27_spill] sm:$0xff] %v3021_v50  ;;  %5858 = vst [vmem:[#allocation28_spill] sm:$0xff] %v3025_v53  ;;  %v248_v14 = vld [vmem:[%s2943_s20 + $0xc8] sm:$0x1]  ;;  %v249_v15 = vld [vmem:[%s2943_s20 + $0xcc] sm:$0xff]   ;;  %v3081_v41 = vunpack.c.l.bf16 %v243_v4  ;;  %v3083_v46 = vunpack.c.h.bf16 %v243_v4  ;;  %v3085_v47 = vunpack.c.l.bf16 %v245_v5 }
  0x23   : > { %5859 = vst [vmem:[#allocation29_spill] sm:$0xff] %v3027_v54  ;;  %5860 = vst [vmem:[#allocation30_spill] sm:$0xff] %v3029_v55  ;;  %v3062_v20 = vld [vmem:[%s2943_s20 + $0xd4] sm:$0x1]  ;;  %v2510_v35 = vld [vmem:[%s5718_s1] ss:$0 sm:$0xff]  ;;  %v3087_v48 = vunpack.c.l.bf16 %v248_v14  ;;  %v3089_v51 = vunpack.c.l.bf16 %v249_v15  ;;  %v3091_v52 = vunpack.c.h.bf16 %v249_v15 }
  0x24   : > { %5861 = vst [vmem:[#allocation31_spill] sm:$0xff] %v3031_v56  ;;  %5862 = vst [vmem:[#allocation32_spill] sm:$0xff] %v3033_v57  ;;  %v3095_v60 = vmul.f32 %v2953_v6, %v2510_v35  ;;  %v3098_v61 = vmul.f32 %v2955_v7, %v2510_v35  ;;  %v3101_v3 = vmul.f32 %v2510_v35, %v2968_v17 }
  0x25   : > { %5863 = vst [vmem:[#allocation33_spill] sm:$0xff] %v3035_v58  ;;  %5864 = vst [vmem:[#allocation34_spill] sm:$0xff] %v3040_v62  ;;  %v3104_v4 = vmul.f32 %v2510_v35, %v2976_v22  ;;  %v3107_v5 = vmul.f32 %v2960_v11, %v2510_v35  ;;  %v3110_v14 = vmul.f32 %v2962_v12, %v2510_v35 }
  0x26   : > { %5865 = vst [vmem:[#allocation35_spill] sm:$0xff] %v3042_v63  ;;  %5866 = vst [vmem:[#allocation36_spill] sm:$0xff] %v3044_v0  ;;  %v3113_v15 = vmul.f32 %v2510_v35, %v2985_v28  ;;  %v3116_v59 = vmul.f32 %v2510_v35, %v2987_v29  ;;  %v3119_v16 = vmul.f32 %v2970_v18, %v2510_v35 }
  0x27   : > { %5867 = vst [vmem:[#allocation37_spill] sm:$0xff] %v3046_v2  ;;  %5868 = vst [vmem:[#allocation38_spill] sm:$0xff] %v3051_v8 }
  0x28   : > { %5869 = vst [vmem:[#allocation39_spill] sm:$0xff] %v3053_v9  ;;  %5870 = vst [vmem:[#allocation40_spill] sm:$0xff] %v3055_v10  ;;  %v3137_v10 = vmul.f32 %v2510_v35, %v3021_v50 }
  0x29   : > { %5871 = vst [vmem:[#allocation41_spill] sm:$0xff] %v3057_v13  ;;  %5872 = vst [vmem:[#allocation42_spill] sm:$0xff] %v3062_v20  ;;  %v3122_v20 = vmul.f32 %v2972_v19, %v2510_v35  ;;  %v3134_v13 = vmul.f32 %v2993_v32, %v2510_v35 }
  0x2a   : > { %5873 = vst [vmem:[#allocation43_spill] sm:$0xff] %v3064_v21  ;;  %5874 = vst [vmem:[#allocation44_spill] sm:$0xff] %v3066_v24 }
  0x2b   : > { %5875 = vst [vmem:[#allocation45_spill] sm:$0xff] %v3068_v25  ;;  %5876 = vst [vmem:[#allocation46_spill] sm:$0xff] %v3070_v26 }
  0x2c   : > { %5877 = vst [vmem:[#allocation47_spill] sm:$0xff] %v3072_v33  ;;  %5878 = vst [vmem:[#allocation48_spill] sm:$0xff] %v3074_v34 }
  0x2d   : > { %5879 = vst [vmem:[#allocation49_spill] sm:$0xff] %v3079_v40  ;;  %5880 = vst [vmem:[#allocation50_spill] sm:$0xff] %v3081_v41 }
  0x2e   : > { %5881 = vst [vmem:[#allocation51_spill] sm:$0xff] %v3083_v46  ;;  %5882 = vst [vmem:[#allocation52_spill] sm:$0xff] %v3085_v47 }
  0x2f   : > { %5883 = vst [vmem:[#allocation53_spill] sm:$0xff] %v3087_v48  ;;  %5884 = vst [vmem:[#allocation54_spill] sm:$0xff] %v3089_v51  ;;  %v3128_v51 = vmul.f32 %v2510_v35, %v3008_v42  ;;  %v3131_v48 = vmul.f32 %v2991_v31, %v2510_v35 }
  0x30   : > { %5885 = vst [vmem:[#allocation55_spill] sm:$0xff] %v3091_v52  ;;  %5886 = vst [vmem:[#allocation56_spill] sm:$0xff] %v3113_v15  ;;  %v3125_v52 = vmul.f32 %v2510_v35, %v3000_v37 }
  0x31   : > { %5887 = vst [vmem:[#allocation57_spill] sm:$0xff] %v3116_v59  ;;  %5888 = vst [vmem:[#allocation58_spill] sm:$0xff] %v3119_v16  ;;  %v3140_v16 = vmul.f32 %v2510_v35, %v3025_v53  ;;  %v3190_v59 = vmul.f32 %v2510_v35, %v3081_v41 }
  0x32   : > { %5889 = vst [vmem:[#allocation59_spill] sm:$0xff] %v3122_v20  ;;  %5890 = vst [vmem:[#allocation60_spill] sm:$0xff] %v3125_v52  ;;  %v3143_v20 = vmul.f32 %v3002_v38, %v2510_v35  ;;  %v3146_v52 = vmul.f32 %v3004_v39, %v2510_v35 }
  0x33   : > { %5891 = vst [vmem:[#allocation61_spill] sm:$0xff] %v3128_v51  ;;  %5892 = vst [vmem:[#allocation62_spill] sm:$0xff] %v3131_v48  ;;  %v3149_v51 = vmul.f32 %v2510_v35, %v3031_v56  ;;  %v3152_v48 = vmul.f32 %v2510_v35, %v3040_v62 }
  0x34   : > { %5893 = vst [vmem:[#allocation63_spill] sm:$0xff] %v3134_v13  ;;  %5894 = vst [vmem:[#allocation64_spill] sm:$0xff] %v3137_v10  ;;  %v3155_v13 = vmul.f32 %v3012_v44, %v2510_v35  ;;  %v3158_v10 = vmul.f32 %v3014_v45, %v2510_v35 }
  0x35   : > { %5895 = vst [vmem:[#allocation65_spill] sm:$0xff] %v3140_v16  ;;  %5896 = vst [vmem:[#allocation66_spill] sm:$0xff] %v3143_v20  ;;  %v3161_v16 = vmul.f32 %v2510_v35, %v3053_v9  ;;  %v3164_v20 = vmul.f32 %v2510_v35, %v3064_v21 }
  0x36   : > { %5897 = vst [vmem:[#allocation67_spill] sm:$0xff] %v3146_v52  ;;  %5898 = vst [vmem:[#allocation68_spill] sm:$0xff] %v3149_v51  ;;  %v3169_v52 = vld [vmem:[%s5718_s1 + $0x1] ss:$0 sm:$0xff]  ;;  %v3172_v51 = vmul.f32 %v3033_v57, %v2510_v35 }
  0x37   : > { %5899 = vst [vmem:[#allocation69_spill] sm:$0xff] %v3152_v48  ;;  %5900 = vst [vmem:[#allocation70_spill] sm:$0xff] %v3155_v13  ;;  %v3175_v48 = vmul.f32 %v3035_v58, %v2510_v35  ;;  %v3178_v13 = vmul.f32 %v2510_v35, %v3070_v26 }
  0x38   : > { %5901 = vst [vmem:[#allocation71_spill] sm:$0xff] %v3158_v10  ;;  %5902 = vst [vmem:[#allocation72_spill] sm:$0xff] %v3161_v16  ;;  %v3181_v10 = vmul.f32 %v2510_v35, %v3072_v33  ;;  %v3184_v16 = vmul.f32 %v3044_v0, %v2510_v35 }
  0x39   : > { %5903 = vst [vmem:[#allocation73_spill] sm:$0xff] %v3164_v20  ;;  %5904 = vst [vmem:[#allocation74_spill] sm:$0xff] %v3172_v51  ;;  %v3187_v20 = vmul.f32 %v3046_v2, %v2510_v35  ;;  %v3193_v51 = vmul.f32 %v2510_v35, %v3083_v46  ;;  %v385_v35 = vmul.f32 %v3169_v52, %v2978_v23 }
  0x3a   : > { %5905 = vst [vmem:[#allocation75_spill] sm:$0xff] %v3175_v48  ;;  %5906 = vst [vmem:[#allocation76_spill] sm:$0xff] %v3178_v13  ;;  %v380_v48 = vmul.f32 %v2953_v6, %v3169_v52  ;;  %v381_v13 = vmul.f32 %v2955_v7, %v3169_v52  ;;  %v3214_v7 = vmul.f32 %v2962_v12, %v3169_v52 }
  0x3b   : > { %5907 = vst [vmem:[#allocation77_spill] sm:$0xff] %v3181_v10  ;;  %5908 = vst [vmem:[#allocation78_spill] sm:$0xff] %v3184_v16  ;;  %v5912_v10 = vunpack.c.l.bf16 %v2947_v1  ;;  %v383_v16 = vmul.f32 %v3169_v52, %v2968_v17  ;;  %v3222_v17 = vmul.f32 %v3169_v52, %v2985_v28  ;;  %v3234_v12 = vmul.f32 %v2970_v18, %v3169_v52 }
  0x3c   : > { %5909 = vst [vmem:[#allocation79_spill] sm:$0xff] %v3187_v20  ;;  %5910 = vst [vmem:[#allocation80_spill] sm:$0xff] %v3190_v59  ;;  %v384_v20 = vmul.f32 %v3169_v52, %v2976_v22  ;;  %v3226_v22 = vmul.f32 %v3169_v52, %v2987_v29  ;;  %v3242_v28 = vmul.f32 %v3169_v52, %v2998_v36  ;;  %v477_v23 = vrot.slane %v380_v48, 1 }
  0x3d   : > { %5911 = vst [vmem:[#allocation81_spill] sm:$0xff] %v3193_v51  ;;  %v382_v15 = vmul.f32 %v3169_v52, %v5912_v10  ;;  %v3210_v51 = vmul.f32 %v2960_v11, %v3169_v52  ;;  %v3218_v10 = vmul.f32 %v3169_v52, %v2983_v27  ;;  %v3230_v11 = vmul.f32 %v3169_v52, %v2989_v30 }
  0x3e   : > { %v3238_v27 = vmul.f32 %v2972_v19, %v3169_v52  ;;  %v3246_v29 = vmul.f32 %v3169_v52, %v3000_v37  ;;  %v3250_v30 = vmul.f32 %v3169_v52, %v3008_v42  ;;  %v3254_v18 = vmul.f32 %v3169_v52, %v3010_v43 }
  0x3f   : > { %v3258_v19 = vmul.f32 %v2991_v31, %v3169_v52  ;;  %v3262_v36 = vmul.f32 %v2993_v32, %v3169_v52  ;;  %v3266_v37 = vmul.f32 %v3169_v52, %v3019_v49  ;;  %v3270_v42 = vmul.f32 %v3169_v52, %v3021_v50 }
  0x40   : > { %v3274_v43 = vmul.f32 %v3169_v52, %v3025_v53  ;;  %v3278_v31 = vmul.f32 %v3169_v52, %v3027_v54  ;;  %v3282_v32 = vmul.f32 %v3002_v38, %v3169_v52  ;;  %v3286_v49 = vmul.f32 %v3004_v39, %v3169_v52 }
  0x41   : > { %v3290_v50 = vmul.f32 %v3169_v52, %v3029_v55  ;;  %v3294_v53 = vmul.f32 %v3169_v52, %v3031_v56  ;;  %v3298_v54 = vmul.f32 %v3169_v52, %v3040_v62  ;;  %v3302_v38 = vmul.f32 %v3169_v52, %v3042_v63 }
  0x42   : > { %v3306_v39 = vmul.f32 %v3012_v44, %v3169_v52  ;;  %v3310_v55 = vmul.f32 %v3014_v45, %v3169_v52  ;;  %v3314_v56 = vmul.f32 %v3169_v52, %v3051_v8  ;;  %v3318_v62 = vmul.f32 %v3169_v52, %v3053_v9 }
  0x43   : > { %v3322_v63 = vmul.f32 %v3169_v52, %v3064_v21  ;;  %v3326_v44 = vmul.f32 %v3169_v52, %v3066_v24  ;;  %v3330_v45 = vmul.f32 %v3033_v57, %v3169_v52  ;;  %v3334_v8 = vmul.f32 %v3035_v58, %v3169_v52 }
  0x44   : > { %v478_v1 = vrot.slane %v381_v13, 1  ;;  %v3338_v9 = vmul.f32 %v3169_v52, %v3068_v25  ;;  %v480_v21 = vrot.slane %v382_v15, 1  ;;  %v482_v6 = vrot.slane %v383_v16, 1 }
  0x45   : > { %v483_v59 = vrot.slane %v384_v20, 1  ;;  %v3342_v24 = vmul.f32 %v3169_v52, %v3070_v26  ;;  %v3346_v57 = vmul.f32 %v3169_v52, %v3072_v33  ;;  %v3350_v58 = vmul.f32 %v3169_v52, %v3074_v34 }
  0x46   : > { %v485_v13 = vrot.slane %v385_v35, 1  ;;  %v3354_v48 = vmul.f32 %v3044_v0, %v3169_v52  ;;  %v3358_v16 = vmul.f32 %v3046_v2, %v3169_v52  ;;  %v3362_v20 = vmul.f32 %v3169_v52, %v3079_v40 }
  0x47   : > { %v3366_v15 = vmul.f32 %v3169_v52, %v3081_v41  ;;  %v3370_v34 = vmul.f32 %v3169_v52, %v3083_v46  ;;  %v3374_v35 = vmul.f32 %v3169_v52, %v3085_v47  ;;  %v3377_v0 = vsel %vm476_vm0, %v477_v23, %v478_v1 }
  0x48   : > { %v487_v2 = vrot.slane %v3210_v51, 1  ;;  %v3381_v40 = vsel %vm476_vm0, %v478_v1, %v480_v21  ;;  %v3384_v33 = vsel %vm476_vm0, %v482_v6, %v483_v59  ;;  %v488_v41 = vrot.slane %v3214_v7, 1 }
  0x49   : > { %v490_v46 = vrot.slane %v3218_v10, 1  ;;  %v3389_v26 = vsel %vm476_vm0, %v483_v59, %v485_v13  ;;  %v492_v52 = vrot.slane %v3222_v17, 1  ;;  %v493_v23 = vrot.slane %v3226_v22, 1 }
  0x4a   : > { %v495_v47 = vrot.slane %v3230_v11, 1  ;;  %v497_v51 = vrot.slane %v3234_v12, 1  ;;  %v498_v1 = vrot.slane %v3238_v27, 1  ;;  %v500_v6 = vrot.slane %v3242_v28, 1 }
  0x4b   : > { %v502_v21 = vrot.slane %v3246_v29, 1  ;;  %v503_v7 = vrot.slane %v3250_v30, 1  ;;  %v505_v10 = vrot.slane %v3254_v18, 1  ;;  %v507_v59 = vrot.slane %v3258_v19, 1 }
  0x4c   : > { %v508_v17 = vrot.slane %v3262_v36, 1  ;;  %v510_v22 = vrot.slane %v3266_v37, 1  ;;  %v512_v11 = vrot.slane %v3270_v42, 1  ;;  %v513_v12 = vrot.slane %v3274_v43, 1 }
  0x4d   : > { %v515_v27 = vrot.slane %v3278_v31, 1  ;;  %v489_v28 = vsel %vm476_vm0, %v487_v2, %v488_v41  ;;  %v517_v29 = vrot.slane %v3282_v32, 1  ;;  %v518_v30 = vrot.slane %v3286_v49, 1 }
  0x4e   : > { %v520_v18 = vrot.slane %v3290_v50, 1  ;;  %v491_v19 = vsel %vm476_vm0, %v488_v41, %v490_v46  ;;  %v494_v36 = vsel %vm476_vm0, %v492_v52, %v493_v23  ;;  %v496_v37 = vsel %vm476_vm0, %v493_v23, %v495_v47 }
  0x4f   : > { %v499_v42 = vsel %vm476_vm0, %v497_v51, %v498_v1  ;;  %v501_v43 = vsel %vm476_vm0, %v498_v1, %v500_v6  ;;  %v504_v31 = vsel %vm476_vm0, %v502_v21, %v503_v7  ;;  %v506_v2 = vsel %vm476_vm0, %v503_v7, %v505_v10 }
  0x50   : > { %v509_v32 = vsel %vm476_vm0, %v507_v59, %v508_v17  ;;  %v511_v49 = vsel %vm476_vm0, %v508_v17, %v510_v22  ;;  %v514_v50 = vsel %vm476_vm0, %v512_v11, %v513_v12  ;;  %v516_v41 = vsel %vm476_vm0, %v513_v12, %v515_v27 }
  0x51   : > { %v522_v46 = vrot.slane %v3294_v53, 1  ;;  %v519_v47 = vsel %vm476_vm0, %v517_v29, %v518_v30  ;;  %v521_v13 = vsel %vm476_vm0, %v518_v30, %v520_v18  ;;  %v523_v52 = vrot.slane %v3298_v54, 1 }
  0x52   : > { %v525_v23 = vrot.slane %v3302_v38, 1  ;;  %v527_v51 = vrot.slane %v3306_v39, 1  ;;  %v528_v1 = vrot.slane %v3310_v55, 1  ;;  %v530_v6 = vrot.slane %v3314_v56, 1 }
  0x53   : > { %v532_v21 = vrot.slane %v3318_v62, 1  ;;  %v533_v7 = vrot.slane %v3322_v63, 1  ;;  %v535_v53 = vrot.slane %v3326_v44, 1  ;;  %v537_v10 = vrot.slane %v3330_v45, 1 }
  0x54   : > { %v538_v59 = vrot.slane %v3334_v8, 1  ;;  %v540_v54 = vrot.slane %v3338_v9, 1  ;;  %v542_v38 = vrot.slane %v3342_v24, 1  ;;  %v543_v39 = vrot.slane %v3346_v57, 1 }
  0x55   : > { %v545_v55 = vrot.slane %v3350_v58, 1  ;;  %v524_v56 = vsel %vm476_vm0, %v522_v46, %v523_v52  ;;  %v547_v62 = vrot.slane %v3354_v48, 1  ;;  %v548_v63 = vrot.slane %v3358_v16, 1 }
  0x56   : > { %v550_v44 = vrot.slane %v3362_v20, 1  ;;  %v526_v45 = vsel %vm476_vm0, %v523_v52, %v525_v23  ;;  %v552_v8 = vrot.slane %v3366_v15, 1  ;;  %v553_v9 = vrot.slane %v3370_v34, 1  ;;  %v5916_v23 = vld [vmem:[#allocation58_spill] sm:$0xff] }
  0x57   : > { %v555_v24 = vrot.slane %v3374_v35, 1  ;;  %v529_v57 = vsel %vm476_vm0, %v527_v51, %v528_v1  ;;  %v531_v58 = vsel %vm476_vm0, %v528_v1, %v530_v6  ;;  %v534_v17 = vsel %vm476_vm0, %v532_v21, %v533_v7 }
  0x58   : > { %v536_v48 = vsel %vm476_vm0, %v533_v7, %v535_v53  ;;  %v539_v16 = vsel %vm476_vm0, %v537_v10, %v538_v59  ;;  %v541_v20 = vsel %vm476_vm0, %v538_v59, %v540_v54  ;;  %v544_v22 = vsel %vm476_vm0, %v542_v38, %v543_v39 }
  0x59   : > { %v546_v15 = vsel %vm476_vm0, %v543_v39, %v545_v55  ;;  %v549_v34 = vsel %vm476_vm0, %v547_v62, %v548_v63  ;;  %v551_v35 = vsel %vm476_vm0, %v548_v63, %v550_v44  ;;  %v3458_v11 = vadd.f32 %v3377_v0, %v3095_v60  ;;  %v5950_v63 = vld [vmem:[#allocation75_spill] sm:$0xff] }
  0x5a   : > { %v3462_v12 = vadd.f32 %v3381_v40, %v3098_v61  ;;  %v554_v27 = vsel %vm476_vm0, %v552_v8, %v553_v9  ;;  %v556_v29 = vsel %vm476_vm0, %v553_v9, %v555_v24  ;;  %v3468_v30 = vadd.f32 %v3384_v33, %v3101_v3  ;;  %v5913_v40 = vld [vmem:[#allocation56_spill] sm:$0xff]  ;;  %v5914_v61 = vld [vmem:[#allocation57_spill] sm:$0xff]  ;;  %v5918_v33 = vld [vmem:[#allocation59_spill] sm:$0xff] }
  0x5b   : > { %v3472_v18 = vadd.f32 %v3389_v26, %v3104_v4  ;;  %v3475_v46 = vadd.f32 %v489_v28, %v3107_v5  ;;  %v3478_v0 = vadd.f32 %v491_v19, %v3110_v14  ;;  %v3481_v60 = vadd.f32 %v494_v36, %v5913_v40  ;;  %v5920_v26 = vld [vmem:[#allocation60_spill] sm:$0xff]  ;;  %v5922_v5 = vld [vmem:[#allocation61_spill] sm:$0xff]  ;;  %v5924_v14 = vld [vmem:[#allocation62_spill] sm:$0xff] }
  0x5c   : > { %v3484_v52 = vadd.f32 %v496_v37, %v5914_v61  ;;  %v3487_v51 = vadd.f32 %v499_v42, %v5916_v23  ;;  %v3490_v3 = vadd.f32 %v501_v43, %v5918_v33  ;;  %v3493_v4 = vadd.f32 %v504_v31, %v5920_v26  ;;  %v5926_v36 = vld [vmem:[#allocation63_spill] sm:$0xff]  ;;  %v5928_v37 = vld [vmem:[#allocation64_spill] sm:$0xff]  ;;  %v5930_v42 = vld [vmem:[#allocation65_spill] sm:$0xff] }
  0x5d   : > { %v3496_v28 = vadd.f32 %v506_v2, %v5922_v5  ;;  %v3499_v19 = vadd.f32 %v509_v32, %v5924_v14  ;;  %v3502_v1 = vadd.f32 %v511_v49, %v5926_v36  ;;  %v3505_v6 = vadd.f32 %v514_v50, %v5928_v37  ;;  %v5932_v43 = vld [vmem:[#allocation66_spill] sm:$0xff]  ;;  %v5934_v31 = vld [vmem:[#allocation67_spill] sm:$0xff]  ;;  %v5936_v2 = vld [vmem:[#allocation68_spill] sm:$0xff] }
  0x5e   : > { %5915 = vst [vmem:[#allocation56_spill] sm:$0xff] %v3484_v52  ;;  %5917 = vst [vmem:[#allocation57_spill] sm:$0xff] %v3487_v51  ;;  %v3508_v21 = vadd.f32 %v516_v41, %v5930_v42  ;;  %v3511_v7 = vadd.f32 %v519_v47, %v5932_v43  ;;  %v3514_v53 = vadd.f32 %v521_v13, %v5934_v31  ;;  %v5938_v32 = vld [vmem:[#allocation69_spill] sm:$0xff]  ;;  %v5940_v49 = vld [vmem:[#allocation70_spill] sm:$0xff] }
  0x5f   : > { %5919 = vst [vmem:[#allocation58_spill] sm:$0xff] %v3490_v3  ;;  %5921 = vst [vmem:[#allocation59_spill] sm:$0xff] %v3493_v4  ;;  %v3517_v10 = vadd.f32 %v524_v56, %v5936_v2  ;;  %v3520_v59 = vadd.f32 %v526_v45, %v5938_v32  ;;  %v3523_v54 = vadd.f32 %v529_v57, %v5940_v49  ;;  %v5942_v50 = vld [vmem:[#allocation71_spill] sm:$0xff]  ;;  %v5944_v41 = vld [vmem:[#allocation72_spill] sm:$0xff] }
  0x60   : > { %5923 = vst [vmem:[#allocation60_spill] sm:$0xff] %v3496_v28  ;;  %5925 = vst [vmem:[#allocation61_spill] sm:$0xff] %v3499_v19  ;;  %v3526_v38 = vadd.f32 %v531_v58, %v5942_v50  ;;  %v3529_v39 = vadd.f32 %v534_v17, %v5944_v41  ;;  %v5946_v47 = vld [vmem:[#allocation73_spill] sm:$0xff]  ;;  %v3537_v13 = vld [vmem:[%s5718_s1 + $0x2] ss:$0 sm:$0xff]  ;;  %v3543_v44 = vadd.f32 %v541_v20, %v5950_v63 }
  0x61   : > { %5927 = vst [vmem:[#allocation62_spill] sm:$0xff] %v3502_v1  ;;  %5929 = vst [vmem:[#allocation63_spill] sm:$0xff] %v3505_v6  ;;  %v3532_v55 = vadd.f32 %v536_v48, %v5946_v47  ;;  %v5948_v56 = vld [vmem:[#allocation74_spill] sm:$0xff]  ;;  %v5952_v45 = vld [vmem:[#allocation76_spill] sm:$0xff] }
  0x62   : > { %5931 = vst [vmem:[#allocation64_spill] sm:$0xff] %v3508_v21  ;;  %5933 = vst [vmem:[#allocation65_spill] sm:$0xff] %v3511_v7  ;;  %v3540_v62 = vadd.f32 %v539_v16, %v5948_v56  ;;  %v3546_v8 = vadd.f32 %v544_v22, %v5952_v45  ;;  %v5954_v9 = vld [vmem:[#allocation77_spill] sm:$0xff]  ;;  %v5956_v57 = vld [vmem:[#allocation78_spill] sm:$0xff] }
  0x63   : > { %5935 = vst [vmem:[#allocation66_spill] sm:$0xff] %v3514_v53  ;;  %5937 = vst [vmem:[#allocation67_spill] sm:$0xff] %v3517_v10  ;;  %v3549_v24 = vadd.f32 %v546_v15, %v5954_v9  ;;  %v3552_v58 = vadd.f32 %v549_v34, %v5956_v57  ;;  %v5958_v17 = vld [vmem:[#allocation79_spill] sm:$0xff]  ;;  %v5960_v40 = vld [vmem:[#allocation80_spill] sm:$0xff] }
  0x64   : > { %5939 = vst [vmem:[#allocation68_spill] sm:$0xff] %v3520_v59  ;;  %5941 = vst [vmem:[#allocation69_spill] sm:$0xff] %v3523_v54  ;;  %v3555_v48 = vadd.f32 %v551_v35, %v5958_v17  ;;  %v3558_v61 = vadd.f32 %v554_v27, %v5960_v40  ;;  %v5962_v16 = vld [vmem:[#allocation81_spill] sm:$0xff]  ;;  %v5964_v20 = vld [vmem:[#allocation3_spill] sm:$0xff] }
  0x65   : > { %5943 = vst [vmem:[#allocation70_spill] sm:$0xff] %v3526_v38  ;;  %5945 = vst [vmem:[#allocation71_spill] sm:$0xff] %v3529_v39  ;;  %v3561_v23 = vadd.f32 %v556_v29, %v5962_v16  ;;  %v626_v33 = vmul.f32 %v5964_v20, %v3537_v13  ;;  %v5965_v22 = vld [vmem:[#allocation4_spill] sm:$0xff]  ;;  %v5966_v15 = vld [vmem:[#allocation2_spill] sm:$0xff] }
  0x66   : > { %5947 = vst [vmem:[#allocation72_spill] sm:$0xff] %v3532_v55  ;;  %5949 = vst [vmem:[#allocation73_spill] sm:$0xff] %v3540_v62  ;;  %v627_v26 = vmul.f32 %v5965_v22, %v3537_v13  ;;  %v5967_v5 = vunpack.c.l.bf16 %v5966_v15  ;;  %v5968_v14 = vld [vmem:[#allocation7_spill] sm:$0xff]  ;;  %v5969_v36 = vld [vmem:[#allocation10_spill] sm:$0xff] }
  0x67   : > { %5951 = vst [vmem:[#allocation74_spill] sm:$0xff] %v3543_v44  ;;  %5953 = vst [vmem:[#allocation75_spill] sm:$0xff] %v3546_v8  ;;  %v629_v35 = vmul.f32 %v3537_v13, %v5968_v14  ;;  %v630_v27 = vmul.f32 %v3537_v13, %v5969_v36  ;;  %v5970_v37 = vld [vmem:[#allocation11_spill] sm:$0xff]  ;;  %v5971_v42 = vld [vmem:[#allocation5_spill] sm:$0xff]  ;;  %v723_v10 = vrot.slane %v626_v33, 2 }
  0x68   : > { %5955 = vst [vmem:[#allocation76_spill] sm:$0xff] %v3549_v24  ;;  %5957 = vst [vmem:[#allocation77_spill] sm:$0xff] %v3552_v58  ;;  %v628_v34 = vmul.f32 %v3537_v13, %v5967_v5  ;;  %v631_v29 = vmul.f32 %v3537_v13, %v5970_v37  ;;  %v3578_v43 = vmul.f32 %v5971_v42, %v3537_v13  ;;  %v5972_v31 = vld [vmem:[#allocation6_spill] sm:$0xff]  ;;  %v5973_v32 = vld [vmem:[#allocation12_spill] sm:$0xff]  ;;  %v724_v53 = vrot.slane %v627_v26, 2 }
  0x69   : > { %5959 = vst [vmem:[#allocation78_spill] sm:$0xff] %v3555_v48  ;;  %5961 = vst [vmem:[#allocation79_spill] sm:$0xff] %v3558_v61  ;;  %v3582_v2 = vmul.f32 %v5972_v31, %v3537_v13  ;;  %v3586_v49 = vmul.f32 %v3537_v13, %v5973_v32  ;;  %v5974_v50 = vld [vmem:[#allocation13_spill] sm:$0xff]  ;;  %v5975_v47 = vld [vmem:[#allocation14_spill] sm:$0xff]  ;;  %v728_v7 = vrot.slane %v629_v35, 2  ;;  %v729_v21 = vrot.slane %v630_v27, 2 }
  0x6a   : > { %5963 = vst [vmem:[#allocation80_spill] sm:$0xff] %v3561_v23  ;;  %v3590_v41 = vmul.f32 %v3537_v13, %v5974_v50  ;;  %v3594_v56 = vmul.f32 %v3537_v13, %v5975_v47  ;;  %v5976_v63 = vld [vmem:[#allocation15_spill] sm:$0xff]  ;;  %v5977_v9 = vld [vmem:[#allocation8_spill] sm:$0xff]  ;;  %v5978_v17 = vld [vmem:[#allocation9_spill] sm:$0xff]  ;;  %v731_v33 = vrot.slane %v631_v29, 2  ;;  %v3745_v3 = vsel %vm722_vm1, %v723_v10, %v724_v53 }
  0x6b   : > { %v3598_v45 = vmul.f32 %v3537_v13, %v5976_v63  ;;  %v3602_v57 = vmul.f32 %v5977_v9, %v3537_v13  ;;  %v3606_v40 = vmul.f32 %v5978_v17, %v3537_v13  ;;  %v5979_v16 = vld [vmem:[#allocation18_spill] sm:$0xff]  ;;  %v5980_v22 = vld [vmem:[#allocation19_spill] sm:$0xff]  ;;  %v5983_v9 = vld [vmem:[#allocation16_spill] sm:$0xff]  ;;  %v3752_v51 = vsel %vm722_vm1, %v728_v7, %v729_v21 }
  0x6c   : > { %v3610_v20 = vmul.f32 %v3537_v13, %v5979_v16  ;;  %v3614_v15 = vmul.f32 %v3537_v13, %v5980_v22  ;;  %v5981_v5 = vld [vmem:[#allocation22_spill] sm:$0xff]  ;;  %v5982_v32 = vld [vmem:[#allocation23_spill] sm:$0xff]  ;;  %v3626_v17 = vmul.f32 %v5983_v9, %v3537_v13  ;;  %v5984_v47 = vld [vmem:[#allocation17_spill] sm:$0xff]  ;;  %v3757_v52 = vsel %vm722_vm1, %v729_v21, %v731_v33 }
  0x6d   : > { %v3618_v63 = vmul.f32 %v3537_v13, %v5981_v5  ;;  %v3622_v37 = vmul.f32 %v3537_v13, %v5982_v32  ;;  %v3630_v16 = vmul.f32 %v5984_v47, %v3537_v13  ;;  %v5985_v50 = vld [vmem:[#allocation26_spill] sm:$0xff]  ;;  %v5986_v31 = vld [vmem:[#allocation27_spill] sm:$0xff]  ;;  %v5987_v42 = vld [vmem:[#allocation28_spill] sm:$0xff]  ;;  %v739_v10 = vrot.slane %v3594_v56, 2 }
  0x6e   : > { %v3634_v22 = vmul.f32 %v3537_v13, %v5985_v50  ;;  %v3638_v5 = vmul.f32 %v3537_v13, %v5986_v31  ;;  %v3642_v32 = vmul.f32 %v3537_v13, %v5987_v42  ;;  %v5988_v36 = vld [vmem:[#allocation29_spill] sm:$0xff]  ;;  %v5989_v14 = vld [vmem:[#allocation20_spill] sm:$0xff]  ;;  %v5991_v61 = vld [vmem:[#allocation30_spill] sm:$0xff]  ;;  %v746_v7 = vrot.slane %v3610_v20, 2 }
  0x6f   : > { %v3646_v9 = vmul.f32 %v3537_v13, %v5988_v36  ;;  %v3650_v47 = vmul.f32 %v5989_v14, %v3537_v13  ;;  %v5990_v23 = vld [vmem:[#allocation21_spill] sm:$0xff]  ;;  %v3658_v31 = vmul.f32 %v3537_v13, %v5991_v61  ;;  %v5992_v48 = vld [vmem:[#allocation31_spill] sm:$0xff]  ;;  %v5993_v58 = vld [vmem:[#allocation34_spill] sm:$0xff]  ;;  %v753_v21 = vrot.slane %v3626_v17, 2 }
  0x70   : > { %v3654_v50 = vmul.f32 %v5990_v23, %v3537_v13  ;;  %v3662_v42 = vmul.f32 %v3537_v13, %v5992_v48  ;;  %v3666_v36 = vmul.f32 %v3537_v13, %v5993_v58  ;;  %v5994_v24 = vld [vmem:[#allocation35_spill] sm:$0xff]  ;;  %v5995_v8 = vld [vmem:[#allocation24_spill] sm:$0xff]  ;;  %v5996_v44 = vld [vmem:[#allocation25_spill] sm:$0xff]  ;;  %v756_v56 = vrot.slane %v3634_v22, 2 }
  0x71   : > { %v3670_v14 = vmul.f32 %v3537_v13, %v5994_v24  ;;  %v3674_v23 = vmul.f32 %v5995_v8, %v3537_v13  ;;  %v3678_v61 = vmul.f32 %v5996_v44, %v3537_v13  ;;  %v5997_v62 = vld [vmem:[#allocation38_spill] sm:$0xff]  ;;  %v5998_v55 = vld [vmem:[#allocation39_spill] sm:$0xff]  ;;  %v6000_v38 = vld [vmem:[#allocation44_spill] sm:$0xff] }
  0x72   : > { %v3682_v48 = vmul.f32 %v3537_v13, %v5997_v62  ;;  %v3686_v58 = vmul.f32 %v3537_v13, %v5998_v55  ;;  %v5999_v39 = vld [vmem:[#allocation43_spill] sm:$0xff]  ;;  %v3694_v8 = vmul.f32 %v3537_v13, %v6000_v38  ;;  %v6001_v54 = vld [vmem:[#allocation32_spill] sm:$0xff]  ;;  %v6002_v59 = vld [vmem:[#allocation33_spill] sm:$0xff]  ;;  %v3706_v55 = vmul.f32 %v3537_v13, %v3068_v25 }
  0x73   : > { %v3690_v24 = vmul.f32 %v3537_v13, %v5999_v39  ;;  %v3698_v44 = vmul.f32 %v6001_v54, %v3537_v13  ;;  %v3702_v62 = vmul.f32 %v6002_v59, %v3537_v13  ;;  %v726_v39 = vrot.slane %v628_v34, 2  ;;  %v6003_v6 = vld [vmem:[#allocation46_spill] sm:$0xff]  ;;  %v6004_v1 = vld [vmem:[#allocation47_spill] sm:$0xff]  ;;  %v6005_v19 = vld [vmem:[#allocation48_spill] sm:$0xff] }
  0x74   : > { %v3710_v38 = vmul.f32 %v3537_v13, %v6003_v6  ;;  %v3714_v54 = vmul.f32 %v3537_v13, %v6004_v1  ;;  %v3718_v59 = vmul.f32 %v3537_v13, %v6005_v19  ;;  %v6006_v26 = vld [vmem:[#allocation36_spill] sm:$0xff]  ;;  %v6007_v34 = vld [vmem:[#allocation37_spill] sm:$0xff]  ;;  %v6009_v28 = vld [vmem:[#allocation50_spill] sm:$0xff] }
  0x75   : > { %v3722_v25 = vmul.f32 %v6006_v26, %v3537_v13  ;;  %v3726_v35 = vmul.f32 %v6007_v34, %v3537_v13  ;;  %v6008_v27 = vld [vmem:[#allocation49_spill] sm:$0xff]  ;;  %v3734_v1 = vmul.f32 %v3537_v13, %v6009_v28  ;;  %v6010_v4 = vld [vmem:[#allocation51_spill] sm:$0xff]  ;;  %v6011_v29 = vld [vmem:[#allocation52_spill] sm:$0xff]  ;;  %v733_v34 = vrot.slane %v3578_v43, 2 }
  0x76   : > { %v3730_v6 = vmul.f32 %v3537_v13, %v6008_v27  ;;  %v3738_v19 = vmul.f32 %v3537_v13, %v6010_v4  ;;  %v3742_v26 = vmul.f32 %v3537_v13, %v6011_v29  ;;  %v3749_v27 = vsel %vm722_vm1, %v724_v53, %v726_v39 }
  0x77   : > { %v734_v28 = vrot.slane %v3582_v2, 2  ;;  %v736_v4 = vrot.slane %v3586_v49, 2  ;;  %v738_v13 = vrot.slane %v3590_v41, 2  ;;  %v741_v29 = vrot.slane %v3598_v45, 2 }
  0x78   : > { %v743_v43 = vrot.slane %v3602_v57, 2  ;;  %v744_v53 = vrot.slane %v3606_v40, 2  ;;  %v748_v39 = vrot.slane %v3614_v15, 2  ;;  %v749_v2 = vrot.slane %v3618_v63, 2 }
  0x79   : > { %v751_v49 = vrot.slane %v3622_v37, 2  ;;  %v754_v41 = vrot.slane %v3630_v16, 2  ;;  %v758_v45 = vrot.slane %v3638_v5, 2  ;;  %v759_v57 = vrot.slane %v3642_v32, 2 }
  0x7a   : > { %v761_v40 = vrot.slane %v3646_v9, 2  ;;  %v735_v20 = vsel %vm722_vm1, %v733_v34, %v734_v28  ;;  %v763_v15 = vrot.slane %v3650_v47, 2  ;;  %v764_v63 = vrot.slane %v3654_v50, 2 }
  0x7b   : > { %v766_v37 = vrot.slane %v3658_v31, 2  ;;  %v737_v17 = vsel %vm722_vm1, %v734_v28, %v736_v4  ;;  %v740_v16 = vsel %vm722_vm1, %v738_v13, %v739_v10  ;;  %v742_v22 = vsel %vm722_vm1, %v739_v10, %v741_v29 }
  0x7c   : > { %v745_v5 = vsel %vm722_vm1, %v743_v43, %v744_v53  ;;  %v747_v32 = vsel %vm722_vm1, %v744_v53, %v746_v7  ;;  %v750_v9 = vsel %vm722_vm1, %v748_v39, %v749_v2  ;;  %v752_v33 = vsel %vm722_vm1, %v749_v2, %v751_v49 }
  0x7d   : > { %v755_v47 = vsel %vm722_vm1, %v753_v21, %v754_v41  ;;  %v757_v50 = vsel %vm722_vm1, %v754_v41, %v756_v56  ;;  %v760_v31 = vsel %vm722_vm1, %v758_v45, %v759_v57  ;;  %v762_v4 = vsel %vm722_vm1, %v759_v57, %v761_v40 }
  0x7e   : > { %v768_v28 = vrot.slane %v3662_v42, 2  ;;  %v765_v34 = vsel %vm722_vm1, %v763_v15, %v764_v63  ;;  %v767_v29 = vsel %vm722_vm1, %v764_v63, %v766_v37  ;;  %v769_v13 = vrot.slane %v3666_v36, 2 }
  0x7f   : > { %v771_v10 = vrot.slane %v3670_v14, 2  ;;  %v773_v43 = vrot.slane %v3674_v23, 2  ;;  %v774_v53 = vrot.slane %v3678_v61, 2  ;;  %v776_v7 = vrot.slane %v3682_v48, 2 }
  0x80   : > { %v778_v39 = vrot.slane %v3686_v58, 2  ;;  %v779_v2 = vrot.slane %v3690_v24, 2  ;;  %v781_v42 = vrot.slane %v3694_v8, 2  ;;  %v783_v49 = vrot.slane %v3698_v44, 2 }
  0x81   : > { %v784_v21 = vrot.slane %v3702_v62, 2  ;;  %v786_v36 = vrot.slane %v3706_v55, 2  ;;  %v788_v14 = vrot.slane %v3710_v38, 2  ;;  %v789_v23 = vrot.slane %v3714_v54, 2 }
  0x82   : > { %v791_v61 = vrot.slane %v3718_v59, 2  ;;  %v770_v48 = vsel %vm722_vm1, %v768_v28, %v769_v13  ;;  %v793_v58 = vrot.slane %v3722_v25, 2  ;;  %v794_v24 = vrot.slane %v3726_v35, 2 }
  0x83   : > { %v796_v8 = vrot.slane %v3730_v6, 2  ;;  %v772_v44 = vsel %vm722_vm1, %v769_v13, %v771_v10  ;;  %v798_v62 = vrot.slane %v3734_v1, 2  ;;  %v799_v55 = vrot.slane %v3738_v19, 2  ;;  %v6013_v13 = vld [vmem:[#allocation57_spill] sm:$0xff] }
  0x84   : > { %v801_v38 = vrot.slane %v3742_v26, 2  ;;  %v775_v54 = vsel %vm722_vm1, %v773_v43, %v774_v53  ;;  %v777_v59 = vsel %vm722_vm1, %v774_v53, %v776_v7  ;;  %v780_v41 = vsel %vm722_vm1, %v778_v39, %v779_v2 }
  0x85   : > { %v782_v25 = vsel %vm722_vm1, %v779_v2, %v781_v42  ;;  %v785_v35 = vsel %vm722_vm1, %v783_v49, %v784_v21  ;;  %v787_v6 = vsel %vm722_vm1, %v784_v21, %v786_v36  ;;  %v790_v56 = vsel %vm722_vm1, %v788_v14, %v789_v23 }
  0x86   : > { %v792_v1 = vsel %vm722_vm1, %v789_v23, %v791_v61  ;;  %v795_v19 = vsel %vm722_vm1, %v793_v58, %v794_v24  ;;  %v797_v26 = vsel %vm722_vm1, %v794_v24, %v796_v8  ;;  %v3826_v45 = vadd.f32 %v3745_v3, %v3458_v11  ;;  %v6012_v3 = vld [vmem:[#allocation56_spill] sm:$0xff]  ;;  %v6032_v23 = vld [vmem:[#allocation73_spill] sm:$0xff]  ;;  %v6036_v24 = vld [vmem:[#allocation75_spill] sm:$0xff] }
  0x87   : > { %v3830_v57 = vadd.f32 %v3749_v27, %v3462_v12  ;;  %v800_v40 = vsel %vm722_vm1, %v798_v62, %v799_v55  ;;  %v802_v15 = vsel %vm722_vm1, %v799_v55, %v801_v38  ;;  %v3836_v63 = vadd.f32 %v3752_v51, %v3468_v30  ;;  %v6014_v30 = vld [vmem:[#allocation58_spill] sm:$0xff]  ;;  %v6040_v55 = vld [vmem:[#allocation77_spill] sm:$0xff] }
  0x88   : > { %v3840_v37 = vadd.f32 %v3757_v52, %v3472_v18  ;;  %v3843_v28 = vadd.f32 %v735_v20, %v3475_v46  ;;  %v3846_v11 = vadd.f32 %v737_v17, %v3478_v0  ;;  %v3849_v12 = vadd.f32 %v740_v16, %v3481_v60  ;;  %v6015_v18 = vld [vmem:[#allocation59_spill] sm:$0xff]  ;;  %v6016_v46 = vld [vmem:[#allocation60_spill] sm:$0xff]  ;;  %v6017_v0 = vld [vmem:[#allocation61_spill] sm:$0xff] }
  0x89   : > { %v3852_v27 = vadd.f32 %v742_v22, %v6012_v3  ;;  %v3855_v10 = vadd.f32 %v745_v5, %v6013_v13  ;;  %v3858_v51 = vadd.f32 %v747_v32, %v6014_v30  ;;  %v3861_v52 = vadd.f32 %v750_v9, %v6015_v18  ;;  %v6018_v60 = vld [vmem:[#allocation62_spill] sm:$0xff]  ;;  %v6019_v22 = vld [vmem:[#allocation63_spill] sm:$0xff]  ;;  %v6020_v5 = vld [vmem:[#allocation64_spill] sm:$0xff] }
  0x8a   : > { %v3864_v20 = vadd.f32 %v752_v33, %v6016_v46  ;;  %v3867_v17 = vadd.f32 %v755_v47, %v6017_v0  ;;  %v3870_v16 = vadd.f32 %v757_v50, %v6018_v60  ;;  %v3873_v43 = vadd.f32 %v760_v31, %v6019_v22  ;;  %v6021_v32 = vld [vmem:[#allocation65_spill] sm:$0xff]  ;;  %v6022_v9 = vld [vmem:[#allocation66_spill] sm:$0xff]  ;;  %v6023_v33 = vld [vmem:[#allocation67_spill] sm:$0xff] }
  0x8b   : > { %v3876_v53 = vadd.f32 %v762_v4, %v6020_v5  ;;  %v3879_v7 = vadd.f32 %v765_v34, %v6021_v32  ;;  %v3882_v39 = vadd.f32 %v767_v29, %v6022_v9  ;;  %v3885_v2 = vadd.f32 %v770_v48, %v6023_v33  ;;  %v6024_v47 = vld [vmem:[#allocation68_spill] sm:$0xff]  ;;  %v6025_v50 = vld [vmem:[#allocation69_spill] sm:$0xff]  ;;  %v6026_v31 = vld [vmem:[#allocation70_spill] sm:$0xff] }
  0x8c   : > { %v3888_v42 = vadd.f32 %v772_v44, %v6024_v47  ;;  %v3891_v49 = vadd.f32 %v775_v54, %v6025_v50  ;;  %v3894_v21 = vadd.f32 %v777_v59, %v6026_v31  ;;  %v6028_v4 = vld [vmem:[#allocation71_spill] sm:$0xff]  ;;  %v6030_v34 = vld [vmem:[#allocation72_spill] sm:$0xff]  ;;  %v2513_v29 = vld [vmem:[%s5718_s1 + $0x3] ss:$0 sm:$0xff]  ;;  %v3906_v61 = vadd.f32 %v785_v35, %v6032_v23 }
  0x8d   : > { %v3897_v36 = vadd.f32 %v780_v41, %v6028_v4  ;;  %v3900_v14 = vadd.f32 %v782_v25, %v6030_v34  ;;  %v6034_v48 = vld [vmem:[#allocation74_spill] sm:$0xff]  ;;  %v3912_v8 = vadd.f32 %v790_v56, %v6036_v24  ;;  %v6038_v44 = vld [vmem:[#allocation76_spill] sm:$0xff]  ;;  %v3918_v38 = vadd.f32 %v795_v19, %v6040_v55  ;;  %v6044_v41 = vld [vmem:[#allocation79_spill] sm:$0xff] }
  0x8e   : > { %6027 = vst [vmem:[#allocation81_spill] sm:$0xff] %v3894_v21  ;;  %6033 = vst [vmem:[#allocation2_spill] sm:$0xff] %v3906_v61  ;;  %v3909_v58 = vadd.f32 %v787_v6, %v6034_v48  ;;  %v3915_v62 = vadd.f32 %v792_v1, %v6038_v44  ;;  %v6042_v54 = vld [vmem:[#allocation78_spill] sm:$0xff]  ;;  %v3924_v25 = vadd.f32 %v800_v40, %v6044_v41  ;;  %v6046_v35 = vld [vmem:[#allocation80_spill] sm:$0xff] }
  0x8f   : > { %6029 = vst [vmem:[#allocation3_spill] sm:$0xff] %v3897_v36  ;;  %6031 = vst [vmem:[#allocation4_spill] sm:$0xff] %v3900_v14  ;;  %v3921_v59 = vadd.f32 %v797_v26, %v6042_v54  ;;  %v3927_v3 = vadd.f32 %v802_v15, %v6046_v35  ;;  %v6048_v6 = vld [vmem:[#allocation7_spill] sm:$0xff]  ;;  %v6049_v30 = vld [vmem:[#allocation10_spill] sm:$0xff] }
  0x90   : > { %6035 = vst [vmem:[#allocation56_spill] sm:$0xff] %v3909_v58  ;;  %6037 = vst [vmem:[#allocation57_spill] sm:$0xff] %v3912_v8  ;;  %v872_v13 = vmul.f32 %v2513_v29, %v6048_v6  ;;  %v873_v56 = vmul.f32 %v2513_v29, %v6049_v30  ;;  %v6050_v18 = vld [vmem:[#allocation5_spill] sm:$0xff]  ;;  %v6051_v1 = vld [vmem:[#allocation6_spill] sm:$0xff] }
  0x91   : > { %6039 = vst [vmem:[#allocation58_spill] sm:$0xff] %v3915_v62  ;;  %6041 = vst [vmem:[#allocation59_spill] sm:$0xff] %v3918_v38  ;;  %v874_v46 = vmul.f32 %v6050_v18, %v2513_v29  ;;  %v875_v0 = vmul.f32 %v6051_v1, %v2513_v29  ;;  %v6052_v60 = vld [vmem:[#allocation13_spill] sm:$0xff]  ;;  %v6053_v22 = vld [vmem:[#allocation14_spill] sm:$0xff] }
  0x92   : > { %6043 = vst [vmem:[#allocation60_spill] sm:$0xff] %v3921_v59  ;;  %6045 = vst [vmem:[#allocation61_spill] sm:$0xff] %v3924_v25  ;;  %v876_v19 = vmul.f32 %v2513_v29, %v6052_v60  ;;  %v877_v5 = vmul.f32 %v2513_v29, %v6053_v22  ;;  %v6054_v26 = vld [vmem:[#allocation8_spill] sm:$0xff]  ;;  %v6055_v9 = vld [vmem:[#allocation9_spill] sm:$0xff] }
  0x93   : > { %6047 = vst [vmem:[#allocation62_spill] sm:$0xff] %v3927_v3  ;;  %v878_v32 = vmul.f32 %v6054_v26, %v2513_v29  ;;  %v879_v40 = vmul.f32 %v6055_v9, %v2513_v29  ;;  %v6056_v33 = vld [vmem:[#allocation19_spill] sm:$0xff]  ;;  %v6057_v15 = vld [vmem:[#allocation22_spill] sm:$0xff]  ;;  %v6058_v31 = vld [vmem:[#allocation16_spill] sm:$0xff] }
  0x94   : > { %v880_v47 = vmul.f32 %v2513_v29, %v6056_v33  ;;  %v881_v50 = vmul.f32 %v2513_v29, %v6057_v15  ;;  %v882_v4 = vmul.f32 %v6058_v31, %v2513_v29  ;;  %v6059_v34 = vld [vmem:[#allocation17_spill] sm:$0xff]  ;;  %v6060_v48 = vld [vmem:[#allocation27_spill] sm:$0xff]  ;;  %v6061_v44 = vld [vmem:[#allocation28_spill] sm:$0xff] }
  0x95   : > { %v883_v23 = vmul.f32 %v6059_v34, %v2513_v29  ;;  %v884_v24 = vmul.f32 %v2513_v29, %v6060_v48  ;;  %v885_v55 = vmul.f32 %v2513_v29, %v6061_v44  ;;  %v6062_v54 = vld [vmem:[#allocation20_spill] sm:$0xff]  ;;  %v6063_v35 = vld [vmem:[#allocation21_spill] sm:$0xff]  ;;  %v6064_v60 = vld [vmem:[#allocation31_spill] sm:$0xff] }
  0x96   : > { %v886_v41 = vmul.f32 %v6062_v54, %v2513_v29  ;;  %v887_v22 = vmul.f32 %v6063_v35, %v2513_v29  ;;  %v888_v26 = vmul.f32 %v2513_v29, %v6064_v60  ;;  %v6065_v1 = vld [vmem:[#allocation34_spill] sm:$0xff]  ;;  %v6066_v18 = vld [vmem:[#allocation24_spill] sm:$0xff]  ;;  %v6067_v30 = vld [vmem:[#allocation25_spill] sm:$0xff] }
  0x97   : > { %v889_v9 = vmul.f32 %v2513_v29, %v6065_v1  ;;  %v890_v33 = vmul.f32 %v6066_v18, %v2513_v29  ;;  %v891_v15 = vmul.f32 %v6067_v30, %v2513_v29  ;;  %v6068_v6 = vld [vmem:[#allocation39_spill] sm:$0xff]  ;;  %v6070_v25 = vld [vmem:[#allocation32_spill] sm:$0xff]  ;;  %v6071_v59 = vld [vmem:[#allocation33_spill] sm:$0xff] }
  0x98   : > { %v892_v31 = vmul.f32 %v2513_v29, %v6068_v6  ;;  %v6069_v3 = vld [vmem:[#allocation43_spill] sm:$0xff]  ;;  %v894_v48 = vmul.f32 %v6070_v25, %v2513_v29  ;;  %v895_v44 = vmul.f32 %v6071_v59, %v2513_v29  ;;  %v6072_v38 = vld [vmem:[#allocation46_spill] sm:$0xff]  ;;  %v6074_v8 = vld [vmem:[#allocation36_spill] sm:$0xff]  ;;  %v3962_v25 = vadd.f32 %v872_v13, %v3826_v45 }
  0x99   : > { %v893_v34 = vmul.f32 %v2513_v29, %v6069_v3  ;;  %v896_v54 = vmul.f32 %v2513_v29, %v6072_v38  ;;  %v6073_v62 = vld [vmem:[#allocation47_spill] sm:$0xff]  ;;  %v898_v60 = vmul.f32 %v6074_v8, %v2513_v29  ;;  %v6075_v58 = vld [vmem:[#allocation37_spill] sm:$0xff]  ;;  %v6076_v61 = vld [vmem:[#allocation50_spill] sm:$0xff]  ;;  %v3965_v59 = vadd.f32 %v873_v56, %v3830_v57 }
  0x9a   : > { %v897_v35 = vmul.f32 %v2513_v29, %v6073_v62  ;;  %v899_v1 = vmul.f32 %v6075_v58, %v2513_v29  ;;  %v900_v18 = vmul.f32 %v2513_v29, %v6076_v61  ;;  %v6077_v14 = vld [vmem:[#allocation51_spill] sm:$0xff]  ;;  %v6078_v36 = vld [vmem:[#allocation40_spill] sm:$0xff]  ;;  %v6079_v21 = vld [vmem:[#allocation41_spill] sm:$0xff]  ;;  %v3968_v62 = vadd.f32 %v874_v46, %v3836_v63 }
  0x9b   : > { %v901_v30 = vmul.f32 %v2513_v29, %v6077_v14  ;;  %v902_v6 = vmul.f32 %v6078_v36, %v2513_v29  ;;  %v903_v3 = vmul.f32 %v6079_v21, %v2513_v29  ;;  %v3971_v8 = vadd.f32 %v875_v0, %v3840_v37 }
  0x9c   : > { %v3974_v61 = vadd.f32 %v876_v19, %v3843_v28  ;;  %v3977_v14 = vadd.f32 %v877_v5, %v3846_v11  ;;  %v3980_v29 = vadd.f32 %v878_v32, %v3849_v12  ;;  %v3983_v45 = vadd.f32 %v879_v40, %v3852_v27  ;;  %v6106_v5 = vld [vmem:[#allocation58_spill] sm:$0xff]  ;;  %v6108_v32 = vld [vmem:[#allocation59_spill] sm:$0xff]  ;;  %v6110_v40 = vld [vmem:[#allocation60_spill] sm:$0xff] }
  0x9d   : > { %v3986_v57 = vadd.f32 %v880_v47, %v3855_v10  ;;  %v3989_v63 = vadd.f32 %v881_v50, %v3858_v51  ;;  %v3992_v37 = vadd.f32 %v882_v4, %v3861_v52  ;;  %v3995_v28 = vadd.f32 %v883_v23, %v3864_v20  ;;  %v6112_v47 = vld [vmem:[#allocation61_spill] sm:$0xff]  ;;  %v6114_v50 = vld [vmem:[#allocation62_spill] sm:$0xff]  ;;  %v6116_v4 = vld [vmem:[#allocation7_spill] sm:$0xff] }
  0x9e   : > { %6080 = vst [vmem:[#allocation63_spill] sm:$0xff] %v3983_v45  ;;  %v3998_v11 = vadd.f32 %v884_v24, %v3867_v17  ;;  %v4001_v12 = vadd.f32 %v885_v55, %v3870_v16  ;;  %v4004_v27 = vadd.f32 %v886_v41, %v3873_v43  ;;  %v4007_v10 = vadd.f32 %v887_v22, %v3876_v53  ;;  %v6094_v43 = vld [vmem:[#allocation81_spill] sm:$0xff]  ;;  %v6096_v53 = vld [vmem:[#allocation3_spill] sm:$0xff]  ;;  %v6117_v23 = vld [vmem:[#allocation10_spill] sm:$0xff] }
  0x9f   : > { %6081 = vst [vmem:[#allocation64_spill] sm:$0xff] %v3986_v57  ;;  %6082 = vst [vmem:[#allocation65_spill] sm:$0xff] %v3989_v63  ;;  %v4010_v51 = vadd.f32 %v888_v26, %v3879_v7  ;;  %v4013_v52 = vadd.f32 %v889_v9, %v3882_v39  ;;  %v4016_v20 = vadd.f32 %v890_v33, %v3885_v2  ;;  %v6098_v7 = vld [vmem:[#allocation4_spill] sm:$0xff]  ;;  %v2514_v39 = vld [vmem:[%s5718_s1 + $0x4] ss:$0 sm:$0xff] }
  0xa0   : > { %6083 = vst [vmem:[#allocation66_spill] sm:$0xff] %v3992_v37  ;;  %6084 = vst [vmem:[#allocation67_spill] sm:$0xff] %v3995_v28  ;;  %v4019_v17 = vadd.f32 %v891_v15, %v3888_v42  ;;  %v4022_v16 = vadd.f32 %v892_v31, %v3891_v49  ;;  %v4025_v13 = vadd.f32 %v893_v34, %v6094_v43  ;;  %v6100_v2 = vld [vmem:[#allocation2_spill] sm:$0xff]  ;;  %v6102_v42 = vld [vmem:[#allocation56_spill] sm:$0xff] }
  0xa1   : > { %6085 = vst [vmem:[#allocation68_spill] sm:$0xff] %v3998_v11  ;;  %6086 = vst [vmem:[#allocation69_spill] sm:$0xff] %v4001_v12  ;;  %v4028_v56 = vadd.f32 %v894_v48, %v6096_v53  ;;  %v4031_v46 = vadd.f32 %v895_v44, %v6098_v7  ;;  %v4037_v0 = vadd.f32 %v896_v54, %v6100_v2  ;;  %v6104_v49 = vld [vmem:[#allocation57_spill] sm:$0xff]  ;;  %v6118_v48 = vld [vmem:[#allocation11_spill] sm:$0xff] }
  0xa2   : > { %6087 = vst [vmem:[#allocation70_spill] sm:$0xff] %v4004_v27  ;;  %6088 = vst [vmem:[#allocation71_spill] sm:$0xff] %v4007_v10  ;;  %v4040_v19 = vadd.f32 %v897_v35, %v6102_v42  ;;  %v4043_v22 = vadd.f32 %v898_v60, %v6104_v49  ;;  %v4046_v26 = vadd.f32 %v899_v1, %v6106_v5  ;;  %v6119_v1 = vld [vmem:[#allocation5_spill] sm:$0xff]  ;;  %v6120_v55 = vld [vmem:[#allocation6_spill] sm:$0xff] }
  0xa3   : > { %6089 = vst [vmem:[#allocation72_spill] sm:$0xff] %v4010_v51  ;;  %6090 = vst [vmem:[#allocation73_spill] sm:$0xff] %v4013_v52  ;;  %v4049_v9 = vadd.f32 %v900_v18, %v6108_v32  ;;  %v4052_v33 = vadd.f32 %v901_v30, %v6110_v40  ;;  %v4055_v15 = vadd.f32 %v902_v6, %v6112_v47  ;;  %v6121_v54 = vld [vmem:[#allocation12_spill] sm:$0xff]  ;;  %v6122_v30 = vld [vmem:[#allocation13_spill] sm:$0xff] }
  0xa4   : > { %6091 = vst [vmem:[#allocation74_spill] sm:$0xff] %v4016_v20  ;;  %6092 = vst [vmem:[#allocation75_spill] sm:$0xff] %v4019_v17  ;;  %v4058_v31 = vadd.f32 %v903_v3, %v6114_v50  ;;  %v941_v34 = vmul.f32 %v2514_v39, %v6116_v4  ;;  %v942_v60 = vmul.f32 %v2514_v39, %v6117_v23  ;;  %v6123_v6 = vld [vmem:[#allocation14_spill] sm:$0xff]  ;;  %v6124_v3 = vld [vmem:[#allocation15_spill] sm:$0xff] }
  0xa5   : > { %6093 = vst [vmem:[#allocation76_spill] sm:$0xff] %v4022_v16  ;;  %6095 = vst [vmem:[#allocation77_spill] sm:$0xff] %v4025_v13  ;;  %v943_v24 = vmul.f32 %v2514_v39, %v6118_v48  ;;  %v944_v44 = vmul.f32 %v6119_v1, %v2514_v39  ;;  %v945_v18 = vmul.f32 %v6120_v55, %v2514_v39  ;;  %v6125_v7 = vld [vmem:[#allocation8_spill] sm:$0xff]  ;;  %v6126_v42 = vld [vmem:[#allocation9_spill] sm:$0xff] }
  0xa6   : > { %6097 = vst [vmem:[#allocation78_spill] sm:$0xff] %v4028_v56  ;;  %6099 = vst [vmem:[#allocation79_spill] sm:$0xff] %v4031_v46  ;;  %v946_v41 = vmul.f32 %v2514_v39, %v6121_v54  ;;  %v4067_v35 = vmul.f32 %v2514_v39, %v6122_v30  ;;  %v4070_v43 = vmul.f32 %v2514_v39, %v6123_v6  ;;  %v6127_v5 = vld [vmem:[#allocation18_spill] sm:$0xff]  ;;  %v6128_v40 = vld [vmem:[#allocation19_spill] sm:$0xff]  ;;  %v1038_v27 = vrot.slane %v942_v60, 1 }
  0xa7   : > { %6101 = vst [vmem:[#allocation80_spill] sm:$0xff] %v4037_v0  ;;  %6103 = vst [vmem:[#allocation81_spill] sm:$0xff] %v4040_v19  ;;  %v4073_v53 = vmul.f32 %v2514_v39, %v6124_v3  ;;  %v4076_v2 = vmul.f32 %v6125_v7, %v2514_v39  ;;  %v4079_v49 = vmul.f32 %v6126_v42, %v2514_v39  ;;  %v6129_v50 = vld [vmem:[#allocation22_spill] sm:$0xff]  ;;  %v6130_v6 = vld [vmem:[#allocation23_spill] sm:$0xff]  ;;  %v1040_v11 = vrot.slane %v943_v24, 1 }
  0xa8   : > { %6105 = vst [vmem:[#allocation3_spill] sm:$0xff] %v4043_v22  ;;  %6107 = vst [vmem:[#allocation4_spill] sm:$0xff] %v4046_v26  ;;  %v4082_v32 = vmul.f32 %v2514_v39, %v6127_v5  ;;  %v4085_v47 = vmul.f32 %v2514_v39, %v6128_v40  ;;  %v4088_v30 = vmul.f32 %v2514_v39, %v6129_v50  ;;  %v6131_v3 = vld [vmem:[#allocation16_spill] sm:$0xff]  ;;  %v6132_v7 = vld [vmem:[#allocation17_spill] sm:$0xff]  ;;  %v1043_v28 = vrot.slane %v945_v18, 1 }
  0xa9   : > { %6109 = vst [vmem:[#allocation2_spill] sm:$0xff] %v4049_v9  ;;  %6111 = vst [vmem:[#allocation56_spill] sm:$0xff] %v4052_v33  ;;  %v4091_v54 = vmul.f32 %v2514_v39, %v6130_v6  ;;  %v4094_v55 = vmul.f32 %v6131_v3, %v2514_v39  ;;  %v4097_v1 = vmul.f32 %v6132_v7, %v2514_v39  ;;  %v6133_v42 = vld [vmem:[#allocation26_spill] sm:$0xff]  ;;  %v6134_v5 = vld [vmem:[#allocation27_spill] sm:$0xff]  ;;  %v1045_v57 = vrot.slane %v946_v41, 1 }
  0xaa   : > { %6113 = vst [vmem:[#allocation57_spill] sm:$0xff] %v4055_v15  ;;  %6115 = vst [vmem:[#allocation58_spill] sm:$0xff] %v4058_v31  ;;  %v4100_v48 = vmul.f32 %v2514_v39, %v6133_v42  ;;  %v4103_v23 = vmul.f32 %v2514_v39, %v6134_v5  ;;  %v6135_v40 = vld [vmem:[#allocation28_spill] sm:$0xff]  ;;  %v6136_v50 = vld [vmem:[#allocation29_spill] sm:$0xff]  ;;  %v4187_v18 = vmul.f32 %v6079_v21, %v2514_v39 }
  0xab   : > { %v4106_v4 = vmul.f32 %v2514_v39, %v6135_v40  ;;  %v4109_v31 = vmul.f32 %v2514_v39, %v6136_v50  ;;  %v6137_v6 = vld [vmem:[#allocation20_spill] sm:$0xff]  ;;  %v6138_v3 = vld [vmem:[#allocation21_spill] sm:$0xff]  ;;  %v6139_v7 = vld [vmem:[#allocation30_spill] sm:$0xff]  ;;  %v4205_v21 = vsel %vm476_vm0, %v1043_v28, %v1045_v57 }
  0xac   : > { %v4112_v15 = vmul.f32 %v6137_v6, %v2514_v39  ;;  %v4115_v33 = vmul.f32 %v6138_v3, %v2514_v39  ;;  %v4118_v9 = vmul.f32 %v2514_v39, %v6139_v7  ;;  %v6140_v42 = vld [vmem:[#allocation31_spill] sm:$0xff]  ;;  %v6141_v5 = vld [vmem:[#allocation34_spill] sm:$0xff]  ;;  %v6143_v50 = vld [vmem:[#allocation24_spill] sm:$0xff]  ;;  %v1067_v57 = vrot.slane %v4103_v23, 1 }
  0xad   : > { %v4121_v26 = vmul.f32 %v2514_v39, %v6140_v42  ;;  %v4124_v22 = vmul.f32 %v2514_v39, %v6141_v5  ;;  %v6142_v40 = vld [vmem:[#allocation35_spill] sm:$0xff]  ;;  %v4130_v0 = vmul.f32 %v6143_v50, %v2514_v39  ;;  %v6144_v6 = vld [vmem:[#allocation25_spill] sm:$0xff]  ;;  %v6145_v3 = vld [vmem:[#allocation38_spill] sm:$0xff] }
  0xae   : > { %v4127_v19 = vmul.f32 %v2514_v39, %v6142_v40  ;;  %v4133_v46 = vmul.f32 %v6144_v6, %v2514_v39  ;;  %v4136_v56 = vmul.f32 %v2514_v39, %v6145_v3  ;;  %v6146_v7 = vld [vmem:[#allocation39_spill] sm:$0xff]  ;;  %v6148_v5 = vld [vmem:[#allocation44_spill] sm:$0xff]  ;;  %v6150_v50 = vld [vmem:[#allocation33_spill] sm:$0xff]  ;;  %v4157_v3 = vmul.f32 %v2514_v39, %v6072_v38 }
  0xaf   : > { %v4139_v13 = vmul.f32 %v2514_v39, %v6146_v7  ;;  %v6147_v42 = vld [vmem:[#allocation43_spill] sm:$0xff]  ;;  %v4145_v17 = vmul.f32 %v2514_v39, %v6148_v5  ;;  %v6149_v40 = vld [vmem:[#allocation32_spill] sm:$0xff]  ;;  %v4151_v52 = vmul.f32 %v6150_v50, %v2514_v39  ;;  %v6151_v6 = vld [vmem:[#allocation45_spill] sm:$0xff] }
  0xb0   : > { %v4142_v16 = vmul.f32 %v2514_v39, %v6147_v42  ;;  %v4148_v20 = vmul.f32 %v6149_v40, %v2514_v39  ;;  %v4154_v51 = vmul.f32 %v2514_v39, %v6151_v6  ;;  %v6152_v7 = vld [vmem:[#allocation47_spill] sm:$0xff]  ;;  %v1037_v42 = vrot.slane %v941_v34, 1  ;;  %v6153_v12 = vld [vmem:[#allocation48_spill] sm:$0xff]  ;;  %v6155_v63 = vld [vmem:[#allocation49_spill] sm:$0xff] }
  0xb1   : > { %v4160_v10 = vmul.f32 %v2514_v39, %v6152_v7  ;;  %v4163_v5 = vmul.f32 %v2514_v39, %v6153_v12  ;;  %v1042_v40 = vrot.slane %v944_v44, 1  ;;  %v6154_v37 = vld [vmem:[#allocation36_spill] sm:$0xff]  ;;  %v4169_v6 = vmul.f32 %v6075_v58, %v2514_v39  ;;  %v6156_v7 = vld [vmem:[#allocation50_spill] sm:$0xff]  ;;  %v6157_v34 = vld [vmem:[#allocation51_spill] sm:$0xff] }
  0xb2   : > { %v4166_v50 = vmul.f32 %v6154_v37, %v2514_v39  ;;  %v4172_v38 = vmul.f32 %v2514_v39, %v6155_v63  ;;  %v4175_v45 = vmul.f32 %v2514_v39, %v6156_v7  ;;  %v4178_v60 = vmul.f32 %v2514_v39, %v6157_v34  ;;  %v6158_v12 = vld [vmem:[#allocation52_spill] sm:$0xff]  ;;  %v6159_v58 = vld [vmem:[#allocation53_spill] sm:$0xff] }
  0xb3   : > { %v4181_v24 = vmul.f32 %v2514_v39, %v6158_v12  ;;  %v4184_v44 = vmul.f32 %v6078_v36, %v2514_v39  ;;  %v4190_v37 = vmul.f32 %v2514_v39, %v6159_v58  ;;  %v4193_v41 = vsel %vm476_vm0, %v1037_v42, %v1038_v27 }
  0xb4   : > { %v1047_v7 = vrot.slane %v4067_v35, 1  ;;  %v4197_v34 = vsel %vm476_vm0, %v1038_v27, %v1040_v11  ;;  %v4200_v12 = vsel %vm476_vm0, %v1042_v40, %v1043_v28  ;;  %v1048_v36 = vrot.slane %v4070_v43, 1 }
  0xb5   : > { %v1050_v63 = vrot.slane %v4073_v53, 1  ;;  %v1052_v39 = vrot.slane %v4076_v2, 1  ;;  %v1053_v42 = vrot.slane %v4079_v49, 1  ;;  %v1055_v58 = vrot.slane %v4082_v32, 1 }
  0xb6   : > { %v1057_v35 = vrot.slane %v4085_v47, 1  ;;  %v1058_v11 = vrot.slane %v4088_v30, 1  ;;  %v1060_v27 = vrot.slane %v4091_v54, 1  ;;  %v1062_v40 = vrot.slane %v4094_v55, 1 }
  0xb7   : > { %v1063_v43 = vrot.slane %v4097_v1, 1  ;;  %v1065_v53 = vrot.slane %v4100_v48, 1  ;;  %v1068_v28 = vrot.slane %v4106_v4, 1  ;;  %v1070_v2 = vrot.slane %v4109_v31, 1 }
  0xb8   : > { %v1072_v49 = vrot.slane %v4112_v15, 1  ;;  %v1073_v32 = vrot.slane %v4115_v33, 1  ;;  %v1075_v30 = vrot.slane %v4118_v9, 1  ;;  %v1049_v54 = vsel %vm476_vm0, %v1047_v7, %v1048_v36 }
  0xb9   : > { %v1077_v55 = vrot.slane %v4121_v26, 1  ;;  %v1078_v1 = vrot.slane %v4124_v22, 1  ;;  %v1080_v48 = vrot.slane %v4127_v19, 1  ;;  %v1051_v23 = vsel %vm476_vm0, %v1048_v36, %v1050_v63 }
  0xba   : > { %v1054_v4 = vsel %vm476_vm0, %v1052_v39, %v1053_v42  ;;  %v1056_v31 = vsel %vm476_vm0, %v1053_v42, %v1055_v58  ;;  %v1059_v15 = vsel %vm476_vm0, %v1057_v35, %v1058_v11  ;;  %v1061_v33 = vsel %vm476_vm0, %v1058_v11, %v1060_v27 }
  0xbb   : > { %v1064_v9 = vsel %vm476_vm0, %v1062_v40, %v1063_v43  ;;  %v1066_v7 = vsel %vm476_vm0, %v1063_v43, %v1065_v53  ;;  %v1069_v26 = vsel %vm476_vm0, %v1067_v57, %v1068_v28  ;;  %v1071_v22 = vsel %vm476_vm0, %v1068_v28, %v1070_v2 }
  0xbc   : > { %v1074_v19 = vsel %vm476_vm0, %v1072_v49, %v1073_v32  ;;  %v1076_v36 = vsel %vm476_vm0, %v1073_v32, %v1075_v30  ;;  %v1082_v63 = vrot.slane %v4130_v0, 1  ;;  %v1079_v58 = vsel %vm476_vm0, %v1077_v55, %v1078_v1 }
  0xbd   : > { %v1081_v47 = vsel %vm476_vm0, %v1078_v1, %v1080_v48  ;;  %v1083_v39 = vrot.slane %v4133_v46, 1  ;;  %v1085_v42 = vrot.slane %v4136_v56, 1  ;;  %v1087_v35 = vrot.slane %v4139_v13, 1 }
  0xbe   : > { %v1088_v11 = vrot.slane %v4142_v16, 1  ;;  %v1090_v27 = vrot.slane %v4145_v17, 1  ;;  %v1092_v40 = vrot.slane %v4148_v20, 1  ;;  %v1093_v43 = vrot.slane %v4151_v52, 1 }
  0xbf   : > { %v1095_v0 = vrot.slane %v4154_v51, 1  ;;  %v1097_v53 = vrot.slane %v4157_v3, 1  ;;  %v1098_v57 = vrot.slane %v4160_v10, 1  ;;  %v1100_v46 = vrot.slane %v4163_v5, 1 }
  0xc0   : > { %v1102_v56 = vrot.slane %v4166_v50, 1  ;;  %v1103_v13 = vrot.slane %v4169_v6, 1  ;;  %v1105_v16 = vrot.slane %v4172_v38, 1  ;;  %v1084_v17 = vsel %vm476_vm0, %v1082_v63, %v1083_v39 }
  0xc1   : > { %v1107_v20 = vrot.slane %v4175_v45, 1  ;;  %v1108_v52 = vrot.slane %v4178_v60, 1  ;;  %v1110_v51 = vrot.slane %v4181_v24, 1  ;;  %v1086_v3 = vsel %vm476_vm0, %v1083_v39, %v1085_v42  ;;  %v6162_v39 = vld [vmem:[#allocation64_spill] sm:$0xff] }
  0xc2   : > { %v1112_v10 = vrot.slane %v4184_v44, 1  ;;  %v1113_v5 = vrot.slane %v4187_v18, 1  ;;  %v1115_v50 = vrot.slane %v4190_v37, 1  ;;  %v1089_v6 = vsel %vm476_vm0, %v1087_v35, %v1088_v11 }
  0xc3   : > { %v1091_v38 = vsel %vm476_vm0, %v1088_v11, %v1090_v27  ;;  %v1094_v28 = vsel %vm476_vm0, %v1092_v40, %v1093_v43  ;;  %v1096_v45 = vsel %vm476_vm0, %v1093_v43, %v1095_v0  ;;  %v1099_v60 = vsel %vm476_vm0, %v1097_v53, %v1098_v57 }
  0xc4   : > { %v1101_v24 = vsel %vm476_vm0, %v1098_v57, %v1100_v46  ;;  %v1104_v2 = vsel %vm476_vm0, %v1102_v56, %v1103_v13  ;;  %v1106_v44 = vsel %vm476_vm0, %v1103_v13, %v1105_v16  ;;  %v1109_v18 = vsel %vm476_vm0, %v1107_v20, %v1108_v52  ;;  %v6194_v13 = vld [vmem:[#allocation80_spill] sm:$0xff] }
  0xc5   : > { %v1111_v37 = vsel %vm476_vm0, %v1108_v52, %v1110_v51  ;;  %v4274_v49 = vadd.f32 %v4193_v41, %v3962_v25  ;;  %v4278_v32 = vadd.f32 %v4197_v34, %v3965_v59  ;;  %v1114_v30 = vsel %vm476_vm0, %v1112_v10, %v1113_v5  ;;  %v6160_v34 = vld [vmem:[#allocation63_spill] sm:$0xff] }
  0xc6   : > { %v1116_v55 = vsel %vm476_vm0, %v1113_v5, %v1115_v50  ;;  %v4284_v1 = vadd.f32 %v4200_v12, %v3968_v62  ;;  %v4288_v48 = vadd.f32 %v4205_v21, %v3971_v8  ;;  %v4291_v63 = vadd.f32 %v1049_v54, %v3974_v61  ;;  %v6164_v62 = vld [vmem:[#allocation65_spill] sm:$0xff]  ;;  %v6166_v21 = vld [vmem:[#allocation66_spill] sm:$0xff]  ;;  %v6168_v61 = vld [vmem:[#allocation67_spill] sm:$0xff] }
  0xc7   : > { %v4294_v25 = vadd.f32 %v1051_v23, %v3977_v14  ;;  %v4297_v59 = vadd.f32 %v1054_v4, %v3980_v29  ;;  %v4300_v41 = vadd.f32 %v1056_v31, %v6160_v34  ;;  %v4303_v42 = vadd.f32 %v1059_v15, %v6162_v39  ;;  %v6170_v14 = vld [vmem:[#allocation68_spill] sm:$0xff]  ;;  %v6172_v29 = vld [vmem:[#allocation69_spill] sm:$0xff]  ;;  %v6174_v31 = vld [vmem:[#allocation70_spill] sm:$0xff] }
  0xc8   : > { %v4306_v12 = vadd.f32 %v1061_v33, %v6164_v62  ;;  %v4309_v8 = vadd.f32 %v1064_v9, %v6166_v21  ;;  %v4312_v54 = vadd.f32 %v1066_v7, %v6168_v61  ;;  %v4315_v23 = vadd.f32 %v1069_v26, %v6170_v14  ;;  %v6176_v15 = vld [vmem:[#allocation71_spill] sm:$0xff]  ;;  %v6178_v33 = vld [vmem:[#allocation72_spill] sm:$0xff]  ;;  %v6180_v9 = vld [vmem:[#allocation73_spill] sm:$0xff] }
  0xc9   : > { %6161 = vst [vmem:[#allocation59_spill] sm:$0xff] %v4300_v41  ;;  %6163 = vst [vmem:[#allocation60_spill] sm:$0xff] %v4303_v42  ;;  %v4318_v4 = vadd.f32 %v1071_v22, %v6172_v29  ;;  %v4321_v35 = vadd.f32 %v1074_v19, %v6174_v31  ;;  %v4324_v11 = vadd.f32 %v1076_v36, %v6176_v15  ;;  %v6182_v7 = vld [vmem:[#allocation74_spill] sm:$0xff]  ;;  %v6184_v26 = vld [vmem:[#allocation75_spill] sm:$0xff] }
  0xca   : > { %6165 = vst [vmem:[#allocation61_spill] sm:$0xff] %v4306_v12  ;;  %6167 = vst [vmem:[#allocation62_spill] sm:$0xff] %v4309_v8  ;;  %v4327_v27 = vadd.f32 %v1079_v58, %v6178_v33  ;;  %v4330_v40 = vadd.f32 %v1081_v47, %v6180_v9  ;;  %v4333_v43 = vadd.f32 %v1084_v17, %v6182_v7  ;;  %v6186_v22 = vld [vmem:[#allocation76_spill] sm:$0xff]  ;;  %v6188_v19 = vld [vmem:[#allocation77_spill] sm:$0xff] }
  0xcb   : > { %6169 = vst [vmem:[#allocation63_spill] sm:$0xff] %v4312_v54  ;;  %6171 = vst [vmem:[#allocation64_spill] sm:$0xff] %v4315_v23  ;;  %v4336_v0 = vadd.f32 %v1086_v3, %v6184_v26  ;;  %v4339_v53 = vadd.f32 %v1089_v6, %v6186_v22  ;;  %v4342_v57 = vadd.f32 %v1091_v38, %v6188_v19  ;;  %v6190_v36 = vld [vmem:[#allocation78_spill] sm:$0xff]  ;;  %v6192_v58 = vld [vmem:[#allocation79_spill] sm:$0xff] }
  0xcc   : > { %6173 = vst [vmem:[#allocation65_spill] sm:$0xff] %v4318_v4  ;;  %6175 = vst [vmem:[#allocation66_spill] sm:$0xff] %v4321_v35  ;;  %v4345_v46 = vadd.f32 %v1094_v28, %v6190_v36  ;;  %v4348_v56 = vadd.f32 %v1096_v45, %v6192_v58  ;;  %v2515_v47 = vld [vmem:[%s5718_s1 + $0x5] ss:$0 sm:$0xff]  ;;  %v4354_v16 = vadd.f32 %v1099_v60, %v6194_v13  ;;  %v6196_v17 = vld [vmem:[#allocation81_spill] sm:$0xff] }
  0xcd   : > { %6177 = vst [vmem:[#allocation67_spill] sm:$0xff] %v4324_v11  ;;  %6179 = vst [vmem:[#allocation68_spill] sm:$0xff] %v4327_v27  ;;  %v4357_v20 = vadd.f32 %v1101_v24, %v6196_v17  ;;  %v6198_v52 = vld [vmem:[#allocation3_spill] sm:$0xff]  ;;  %v6200_v3 = vld [vmem:[#allocation4_spill] sm:$0xff] }
  0xce   : > { %6181 = vst [vmem:[#allocation69_spill] sm:$0xff] %v4330_v40  ;;  %6183 = vst [vmem:[#allocation70_spill] sm:$0xff] %v4333_v43  ;;  %v4360_v51 = vadd.f32 %v1104_v2, %v6198_v52  ;;  %v4363_v10 = vadd.f32 %v1106_v44, %v6200_v3  ;;  %v6202_v5 = vld [vmem:[#allocation2_spill] sm:$0xff]  ;;  %v6204_v6 = vld [vmem:[#allocation56_spill] sm:$0xff] }
  0xcf   : > { %6185 = vst [vmem:[#allocation71_spill] sm:$0xff] %v4336_v0  ;;  %6187 = vst [vmem:[#allocation72_spill] sm:$0xff] %v4339_v53  ;;  %v4366_v50 = vadd.f32 %v1109_v18, %v6202_v5  ;;  %v4369_v38 = vadd.f32 %v1111_v37, %v6204_v6  ;;  %v6206_v28 = vld [vmem:[#allocation57_spill] sm:$0xff]  ;;  %v6208_v60 = vld [vmem:[#allocation58_spill] sm:$0xff] }
  0xd0   : > { %6189 = vst [vmem:[#allocation73_spill] sm:$0xff] %v4342_v57  ;;  %6191 = vst [vmem:[#allocation74_spill] sm:$0xff] %v4345_v46  ;;  %v4372_v45 = vadd.f32 %v1114_v30, %v6206_v28  ;;  %v4375_v34 = vadd.f32 %v1116_v55, %v6208_v60  ;;  %v6210_v24 = vld [vmem:[#allocation7_spill] sm:$0xff]  ;;  %v6211_v62 = vld [vmem:[#allocation10_spill] sm:$0xff] }
  0xd1   : > { %6193 = vst [vmem:[#allocation75_spill] sm:$0xff] %v4348_v56  ;;  %6195 = vst [vmem:[#allocation76_spill] sm:$0xff] %v4354_v16  ;;  %v1186_v39 = vmul.f32 %v2515_v47, %v6210_v24  ;;  %v1187_v2 = vmul.f32 %v2515_v47, %v6211_v62  ;;  %v6212_v21 = vld [vmem:[#allocation11_spill] sm:$0xff]  ;;  %v6213_v44 = vld [vmem:[#allocation5_spill] sm:$0xff] }
  0xd2   : > { %6197 = vst [vmem:[#allocation77_spill] sm:$0xff] %v4357_v20  ;;  %6199 = vst [vmem:[#allocation78_spill] sm:$0xff] %v4360_v51  ;;  %v1188_v61 = vmul.f32 %v2515_v47, %v6212_v21  ;;  %v1189_v14 = vmul.f32 %v6213_v44, %v2515_v47  ;;  %v6214_v29 = vld [vmem:[#allocation6_spill] sm:$0xff]  ;;  %v6215_v31 = vld [vmem:[#allocation12_spill] sm:$0xff] }
  0xd3   : > { %6201 = vst [vmem:[#allocation79_spill] sm:$0xff] %v4363_v10  ;;  %6203 = vst [vmem:[#allocation80_spill] sm:$0xff] %v4366_v50  ;;  %v1190_v18 = vmul.f32 %v6214_v29, %v2515_v47  ;;  %v1191_v15 = vmul.f32 %v2515_v47, %v6215_v31  ;;  %v6216_v37 = vld [vmem:[#allocation13_spill] sm:$0xff]  ;;  %v6217_v30 = vld [vmem:[#allocation14_spill] sm:$0xff]  ;;  %v1283_v40 = vrot.slane %v1187_v2, 2 }
  0xd4   : > { %6205 = vst [vmem:[#allocation81_spill] sm:$0xff] %v4369_v38  ;;  %6207 = vst [vmem:[#allocation3_spill] sm:$0xff] %v4372_v45  ;;  %v4384_v33 = vmul.f32 %v2515_v47, %v6216_v37  ;;  %v4387_v9 = vmul.f32 %v2515_v47, %v6217_v30  ;;  %v6218_v55 = vld [vmem:[#allocation15_spill] sm:$0xff]  ;;  %v6219_v26 = vld [vmem:[#allocation8_spill] sm:$0xff]  ;;  %v1285_v11 = vrot.slane %v1188_v61, 2 }
  0xd5   : > { %6209 = vst [vmem:[#allocation4_spill] sm:$0xff] %v4375_v34  ;;  %v4390_v7 = vmul.f32 %v2515_v47, %v6218_v55  ;;  %v4393_v22 = vmul.f32 %v6219_v26, %v2515_v47  ;;  %v6220_v19 = vld [vmem:[#allocation9_spill] sm:$0xff]  ;;  %v6221_v58 = vld [vmem:[#allocation18_spill] sm:$0xff]  ;;  %v6222_v17 = vld [vmem:[#allocation19_spill] sm:$0xff]  ;;  %v1288_v35 = vrot.slane %v1190_v18, 2  ;;  %v1290_v8 = vrot.slane %v1191_v15, 2 }
  0xd6   : > { %v4396_v36 = vmul.f32 %v6220_v19, %v2515_v47  ;;  %v4399_v13 = vmul.f32 %v2515_v47, %v6221_v58  ;;  %v4402_v52 = vmul.f32 %v2515_v47, %v6222_v17  ;;  %v6223_v3 = vld [vmem:[#allocation22_spill] sm:$0xff]  ;;  %v6224_v6 = vld [vmem:[#allocation23_spill] sm:$0xff]  ;;  %v6225_v60 = vld [vmem:[#allocation16_spill] sm:$0xff] }
  0xd7   : > { %v4405_v5 = vmul.f32 %v2515_v47, %v6223_v3  ;;  %v4408_v28 = vmul.f32 %v2515_v47, %v6224_v6  ;;  %v4411_v24 = vmul.f32 %v6225_v60, %v2515_v47  ;;  %v6226_v62 = vld [vmem:[#allocation17_spill] sm:$0xff]  ;;  %v6227_v55 = vld [vmem:[#allocation26_spill] sm:$0xff]  ;;  %v6228_v58 = vld [vmem:[#allocation27_spill] sm:$0xff] }
  0xd8   : > { %v4414_v21 = vmul.f32 %v6226_v62, %v2515_v47  ;;  %v4417_v31 = vmul.f32 %v2515_v47, %v6227_v55  ;;  %v4420_v19 = vmul.f32 %v2515_v47, %v6228_v58  ;;  %v6229_v17 = vld [vmem:[#allocation28_spill] sm:$0xff]  ;;  %v6230_v3 = vld [vmem:[#allocation29_spill] sm:$0xff]  ;;  %v6233_v62 = vld [vmem:[#allocation30_spill] sm:$0xff] }
  0xd9   : > { %v4423_v26 = vmul.f32 %v2515_v47, %v6229_v17  ;;  %v4426_v30 = vmul.f32 %v2515_v47, %v6230_v3  ;;  %v6231_v6 = vld [vmem:[#allocation20_spill] sm:$0xff]  ;;  %v6232_v60 = vld [vmem:[#allocation21_spill] sm:$0xff]  ;;  %v4435_v44 = vmul.f32 %v2515_v47, %v6233_v62  ;;  %v6234_v55 = vld [vmem:[#allocation31_spill] sm:$0xff] }
  0xda   : > { %v4429_v37 = vmul.f32 %v6231_v6, %v2515_v47  ;;  %v4432_v29 = vmul.f32 %v6232_v60, %v2515_v47  ;;  %v4438_v34 = vmul.f32 %v2515_v47, %v6234_v55  ;;  %v6235_v58 = vld [vmem:[#allocation34_spill] sm:$0xff]  ;;  %v6236_v17 = vld [vmem:[#allocation35_spill] sm:$0xff]  ;;  %v6237_v3 = vld [vmem:[#allocation24_spill] sm:$0xff] }
  0xdb   : > { %v4441_v45 = vmul.f32 %v2515_v47, %v6235_v58  ;;  %v4444_v38 = vmul.f32 %v2515_v47, %v6236_v17  ;;  %v4447_v50 = vmul.f32 %v6237_v3, %v2515_v47  ;;  %v6238_v6 = vld [vmem:[#allocation25_spill] sm:$0xff]  ;;  %v6239_v60 = vld [vmem:[#allocation38_spill] sm:$0xff]  ;;  %v6240_v62 = vld [vmem:[#allocation39_spill] sm:$0xff] }
  0xdc   : > { %v4450_v10 = vmul.f32 %v6238_v6, %v2515_v47  ;;  %v4453_v51 = vmul.f32 %v2515_v47, %v6239_v60  ;;  %v4456_v20 = vmul.f32 %v2515_v47, %v6240_v62  ;;  %v6241_v55 = vld [vmem:[#allocation43_spill] sm:$0xff]  ;;  %v6242_v58 = vld [vmem:[#allocation44_spill] sm:$0xff]  ;;  %v6244_v3 = vld [vmem:[#allocation33_spill] sm:$0xff] }
  0xdd   : > { %v4459_v16 = vmul.f32 %v2515_v47, %v6241_v55  ;;  %v4462_v56 = vmul.f32 %v2515_v47, %v6242_v58  ;;  %v6243_v17 = vld [vmem:[#allocation32_spill] sm:$0xff]  ;;  %v4468_v57 = vmul.f32 %v6244_v3, %v2515_v47  ;;  %v6245_v6 = vld [vmem:[#allocation45_spill] sm:$0xff]  ;;  %v6246_v60 = vld [vmem:[#allocation46_spill] sm:$0xff]  ;;  %v1282_v55 = vrot.slane %v1186_v39, 2 }
  0xde   : > { %v4465_v46 = vmul.f32 %v6243_v17, %v2515_v47  ;;  %v4471_v53 = vmul.f32 %v2515_v47, %v6245_v6  ;;  %v4474_v0 = vmul.f32 %v2515_v47, %v6246_v60  ;;  %v6247_v62 = vld [vmem:[#allocation47_spill] sm:$0xff]  ;;  %v6248_v27 = vld [vmem:[#allocation48_spill] sm:$0xff]  ;;  %v1287_v17 = vrot.slane %v1189_v14, 2  ;;  %v6250_v23 = vld [vmem:[#allocation37_spill] sm:$0xff] }
  0xdf   : > { %v4477_v43 = vmul.f32 %v2515_v47, %v6247_v62  ;;  %v4480_v58 = vmul.f32 %v2515_v47, %v6248_v27  ;;  %v6249_v4 = vld [vmem:[#allocation36_spill] sm:$0xff]  ;;  %v4486_v6 = vmul.f32 %v6250_v23, %v2515_v47  ;;  %v6251_v54 = vld [vmem:[#allocation49_spill] sm:$0xff]  ;;  %v6252_v62 = vld [vmem:[#allocation50_spill] sm:$0xff]  ;;  %v4510_v15 = vsel %vm722_vm1, %v1282_v55, %v1283_v40 }
  0xe0   : > { %v4483_v3 = vmul.f32 %v6249_v4, %v2515_v47  ;;  %v4489_v60 = vmul.f32 %v2515_v47, %v6251_v54  ;;  %v4492_v12 = vmul.f32 %v2515_v47, %v6252_v62  ;;  %v6253_v39 = vld [vmem:[#allocation51_spill] sm:$0xff]  ;;  %v6254_v27 = vld [vmem:[#allocation52_spill] sm:$0xff]  ;;  %v6256_v4 = vld [vmem:[#allocation41_spill] sm:$0xff]  ;;  %v1292_v54 = vrot.slane %v4384_v33, 2 }
  0xe1   : > { %v4495_v2 = vmul.f32 %v2515_v47, %v6253_v39  ;;  %v4498_v61 = vmul.f32 %v2515_v47, %v6254_v27  ;;  %v6255_v14 = vld [vmem:[#allocation40_spill] sm:$0xff]  ;;  %v4504_v42 = vmul.f32 %v6256_v4, %v2515_v47  ;;  %v6257_v23 = vld [vmem:[#allocation53_spill] sm:$0xff]  ;;  %v4514_v39 = vsel %vm722_vm1, %v1283_v40, %v1285_v11 }
  0xe2   : > { %v4501_v18 = vmul.f32 %v6255_v14, %v2515_v47  ;;  %v4507_v41 = vmul.f32 %v2515_v47, %v6257_v23  ;;  %v4517_v27 = vsel %vm722_vm1, %v1287_v17, %v1288_v35  ;;  %v1293_v14 = vrot.slane %v4387_v9, 2 }
  0xe3   : > { %v1295_v62 = vrot.slane %v4390_v7, 2  ;;  %v4522_v4 = vsel %vm722_vm1, %v1288_v35, %v1290_v8  ;;  %v1297_v47 = vrot.slane %v4393_v22, 2  ;;  %v1298_v55 = vrot.slane %v4396_v36, 2 }
  0xe4   : > { %v1300_v23 = vrot.slane %v4399_v13, 2  ;;  %v1302_v33 = vrot.slane %v4402_v52, 2  ;;  %v1303_v11 = vrot.slane %v4405_v5, 2  ;;  %v1305_v40 = vrot.slane %v4408_v28, 2 }
  0xe5   : > { %v1307_v17 = vrot.slane %v4411_v24, 2  ;;  %v1308_v9 = vrot.slane %v4414_v21, 2  ;;  %v1310_v7 = vrot.slane %v4417_v31, 2  ;;  %v1312_v8 = vrot.slane %v4420_v19, 2 }
  0xe6   : > { %v1313_v35 = vrot.slane %v4423_v26, 2  ;;  %v1315_v22 = vrot.slane %v4426_v30, 2  ;;  %v1317_v36 = vrot.slane %v4429_v37, 2  ;;  %v1318_v13 = vrot.slane %v4432_v29, 2 }
  0xe7   : > { %v1320_v52 = vrot.slane %v4435_v44, 2  ;;  %v1294_v5 = vsel %vm722_vm1, %v1292_v54, %v1293_v14  ;;  %v1322_v28 = vrot.slane %v4438_v34, 2  ;;  %v1323_v24 = vrot.slane %v4441_v45, 2 }
  0xe8   : > { %v1325_v31 = vrot.slane %v4444_v38, 2  ;;  %v1296_v19 = vsel %vm722_vm1, %v1293_v14, %v1295_v62  ;;  %v1299_v26 = vsel %vm722_vm1, %v1297_v47, %v1298_v55  ;;  %v1301_v30 = vsel %vm722_vm1, %v1298_v55, %v1300_v23 }
  0xe9   : > { %v1304_v37 = vsel %vm722_vm1, %v1302_v33, %v1303_v11  ;;  %v1306_v29 = vsel %vm722_vm1, %v1303_v11, %v1305_v40  ;;  %v1309_v44 = vsel %vm722_vm1, %v1307_v17, %v1308_v9  ;;  %v1311_v54 = vsel %vm722_vm1, %v1308_v9, %v1310_v7 }
  0xea   : > { %v1314_v34 = vsel %vm722_vm1, %v1312_v8, %v1313_v35  ;;  %v1316_v45 = vsel %vm722_vm1, %v1313_v35, %v1315_v22  ;;  %v1319_v38 = vsel %vm722_vm1, %v1317_v36, %v1318_v13  ;;  %v1321_v62 = vsel %vm722_vm1, %v1318_v13, %v1320_v52 }
  0xeb   : > { %v1327_v21 = vrot.slane %v4447_v50, 2  ;;  %v1324_v23 = vsel %vm722_vm1, %v1322_v28, %v1323_v24  ;;  %v1326_v14 = vsel %vm722_vm1, %v1323_v24, %v1325_v31  ;;  %v1328_v47 = vrot.slane %v4450_v10, 2 }
  0xec   : > { %v1330_v55 = vrot.slane %v4453_v51, 2  ;;  %v1332_v33 = vrot.slane %v4456_v20, 2  ;;  %v1333_v11 = vrot.slane %v4459_v16, 2  ;;  %v1335_v40 = vrot.slane %v4462_v56, 2 }
  0xed   : > { %v1337_v17 = vrot.slane %v4465_v46, 2  ;;  %v1338_v9 = vrot.slane %v4468_v57, 2  ;;  %v1340_v50 = vrot.slane %v4471_v53, 2  ;;  %v1342_v7 = vrot.slane %v4474_v0, 2 }
  0xee   : > { %v1343_v8 = vrot.slane %v4477_v43, 2  ;;  %v1345_v10 = vrot.slane %v4480_v58, 2  ;;  %v1347_v51 = vrot.slane %v4483_v3, 2  ;;  %v1348_v20 = vrot.slane %v4486_v6, 2 }
  0xef   : > { %v1350_v16 = vrot.slane %v4489_v60, 2  ;;  %v1329_v56 = vsel %vm722_vm1, %v1327_v21, %v1328_v47  ;;  %v1352_v46 = vrot.slane %v4492_v12, 2  ;;  %v1353_v57 = vrot.slane %v4495_v2, 2 }
  0xf0   : > { %v1355_v53 = vrot.slane %v4498_v61, 2  ;;  %v1331_v0 = vsel %vm722_vm1, %v1328_v47, %v1330_v55  ;;  %v1357_v43 = vrot.slane %v4501_v18, 2  ;;  %v1358_v58 = vrot.slane %v4504_v42, 2  ;;  %v6259_v47 = vld [vmem:[#allocation60_spill] sm:$0xff] }
  0xf1   : > { %v1360_v3 = vrot.slane %v4507_v41, 2  ;;  %v1334_v6 = vsel %vm722_vm1, %v1332_v33, %v1333_v11  ;;  %v1336_v60 = vsel %vm722_vm1, %v1333_v11, %v1335_v40  ;;  %v1339_v35 = vsel %vm722_vm1, %v1337_v17, %v1338_v9 }
  0xf2   : > { %v1341_v12 = vsel %vm722_vm1, %v1338_v9, %v1340_v50  ;;  %v1344_v2 = vsel %vm722_vm1, %v1342_v7, %v1343_v8  ;;  %v1346_v61 = vsel %vm722_vm1, %v1343_v8, %v1345_v10  ;;  %v1349_v22 = vsel %vm722_vm1, %v1347_v51, %v1348_v20 }
  0xf3   : > { %v1351_v18 = vsel %vm722_vm1, %v1348_v20, %v1350_v16  ;;  %v1354_v42 = vsel %vm722_vm1, %v1352_v46, %v1353_v57  ;;  %v1356_v41 = vsel %vm722_vm1, %v1353_v57, %v1355_v53  ;;  %v4591_v36 = vadd.f32 %v4510_v15, %v4274_v49  ;;  %v6278_v20 = vld [vmem:[#allocation76_spill] sm:$0xff]  ;;  %v6282_v57 = vld [vmem:[#allocation78_spill] sm:$0xff] }
  0xf4   : > { %v4595_v13 = vadd.f32 %v4514_v39, %v4278_v32  ;;  %v1359_v52 = vsel %vm722_vm1, %v1357_v43, %v1358_v58  ;;  %v1361_v28 = vsel %vm722_vm1, %v1358_v58, %v1360_v3  ;;  %v4601_v24 = vadd.f32 %v4517_v27, %v4284_v1  ;;  %v6258_v39 = vld [vmem:[#allocation59_spill] sm:$0xff]  ;;  %v6260_v1 = vld [vmem:[#allocation61_spill] sm:$0xff]  ;;  %v6286_v58 = vld [vmem:[#allocation80_spill] sm:$0xff] }
  0xf5   : > { %v4605_v31 = vadd.f32 %v4522_v4, %v4288_v48  ;;  %v4608_v21 = vadd.f32 %v1294_v5, %v4291_v63  ;;  %v4611_v49 = vadd.f32 %v1296_v19, %v4294_v25  ;;  %v4614_v32 = vadd.f32 %v1299_v26, %v4297_v59  ;;  %v6261_v48 = vld [vmem:[#allocation62_spill] sm:$0xff]  ;;  %v6262_v63 = vld [vmem:[#allocation63_spill] sm:$0xff]  ;;  %v6263_v25 = vld [vmem:[#allocation64_spill] sm:$0xff] }
  0xf6   : > { %v4617_v15 = vadd.f32 %v1301_v30, %v6258_v39  ;;  %v4620_v55 = vadd.f32 %v1304_v37, %v6259_v47  ;;  %v4623_v27 = vadd.f32 %v1306_v29, %v6260_v1  ;;  %v4626_v4 = vadd.f32 %v1309_v44, %v6261_v48  ;;  %v6264_v59 = vld [vmem:[#allocation65_spill] sm:$0xff]  ;;  %v6265_v30 = vld [vmem:[#allocation66_spill] sm:$0xff]  ;;  %v6266_v37 = vld [vmem:[#allocation67_spill] sm:$0xff] }
  0xf7   : > { %v4629_v5 = vadd.f32 %v1311_v54, %v6262_v63  ;;  %v4632_v19 = vadd.f32 %v1314_v34, %v6263_v25  ;;  %v4635_v26 = vadd.f32 %v1316_v45, %v6264_v59  ;;  %v4638_v33 = vadd.f32 %v1319_v38, %v6265_v30  ;;  %v6267_v29 = vld [vmem:[#allocation68_spill] sm:$0xff]  ;;  %v6268_v44 = vld [vmem:[#allocation69_spill] sm:$0xff]  ;;  %v6269_v54 = vld [vmem:[#allocation70_spill] sm:$0xff] }
  0xf8   : > { %v4641_v11 = vadd.f32 %v1321_v62, %v6266_v37  ;;  %v4644_v40 = vadd.f32 %v1324_v23, %v6267_v29  ;;  %v4647_v17 = vadd.f32 %v1326_v14, %v6268_v44  ;;  %v4650_v9 = vadd.f32 %v1329_v56, %v6269_v54  ;;  %v6270_v34 = vld [vmem:[#allocation71_spill] sm:$0xff]  ;;  %v6271_v45 = vld [vmem:[#allocation72_spill] sm:$0xff]  ;;  %v6272_v38 = vld [vmem:[#allocation73_spill] sm:$0xff] }
  0xf9   : > { %v4653_v50 = vadd.f32 %v1331_v0, %v6270_v34  ;;  %v4656_v7 = vadd.f32 %v1334_v6, %v6271_v45  ;;  %v4659_v8 = vadd.f32 %v1336_v60, %v6272_v38  ;;  %v6274_v62 = vld [vmem:[#allocation74_spill] sm:$0xff]  ;;  %v6276_v23 = vld [vmem:[#allocation75_spill] sm:$0xff]  ;;  %v4671_v16 = vadd.f32 %v1344_v2, %v6278_v20  ;;  %v6280_v56 = vld [vmem:[#allocation77_spill] sm:$0xff] }
  0xfa   : > { %v4662_v10 = vadd.f32 %v1339_v35, %v6274_v62  ;;  %v4665_v51 = vadd.f32 %v1341_v12, %v6276_v23  ;;  %v2516_v14 = vld [vmem:[%s5718_s1 + $0x6] ss:$0 sm:$0xff]  ;;  %v4674_v46 = vadd.f32 %v1346_v61, %v6280_v56  ;;  %v4677_v53 = vadd.f32 %v1349_v22, %v6282_v57  ;;  %v6284_v0 = vld [vmem:[#allocation79_spill] sm:$0xff]  ;;  %v6288_v6 = vld [vmem:[#allocation81_spill] sm:$0xff] }
  0xfb   : > { %6273 = vst [vmem:[#allocation2_spill] sm:$0xff] %v4659_v8  ;;  %6279 = vst [vmem:[#allocation58_spill] sm:$0xff] %v4671_v16  ;;  %v4680_v43 = vadd.f32 %v1351_v18, %v6284_v0  ;;  %v4683_v3 = vadd.f32 %v1354_v42, %v6286_v58  ;;  %v4686_v60 = vadd.f32 %v1356_v41, %v6288_v6  ;;  %v6290_v35 = vld [vmem:[#allocation3_spill] sm:$0xff]  ;;  %v6292_v2 = vld [vmem:[#allocation4_spill] sm:$0xff] }
  0xfc   : > { %6275 = vst [vmem:[#allocation56_spill] sm:$0xff] %v4662_v10  ;;  %6277 = vst [vmem:[#allocation57_spill] sm:$0xff] %v4665_v51  ;;  %v4689_v12 = vadd.f32 %v1359_v52, %v6290_v35  ;;  %v4692_v39 = vadd.f32 %v1361_v28, %v6292_v2  ;;  %v6294_v61 = vld [vmem:[#allocation5_spill] sm:$0xff]  ;;  %v6295_v1 = vld [vmem:[#allocation6_spill] sm:$0xff] }
  0xfd   : > { %6281 = vst [vmem:[#allocation7_spill] sm:$0xff] %v4674_v46  ;;  %6283 = vst [vmem:[#allocation10_spill] sm:$0xff] %v4677_v53  ;;  %v1431_v47 = vmul.f32 %v6294_v61, %v2516_v14  ;;  %v1432_v22 = vmul.f32 %v6295_v1, %v2516_v14  ;;  %v6296_v48 = vld [vmem:[#allocation13_spill] sm:$0xff]  ;;  %v6297_v18 = vld [vmem:[#allocation14_spill] sm:$0xff] }
  0xfe   : > { %6285 = vst [vmem:[#allocation11_spill] sm:$0xff] %v4680_v43  ;;  %6287 = vst [vmem:[#allocation59_spill] sm:$0xff] %v4683_v3  ;;  %v1433_v63 = vmul.f32 %v2516_v14, %v6296_v48  ;;  %v1434_v25 = vmul.f32 %v2516_v14, %v6297_v18  ;;  %v6298_v59 = vld [vmem:[#allocation8_spill] sm:$0xff]  ;;  %v6299_v30 = vld [vmem:[#allocation9_spill] sm:$0xff] }
  0xff   : > { %6289 = vst [vmem:[#allocation60_spill] sm:$0xff] %v4686_v60  ;;  %6291 = vst [vmem:[#allocation61_spill] sm:$0xff] %v4689_v12  ;;  %v1435_v42 = vmul.f32 %v6298_v59, %v2516_v14  ;;  %v1436_v37 = vmul.f32 %v6299_v30, %v2516_v14  ;;  %v6300_v41 = vld [vmem:[#allocation19_spill] sm:$0xff]  ;;  %v6301_v44 = vld [vmem:[#allocation22_spill] sm:$0xff] }
 0x100   : > { %6293 = vst [vmem:[#allocation62_spill] sm:$0xff] %v4692_v39  ;;  %v1437_v29 = vmul.f32 %v2516_v14, %v6300_v41  ;;  %v1438_v52 = vmul.f32 %v2516_v14, %v6301_v44  ;;  %v6302_v54 = vld [vmem:[#allocation16_spill] sm:$0xff]  ;;  %v6303_v28 = vld [vmem:[#allocation17_spill] sm:$0xff]  ;;  %v6304_v38 = vld [vmem:[#allocation27_spill] sm:$0xff] }
 0x101   : > { %v1439_v34 = vmul.f32 %v6302_v54, %v2516_v14  ;;  %v1440_v45 = vmul.f32 %v6303_v28, %v2516_v14  ;;  %v1441_v62 = vmul.f32 %v2516_v14, %v6304_v38  ;;  %v6305_v23 = vld [vmem:[#allocation28_spill] sm:$0xff]  ;;  %v6307_v0 = vld [vmem:[#allocation21_spill] sm:$0xff]  ;;  %v6308_v6 = vld [vmem:[#allocation31_spill] sm:$0xff] }
 0x102   : > { %v1442_v20 = vmul.f32 %v2516_v14, %v6305_v23  ;;  %v6306_v56 = vld [vmem:[#allocation20_spill] sm:$0xff]  ;;  %v1444_v58 = vmul.f32 %v6307_v0, %v2516_v14  ;;  %v1445_v35 = vmul.f32 %v2516_v14, %v6308_v6  ;;  %v6309_v2 = vld [vmem:[#allocation34_spill] sm:$0xff]  ;;  %v6311_v18 = vld [vmem:[#allocation25_spill] sm:$0xff] }
 0x103   : > { %v1443_v57 = vmul.f32 %v6306_v56, %v2516_v14  ;;  %v1446_v30 = vmul.f32 %v2516_v14, %v6309_v2  ;;  %v6310_v59 = vld [vmem:[#allocation24_spill] sm:$0xff]  ;;  %v1448_v44 = vmul.f32 %v6311_v18, %v2516_v14  ;;  %v6312_v48 = vld [vmem:[#allocation39_spill] sm:$0xff]  ;;  %v6315_v39 = vld [vmem:[#allocation33_spill] sm:$0xff] }
 0x104   : > { %v1447_v41 = vmul.f32 %v6310_v59, %v2516_v14  ;;  %v1449_v54 = vmul.f32 %v2516_v14, %v6312_v48  ;;  %v6313_v1 = vld [vmem:[#allocation43_spill] sm:$0xff]  ;;  %v6314_v61 = vld [vmem:[#allocation32_spill] sm:$0xff]  ;;  %v1452_v23 = vmul.f32 %v6315_v39, %v2516_v14  ;;  %v6316_v12 = vld [vmem:[#allocation46_spill] sm:$0xff] }
 0x105   : > { %v1450_v28 = vmul.f32 %v2516_v14, %v6313_v1  ;;  %v1451_v38 = vmul.f32 %v6314_v61, %v2516_v14  ;;  %v1453_v56 = vmul.f32 %v2516_v14, %v6316_v12  ;;  %v6317_v60 = vld [vmem:[#allocation47_spill] sm:$0xff]  ;;  %v6318_v3 = vld [vmem:[#allocation36_spill] sm:$0xff]  ;;  %v6319_v43 = vld [vmem:[#allocation37_spill] sm:$0xff]  ;;  %v4727_v12 = vadd.f32 %v1431_v47, %v4591_v36 }
 0x106   : > { %v1454_v0 = vmul.f32 %v2516_v14, %v6317_v60  ;;  %v1455_v6 = vmul.f32 %v6318_v3, %v2516_v14  ;;  %v1456_v2 = vmul.f32 %v6319_v43, %v2516_v14  ;;  %v6320_v53 = vld [vmem:[#allocation50_spill] sm:$0xff]  ;;  %v6321_v46 = vld [vmem:[#allocation51_spill] sm:$0xff]  ;;  %v6322_v16 = vld [vmem:[#allocation40_spill] sm:$0xff]  ;;  %v4730_v60 = vadd.f32 %v1432_v22, %v4595_v13 }
 0x107   : > { %v1457_v59 = vmul.f32 %v2516_v14, %v6320_v53  ;;  %v1458_v18 = vmul.f32 %v2516_v14, %v6321_v46  ;;  %v1459_v48 = vmul.f32 %v6322_v16, %v2516_v14  ;;  %v6323_v51 = vld [vmem:[#allocation41_spill] sm:$0xff]  ;;  %v6324_v10 = vld [vmem:[#allocation54_spill] sm:$0xff]  ;;  %v6325_v8 = vld [vmem:[#allocation55_spill] sm:$0xff]  ;;  %v4733_v43 = vadd.f32 %v1433_v63, %v4601_v24 }
 0x108   : > { %v1460_v1 = vmul.f32 %v6323_v51, %v2516_v14  ;;  %v1461_v61 = vmul.f32 %v2516_v14, %v6324_v10  ;;  %v1462_v39 = vmul.f32 %v2516_v14, %v6325_v8  ;;  %v4736_v53 = vadd.f32 %v1434_v25, %v4605_v31 }
 0x109   : > { %v4739_v16 = vadd.f32 %v1435_v42, %v4608_v21  ;;  %v4742_v51 = vadd.f32 %v1436_v37, %v4611_v49  ;;  %v4745_v14 = vadd.f32 %v1437_v29, %v4614_v32  ;;  %v4748_v36 = vadd.f32 %v1438_v52, %v4617_v15  ;;  %v6353_v37 = vld [vmem:[#allocation11_spill] sm:$0xff]  ;;  %v6357_v52 = vld [vmem:[#allocation60_spill] sm:$0xff] }
 0x10a   : > { %v4751_v13 = vadd.f32 %v1439_v34, %v4620_v55  ;;  %v4754_v24 = vadd.f32 %v1440_v45, %v4623_v27  ;;  %v4757_v31 = vadd.f32 %v1441_v62, %v4626_v4  ;;  %v4760_v21 = vadd.f32 %v1442_v20, %v4629_v5  ;;  %v6355_v29 = vld [vmem:[#allocation59_spill] sm:$0xff]  ;;  %v6359_v34 = vld [vmem:[#allocation61_spill] sm:$0xff]  ;;  %v6361_v45 = vld [vmem:[#allocation62_spill] sm:$0xff] }
 0x10b   : > { %6326 = vst [vmem:[#allocation63_spill] sm:$0xff] %v4745_v14  ;;  %6327 = vst [vmem:[#allocation64_spill] sm:$0xff] %v4748_v36  ;;  %v4763_v49 = vadd.f32 %v1443_v57, %v4632_v19  ;;  %v4766_v32 = vadd.f32 %v1444_v58, %v4635_v26  ;;  %v4769_v15 = vadd.f32 %v1445_v35, %v4638_v33  ;;  %v6341_v33 = vld [vmem:[#allocation2_spill] sm:$0xff]  ;;  %v6363_v62 = vld [vmem:[#allocation5_spill] sm:$0xff] }
 0x10c   : > { %6328 = vst [vmem:[#allocation65_spill] sm:$0xff] %v4751_v13  ;;  %6329 = vst [vmem:[#allocation66_spill] sm:$0xff] %v4754_v24  ;;  %v4772_v55 = vadd.f32 %v1446_v30, %v4641_v11  ;;  %v4775_v27 = vadd.f32 %v1447_v41, %v4644_v40  ;;  %v4778_v4 = vadd.f32 %v1448_v44, %v4647_v17  ;;  %v6343_v11 = vld [vmem:[#allocation56_spill] sm:$0xff]  ;;  %v6345_v40 = vld [vmem:[#allocation57_spill] sm:$0xff] }
 0x10d   : > { %6330 = vst [vmem:[#allocation67_spill] sm:$0xff] %v4757_v31  ;;  %6331 = vst [vmem:[#allocation68_spill] sm:$0xff] %v4760_v21  ;;  %v4781_v5 = vadd.f32 %v1449_v54, %v4650_v9  ;;  %v4784_v19 = vadd.f32 %v1450_v28, %v4653_v50  ;;  %v4787_v26 = vadd.f32 %v1451_v38, %v4656_v7  ;;  %v2517_v17 = vld [vmem:[%s5718_s1 + $0x7] ss:$0 sm:$0xff]  ;;  %v6349_v50 = vld [vmem:[#allocation7_spill] sm:$0xff] }
 0x10e   : > { %6332 = vst [vmem:[#allocation69_spill] sm:$0xff] %v4763_v49  ;;  %6333 = vst [vmem:[#allocation70_spill] sm:$0xff] %v4766_v32  ;;  %v4790_v47 = vadd.f32 %v1452_v23, %v6341_v33  ;;  %v4793_v22 = vadd.f32 %v1453_v56, %v6343_v11  ;;  %v4796_v63 = vadd.f32 %v1454_v0, %v6345_v40  ;;  %v6347_v9 = vld [vmem:[#allocation58_spill] sm:$0xff]  ;;  %v6365_v56 = vld [vmem:[#allocation12_spill] sm:$0xff] }
 0x10f   : > { %6334 = vst [vmem:[#allocation71_spill] sm:$0xff] %v4769_v15  ;;  %6335 = vst [vmem:[#allocation72_spill] sm:$0xff] %v4772_v55  ;;  %v4802_v25 = vadd.f32 %v1455_v6, %v6347_v9  ;;  %v4805_v42 = vadd.f32 %v1456_v2, %v6349_v50  ;;  %v6351_v7 = vld [vmem:[#allocation10_spill] sm:$0xff]  ;;  %v4811_v41 = vadd.f32 %v1458_v18, %v6353_v37  ;;  %v6366_v18 = vld [vmem:[#allocation13_spill] sm:$0xff] }
 0x110   : > { %6336 = vst [vmem:[#allocation73_spill] sm:$0xff] %v4775_v27  ;;  %6337 = vst [vmem:[#allocation74_spill] sm:$0xff] %v4778_v4  ;;  %v4808_v30 = vadd.f32 %v1457_v59, %v6351_v7  ;;  %v4814_v44 = vadd.f32 %v1459_v48, %v6355_v29  ;;  %v4817_v54 = vadd.f32 %v1460_v1, %v6357_v52  ;;  %v6364_v20 = vld [vmem:[#allocation6_spill] sm:$0xff]  ;;  %v6368_v6 = vld [vmem:[#allocation15_spill] sm:$0xff] }
 0x111   : > { %6338 = vst [vmem:[#allocation75_spill] sm:$0xff] %v4781_v5  ;;  %6339 = vst [vmem:[#allocation76_spill] sm:$0xff] %v4784_v19  ;;  %v4820_v28 = vadd.f32 %v1461_v61, %v6359_v34  ;;  %v4823_v38 = vadd.f32 %v1462_v39, %v6361_v45  ;;  %v1500_v23 = vmul.f32 %v6363_v62, %v2517_v17  ;;  %v6367_v58 = vld [vmem:[#allocation14_spill] sm:$0xff]  ;;  %v6369_v1 = vld [vmem:[#allocation8_spill] sm:$0xff] }
 0x112   : > { %6340 = vst [vmem:[#allocation77_spill] sm:$0xff] %v4787_v26  ;;  %6342 = vst [vmem:[#allocation78_spill] sm:$0xff] %v4790_v47  ;;  %v1501_v59 = vmul.f32 %v6364_v20, %v2517_v17  ;;  %v1502_v57 = vmul.f32 %v2517_v17, %v6365_v56  ;;  %v1503_v0 = vmul.f32 %v2517_v17, %v6366_v18  ;;  %v6370_v61 = vld [vmem:[#allocation9_spill] sm:$0xff]  ;;  %v6371_v39 = vld [vmem:[#allocation18_spill] sm:$0xff] }
 0x113   : > { %6344 = vst [vmem:[#allocation79_spill] sm:$0xff] %v4793_v22  ;;  %6346 = vst [vmem:[#allocation80_spill] sm:$0xff] %v4796_v63  ;;  %v1504_v48 = vmul.f32 %v2517_v17, %v6367_v58  ;;  %v1505_v35 = vmul.f32 %v2517_v17, %v6368_v6  ;;  %v4832_v2 = vmul.f32 %v6369_v1, %v2517_v17  ;;  %v6372_v40 = vld [vmem:[#allocation19_spill] sm:$0xff]  ;;  %v6373_v50 = vld [vmem:[#allocation22_spill] sm:$0xff] }
 0x114   : > { %6348 = vst [vmem:[#allocation81_spill] sm:$0xff] %v4802_v25  ;;  %6350 = vst [vmem:[#allocation3_spill] sm:$0xff] %v4805_v42  ;;  %v4835_v33 = vmul.f32 %v6370_v61, %v2517_v17  ;;  %v4838_v11 = vmul.f32 %v2517_v17, %v6371_v39  ;;  %v4841_v9 = vmul.f32 %v2517_v17, %v6372_v40  ;;  %v6374_v37 = vld [vmem:[#allocation23_spill] sm:$0xff]  ;;  %v6375_v52 = vld [vmem:[#allocation16_spill] sm:$0xff]  ;;  %v1597_v15 = vrot.slane %v1501_v59, 1 }
 0x115   : > { %6352 = vst [vmem:[#allocation4_spill] sm:$0xff] %v4808_v30  ;;  %6354 = vst [vmem:[#allocation2_spill] sm:$0xff] %v4811_v41  ;;  %v4844_v7 = vmul.f32 %v2517_v17, %v6373_v50  ;;  %v4847_v29 = vmul.f32 %v2517_v17, %v6374_v37  ;;  %v4850_v34 = vmul.f32 %v6375_v52, %v2517_v17  ;;  %v6376_v45 = vld [vmem:[#allocation17_spill] sm:$0xff]  ;;  %v6377_v61 = vld [vmem:[#allocation26_spill] sm:$0xff]  ;;  %v1599_v49 = vrot.slane %v1502_v57, 1 }
 0x116   : > { %6356 = vst [vmem:[#allocation56_spill] sm:$0xff] %v4814_v44  ;;  %6358 = vst [vmem:[#allocation57_spill] sm:$0xff] %v4817_v54  ;;  %v4853_v1 = vmul.f32 %v6376_v45, %v2517_v17  ;;  %v4856_v6 = vmul.f32 %v2517_v17, %v6377_v61  ;;  %v6378_v39 = vld [vmem:[#allocation27_spill] sm:$0xff]  ;;  %v6379_v40 = vld [vmem:[#allocation28_spill] sm:$0xff]  ;;  %v1602_v21 = vrot.slane %v1504_v48, 1  ;;  %v1604_v13 = vrot.slane %v1505_v35, 1 }
 0x117   : > { %6360 = vst [vmem:[#allocation58_spill] sm:$0xff] %v4820_v28  ;;  %6362 = vst [vmem:[#allocation7_spill] sm:$0xff] %v4823_v38  ;;  %v4859_v58 = vmul.f32 %v2517_v17, %v6378_v39  ;;  %v4862_v18 = vmul.f32 %v2517_v17, %v6379_v40  ;;  %v6380_v50 = vld [vmem:[#allocation29_spill] sm:$0xff]  ;;  %v6381_v37 = vld [vmem:[#allocation20_spill] sm:$0xff]  ;;  %v4952_v48 = vmul.f32 %v2517_v17, %v6325_v8  ;;  %v1609_v8 = vrot.slane %v4838_v11, 1 }
 0x118   : > { %v4865_v56 = vmul.f32 %v2517_v17, %v6380_v50  ;;  %v4868_v20 = vmul.f32 %v6381_v37, %v2517_v17  ;;  %v6382_v52 = vld [vmem:[#allocation21_spill] sm:$0xff]  ;;  %v6383_v45 = vld [vmem:[#allocation30_spill] sm:$0xff]  ;;  %v6384_v61 = vld [vmem:[#allocation31_spill] sm:$0xff]  ;;  %v4971_v14 = vsel %vm476_vm0, %v1602_v21, %v1604_v13 }
 0x119   : > { %v4871_v62 = vmul.f32 %v6382_v52, %v2517_v17  ;;  %v4874_v38 = vmul.f32 %v2517_v17, %v6383_v45  ;;  %v4877_v28 = vmul.f32 %v2517_v17, %v6384_v61  ;;  %v6385_v39 = vld [vmem:[#allocation34_spill] sm:$0xff]  ;;  %v6386_v40 = vld [vmem:[#allocation35_spill] sm:$0xff]  ;;  %v6387_v50 = vld [vmem:[#allocation24_spill] sm:$0xff] }
 0x11a   : > { %v4880_v54 = vmul.f32 %v2517_v17, %v6385_v39  ;;  %v4883_v44 = vmul.f32 %v2517_v17, %v6386_v40  ;;  %v4886_v41 = vmul.f32 %v6387_v50, %v2517_v17  ;;  %v6388_v37 = vld [vmem:[#allocation25_spill] sm:$0xff]  ;;  %v6389_v52 = vld [vmem:[#allocation38_spill] sm:$0xff]  ;;  %v6390_v45 = vld [vmem:[#allocation39_spill] sm:$0xff]  ;;  %v1624_v11 = vrot.slane %v4865_v56, 1 }
 0x11b   : > { %v4889_v30 = vmul.f32 %v6388_v37, %v2517_v17  ;;  %v4892_v42 = vmul.f32 %v2517_v17, %v6389_v52  ;;  %v4895_v25 = vmul.f32 %v2517_v17, %v6390_v45  ;;  %v6391_v61 = vld [vmem:[#allocation43_spill] sm:$0xff]  ;;  %v6392_v39 = vld [vmem:[#allocation44_spill] sm:$0xff]  ;;  %v6394_v50 = vld [vmem:[#allocation33_spill] sm:$0xff]  ;;  %v1626_v13 = vrot.slane %v4868_v20, 1 }
 0x11c   : > { %v4898_v63 = vmul.f32 %v2517_v17, %v6391_v61  ;;  %v4901_v22 = vmul.f32 %v2517_v17, %v6392_v39  ;;  %v6393_v40 = vld [vmem:[#allocation32_spill] sm:$0xff]  ;;  %v4907_v26 = vmul.f32 %v6394_v50, %v2517_v17  ;;  %v6395_v37 = vld [vmem:[#allocation45_spill] sm:$0xff]  ;;  %v6396_v52 = vld [vmem:[#allocation46_spill] sm:$0xff]  ;;  %v4922_v39 = vmul.f32 %v6318_v3, %v2517_v17 }
 0x11d   : > { %v4904_v47 = vmul.f32 %v6393_v40, %v2517_v17  ;;  %v4910_v19 = vmul.f32 %v2517_v17, %v6395_v37  ;;  %v4913_v5 = vmul.f32 %v2517_v17, %v6396_v52  ;;  %v6397_v45 = vld [vmem:[#allocation47_spill] sm:$0xff]  ;;  %v6398_v61 = vld [vmem:[#allocation48_spill] sm:$0xff]  ;;  %v6399_v40 = vld [vmem:[#allocation37_spill] sm:$0xff]  ;;  %v1596_v50 = vrot.slane %v1500_v23, 1 }
 0x11e   : > { %v4916_v4 = vmul.f32 %v2517_v17, %v6397_v45  ;;  %v4919_v27 = vmul.f32 %v2517_v17, %v6398_v61  ;;  %v4925_v55 = vmul.f32 %v6399_v40, %v2517_v17  ;;  %v6400_v32 = vld [vmem:[#allocation49_spill] sm:$0xff]  ;;  %v1601_v52 = vrot.slane %v1503_v0, 1  ;;  %v6401_v31 = vld [vmem:[#allocation50_spill] sm:$0xff]  ;;  %v6402_v24 = vld [vmem:[#allocation52_spill] sm:$0xff] }
 0x11f   : > { %v4928_v37 = vmul.f32 %v2517_v17, %v6400_v32  ;;  %v4931_v45 = vmul.f32 %v2517_v17, %v6401_v31  ;;  %v4934_v61 = vmul.f32 %v2517_v17, %v6321_v46  ;;  %v4937_v3 = vmul.f32 %v2517_v17, %v6402_v24  ;;  %v6403_v40 = vld [vmem:[#allocation40_spill] sm:$0xff]  ;;  %v6404_v23 = vld [vmem:[#allocation41_spill] sm:$0xff]  ;;  %v6406_v46 = vld [vmem:[#allocation42_spill] sm:$0xff] }
 0x120   : > { %v4940_v36 = vmul.f32 %v6403_v40, %v2517_v17  ;;  %v4943_v59 = vmul.f32 %v6404_v23, %v2517_v17  ;;  %v6405_v32 = vld [vmem:[#allocation53_spill] sm:$0xff]  ;;  %v4949_v0 = vmul.f32 %v2517_v17, %v6324_v10  ;;  %v6407_v31 = vunpack.c.l.bf16 %v6406_v46 }
 0x121   : > { %v4946_v57 = vmul.f32 %v2517_v17, %v6405_v32  ;;  %v4959_v35 = vsel %vm476_vm0, %v1596_v50, %v1597_v15  ;;  %v1606_v40 = vrot.slane %v4832_v2, 1  ;;  %v4963_v23 = vsel %vm476_vm0, %v1597_v15, %v1599_v49 }
 0x122   : > { %v4956_v24 = vmul.f32 %v2517_v17, %v6407_v31  ;;  %v4966_v32 = vsel %vm476_vm0, %v1601_v52, %v1602_v21  ;;  %v1607_v10 = vrot.slane %v4835_v33, 1  ;;  %v1611_v31 = vrot.slane %v4841_v9, 1 }
 0x123   : > { %v1612_v17 = vrot.slane %v4844_v7, 1  ;;  %v1614_v50 = vrot.slane %v4847_v29, 1  ;;  %v1616_v2 = vrot.slane %v4850_v34, 1  ;;  %v1617_v49 = vrot.slane %v4853_v1, 1 }
 0x124   : > { %v1619_v15 = vrot.slane %v4856_v6, 1  ;;  %v1621_v52 = vrot.slane %v4859_v58, 1  ;;  %v1622_v33 = vrot.slane %v4862_v18, 1  ;;  %v1627_v21 = vrot.slane %v4871_v62, 1 }
 0x125   : > { %v1629_v9 = vrot.slane %v4874_v38, 1  ;;  %v1631_v7 = vrot.slane %v4877_v28, 1  ;;  %v1632_v29 = vrot.slane %v4880_v54, 1  ;;  %v1634_v1 = vrot.slane %v4883_v44, 1 }
 0x126   : > { %v1608_v6 = vsel %vm476_vm0, %v1606_v40, %v1607_v10  ;;  %v1636_v58 = vrot.slane %v4886_v41, 1  ;;  %v1637_v18 = vrot.slane %v4889_v30, 1  ;;  %v1639_v56 = vrot.slane %v4892_v42, 1 }
 0x127   : > { %v1610_v20 = vsel %vm476_vm0, %v1607_v10, %v1609_v8  ;;  %v1613_v62 = vsel %vm476_vm0, %v1611_v31, %v1612_v17  ;;  %v1615_v38 = vsel %vm476_vm0, %v1612_v17, %v1614_v50  ;;  %v1618_v28 = vsel %vm476_vm0, %v1616_v2, %v1617_v49 }
 0x128   : > { %v1620_v54 = vsel %vm476_vm0, %v1617_v49, %v1619_v15  ;;  %v1623_v44 = vsel %vm476_vm0, %v1621_v52, %v1622_v33  ;;  %v1625_v40 = vsel %vm476_vm0, %v1622_v33, %v1624_v11  ;;  %v1628_v41 = vsel %vm476_vm0, %v1626_v13, %v1627_v21 }
 0x129   : > { %v1630_v30 = vsel %vm476_vm0, %v1627_v21, %v1629_v9  ;;  %v1633_v42 = vsel %vm476_vm0, %v1631_v7, %v1632_v29  ;;  %v1635_v8 = vsel %vm476_vm0, %v1632_v29, %v1634_v1  ;;  %v1641_v10 = vrot.slane %v4895_v25, 1 }
 0x12a   : > { %v1638_v34 = vsel %vm476_vm0, %v1636_v58, %v1637_v18  ;;  %v1640_v31 = vsel %vm476_vm0, %v1637_v18, %v1639_v56  ;;  %v1642_v17 = vrot.slane %v4898_v63, 1  ;;  %v1644_v50 = vrot.slane %v4901_v22, 1 }
 0x12b   : > { %v1646_v2 = vrot.slane %v4904_v47, 1  ;;  %v1647_v49 = vrot.slane %v4907_v26, 1  ;;  %v1649_v15 = vrot.slane %v4910_v19, 1  ;;  %v1651_v52 = vrot.slane %v4913_v5, 1 }
 0x12c   : > { %v1652_v33 = vrot.slane %v4916_v4, 1  ;;  %v1654_v25 = vrot.slane %v4919_v27, 1  ;;  %v1656_v11 = vrot.slane %v4922_v39, 1  ;;  %v1657_v13 = vrot.slane %v4925_v55, 1 }
 0x12d   : > { %v1659_v63 = vrot.slane %v4928_v37, 1  ;;  %v1661_v22 = vrot.slane %v4931_v45, 1  ;;  %v1662_v47 = vrot.slane %v4934_v61, 1  ;;  %v1664_v26 = vrot.slane %v4937_v3, 1 }
 0x12e   : > { %v1643_v19 = vsel %vm476_vm0, %v1641_v10, %v1642_v17  ;;  %v1666_v5 = vrot.slane %v4940_v36, 1  ;;  %v1667_v4 = vrot.slane %v4943_v59, 1  ;;  %v1669_v27 = vrot.slane %v4946_v57, 1 }
 0x12f   : > { %v1645_v39 = vsel %vm476_vm0, %v1642_v17, %v1644_v50  ;;  %v1671_v55 = vrot.slane %v4949_v0, 1  ;;  %v1672_v37 = vrot.slane %v4952_v48, 1  ;;  %v1674_v45 = vrot.slane %v4956_v24, 1  ;;  %v6412_v50 = vld [vmem:[#allocation65_spill] sm:$0xff] }
 0x130   : > { %v1648_v61 = vsel %vm476_vm0, %v1646_v2, %v1647_v49  ;;  %v1650_v3 = vsel %vm476_vm0, %v1647_v49, %v1649_v15  ;;  %v1653_v21 = vsel %vm476_vm0, %v1651_v52, %v1652_v33  ;;  %v1655_v36 = vsel %vm476_vm0, %v1652_v33, %v1654_v25 }
 0x131   : > { %v1658_v59 = vsel %vm476_vm0, %v1656_v11, %v1657_v13  ;;  %v1660_v57 = vsel %vm476_vm0, %v1657_v13, %v1659_v63  ;;  %v1663_v9 = vsel %vm476_vm0, %v1661_v22, %v1662_v47  ;;  %v1665_v0 = vsel %vm476_vm0, %v1662_v47, %v1664_v26 }
 0x132   : > { %v1668_v48 = vsel %vm476_vm0, %v1666_v5, %v1667_v4  ;;  %v1670_v24 = vsel %vm476_vm0, %v1667_v4, %v1669_v27  ;;  %v5040_v7 = vadd.f32 %v4959_v35, %v4727_v12  ;;  %v5044_v29 = vadd.f32 %v4963_v23, %v4730_v60  ;;  %v6408_v60 = vld [vmem:[#allocation63_spill] sm:$0xff]  ;;  %v6410_v35 = vld [vmem:[#allocation64_spill] sm:$0xff] }
 0x133   : > { %v1673_v1 = vsel %vm476_vm0, %v1671_v55, %v1672_v37  ;;  %v1675_v58 = vsel %vm476_vm0, %v1672_v37, %v1674_v45  ;;  %v5050_v18 = vadd.f32 %v4966_v32, %v4733_v43  ;;  %v5054_v56 = vadd.f32 %v4971_v14, %v4736_v53  ;;  %v6414_v43 = vld [vmem:[#allocation66_spill] sm:$0xff]  ;;  %v6416_v53 = vld [vmem:[#allocation67_spill] sm:$0xff] }
 0x134   : > { %v5057_v10 = vadd.f32 %v1608_v6, %v4739_v16  ;;  %v5060_v12 = vadd.f32 %v1610_v20, %v4742_v51  ;;  %v5063_v23 = vadd.f32 %v1613_v62, %v6408_v60  ;;  %v5066_v17 = vadd.f32 %v1615_v38, %v6410_v35  ;;  %v6418_v16 = vld [vmem:[#allocation68_spill] sm:$0xff]  ;;  %v6420_v51 = vld [vmem:[#allocation69_spill] sm:$0xff]  ;;  %v6422_v62 = vld [vmem:[#allocation70_spill] sm:$0xff] }
 0x135   : > { %v5069_v2 = vadd.f32 %v1618_v28, %v6412_v50  ;;  %v5072_v32 = vadd.f32 %v1620_v54, %v6414_v43  ;;  %v5075_v14 = vadd.f32 %v1623_v44, %v6416_v53  ;;  %v5078_v6 = vadd.f32 %v1625_v40, %v6418_v16  ;;  %v6424_v38 = vld [vmem:[#allocation71_spill] sm:$0xff]  ;;  %v6426_v28 = vld [vmem:[#allocation72_spill] sm:$0xff]  ;;  %v6428_v54 = vld [vmem:[#allocation73_spill] sm:$0xff] }
 0x136   : > { %6409 = vst [vmem:[#allocation10_spill] sm:$0xff] %v5063_v23  ;;  %6411 = vst [vmem:[#allocation11_spill] sm:$0xff] %v5066_v17  ;;  %v5081_v20 = vadd.f32 %v1628_v41, %v6420_v51  ;;  %v5084_v49 = vadd.f32 %v1630_v30, %v6422_v62  ;;  %v5087_v15 = vadd.f32 %v1633_v42, %v6424_v38  ;;  %v6430_v44 = vld [vmem:[#allocation74_spill] sm:$0xff]  ;;  %v6432_v40 = vld [vmem:[#allocation75_spill] sm:$0xff] }
 0x137   : > { %6413 = vst [vmem:[#allocation59_spill] sm:$0xff] %v5069_v2  ;;  %6415 = vst [vmem:[#allocation60_spill] sm:$0xff] %v5072_v32  ;;  %v5090_v52 = vadd.f32 %v1635_v8, %v6426_v28  ;;  %v5093_v33 = vadd.f32 %v1638_v34, %v6428_v54  ;;  %v5096_v25 = vadd.f32 %v1640_v31, %v6430_v44  ;;  %v6434_v41 = vld [vmem:[#allocation76_spill] sm:$0xff]  ;;  %v6436_v30 = vld [vmem:[#allocation77_spill] sm:$0xff] }
 0x138   : > { %6417 = vst [vmem:[#allocation61_spill] sm:$0xff] %v5075_v14  ;;  %6419 = vst [vmem:[#allocation62_spill] sm:$0xff] %v5078_v6  ;;  %v5099_v11 = vadd.f32 %v1643_v19, %v6432_v40  ;;  %v5102_v13 = vadd.f32 %v1645_v39, %v6434_v41  ;;  %v5105_v63 = vadd.f32 %v1648_v61, %v6436_v30  ;;  %v6438_v42 = vld [vmem:[#allocation78_spill] sm:$0xff]  ;;  %v6440_v8 = vld [vmem:[#allocation79_spill] sm:$0xff] }
 0x139   : > { %6421 = vst [vmem:[#allocation42_spill] sm:$0xff] %v5081_v20  ;;  %6423 = vst [vmem:[#allocation63_spill] sm:$0xff] %v5084_v49  ;;  %v5108_v22 = vadd.f32 %v1650_v3, %v6438_v42  ;;  %v5111_v47 = vadd.f32 %v1653_v21, %v6440_v8  ;;  %v6442_v34 = vld [vmem:[#allocation80_spill] sm:$0xff]  ;;  %v2518_v31 = vld [vmem:[%s5718_s1 + $0x8] ss:$0 sm:$0xff] }
 0x13a   : > { %6425 = vst [vmem:[#allocation64_spill] sm:$0xff] %v5087_v15  ;;  %6427 = vst [vmem:[#allocation65_spill] sm:$0xff] %v5090_v52  ;;  %v5114_v26 = vadd.f32 %v1655_v36, %v6442_v34  ;;  %v6444_v19 = vld [vmem:[#allocation81_spill] sm:$0xff]  ;;  %v6446_v4 = vld [vmem:[#allocation3_spill] sm:$0xff] }
 0x13b   : > { %6429 = vst [vmem:[#allocation66_spill] sm:$0xff] %v5093_v33  ;;  %6431 = vst [vmem:[#allocation67_spill] sm:$0xff] %v5096_v25  ;;  %v5120_v5 = vadd.f32 %v1658_v59, %v6444_v19  ;;  %v5123_v27 = vadd.f32 %v1660_v57, %v6446_v4  ;;  %v6448_v39 = vld [vmem:[#allocation4_spill] sm:$0xff]  ;;  %v6450_v37 = vld [vmem:[#allocation2_spill] sm:$0xff] }
 0x13c   : > { %6433 = vst [vmem:[#allocation68_spill] sm:$0xff] %v5099_v11  ;;  %6435 = vst [vmem:[#allocation69_spill] sm:$0xff] %v5102_v13  ;;  %v5126_v55 = vadd.f32 %v1663_v9, %v6448_v39  ;;  %v5129_v45 = vadd.f32 %v1665_v0, %v6450_v37  ;;  %v6452_v61 = vld [vmem:[#allocation56_spill] sm:$0xff]  ;;  %v6454_v21 = vld [vmem:[#allocation57_spill] sm:$0xff] }
 0x13d   : > { %6437 = vst [vmem:[#allocation70_spill] sm:$0xff] %v5105_v63  ;;  %6439 = vst [vmem:[#allocation71_spill] sm:$0xff] %v5108_v22  ;;  %v5132_v3 = vadd.f32 %v1668_v48, %v6452_v61  ;;  %v5135_v36 = vadd.f32 %v1670_v24, %v6454_v21  ;;  %v6456_v60 = vld [vmem:[#allocation58_spill] sm:$0xff]  ;;  %v6458_v59 = vld [vmem:[#allocation7_spill] sm:$0xff] }
 0x13e   : > { %6441 = vst [vmem:[#allocation72_spill] sm:$0xff] %v5111_v47  ;;  %6443 = vst [vmem:[#allocation73_spill] sm:$0xff] %v5114_v26  ;;  %v5138_v35 = vadd.f32 %v1673_v1, %v6456_v60  ;;  %v5141_v50 = vadd.f32 %v1675_v58, %v6458_v59  ;;  %v6460_v57 = vld [vmem:[#allocation5_spill] sm:$0xff]  ;;  %v6461_v53 = vld [vmem:[#allocation6_spill] sm:$0xff] }
 0x13f   : > { %6445 = vst [vmem:[#allocation74_spill] sm:$0xff] %v5120_v5  ;;  %6447 = vst [vmem:[#allocation75_spill] sm:$0xff] %v5123_v27  ;;  %v1745_v43 = vmul.f32 %v6460_v57, %v2518_v31  ;;  %v1746_v9 = vmul.f32 %v6461_v53, %v2518_v31  ;;  %v6462_v16 = vld [vmem:[#allocation12_spill] sm:$0xff]  ;;  %v6463_v0 = vld [vmem:[#allocation13_spill] sm:$0xff] }
 0x140   : > { %6449 = vst [vmem:[#allocation76_spill] sm:$0xff] %v5126_v55  ;;  %6451 = vst [vmem:[#allocation77_spill] sm:$0xff] %v5129_v45  ;;  %v1747_v51 = vmul.f32 %v2518_v31, %v6462_v16  ;;  %v1748_v62 = vmul.f32 %v2518_v31, %v6463_v0  ;;  %v6464_v38 = vld [vmem:[#allocation14_spill] sm:$0xff]  ;;  %v6465_v28 = vld [vmem:[#allocation15_spill] sm:$0xff] }
 0x141   : > { %6453 = vst [vmem:[#allocation78_spill] sm:$0xff] %v5132_v3  ;;  %6455 = vst [vmem:[#allocation79_spill] sm:$0xff] %v5135_v36  ;;  %v1749_v48 = vmul.f32 %v2518_v31, %v6464_v38  ;;  %v1750_v54 = vmul.f32 %v2518_v31, %v6465_v28  ;;  %v6466_v24 = vld [vmem:[#allocation8_spill] sm:$0xff]  ;;  %v6467_v1 = vld [vmem:[#allocation9_spill] sm:$0xff]  ;;  %v1842_v33 = vrot.slane %v1746_v9, 2 }
 0x142   : > { %6457 = vst [vmem:[#allocation80_spill] sm:$0xff] %v5138_v35  ;;  %6459 = vst [vmem:[#allocation81_spill] sm:$0xff] %v5141_v50  ;;  %v5150_v44 = vmul.f32 %v6466_v24, %v2518_v31  ;;  %v5153_v40 = vmul.f32 %v6467_v1, %v2518_v31  ;;  %v6468_v58 = vld [vmem:[#allocation18_spill] sm:$0xff]  ;;  %v6469_v30 = vld [vmem:[#allocation19_spill] sm:$0xff]  ;;  %v1844_v15 = vrot.slane %v1747_v51, 2 }
 0x143   : > { %v5156_v41 = vmul.f32 %v2518_v31, %v6468_v58  ;;  %v5159_v42 = vmul.f32 %v2518_v31, %v6469_v30  ;;  %v6470_v8 = vld [vmem:[#allocation22_spill] sm:$0xff]  ;;  %v6471_v19 = vld [vmem:[#allocation23_spill] sm:$0xff]  ;;  %v6472_v39 = vld [vmem:[#allocation16_spill] sm:$0xff]  ;;  %v1847_v49 = vrot.slane %v1749_v48, 2  ;;  %v1849_v32 = vrot.slane %v1750_v54, 2 }
 0x144   : > { %v5162_v34 = vmul.f32 %v2518_v31, %v6470_v8  ;;  %v5165_v4 = vmul.f32 %v2518_v31, %v6471_v19  ;;  %v5168_v37 = vmul.f32 %v6472_v39, %v2518_v31  ;;  %v6473_v61 = vld [vmem:[#allocation17_spill] sm:$0xff]  ;;  %v6474_v60 = vld [vmem:[#allocation26_spill] sm:$0xff]  ;;  %v6475_v57 = vld [vmem:[#allocation27_spill] sm:$0xff] }
 0x145   : > { %v5171_v21 = vmul.f32 %v6473_v61, %v2518_v31  ;;  %v5174_v59 = vmul.f32 %v2518_v31, %v6474_v60  ;;  %v5177_v53 = vmul.f32 %v2518_v31, %v6475_v57  ;;  %v6476_v16 = vld [vmem:[#allocation28_spill] sm:$0xff]  ;;  %v6477_v38 = vld [vmem:[#allocation29_spill] sm:$0xff]  ;;  %v6480_v8 = vld [vmem:[#allocation30_spill] sm:$0xff]  ;;  %v5289_v23 = vsel %vm722_vm1, %v1847_v49, %v1849_v32 }
 0x146   : > { %v5180_v0 = vmul.f32 %v2518_v31, %v6476_v16  ;;  %v5183_v28 = vmul.f32 %v2518_v31, %v6477_v38  ;;  %v6478_v24 = vld [vmem:[#allocation20_spill] sm:$0xff]  ;;  %v6479_v58 = vld [vmem:[#allocation21_spill] sm:$0xff]  ;;  %v5192_v19 = vmul.f32 %v2518_v31, %v6480_v8  ;;  %v6481_v39 = vld [vmem:[#allocation31_spill] sm:$0xff] }
 0x147   : > { %v5186_v1 = vmul.f32 %v6478_v24, %v2518_v31  ;;  %v5189_v30 = vmul.f32 %v6479_v58, %v2518_v31  ;;  %v5195_v61 = vmul.f32 %v2518_v31, %v6481_v39  ;;  %v6482_v60 = vld [vmem:[#allocation34_spill] sm:$0xff]  ;;  %v6483_v16 = vld [vmem:[#allocation35_spill] sm:$0xff]  ;;  %v6484_v38 = vld [vmem:[#allocation24_spill] sm:$0xff] }
 0x148   : > { %v5198_v57 = vmul.f32 %v2518_v31, %v6482_v60  ;;  %v5201_v50 = vmul.f32 %v2518_v31, %v6483_v16  ;;  %v5204_v35 = vmul.f32 %v6484_v38, %v2518_v31  ;;  %v6485_v24 = vld [vmem:[#allocation25_spill] sm:$0xff]  ;;  %v6486_v58 = vld [vmem:[#allocation38_spill] sm:$0xff]  ;;  %v6487_v8 = vld [vmem:[#allocation39_spill] sm:$0xff] }
 0x149   : > { %v5207_v36 = vmul.f32 %v6485_v24, %v2518_v31  ;;  %v5210_v3 = vmul.f32 %v2518_v31, %v6486_v58  ;;  %v5213_v45 = vmul.f32 %v2518_v31, %v6487_v8  ;;  %v6488_v39 = vld [vmem:[#allocation43_spill] sm:$0xff]  ;;  %v6489_v60 = vld [vmem:[#allocation44_spill] sm:$0xff]  ;;  %v6491_v38 = vld [vmem:[#allocation33_spill] sm:$0xff]  ;;  %v1871_v32 = vrot.slane %v5186_v1, 2 }
 0x14a   : > { %v5216_v55 = vmul.f32 %v2518_v31, %v6488_v39  ;;  %v5219_v27 = vmul.f32 %v2518_v31, %v6489_v60  ;;  %v6490_v16 = vld [vmem:[#allocation32_spill] sm:$0xff]  ;;  %v5225_v26 = vmul.f32 %v6491_v38, %v2518_v31  ;;  %v6492_v24 = vld [vmem:[#allocation45_spill] sm:$0xff]  ;;  %v6493_v58 = vld [vmem:[#allocation46_spill] sm:$0xff]  ;;  %v1841_v38 = vrot.slane %v1745_v43, 2 }
 0x14b   : > { %v5222_v5 = vmul.f32 %v6490_v16, %v2518_v31  ;;  %v5228_v47 = vmul.f32 %v2518_v31, %v6492_v24  ;;  %v5231_v22 = vmul.f32 %v2518_v31, %v6493_v58  ;;  %v6494_v8 = vld [vmem:[#allocation47_spill] sm:$0xff]  ;;  %v6495_v39 = vld [vmem:[#allocation48_spill] sm:$0xff]  ;;  %v6497_v16 = vld [vmem:[#allocation37_spill] sm:$0xff]  ;;  %v1846_v58 = vrot.slane %v1748_v62, 2 }
 0x14c   : > { %v5234_v63 = vmul.f32 %v2518_v31, %v6494_v8  ;;  %v5237_v13 = vmul.f32 %v2518_v31, %v6495_v39  ;;  %v6496_v60 = vld [vmem:[#allocation36_spill] sm:$0xff]  ;;  %v5243_v25 = vmul.f32 %v6497_v16, %v2518_v31  ;;  %v6498_v52 = vld [vmem:[#allocation49_spill] sm:$0xff]  ;;  %v6499_v20 = vld [vmem:[#allocation50_spill] sm:$0xff]  ;;  %v5277_v54 = vsel %vm722_vm1, %v1841_v38, %v1842_v33 }
 0x14d   : > { %v5240_v11 = vmul.f32 %v6496_v60, %v2518_v31  ;;  %v5246_v24 = vmul.f32 %v2518_v31, %v6498_v52  ;;  %v5249_v8 = vmul.f32 %v2518_v31, %v6499_v20  ;;  %v6500_v6 = vld [vmem:[#allocation51_spill] sm:$0xff]  ;;  %v6501_v14 = vld [vmem:[#allocation52_spill] sm:$0xff]  ;;  %v6503_v43 = vld [vmem:[#allocation41_spill] sm:$0xff]  ;;  %v1859_v38 = vrot.slane %v5165_v4, 2 }
 0x14e   : > { %v5252_v39 = vmul.f32 %v2518_v31, %v6500_v6  ;;  %v5255_v60 = vmul.f32 %v2518_v31, %v6501_v14  ;;  %v6502_v16 = vld [vmem:[#allocation40_spill] sm:$0xff]  ;;  %v5261_v9 = vmul.f32 %v6503_v43, %v2518_v31  ;;  %v6504_v52 = vld [vmem:[#allocation53_spill] sm:$0xff]  ;;  %v6505_v62 = vld [vmem:[#allocation54_spill] sm:$0xff]  ;;  %v6507_v6 = vunpack.c.l.bf16 %v6406_v46 }
 0x14f   : > { %v5258_v2 = vmul.f32 %v6502_v16, %v2518_v31  ;;  %v5264_v51 = vmul.f32 %v2518_v31, %v6504_v52  ;;  %v5267_v48 = vmul.f32 %v2518_v31, %v6505_v62  ;;  %v6506_v20 = vld [vmem:[#allocation55_spill] sm:$0xff]  ;;  %v1851_v16 = vrot.slane %v5150_v44, 2 }
 0x150   : > { %v5270_v17 = vmul.f32 %v2518_v31, %v6506_v20  ;;  %v5274_v14 = vmul.f32 %v2518_v31, %v6507_v6  ;;  %v5281_v43 = vsel %vm722_vm1, %v1842_v33, %v1844_v15  ;;  %v5284_v52 = vsel %vm722_vm1, %v1846_v58, %v1847_v49 }
 0x151   : > { %v1852_v62 = vrot.slane %v5153_v40, 2  ;;  %v1854_v20 = vrot.slane %v5156_v41, 2  ;;  %v1856_v46 = vrot.slane %v5159_v42, 2  ;;  %v1857_v31 = vrot.slane %v5162_v34, 2 }
 0x152   : > { %v1861_v44 = vrot.slane %v5168_v37, 2  ;;  %v1862_v15 = vrot.slane %v5171_v21, 2  ;;  %v1864_v33 = vrot.slane %v5174_v59, 2  ;;  %v1866_v58 = vrot.slane %v5177_v53, 2 }
 0x153   : > { %v1867_v40 = vrot.slane %v5180_v0, 2  ;;  %v1869_v41 = vrot.slane %v5183_v28, 2  ;;  %v1872_v49 = vrot.slane %v5189_v30, 2  ;;  %v1874_v42 = vrot.slane %v5192_v19, 2 }
 0x154   : > { %v1876_v34 = vrot.slane %v5195_v61, 2  ;;  %v1877_v4 = vrot.slane %v5198_v57, 2  ;;  %v1879_v37 = vrot.slane %v5201_v50, 2  ;;  %v1853_v21 = vsel %vm722_vm1, %v1851_v16, %v1852_v62 }
 0x155   : > { %v1881_v59 = vrot.slane %v5204_v35, 2  ;;  %v1882_v53 = vrot.slane %v5207_v36, 2  ;;  %v1884_v0 = vrot.slane %v5210_v3, 2  ;;  %v1855_v28 = vsel %vm722_vm1, %v1852_v62, %v1854_v20 }
 0x156   : > { %v1858_v1 = vsel %vm722_vm1, %v1856_v46, %v1857_v31  ;;  %v1860_v30 = vsel %vm722_vm1, %v1857_v31, %v1859_v38  ;;  %v1863_v19 = vsel %vm722_vm1, %v1861_v44, %v1862_v15  ;;  %v1865_v61 = vsel %vm722_vm1, %v1862_v15, %v1864_v33 }
 0x157   : > { %v1868_v50 = vsel %vm722_vm1, %v1866_v58, %v1867_v40  ;;  %v1870_v57 = vsel %vm722_vm1, %v1867_v40, %v1869_v41  ;;  %v1873_v35 = vsel %vm722_vm1, %v1871_v32, %v1872_v49  ;;  %v1875_v36 = vsel %vm722_vm1, %v1872_v49, %v1874_v42 }
 0x158   : > { %v1878_v3 = vsel %vm722_vm1, %v1876_v34, %v1877_v4  ;;  %v1880_v6 = vsel %vm722_vm1, %v1877_v4, %v1879_v37  ;;  %v1886_v16 = vrot.slane %v5213_v45, 2  ;;  %v1883_v62 = vsel %vm722_vm1, %v1881_v59, %v1882_v53 }
 0x159   : > { %v1885_v20 = vsel %vm722_vm1, %v1882_v53, %v1884_v0  ;;  %v1887_v46 = vrot.slane %v5216_v55, 2  ;;  %v1889_v31 = vrot.slane %v5219_v27, 2  ;;  %v1891_v38 = vrot.slane %v5222_v5, 2 }
 0x15a   : > { %v1892_v44 = vrot.slane %v5225_v26, 2  ;;  %v1894_v15 = vrot.slane %v5228_v47, 2  ;;  %v1896_v33 = vrot.slane %v5231_v22, 2  ;;  %v1897_v58 = vrot.slane %v5234_v63, 2 }
 0x15b   : > { %v1899_v45 = vrot.slane %v5237_v13, 2  ;;  %v1901_v40 = vrot.slane %v5240_v11, 2  ;;  %v1902_v41 = vrot.slane %v5243_v25, 2  ;;  %v1904_v55 = vrot.slane %v5246_v24, 2 }
 0x15c   : > { %v1906_v27 = vrot.slane %v5249_v8, 2  ;;  %v1907_v5 = vrot.slane %v5252_v39, 2  ;;  %v1909_v26 = vrot.slane %v5255_v60, 2  ;;  %v1888_v47 = vsel %vm722_vm1, %v1886_v16, %v1887_v46 }
 0x15d   : > { %v1911_v22 = vrot.slane %v5258_v2, 2  ;;  %v1912_v63 = vrot.slane %v5261_v9, 2  ;;  %v1914_v13 = vrot.slane %v5264_v51, 2  ;;  %v1890_v11 = vsel %vm722_vm1, %v1887_v46, %v1889_v31  ;;  %v6508_v46 = vld [vmem:[#allocation10_spill] sm:$0xff] }
 0x15e   : > { %v1916_v25 = vrot.slane %v5267_v48, 2  ;;  %v1917_v24 = vrot.slane %v5270_v17, 2  ;;  %v1919_v8 = vrot.slane %v5274_v14, 2  ;;  %v1893_v39 = vsel %vm722_vm1, %v1891_v38, %v1892_v44 }
 0x15f   : > { %v1895_v60 = vsel %vm722_vm1, %v1892_v44, %v1894_v15  ;;  %v1898_v32 = vsel %vm722_vm1, %v1896_v33, %v1897_v58  ;;  %v1900_v2 = vsel %vm722_vm1, %v1897_v58, %v1899_v45  ;;  %v1903_v9 = vsel %vm722_vm1, %v1901_v40, %v1902_v41  ;;  %v6511_v44 = vld [vmem:[#allocation60_spill] sm:$0xff]  ;;  %v6518_v45 = vld [vmem:[#allocation66_spill] sm:$0xff] }
 0x160   : > { %v1905_v51 = vsel %vm722_vm1, %v1902_v41, %v1904_v55  ;;  %v1908_v49 = vsel %vm722_vm1, %v1906_v27, %v1907_v5  ;;  %v1910_v48 = vsel %vm722_vm1, %v1907_v5, %v1909_v26  ;;  %v1913_v17 = vsel %vm722_vm1, %v1911_v22, %v1912_v63  ;;  %v6519_v41 = vld [vmem:[#allocation67_spill] sm:$0xff]  ;;  %v6520_v27 = vld [vmem:[#allocation68_spill] sm:$0xff]  ;;  %v6521_v5 = vld [vmem:[#allocation69_spill] sm:$0xff] }
 0x161   : > { %v1915_v14 = vsel %vm722_vm1, %v1912_v63, %v1914_v13  ;;  %v1953_v42 = vadd.f32 %v5277_v54, %v5040_v7  ;;  %v1954_v34 = vadd.f32 %v5281_v43, %v5044_v29  ;;  %v1918_v4 = vsel %vm722_vm1, %v1916_v25, %v1917_v24  ;;  %v6509_v7 = vld [vmem:[#allocation11_spill] sm:$0xff]  ;;  %v5373_v29 = vld [vmem:[%s5719_s2] ss:$0 sm:$0xff]  ;;  %v6524_v22 = vld [vmem:[#allocation72_spill] sm:$0xff] }
 0x162   : > { %v1920_v37 = vsel %vm722_vm1, %v1917_v24, %v1919_v8  ;;  %v1955_v59 = vadd.f32 %v5284_v52, %v5050_v18  ;;  %v1956_v53 = vadd.f32 %v5289_v23, %v5054_v56  ;;  %v1957_v0 = vadd.f32 %v1853_v21, %v5057_v10  ;;  %v6510_v43 = vld [vmem:[#allocation59_spill] sm:$0xff]  ;;  %v6512_v52 = vld [vmem:[#allocation61_spill] sm:$0xff]  ;;  %v6513_v56 = vld [vmem:[#allocation62_spill] sm:$0xff] }
 0x163   : > { %v1958_v16 = vadd.f32 %v1855_v28, %v5060_v12  ;;  %v1959_v31 = vadd.f32 %v1858_v1, %v6508_v46  ;;  %v1960_v54 = vadd.f32 %v1860_v30, %v6509_v7  ;;  %v1961_v38 = vadd.f32 %v1863_v19, %v6510_v43  ;;  %v6514_v10 = vld [vmem:[#allocation42_spill] sm:$0xff]  ;;  %v6515_v12 = vld [vmem:[#allocation63_spill] sm:$0xff]  ;;  %v6516_v1 = vld [vmem:[#allocation64_spill] sm:$0xff] }
 0x164   : > { %v1962_v18 = vadd.f32 %v1865_v61, %v6511_v44  ;;  %v1963_v15 = vadd.f32 %v1868_v50, %v6512_v52  ;;  %v1964_v23 = vadd.f32 %v1870_v57, %v6513_v56  ;;  %v1965_v21 = vadd.f32 %v1873_v35, %v6514_v10  ;;  %v6517_v30 = vld [vmem:[#allocation65_spill] sm:$0xff]  ;;  %v6526_v25 = vld [vmem:[#allocation74_spill] sm:$0xff]  ;;  %v6527_v8 = vld [vmem:[#allocation75_spill] sm:$0xff] }
 0x165   : > { %v1966_v28 = vadd.f32 %v1875_v36, %v6515_v12  ;;  %v1967_v33 = vadd.f32 %v1878_v3, %v6516_v1  ;;  %v1968_v58 = vadd.f32 %v1880_v6, %v6517_v30  ;;  %v1969_v40 = vadd.f32 %v1883_v62, %v6518_v45  ;;  %v5396_v3 = vld [vmem:[%s5720_s3] ss:$0 sm:$0xff]  ;;  %v6525_v13 = vld [vmem:[#allocation73_spill] sm:$0xff] }
 0x166   : > { %v1970_v55 = vadd.f32 %v1885_v20, %v6519_v41  ;;  %v1992_v19 = vmul.f32 %v5373_v29, %v1953_v42  ;;  %v1993_v61 = vmul.f32 %v5373_v29, %v1954_v34  ;;  %v1971_v50 = vadd.f32 %v1888_v47, %v6520_v27  ;;  %v6522_v6 = vld [vmem:[#allocation70_spill] sm:$0xff]  ;;  %v6523_v20 = vld [vmem:[#allocation71_spill] sm:$0xff]  ;;  %v6528_v34 = vld [vmem:[#allocation76_spill] sm:$0xff] }
 0x167   : > { %v5389_v57 = vadd.f32 %v1890_v11, %v6521_v5  ;;  %v1994_v35 = vmul.f32 %v5373_v29, %v1955_v59  ;;  %v1995_v36 = vmul.f32 %v5373_v29, %v1956_v53  ;;  %v5399_v62 = vadd.f32 %v1893_v39, %v6522_v6 }
 0x168   : > { %v5402_v26 = vadd.f32 %v1895_v60, %v6523_v20  ;;  %v5405_v47 = vadd.f32 %v1898_v32, %v6524_v22  ;;  %v1996_v63 = vmul.f32 %v5373_v29, %v1957_v0  ;;  %v5409_v11 = vadd.f32 %v1900_v2, %v6525_v13  ;;  %v6529_v2 = vld [vmem:[#allocation77_spill] sm:$0xff] }
 0x169   : > { %v5412_v24 = vadd.f32 %v1903_v9, %v6526_v25  ;;  %v5415_v42 = vadd.f32 %v1905_v51, %v6527_v8  ;;  %v1997_v39 = vmul.f32 %v5373_v29, %v1958_v16  ;;  %v5419_v59 = vadd.f32 %v1908_v49, %v6528_v34  ;;  %v6530_v49 = vld [vmem:[#allocation78_spill] sm:$0xff] }
 0x16a   : > { %v1998_v60 = vmul.f32 %v5373_v29, %v1959_v31  ;;  %v5423_v32 = vadd.f32 %v5396_v3, %v1992_v19  ;;  %v5426_v53 = vadd.f32 %v5396_v3, %v1993_v61  ;;  %v5429_v0 = vadd.f32 %v1910_v48, %v6529_v2  ;;  %v6531_v31 = vld [vmem:[#allocation79_spill] sm:$0xff]  ;;  %v6532_v48 = vld [vmem:[#allocation80_spill] sm:$0xff] }
 0x16b   : > { %v1999_v9 = vmul.f32 %v5373_v29, %v1960_v54  ;;  %v5433_v51 = vadd.f32 %v5396_v3, %v1994_v35  ;;  %v5436_v16 = vadd.f32 %v5396_v3, %v1995_v36  ;;  %v5439_v46 = vadd.f32 %v1913_v17, %v6530_v49  ;;  %v6533_v54 = vld [vmem:[#allocation81_spill] sm:$0xff] }
 0x16c   : > { %v5442_v7 = vadd.f32 %v1915_v14, %v6531_v31  ;;  %v2000_v43 = vmul.f32 %v5373_v29, %v1961_v38  ;;  %v5446_v44 = vadd.f32 %v5396_v3, %v1996_v63  ;;  %v5449_v52 = vadd.f32 %v1918_v4, %v6532_v48 }
 0x16d   : > { %v5452_v56 = vadd.f32 %v1920_v37, %v6533_v54  ;;  %v2001_v10 = vmul.f32 %v5373_v29, %v1962_v18  ;;  %v5456_v12 = vadd.f32 %v5396_v3, %v1997_v39  ;;  %v2002_v17 = vmul.f32 %v5373_v29, %v1963_v15 }
 0x16e   : > { %v5460_v14 = vadd.f32 %v5396_v3, %v1998_v60  ;;  %v2521_v38 = vmul.f32 -1.442695, %v5423_v32  ;;  %v2522_v1 = vmul.f32 -1.442695, %v5426_v53  ;;  %v2003_v4 = vmul.f32 %v5373_v29, %v1964_v23 }
 0x16f   : > { %v5466_v30 = vadd.f32 %v5396_v3, %v1999_v9  ;;  %v2523_v37 = vmul.f32 -1.442695, %v5433_v51  ;;  %v2524_v18 = vmul.f32 -1.442695, %v5436_v16  ;;  %v2004_v45 = vmul.f32 %v5373_v29, %v1965_v21 }
 0x170   : > { %v5472_v15 = vadd.f32 %v5396_v3, %v2000_v43  ;;  %2768 = vpow2.f32 %v2521_v38  ;;  %v2525_v41 = vmul.f32 -1.442695, %v5446_v44  ;;  %v2005_v19 = vmul.f32 %v5373_v29, %v1966_v28 }
 0x171   : > { %v5477_v61 = vadd.f32 %v5396_v3, %v2001_v10  ;;  %2770 = vpow2.f32 %v2522_v1  ;;  %v2526_v23 = vmul.f32 -1.442695, %v5456_v12  ;;  %v2006_v27 = vmul.f32 %v5373_v29, %v1967_v33 }
 0x172   : > { %v5482_v5 = vadd.f32 %v5396_v3, %v2002_v17  ;;  %2772 = vpow2.f32 %v2523_v37  ;;  %v2527_v21 = vmul.f32 -1.442695, %v5460_v14  ;;  %v2007_v35 = vmul.f32 %v5373_v29, %v1968_v58 }
 0x173   : > { %v5487_v36 = vadd.f32 %v5396_v3, %v2003_v4  ;;  %2774 = vpow2.f32 %v2524_v18  ;;  %v2528_v28 = vmul.f32 -1.442695, %v5466_v30  ;;  %v2008_v6 = vmul.f32 %v5373_v29, %v1969_v40 }
 0x174   : > { %v5492_v20 = vadd.f32 %v5396_v3, %v2004_v45  ;;  %2776 = vpow2.f32 %v2525_v41  ;;  %v2529_v33 = vmul.f32 -1.442695, %v5472_v15  ;;  %v2009_v22 = vmul.f32 %v5373_v29, %v1970_v55 }
 0x175   : > { %v5497_v63 = vadd.f32 %v5396_v3, %v2005_v19  ;;  %2778 = vpow2.f32 %v2526_v23  ;;  %v2530_v58 = vmul.f32 -1.442695, %v5477_v61  ;;  %v2010_v13 = vmul.f32 %v5373_v29, %v1971_v50 }
 0x176   : > { %v5502_v25 = vadd.f32 %v5396_v3, %v2006_v27  ;;  %2780 = vpow2.f32 %v2527_v21  ;;  %v2531_v40 = vmul.f32 -1.442695, %v5482_v5  ;;  %v2011_v8 = vmul.f32 %v5373_v29, %v5389_v57 }
 0x177   : > { %v5508_v39 = vadd.f32 %v5396_v3, %v2007_v35  ;;  %2782 = vpow2.f32 %v2528_v28  ;;  %v2532_v55 = vmul.f32 -1.442695, %v5487_v36  ;;  %v2012_v34 = vmul.f32 %v5373_v29, %v5399_v62 }
 0x178   : > { %v5514_v50 = vadd.f32 %v5396_v3, %v2008_v6  ;;  %2784 = vpow2.f32 %v2529_v33  ;;  %v2533_v60 = vmul.f32 -1.442695, %v5492_v20  ;;  %v2013_v2 = vmul.f32 %v5373_v29, %v5402_v26 }
 0x179   : > { %v5520_v57 = vadd.f32 %v5396_v3, %v2009_v22  ;;  %2786 = vpow2.f32 %v2530_v58  ;;  %v2534_v9 = vmul.f32 -1.442695, %v5497_v63  ;;  %v2014_v62 = vmul.f32 %v5373_v29, %v5405_v47 }
 0x17a   : > { %v5523_v49 = vpop.eup %2768  ;;  %v5528_v31 = vadd.f32 %v5396_v3, %v2010_v13  ;;  %2788 = vpow2.f32 %v2531_v40  ;;  %v2535_v43 = vmul.f32 -1.442695, %v5502_v25  ;;  %v2015_v26 = vmul.f32 %v5373_v29, %v5409_v11 }
 0x17b   : > { %v5531_v48 = vpop.eup %2770  ;;  %v5536_v54 = vadd.f32 %v5396_v3, %v2011_v8  ;;  %2790 = vpow2.f32 %v2532_v55  ;;  %v2536_v10 = vmul.f32 -1.442695, %v5508_v39  ;;  %v2016_v47 = vmul.f32 %v5373_v29, %v5412_v24 }
 0x17c   : > { %v5539_v17 = vpop.eup %2772  ;;  %v5544_v38 = vadd.f32 %v5396_v3, %v2012_v34  ;;  %2792 = vpow2.f32 %v2533_v60  ;;  %v2537_v1 = vmul.f32 -1.442695, %v5514_v50  ;;  %v2017_v11 = vmul.f32 %v5373_v29, %v5415_v42 }
 0x17d   : > { %v5547_v4 = vpop.eup %2774  ;;  %v5552_v37 = vadd.f32 %v5396_v3, %v2013_v2  ;;  %2794 = vpow2.f32 %v2534_v9  ;;  %v2538_v18 = vmul.f32 -1.442695, %v5520_v57  ;;  %v2018_v24 = vmul.f32 %v5373_v29, %v5419_v59 }
 0x17e   : > { %v5555_v45 = vpop.eup %2776  ;;  %v5560_v41 = vadd.f32 %v5396_v3, %v2014_v62  ;;  %2796 = vpow2.f32 %v2535_v43  ;;  %v2539_v19 = vmul.f32 -1.442695, %v5528_v31  ;;  %v2019_v42 = vmul.f32 %v5373_v29, %v5429_v0 }
 0x17f   : > { %v5563_v23 = vpop.eup %2778  ;;  %v5568_v27 = vadd.f32 %v5396_v3, %v2015_v26  ;;  %2798 = vpow2.f32 %v2536_v10  ;;  %v2540_v21 = vmul.f32 -1.442695, %v5536_v54  ;;  %v2020_v59 = vmul.f32 %v5373_v29, %v5439_v46 }
 0x180   : > { %v5571_v35 = vpop.eup %2780  ;;  %v5576_v28 = vadd.f32 %v5396_v3, %v2016_v47  ;;  %2800 = vpow2.f32 %v2537_v1  ;;  %v2541_v6 = vmul.f32 -1.442695, %v5544_v38  ;;  %v2021_v0 = vmul.f32 %v5373_v29, %v5442_v7 }
 0x181   : > { %v5579_v33 = vpop.eup %2782  ;;  %v5584_v22 = vadd.f32 %v5396_v3, %v2017_v11  ;;  %2802 = vpow2.f32 %v2538_v18  ;;  %v2542_v58 = vmul.f32 -1.442695, %v5552_v37  ;;  %v2022_v46 = vmul.f32 %v5373_v29, %v5449_v52 }
 0x182   : > { %v2785_v13 = vpop.eup %2784  ;;  %v5590_v40 = vadd.f32 %v5396_v3, %v2018_v24  ;;  %2804 = vpow2.f32 %v2539_v19  ;;  %v2543_v8 = vmul.f32 -1.442695, %v5560_v41  ;;  %v2023_v7 = vmul.f32 %v5373_v29, %v5452_v56 }
 0x183   : > { %v2787_v55 = vpop.eup %2786  ;;  %v5596_v34 = vadd.f32 %v5396_v3, %v2019_v42  ;;  %2806 = vpow2.f32 %v2540_v21  ;;  %v2544_v60 = vmul.f32 -1.442695, %v5568_v27  ;;  %v5600_v9 = vadd.f32 %v5396_v3, %v2020_v59 }
 0x184   : > { %v2789_v2 = vpop.eup %2788  ;;  %2808 = vpow2.f32 %v2541_v6  ;;  %v2545_v52 = vmul.f32 -1.442695, %v5576_v28  ;;  %v5604_v43 = vadd.f32 %v5396_v3, %v2021_v0  ;;  %v2546_v29 = vmul.f32 -1.442695, %v5584_v22 }
 0x185   : > { %v2791_v62 = vpop.eup %2790  ;;  %2810 = vpow2.f32 %v2542_v58  ;;  %v5608_v26 = vadd.f32 %v5396_v3, %v2022_v46  ;;  %v2547_v10 = vmul.f32 -1.442695, %v5590_v40  ;;  %v5612_v1 = vadd.f32 %v5396_v3, %v2023_v7 }
 0x186   : > { %v2793_v56 = vpop.eup %2792  ;;  %2812 = vpow2.f32 %v2543_v8  ;;  %v2548_v11 = vmul.f32 -1.442695, %v5596_v34  ;;  %v2549_v24 = vmul.f32 -1.442695, %v5600_v9  ;;  %v2550_v42 = vmul.f32 -1.442695, %v5604_v43 }
 0x187   : > { %6534 = vst [vmem:[#allocation3_spill] sm:$0xff] %v5608_v26  ;;  %v2795_v47 = vpop.eup %2794  ;;  %6535 = vst [vmem:[#allocation4_spill] sm:$0xff] %v5612_v1  ;;  %2814 = vpow2.f32 %v2544_v60  ;;  %v2551_v59 = vmul.f32 -1.442695, %v5608_v26  ;;  %v2552_v3 = vmul.f32 -1.442695, %v5612_v1 }
 0x188   : > { %v2797_v18 = vpop.eup %2796  ;;  %2816 = vpow2.f32 %v2545_v52  ;;  %v2159_v58 = vadd.f32 1.0, %v5523_v49  ;;  %v2160_v8 = vadd.f32 1.0, %v5531_v48  ;;  %v2161_v60 = vadd.f32 1.0, %v5539_v17 }
 0x189   : > { %v2799_v19 = vpop.eup %2798  ;;  %2818 = vpow2.f32 %v2546_v29  ;;  %v2162_v29 = vadd.f32 1.0, %v5547_v4  ;;  %v2164_v49 = vadd.f32 1.0, %v5563_v23 }
 0x18a   : > { %v2801_v21 = vpop.eup %2800  ;;  %2820 = vpow2.f32 %v2547_v10  ;;  %v2174_v26 = vadd.f32 1.0, %v2799_v19 }
 0x18b   : > { %v2803_v6 = vpop.eup %2802  ;;  %2822 = vpow2.f32 %v2548_v11  ;;  %v2163_v11 = vadd.f32 1.0, %v5555_v45 }
 0x18c   : > { %v2805_v0 = vpop.eup %2804  ;;  %2824 = vpow2.f32 %v2549_v24 }
 0x18d   : > { %v2807_v46 = vpop.eup %2806  ;;  %2826 = vpow2.f32 %v2550_v42  ;;  %v2165_v42 = vadd.f32 1.0, %v5571_v35 }
 0x18e   : > { %v2809_v7 = vpop.eup %2808  ;;  %2828 = vpow2.f32 %v2551_v59  ;;  %v2166_v59 = vadd.f32 1.0, %v5579_v33  ;;  %v2171_v33 = vadd.f32 1.0, %v2793_v56 }
 0x18f   : > { %v5622_v52 = vpop.eup %2810  ;;  %2830 = vpow2.f32 %v2552_v3  ;;  %v2167_v3 = vadd.f32 1.0, %v2785_v13  ;;  %v2172_v13 = vadd.f32 1.0, %v2795_v47  ;;  %v2176_v47 = vadd.f32 1.0, %v2803_v6 }
 0x190   : > { %v5625_v10 = vpop.eup %2812  ;;  %2832 = vrcp.f32 %v2159_v58  ;;  %v2168_v58 = vadd.f32 1.0, %v2787_v55  ;;  %v2173_v55 = vadd.f32 1.0, %v2797_v18 }
 0x191   : > { %v5628_v24 = vpop.eup %2814  ;;  %2834 = vrcp.f32 %v2160_v8  ;;  %v2169_v8 = vadd.f32 1.0, %v2789_v2 }
 0x192   : > { %v5631_v48 = vpop.eup %2816  ;;  %2836 = vrcp.f32 %v2161_v60  ;;  %v2170_v60 = vadd.f32 1.0, %v2791_v62  ;;  %v2175_v62 = vadd.f32 1.0, %v2801_v21 }
 0x193   : > { %v5634_v17 = vpop.eup %2818  ;;  %2838 = vrcp.f32 %v2162_v29 }
 0x194   : > { %v5637_v4 = vpop.eup %2820  ;;  %2840 = vrcp.f32 %v2163_v11 }
 0x195   : > { %v5639_v45 = vpop.eup %2822  ;;  %2842 = vrcp.f32 %v2164_v49 }
 0x196   : > { %v5641_v23 = vpop.eup %2824  ;;  %2844 = vrcp.f32 %v2165_v42 }
 0x197   : > { %v5643_v35 = vpop.eup %2826  ;;  %2846 = vrcp.f32 %v2166_v59 }
 0x198   : > { %v5645_v1 = vpop.eup %2828  ;;  %2848 = vrcp.f32 %v2167_v3  ;;  %v2177_v3 = vadd.f32 1.0, %v2805_v0  ;;  %v2180_v0 = vadd.f32 1.0, %v5622_v52 }
 0x199   : > { %v5647_v29 = vpop.eup %2830  ;;  %2850 = vrcp.f32 %v2168_v58 }
 0x19a   : > { %v2833_v11 = vpop.eup %2832  ;;  %2852 = vrcp.f32 %v2169_v8  ;;  %v2178_v8 = vadd.f32 1.0, %v2807_v46 }
 0x19b   : > { %v2835_v49 = vpop.eup %2834  ;;  %2854 = vrcp.f32 %v2170_v60  ;;  %v2255_v2 = vmul.f32 %v2833_v11, %v5423_v32 }
 0x19c   : > { %v2837_v42 = vpop.eup %2836  ;;  %2856 = vrcp.f32 %v2171_v33  ;;  %v2256_v59 = vmul.f32 %v2835_v49, %v5426_v53  ;;  %v2179_v33 = vadd.f32 1.0, %v2809_v7  ;;  %v2183_v49 = vadd.f32 1.0, %v5631_v48 }
 0x19d   : > { %v2839_v56 = vpop.eup %2838  ;;  %2858 = vrcp.f32 %v2172_v13  ;;  %v2257_v18 = vmul.f32 %v2837_v42, %v5433_v51 }
 0x19e   : > { %v2841_v19 = vpop.eup %2840  ;;  %2860 = vrcp.f32 %v2173_v55  ;;  %v2258_v32 = vmul.f32 %v2839_v56, %v5436_v16  ;;  %v2659_v21 = vpack.c.bf16 %v2256_v59, %v2255_v2 }
 0x19f   : > { %v2843_v58 = vpop.eup %2842  ;;  %2862 = vrcp.f32 %v2174_v26  ;;  %v2259_v53 = vmul.f32 %v2841_v19, %v5446_v44  ;;  %v2181_v26 = vadd.f32 1.0, %v5625_v10 }
 0x1a0   : > { %v2845_v60 = vpop.eup %2844  ;;  %2864 = vrcp.f32 %v2175_v62  ;;  %v2260_v6 = vmul.f32 %v2843_v58, %v5456_v12  ;;  %2660 = vst [vmem:[%s5655_s22] sm:$0xff] %v2659_v21   ;;  %v2664_v13 = vpack.c.bf16 %v2258_v32, %v2257_v18  ;;  %v2182_v12 = vadd.f32 1.0, %v5628_v24 }
 0x1a1   : > { %v2847_v51 = vpop.eup %2846  ;;  %2866 = vrcp.f32 %v2176_v47  ;;  %v2261_v16 = vmul.f32 %v2845_v60, %v5460_v14  ;;  %v2185_v62 = vadd.f32 1.0, %v5637_v4  ;;  %v2187_v47 = vadd.f32 1.0, %v5641_v23 }
 0x1a2   : > { %v2849_v11 = vpop.eup %2848  ;;  %2868 = vrcp.f32 %v2177_v3  ;;  %v2262_v44 = vmul.f32 %v2847_v51, %v5466_v30  ;;  %2744 = vst [vmem:[%s5655_s22 + $0x8] sm:$0xff] %v2664_v13   ;;  %v2669_v46 = vpack.c.bf16 %v2260_v6, %v2259_v53  ;;  %v2184_v30 = vadd.f32 1.0, %v5634_v17 }
 0x1a3   : > { %v2851_v7 = vpop.eup %2850  ;;  %2870 = vrcp.f32 %v2178_v8  ;;  %v2263_v55 = vmul.f32 %v2849_v11, %v5472_v15  ;;  %v2189_v3 = vadd.f32 1.0, %v5645_v1 }
 0x1a4   : > { %v2853_v52 = vpop.eup %2852  ;;  %2872 = vrcp.f32 %v2179_v33  ;;  %v2264_v14 = vmul.f32 %v2851_v7, %v5477_v61  ;;  %2745 = vst [vmem:[%s5655_s22 + $0x10] sm:$0xff] %v2669_v46   ;;  %v2674_v10 = vpack.c.bf16 %v2262_v44, %v2261_v16  ;;  %v2186_v61 = vadd.f32 1.0, %v5639_v45 }
 0x1a5   : > { %v2855_v2 = vpop.eup %2854  ;;  %2874 = vrcp.f32 %v2180_v0  ;;  %v2265_v42 = vmul.f32 %v2853_v52, %v5482_v5 }
 0x1a6   : > { %v2857_v24 = vpop.eup %2856  ;;  %2876 = vrcp.f32 %v2181_v26  ;;  %v2266_v15 = vmul.f32 %v2855_v2, %v5487_v36  ;;  %2746 = vst [vmem:[%s5655_s22 + $0x18] sm:$0xff] %v2674_v10   ;;  %v2679_v48 = vpack.c.bf16 %v2264_v14, %v2263_v55  ;;  %v2188_v36 = vadd.f32 1.0, %v5643_v35  ;;  %v6536_v14 = vld [vmem:[#allocation3_spill] sm:$0xff]  ;;  %v6537_v2 = vld [vmem:[#allocation4_spill] sm:$0xff] }
 0x1a7   : > { %v2859_v59 = vpop.eup %2858  ;;  %2878 = vrcp.f32 %v2182_v12  ;;  %v2267_v56 = vmul.f32 %v2857_v24, %v5492_v20 }
 0x1a8   : > { %v2861_v17 = vpop.eup %2860  ;;  %2880 = vrcp.f32 %v2183_v49  ;;  %v2268_v5 = vmul.f32 %v2859_v59, %v5497_v63  ;;  %2747 = vst [vmem:[%s5655_s22 + $0x20] sm:$0xff] %v2679_v48   ;;  %v2684_v4 = vpack.c.bf16 %v2266_v15, %v2265_v42  ;;  %v2190_v63 = vadd.f32 1.0, %v5647_v29 }
 0x1a9   : > { %v2863_v18 = vpop.eup %2862  ;;  %2882 = vrcp.f32 %v2184_v30  ;;  %v2269_v19 = vmul.f32 %v2861_v17, %v5502_v25 }
 0x1aa   : > { %v2865_v45 = vpop.eup %2864  ;;  %2884 = vrcp.f32 %v2185_v62  ;;  %v2270_v20 = vmul.f32 %v2863_v18, %v5508_v39  ;;  %2748 = vst [vmem:[%s5655_s22 + $0x28] sm:$0xff] %v2684_v4   ;;  %v2689_v23 = vpack.c.bf16 %v2268_v5, %v2267_v56 }
 0x1ab   : > { %v2867_v32 = vpop.eup %2866  ;;  %2886 = vrcp.f32 %v2186_v61  ;;  %v2271_v21 = vmul.f32 %v2865_v45, %v5514_v50 }
 0x1ac   : > { %v2869_v35 = vpop.eup %2868  ;;  %2888 = vrcp.f32 %v2187_v47  ;;  %v2272_v58 = vmul.f32 %v2867_v32, %v5520_v57  ;;  %2749 = vst [vmem:[%s5655_s22 + $0x30] sm:$0xff] %v2689_v23   ;;  %v2694_v25 = vpack.c.bf16 %v2270_v20, %v2269_v19 }
 0x1ad   : > { %v2871_v1 = vpop.eup %2870  ;;  %2890 = vrcp.f32 %v2188_v36  ;;  %v2273_v39 = vmul.f32 %v2869_v35, %v5528_v31 }
 0x1ae   : > { %v2873_v8 = vpop.eup %2872  ;;  %2892 = vrcp.f32 %v2189_v3  ;;  %v2274_v53 = vmul.f32 %v2871_v1, %v5536_v54  ;;  %2750 = vst [vmem:[%s5655_s22 + $0x38] sm:$0xff] %v2694_v25   ;;  %v2699_v29 = vpack.c.bf16 %v2272_v58, %v2271_v21 }
 0x1af   : > { %v2875_v60 = vpop.eup %2874  ;;  %2894 = vrcp.f32 %v2190_v63  ;;  %v2275_v50 = vmul.f32 %v2873_v8, %v5544_v38 }
 0x1b0   : > { %v2877_v57 = vpop.eup %2876  ;;  %v2276_v33 = vmul.f32 %v2875_v60, %v5552_v37  ;;  %2751 = vst [vmem:[%s5655_s22 + $0x40] sm:$0xff] %v2699_v29   ;;  %v2704_v6 = vpack.c.bf16 %v2274_v53, %v2273_v39 }
 0x1b1   : > { %v2879_v13 = vpop.eup %2878  ;;  %v2277_v31 = vmul.f32 %v2877_v57, %v5560_v41 }
 0x1b2   : > { %v2881_v51 = vpop.eup %2880  ;;  %v2278_v0 = vmul.f32 %v2879_v13, %v5568_v27  ;;  %2752 = vst [vmem:[%s5655_s22 + $0x48] sm:$0xff] %v2704_v6   ;;  %v2709_v54 = vpack.c.bf16 %v2276_v33, %v2275_v50 }
 0x1b3   : > { %v2883_v16 = vpop.eup %2882  ;;  %v2279_v11 = vmul.f32 %v2881_v51, %v5576_v28 }
 0x1b4   : > { %v2885_v26 = vpop.eup %2884  ;;  %v2280_v38 = vmul.f32 %v2883_v16, %v5584_v22  ;;  %2753 = vst [vmem:[%s5655_s22 + $0x50] sm:$0xff] %v2709_v54   ;;  %v2714_v37 = vpack.c.bf16 %v2278_v0, %v2277_v31 }
 0x1b5   : > { %v2887_v44 = vpop.eup %2886  ;;  %v2281_v46 = vmul.f32 %v2885_v26, %v5590_v40 }
 0x1b6   : > { %v2889_v41 = vpop.eup %2888  ;;  %v2282_v7 = vmul.f32 %v2887_v44, %v5596_v34  ;;  %2754 = vst [vmem:[%s5655_s22 + $0x58] sm:$0xff] %v2714_v37   ;;  %v2719_v27 = vpack.c.bf16 %v2280_v38, %v2279_v11 }
 0x1b7   : > { %v2891_v12 = vpop.eup %2890  ;;  %v2283_v55 = vmul.f32 %v2889_v41, %v5600_v9 }
 0x1b8   : > { %v2893_v28 = vpop.eup %2892  ;;  %v2284_v52 = vmul.f32 %v2891_v12, %v5604_v43  ;;  %2755 = vst [vmem:[%s5655_s22 + $0x60] sm:$0xff] %v2719_v27   ;;  %v2724_v22 = vpack.c.bf16 %v2282_v7, %v2281_v46 }
 0x1b9   : > { %v2895_v49 = vpop.eup %2894  ;;  %v2285_v10 = vmul.f32 %v2893_v28, %v6536_v14 }
 0x1ba   : > { %v2286_v40 = vmul.f32 %v2895_v49, %v6537_v2  ;;  %2756 = vst [vmem:[%s5655_s22 + $0x68] sm:$0xff] %v2724_v22   ;;  %v2729_v30 = vpack.c.bf16 %v2284_v52, %v2283_v55 }
 0x1bc   : > { %2757 = vst [vmem:[%s5655_s22 + $0x70] sm:$0xff] %v2729_v30   ;;  %v2734_v34 = vpack.c.bf16 %v2286_v40, %v2285_v10 }
 0x1be   : > { %2758 = vst [vmem:[%s5655_s22 + $0x78] sm:$0xff] %v2734_v34  }
 0x1bf PF: > { %s14_s15 = sadd.s32 1, %s2902_s15  }
 0x1c0   : > { %p11_p4 = scmp.ge.s32.totalorder %s14_s15, 4  }
 0x1c2   :  { %13 = sbr.rel (!%p11_p4) target bundleno = 1 (0x1), region = 66 }

// kernel: cnn_efficientnet_forward.14
= control target key start
LH: loop header
LB: loop body
LE: loop exit
PB: predicated region body
PF: predicated region fallthrough
CT: control target
= control target key end

     0   :  { %s1823_s18 = smov 0   ;;  %s1825_s19 = smov 0   ;;  %s2120_s0 = inlined_call_operand.vmem [shape: bf16[512,128], index: 0, kind: input, shape index: {}]   ;;  %s2121_s1 = inlined_call_operand.vmem [shape: bf16[128,128], index: 1, kind: input, shape index: {}]   ;;  %s2122_s2 = inlined_call_operand.vmem [shape: f32[1,128], index: 2, kind: input, shape index: {}]   ;;  %s2123_s3 = inlined_call_operand.vmem [shape: f32[1,128], index: 3, kind: input, shape index: {}]   ;;  %s2124_s4 = inlined_call_operand.vmem [shape: bf16[512,128], index: 4, kind: input, shape index: {}]   ;;  %s2125_s5 = inlined_call_operand.vmem [shape: bf16[512,128], index: 5, kind: output, shape index: {}]  }
   0x1   :  { %s1827_s20 = smov 0  }
   0x2 LB: > { %s34_s21 = sadd.s32 1, %s1787_s19  ;;  %p1360_p0 = scmp.ge.s32.totalorder %s1791_s20, 1  ;;  %s1791_s20 = sphi %s1827_s20, %s15_s20   ;;  %s1787_s19 = sphi %s1825_s19, %s2127_s19   ;;  %s1783_s18 = sphi %s1823_s18, %s2126_s18  }
   0x3   : > { %p36_p1 = scmp.ge.s32.totalorder %s34_s21, 2  ;;  %p262_p2 = scmp.lt.s32.totalorder %s1791_s20, 3 }
   0x5   : > { %s2129_s21 = smov (%p36_p1, %s34_s21), 0  ;;  %p263_p3 = pnand %p1360_p0, %p262_p2 }
   0x6   : > { %v1745_v0 = vld [vmem:[%s2121_s1] sm:$0xff] (!%p263_p3)   ;;  %s1361_s24 = sshll.u32 (!%p263_p3), %s1783_s18, 5  ;;  %v1746_v1 = vld [vmem:[%s2121_s1 + $0x8] sm:$0xff] (!%p263_p3)   ;;  %v1747_v2 = vld [vmem:[%s2121_s1 + $0x10] sm:$0xff] (!%p263_p3)  }
   0x7   : > { %266 = sbr.rel (%p263_p3) target bundleno = 288 (0x120), region = 40  ;;  %p319_p4 = scmp.lt.s32.totalorder (!%p263_p3), %s1361_s24, 63  ;;  %1657 = vmatprep.subr.bf16.mxu0 (!%p263_p3), %v1745_v0  ;;  %1705 = vmatprep.subr.bf16.mxu1 (!%p263_p3), %v1745_v0  ;;  %v1748_v3 = vld [vmem:[%s2121_s1 + $0x18] sm:$0xff] (!%p263_p3)   ;;  %v1749_v6 = vld [vmem:[%s2121_s1 + $0x20] sm:$0xff] (!%p263_p3)   ;;  %v1750_v7 = vld [vmem:[%s2121_s1 + $0x28] sm:$0xff] (!%p263_p3)  }
   0x8   : > { %1658 = vmatpush3.bf16.msra.mxu0 (!%p263_p3), %v1745_v0  ;;  %1713 = vmatpush3.bf16.msra.mxu1 (!%p263_p3), %v1745_v0  ;;  %v1751_v8 = vld [vmem:[%s2121_s1 + $0x30] sm:$0xff] (!%p263_p3)   ;;  %v1752_v9 = vld [vmem:[%s2121_s1 + $0x38] sm:$0xff] (!%p263_p3)   ;;  %v1926_v36 = vld [vmem:[%s2122_s2] ss:$0 sm:$0xff] (!%p263_p3) }
   0x9   : > { %1659 = vmatprep.subr.bf16.mxu0 (!%p263_p3), %v1746_v1  ;;  %1706 = vmatprep.subr.bf16.mxu1 (!%p263_p3), %v1746_v1  ;;  %v1951_v50 = vld [vmem:[%s2123_s3] ss:$0 sm:$0xff] (!%p263_p3) }
   0xc   : > { %1660 = vmatpush3.bf16.msra.mxu0 (!%p263_p3), %v1746_v1  ;;  %1714 = vmatpush3.bf16.msra.mxu1 (!%p263_p3), %v1746_v1 }
   0xd   : > { %1661 = vmatprep.subr.bf16.mxu0 (!%p263_p3), %v1747_v2  ;;  %1707 = vmatprep.subr.bf16.mxu1 (!%p263_p3), %v1747_v2 }
   0xe   : > { %s2131_s24 = smov (!%p319_p4, %s1361_s24), 63 }
   0xf   : > { %s1850_s29 = sshll.u32 %s2131_s24, 2 }
  0x10   : > { %s1856_s7 = scalar_lea.vmem %s2120_s0, %s1850_s29  ;;  %1662 = vmatpush3.bf16.msra.mxu0 %v1747_v2  ;;  %1715 = vmatpush3.bf16.msra.mxu1 %v1747_v2  ;;  %s1893_s23 = scalar_lea.vmem %s2124_s4, %s1850_s29 }
  0x11   : > { %v1753_v4 = vld [vmem:[%s1856_s7] sm:$0xff]   ;;  %1663 = vmatprep.subr.bf16.mxu0 %v1748_v3  ;;  %1708 = vmatprep.subr.bf16.mxu1 %v1748_v3  ;;  %v1755_v10 = vld [vmem:[%s1856_s7 + $0x8] sm:$0xff]   ;;  %v1757_v12 = vld [vmem:[%s1856_s7 + $0x10] sm:$0xff]   ;;  %s1985_s6 = scalar_lea.vmem %s2125_s5, %s1850_s29 }
  0x12   : > { %v1754_v5 = vld [vmem:[%s1856_s7 + $0x40] sm:$0xff]   ;;  %1673 = vmatprep.mubr.bf16.mxu0 %v1753_v4  ;;  %v1756_v11 = vld [vmem:[%s1856_s7 + $0x48] sm:$0xff]   ;;  %v1758_v13 = vld [vmem:[%s1856_s7 + $0x50] sm:$0xff]  }
  0x13   : > { %1689 = vmatprep.mubr.bf16.mxu1 %v1754_v5  ;;  %v1759_v14 = vld [vmem:[%s1856_s7 + $0x18] sm:$0xff]   ;;  %v1761_v16 = vld [vmem:[%s1856_s7 + $0x20] sm:$0xff]   ;;  %v1763_v18 = vld [vmem:[%s1856_s7 + $0x28] sm:$0xff]  }
  0x14   : > { %1664 = vmatpush3.bf16.msra.mxu0 %v1748_v3  ;;  %1716 = vmatpush3.bf16.msra.mxu1 %v1748_v3  ;;  %v1760_v15 = vld [vmem:[%s1856_s7 + $0x58] sm:$0xff]   ;;  %v1762_v17 = vld [vmem:[%s1856_s7 + $0x60] sm:$0xff]   ;;  %v1764_v19 = vld [vmem:[%s1856_s7 + $0x68] sm:$0xff]  }
  0x15   : > { %1665 = vmatprep.subr.bf16.mxu0 %v1749_v6  ;;  %1709 = vmatprep.subr.bf16.mxu1 %v1749_v6  ;;  %v1765_v20 = vld [vmem:[%s1856_s7 + $0x30] sm:$0xff]   ;;  %v1767_v22 = vld [vmem:[%s1856_s7 + $0x38] sm:$0xff]   ;;  %v1896_v24 = vld [vmem:[%s1893_s23 + $0x8] sm:$0xff]  }
  0x16   : > { %v1766_v21 = vld [vmem:[%s1856_s7 + $0x70] sm:$0xff]   ;;  %v1768_v23 = vld [vmem:[%s1856_s7 + $0x78] sm:$0xff]   ;;  %v1899_v25 = vld [vmem:[%s1893_s23 + $0x48] sm:$0xff]   ;;  %v1465_v32 = vunpack.c.l.bf16 %v1896_v24  ;;  %v1466_v37 = vunpack.c.h.bf16 %v1896_v24 }
  0x17   : > { %v1902_v26 = vld [vmem:[%s1893_s23] sm:$0xff]   ;;  %v1908_v28 = vld [vmem:[%s1893_s23 + $0x18] sm:$0xff]   ;;  %v1914_v30 = vld [vmem:[%s1893_s23 + $0x10] sm:$0xff]   ;;  %v1497_v33 = vunpack.c.l.bf16 %v1899_v25  ;;  %v1498_v38 = vunpack.c.h.bf16 %v1899_v25 }
  0x18   : > { %1666 = vmatpush3.bf16.msra.mxu0 %v1749_v6  ;;  %1717 = vmatpush3.bf16.msra.mxu1 %v1749_v6  ;;  %v1905_v27 = vld [vmem:[%s1893_s23 + $0x40] sm:$0xff]   ;;  %v1911_v29 = vld [vmem:[%s1893_s23 + $0x58] sm:$0xff]   ;;  %v1917_v31 = vld [vmem:[%s1893_s23 + $0x50] sm:$0xff]   ;;  %v1461_v34 = vunpack.c.l.bf16 %v1902_v26  ;;  %v1462_v39 = vunpack.c.h.bf16 %v1902_v26  ;;  %v1473_v43 = vunpack.c.l.bf16 %v1908_v28  ;;  %v1469_v45 = vunpack.c.l.bf16 %v1914_v30 }
  0x19   : > { %1667 = vmatprep.subr.bf16.mxu0 %v1750_v7  ;;  %1710 = vmatprep.subr.bf16.mxu1 %v1750_v7  ;;  %v1493_v35 = vunpack.c.l.bf16 %v1905_v27  ;;  %v1494_v40 = vunpack.c.h.bf16 %v1905_v27  ;;  %v1933_v41 = vld [vmem:[%s1893_s23 + $0x28] sm:$0xff]   ;;  %v1505_v44 = vunpack.c.l.bf16 %v1911_v29  ;;  %v1501_v46 = vunpack.c.l.bf16 %v1917_v31  ;;  %v1943_v47 = vld [vmem:[%s1893_s23 + $0x20] sm:$0xff]  }
  0x1a   : > { %v1936_v42 = vld [vmem:[%s1893_s23 + $0x68] sm:$0xff]   ;;  %v1946_v48 = vld [vmem:[%s1893_s23 + $0x60] sm:$0xff]   ;;  %v1474_v52 = vunpack.c.h.bf16 %v1908_v28  ;;  %v1506_v53 = vunpack.c.h.bf16 %v1911_v29  ;;  %v1470_v54 = vunpack.c.h.bf16 %v1914_v30  ;;  %v1502_v55 = vunpack.c.h.bf16 %v1917_v31 }
  0x1b   : > { %v1481_v60 = vunpack.c.l.bf16 %v1933_v41  ;;  %v1513_v61 = vunpack.c.l.bf16 %v1936_v42  ;;  %v1477_v2 = vunpack.c.l.bf16 %v1943_v47  ;;  %v1509_v3 = vunpack.c.l.bf16 %v1946_v48 }
  0x1c   : > { %1668 = vmatpush3.bf16.msra.mxu0 %v1750_v7  ;;  %1718 = vmatpush3.bf16.msra.mxu1 %v1750_v7 }
  0x1d   : > { %1669 = vmatprep.subr.bf16.mxu0 %v1751_v8  ;;  %1711 = vmatprep.subr.bf16.mxu1 %v1751_v8 }
  0x20   : > { %1670 = vmatpush3.bf16.msra.mxu0 %v1751_v8  ;;  %1719 = vmatpush3.bf16.msra.mxu1 %v1751_v8 }
  0x21   : > { %1671 = vmatprep.subr.bf16.mxu0 %v1752_v9  ;;  %1712 = vmatprep.subr.bf16.mxu1 %v1752_v9 }
  0x24   : > { %1672 = vmatpush3.bf16.msra.mxu0 %v1752_v9  ;;  %1720 = vmatpush3.bf16.msra.mxu1 %v1752_v9 }
  0x27   : > { %1674 = vmatmul.mubr.bf16.vlgmr.msra.gmra.mrb[0].mxu0 %v1755_v10  ;;  %1690 = vmatmul.mubr.bf16.vlgmr.msra.gmra.mrb[0].mxu1 %v1756_v11 }
  0x28   : > { %1677 = vmatprep.mubr.bf16.mxu0 %v1757_v12  ;;  %1693 = vmatprep.mubr.bf16.mxu1 %v1758_v13 }
  0x2f   : > { %1678 = vmatmul.mubr.bf16.gmra.mrb[4].mxu0 %v1759_v14  ;;  %1694 = vmatmul.mubr.bf16.gmra.mrb[4].mxu1 %v1760_v15 }
  0x30   : > { %1681 = vmatprep.mubr.bf16.mxu0 %v1761_v16  ;;  %1697 = vmatprep.mubr.bf16.mxu1 %v1762_v17  ;;  %v1482_v16 = vunpack.c.h.bf16 %v1933_v41  ;;  %v1514_v17 = vunpack.c.h.bf16 %v1936_v42 }
  0x37   : > { %1682 = vmatmul.mubr.bf16.gmra.mrb[8].mxu0 %v1763_v18  ;;  %1698 = vmatmul.mubr.bf16.gmra.mrb[8].mxu1 %v1764_v19 }
  0x38   : > { %1685 = vmatprep.mubr.bf16.mxu0 %v1765_v20  ;;  %1701 = vmatprep.mubr.bf16.mxu1 %v1766_v21  ;;  %v1478_v20 = vunpack.c.h.bf16 %v1943_v47  ;;  %v1510_v21 = vunpack.c.h.bf16 %v1946_v48 }
  0x3f   : > { %1686 = vmatmul.mubr.bf16.gmra.mrb[12].mxu0 %v1767_v22  ;;  %1702 = vmatmul.mubr.bf16.gmra.mrb[12].mxu1 %v1768_v23 }
  0xfa   : > { %v1675_v49 = vpop.f32.mrb[0].mxu0  ;;  %v1691_v51 = vpop.f32.mrb[0].mxu1 }
  0xfb   : > { %v890_v56 = vmul.f32 %v1675_v49, %v1926_v36  ;;  %v906_v57 = vmul.f32 %v1691_v51, %v1926_v36  ;;  %v655_v58 = vpop.f32.mrb[1].mxu0  ;;  %v719_v59 = vpop.f32.mrb[1].mxu1 }
  0xfc   : > { %v888_v62 = vmul.f32 %v1926_v36, %v655_v58  ;;  %v904_v63 = vmul.f32 %v1926_v36, %v719_v59  ;;  %v1676_v0 = vpop.f32.mrb[2].mxu0  ;;  %v1692_v1 = vpop.f32.mrb[2].mxu1 }
  0xfd   : > { %v929_v4 = vadd.f32 %v1951_v50, %v890_v56  ;;  %v945_v5 = vadd.f32 %v1951_v50, %v906_v57  ;;  %v891_v6 = vmul.f32 %v1676_v0, %v1926_v36  ;;  %v907_v7 = vmul.f32 %v1692_v1, %v1926_v36  ;;  %v658_v8 = vpop.f32.mrb[3].mxu0  ;;  %v722_v9 = vpop.f32.mrb[3].mxu1  ;;  %v1992_v0 = vld [vmem:[%s1893_s23 + $0x38] sm:$0xff]  }
  0xfe   : > { %v927_v10 = vadd.f32 %v1951_v50, %v888_v62  ;;  %v943_v11 = vadd.f32 %v1951_v50, %v904_v63  ;;  %v889_v12 = vmul.f32 %v1926_v36, %v658_v8  ;;  %v905_v13 = vmul.f32 %v1926_v36, %v722_v9  ;;  %v1995_v1 = vld [vmem:[%s1893_s23 + $0x78] sm:$0xff]  }
  0xff   : > { %v930_v14 = vadd.f32 %v1951_v50, %v891_v6  ;;  %v946_v15 = vadd.f32 %v1951_v50, %v907_v7  ;;  %v1025_v22 = vadd.f32 %v1465_v32, %v929_v4  ;;  %v1041_v23 = vadd.f32 %v1497_v33, %v945_v5 }
 0x100   : > { %v928_v18 = vadd.f32 %v1951_v50, %v889_v12  ;;  %v944_v19 = vadd.f32 %v1951_v50, %v905_v13  ;;  %v1023_v26 = vadd.f32 %v1461_v34, %v927_v10  ;;  %v1039_v27 = vadd.f32 %v1493_v35, %v943_v11  ;;  %v2004_v10 = vld [vmem:[%s1893_s23 + $0x30] sm:$0xff]  }
 0x101   : > { %v1026_v24 = vadd.f32 %v1466_v37, %v930_v14  ;;  %v1042_v25 = vadd.f32 %v1498_v38, %v946_v15  ;;  %v2007_v11 = vld [vmem:[%s1893_s23 + $0x70] sm:$0xff]  }
 0x102   : > { %v1024_v49 = vadd.f32 %v1462_v39, %v928_v18  ;;  %v1040_v51 = vadd.f32 %v1494_v40, %v944_v19  ;;  %v1679_v56 = vpop.f32.mrb[4].mxu0  ;;  %v1695_v57 = vpop.f32.mrb[4].mxu1 }
 0x103   : > { %v1531_v58 = vpack.c.bf16 %v1026_v24, %v1025_v22  ;;  %v1571_v32 = vpack.c.bf16 %v1042_v25, %v1041_v23  ;;  %v894_v33 = vmul.f32 %v1679_v56, %v1926_v36  ;;  %v910_v34 = vmul.f32 %v1695_v57, %v1926_v36  ;;  %v671_v35 = vpop.f32.mrb[5].mxu0  ;;  %v735_v37 = vpop.f32.mrb[5].mxu1 }
 0x104   : > { %v1526_v38 = vpack.c.bf16 %v1024_v49, %v1023_v26  ;;  %v1566_v59 = vpack.c.bf16 %v1040_v51, %v1039_v27  ;;  %v892_v39 = vmul.f32 %v1926_v36, %v671_v35  ;;  %v908_v40 = vmul.f32 %v1926_v36, %v735_v37  ;;  %v1680_v62 = vpop.f32.mrb[6].mxu0  ;;  %v1696_v63 = vpop.f32.mrb[6].mxu1 }
 0x105   : > { %1618 = vst [vmem:[%s1985_s6 + $0x8] sm:$0xff] %v1531_v58   ;;  %1626 = vst [vmem:[%s1985_s6 + $0x48] sm:$0xff] %v1571_v32   ;;  %v933_v4 = vadd.f32 %v1951_v50, %v894_v33  ;;  %v949_v5 = vadd.f32 %v1951_v50, %v910_v34  ;;  %v895_v6 = vmul.f32 %v1680_v62, %v1926_v36  ;;  %v674_v8 = vpop.f32.mrb[7].mxu0  ;;  %v738_v9 = vpop.f32.mrb[7].mxu1  ;;  %v1489_v22 = vunpack.c.l.bf16 %v1992_v0 }
 0x106   : > { %v911_v7 = vmul.f32 %v1696_v63, %v1926_v36  ;;  %1527 = vst [vmem:[%s1985_s6] sm:$0xff] %v1526_v38   ;;  %1625 = vst [vmem:[%s1985_s6 + $0x40] sm:$0xff] %v1566_v59   ;;  %v931_v12 = vadd.f32 %v1951_v50, %v892_v39  ;;  %v947_v13 = vadd.f32 %v1951_v50, %v908_v40  ;;  %v1521_v23 = vunpack.c.l.bf16 %v1995_v1 }
 0x107   : > { %v893_v14 = vmul.f32 %v1926_v36, %v674_v8  ;;  %v909_v15 = vmul.f32 %v1926_v36, %v738_v9  ;;  %v934_v18 = vadd.f32 %v1951_v50, %v895_v6  ;;  %v1485_v26 = vunpack.c.l.bf16 %v2004_v10 }
 0x108   : > { %v950_v19 = vadd.f32 %v1951_v50, %v911_v7  ;;  %v1517_v27 = vunpack.c.l.bf16 %v2007_v11  ;;  %v1029_v49 = vadd.f32 %v1473_v43, %v933_v4  ;;  %v1045_v51 = vadd.f32 %v1505_v44, %v949_v5 }
 0x109   : > { %v932_v24 = vadd.f32 %v1951_v50, %v893_v14  ;;  %v948_v25 = vadd.f32 %v1951_v50, %v909_v15  ;;  %v1030_v56 = vadd.f32 %v1474_v52, %v934_v18  ;;  %v1027_v58 = vadd.f32 %v1469_v45, %v931_v12 }
 0x10a   : > { %v1046_v57 = vadd.f32 %v1506_v53, %v950_v19  ;;  %v1043_v32 = vadd.f32 %v1501_v46, %v947_v13  ;;  %v1683_v44 = vpop.f32.mrb[8].mxu0  ;;  %v1699_v28 = vpop.f32.mrb[8].mxu1  ;;  %v1490_v12 = vunpack.c.h.bf16 %v1992_v0  ;;  %v1522_v13 = vunpack.c.h.bf16 %v1995_v1 }
 0x10b   : > { %v1028_v33 = vadd.f32 %v1470_v54, %v932_v24  ;;  %v1044_v43 = vadd.f32 %v1502_v55, %v948_v25  ;;  %v1541_v52 = vpack.c.bf16 %v1030_v56, %v1029_v49  ;;  %v898_v29 = vmul.f32 %v1683_v44, %v1926_v36  ;;  %v687_v45 = vpop.f32.mrb[9].mxu0  ;;  %v751_v35 = vpop.f32.mrb[9].mxu1 }
 0x10c   : > { %v1581_v34 = vpack.c.bf16 %v1046_v57, %v1045_v51  ;;  %v914_v53 = vmul.f32 %v1699_v28, %v1926_v36  ;;  %v896_v54 = vmul.f32 %v1926_v36, %v687_v45  ;;  %v912_v31 = vmul.f32 %v1926_v36, %v751_v35  ;;  %v1684_v55 = vpop.f32.mrb[10].mxu0  ;;  %v1700_v37 = vpop.f32.mrb[10].mxu1 }
 0x10d   : > { %v1536_v46 = vpack.c.bf16 %v1028_v33, %v1027_v58  ;;  %v1576_v30 = vpack.c.bf16 %v1044_v43, %v1043_v32  ;;  %1620 = vst [vmem:[%s1985_s6 + $0x18] sm:$0xff] %v1541_v52   ;;  %v937_v38 = vadd.f32 %v1951_v50, %v898_v29  ;;  %v899_v39 = vmul.f32 %v1684_v55, %v1926_v36  ;;  %v690_v62 = vpop.f32.mrb[11].mxu0  ;;  %v754_v63 = vpop.f32.mrb[11].mxu1 }
 0x10e   : > { %1628 = vst [vmem:[%s1985_s6 + $0x58] sm:$0xff] %v1581_v34   ;;  %v953_v59 = vadd.f32 %v1951_v50, %v914_v53  ;;  %v915_v40 = vmul.f32 %v1700_v37, %v1926_v36  ;;  %v935_v4 = vadd.f32 %v1951_v50, %v896_v54  ;;  %v951_v5 = vadd.f32 %v1951_v50, %v912_v31 }
 0x10f   : > { %1619 = vst [vmem:[%s1985_s6 + $0x10] sm:$0xff] %v1536_v46   ;;  %1627 = vst [vmem:[%s1985_s6 + $0x50] sm:$0xff] %v1576_v30   ;;  %v897_v6 = vmul.f32 %v1926_v36, %v690_v62  ;;  %v913_v7 = vmul.f32 %v1926_v36, %v754_v63  ;;  %v938_v8 = vadd.f32 %v1951_v50, %v899_v39  ;;  %v1486_v18 = vunpack.c.h.bf16 %v2004_v10 }
 0x110   : > { %v954_v9 = vadd.f32 %v1951_v50, %v915_v40  ;;  %v1518_v19 = vunpack.c.h.bf16 %v2007_v11  ;;  %v1033_v24 = vadd.f32 %v1481_v60, %v937_v38  ;;  %v1049_v25 = vadd.f32 %v1513_v61, %v953_v59 }
 0x111   : > { %v936_v14 = vadd.f32 %v1951_v50, %v897_v6  ;;  %v952_v15 = vadd.f32 %v1951_v50, %v913_v7  ;;  %v1034_v49 = vadd.f32 %v1482_v16, %v938_v8  ;;  %v1031_v56 = vadd.f32 %v1477_v2, %v935_v4 }
 0x112   : > { %v1050_v51 = vadd.f32 %v1514_v17, %v954_v9  ;;  %v1047_v57 = vadd.f32 %v1509_v3, %v951_v5  ;;  %v1687_v61 = vpop.f32.mrb[12].mxu0  ;;  %v1703_v41 = vpop.f32.mrb[12].mxu1 }
 0x113   : > { %v1032_v58 = vadd.f32 %v1478_v20, %v936_v14  ;;  %v1048_v60 = vadd.f32 %v1510_v21, %v952_v15  ;;  %v1551_v16 = vpack.c.bf16 %v1034_v49, %v1033_v24  ;;  %v902_v42 = vmul.f32 %v1687_v61, %v1926_v36  ;;  %v703_v2 = vpop.f32.mrb[13].mxu0  ;;  %v767_v33 = vpop.f32.mrb[13].mxu1 }
 0x114   : > { %v1591_v32 = vpack.c.bf16 %v1050_v51, %v1049_v25  ;;  %v918_v17 = vmul.f32 %v1703_v41, %v1926_v36  ;;  %v900_v20 = vmul.f32 %v1926_v36, %v703_v2  ;;  %v916_v48 = vmul.f32 %v1926_v36, %v767_v33  ;;  %v1688_v21 = vpop.f32.mrb[14].mxu0  ;;  %v1704_v43 = vpop.f32.mrb[14].mxu1 }
 0x115   : > { %v1546_v3 = vpack.c.bf16 %v1032_v58, %v1031_v56  ;;  %v1586_v47 = vpack.c.bf16 %v1048_v60, %v1047_v57  ;;  %1622 = vst [vmem:[%s1985_s6 + $0x28] sm:$0xff] %v1551_v16   ;;  %v941_v44 = vadd.f32 %v1951_v50, %v902_v42  ;;  %v903_v52 = vmul.f32 %v1688_v21, %v1926_v36  ;;  %v706_v29 = vpop.f32.mrb[15].mxu0  ;;  %v770_v53 = vpop.f32.mrb[15].mxu1 }
 0x116   : > { %1630 = vst [vmem:[%s1985_s6 + $0x68] sm:$0xff] %v1591_v32   ;;  %v957_v28 = vadd.f32 %v1951_v50, %v918_v17  ;;  %v919_v34 = vmul.f32 %v1704_v43, %v1926_v36  ;;  %v939_v45 = vadd.f32 %v1951_v50, %v900_v20  ;;  %v955_v35 = vadd.f32 %v1951_v50, %v916_v48 }
 0x117   : > { %1621 = vst [vmem:[%s1985_s6 + $0x20] sm:$0xff] %v1546_v3   ;;  %1629 = vst [vmem:[%s1985_s6 + $0x60] sm:$0xff] %v1586_v47   ;;  %v901_v46 = vmul.f32 %v1926_v36, %v706_v29  ;;  %v917_v30 = vmul.f32 %v1926_v36, %v770_v53  ;;  %v942_v54 = vadd.f32 %v1951_v50, %v903_v52 }
 0x118   : > { %v958_v31 = vadd.f32 %v1951_v50, %v919_v34  ;;  %v1037_v38 = vadd.f32 %v1489_v22, %v941_v44  ;;  %v1053_v59 = vadd.f32 %v1521_v23, %v957_v28  ;;  %v1035_v40 = vadd.f32 %v1485_v26, %v939_v45 }
 0x119   : > { %v940_v55 = vadd.f32 %v1951_v50, %v901_v46  ;;  %v956_v37 = vadd.f32 %v1951_v50, %v917_v30  ;;  %v1038_v39 = vadd.f32 %v1490_v12, %v942_v54  ;;  %v1051_v62 = vadd.f32 %v1517_v27, %v955_v35 }
 0x11a   : > { %v1054_v36 = vadd.f32 %v1522_v13, %v958_v31 }
 0x11b   : > { %v1036_v63 = vadd.f32 %v1486_v18, %v940_v55  ;;  %v1052_v4 = vadd.f32 %v1518_v19, %v956_v37  ;;  %v1561_v5 = vpack.c.bf16 %v1038_v39, %v1037_v38 }
 0x11c   : > { %v1601_v6 = vpack.c.bf16 %v1054_v36, %v1053_v59 }
 0x11d   : > { %v1556_v50 = vpack.c.bf16 %v1036_v63, %v1035_v40  ;;  %v1596_v7 = vpack.c.bf16 %v1052_v4, %v1051_v62  ;;  %1624 = vst [vmem:[%s1985_s6 + $0x38] sm:$0xff] %v1561_v5  }
 0x11e   : > { %1632 = vst [vmem:[%s1985_s6 + $0x78] sm:$0xff] %v1601_v6  }
 0x11f   : > { %1623 = vst [vmem:[%s1985_s6 + $0x30] sm:$0xff] %v1556_v50   ;;  %1631 = vst [vmem:[%s1985_s6 + $0x70] sm:$0xff] %v1596_v7  }
 0x120 PF: > { %s15_s20 = sadd.s32 1, %s1791_s20   ;;  %s2126_s18 = smov %s1787_s19 }
 0x121   : > { %p12_p5 = scmp.ge.s32.totalorder %s15_s20, 4   ;;  %s2127_s19 = smov %s2129_s21 }
 0x123   :  { %14 = sbr.rel (!%p12_p5) target bundleno = 2 (0x2), region = 90 }

// kernel: cnn_efficientnet_forward.15
= control target key start
LH: loop header
LB: loop body
LE: loop exit
PB: predicated region body
PF: predicated region fallthrough
CT: control target
= control target key end

     0   :  { %s1950_s15 = smov 0   ;;  %s1952_s16 = smov 0   ;;  %s2282_s0 = inlined_call_operand.vmem [shape: bf16[512,128], index: 0, kind: input, shape index: {}]   ;;  %s2283_s1 = inlined_call_operand.vmem [shape: bf16[128,128], index: 1, kind: input, shape index: {}]   ;;  %s2284_s2 = inlined_call_operand.vmem [shape: f32[1,128], index: 2, kind: input, shape index: {}]   ;;  %s2285_s3 = inlined_call_operand.vmem [shape: f32[1,128], index: 3, kind: input, shape index: {}]   ;;  %s2286_s4 = inlined_call_operand.vmem [shape: bf16[512,128], index: 4, kind: output, shape index: {}]  }
   0x1   :  { %s1954_s17 = smov 0  }
   0x2 LB: > { %s33_s18 = sadd.s32 1, %s1919_s16  ;;  %p1413_p0 = scmp.ge.s32.totalorder %s1923_s17, 1  ;;  %s1923_s17 = sphi %s1954_s17, %s14_s17   ;;  %s1919_s16 = sphi %s1952_s16, %s2288_s16   ;;  %s1915_s15 = sphi %s1950_s15, %s2287_s15  }
   0x3   : > { %p35_p1 = scmp.ge.s32.totalorder %s33_s18, 2  ;;  %p221_p2 = scmp.lt.s32.totalorder %s1923_s17, 3 }
   0x5   : > { %s2290_s18 = smov (%p35_p1, %s33_s18), 0  ;;  %p222_p3 = pnand %p1413_p0, %p221_p2 }
   0x6   : > { %v1749_v0 = vld [vmem:[%s2283_s1] sm:$0xff] (!%p222_p3)   ;;  %s1414_s21 = sshll.u32 (!%p222_p3), %s1915_s15, 5  ;;  %v1750_v1 = vld [vmem:[%s2283_s1 + $0x8] sm:$0xff] (!%p222_p3)   ;;  %v1751_v2 = vld [vmem:[%s2283_s1 + $0x10] sm:$0xff] (!%p222_p3)  }
   0x7   : > { %225 = sbr.rel (%p222_p3) target bundleno = 343 (0x157), region = 36  ;;  %p268_p4 = scmp.lt.s32.totalorder (!%p222_p3), %s1414_s21, 63  ;;  %1661 = vmatprep.subr.bf16.mxu0 (!%p222_p3), %v1749_v0  ;;  %1709 = vmatprep.subr.bf16.mxu1 (!%p222_p3), %v1749_v0  ;;  %v1752_v3 = vld [vmem:[%s2283_s1 + $0x18] sm:$0xff] (!%p222_p3)   ;;  %v1753_v6 = vld [vmem:[%s2283_s1 + $0x20] sm:$0xff] (!%p222_p3)   ;;  %v1754_v7 = vld [vmem:[%s2283_s1 + $0x28] sm:$0xff] (!%p222_p3)  }
   0x8   : > { %1662 = vmatpush3.bf16.msra.mxu0 (!%p222_p3), %v1749_v0  ;;  %1717 = vmatpush3.bf16.msra.mxu1 (!%p222_p3), %v1749_v0  ;;  %v1755_v8 = vld [vmem:[%s2283_s1 + $0x30] sm:$0xff] (!%p222_p3)   ;;  %v1756_v9 = vld [vmem:[%s2283_s1 + $0x38] sm:$0xff] (!%p222_p3)   ;;  %v2021_v24 = vld [vmem:[%s2284_s2] ss:$0 sm:$0xff] (!%p222_p3) }
   0x9   : > { %1663 = vmatprep.subr.bf16.mxu0 (!%p222_p3), %v1750_v1  ;;  %1710 = vmatprep.subr.bf16.mxu1 (!%p222_p3), %v1750_v1  ;;  %v2026_v26 = vld [vmem:[%s2285_s3] ss:$0 sm:$0xff] (!%p222_p3) }
   0xc   : > { %1664 = vmatpush3.bf16.msra.mxu0 (!%p222_p3), %v1750_v1  ;;  %1718 = vmatpush3.bf16.msra.mxu1 (!%p222_p3), %v1750_v1 }
   0xd   : > { %1665 = vmatprep.subr.bf16.mxu0 (!%p222_p3), %v1751_v2  ;;  %1711 = vmatprep.subr.bf16.mxu1 (!%p222_p3), %v1751_v2 }
   0xe   : > { %s2292_s21 = smov (!%p268_p4, %s1414_s21), 63 }
   0xf   : > { %s1415_s26 = sshll.u32 %s2292_s21, 2 }
  0x10   : > { %s1985_s29 = scalar_lea.vmem %s2282_s0, %s1415_s26  ;;  %1666 = vmatpush3.bf16.msra.mxu0 %v1751_v2  ;;  %1719 = vmatpush3.bf16.msra.mxu1 %v1751_v2  ;;  %s2172_s24 = scalar_lea.vmem %s2286_s4, %s1415_s26 }
  0x11   : > { %v1757_v4 = vld [vmem:[%s1985_s29] sm:$0xff]   ;;  %1667 = vmatprep.subr.bf16.mxu0 %v1752_v3  ;;  %1712 = vmatprep.subr.bf16.mxu1 %v1752_v3  ;;  %v1759_v10 = vld [vmem:[%s1985_s29 + $0x8] sm:$0xff]   ;;  %v1761_v12 = vld [vmem:[%s1985_s29 + $0x10] sm:$0xff]  }
  0x12   : > { %v1758_v5 = vld [vmem:[%s1985_s29 + $0x40] sm:$0xff]   ;;  %1677 = vmatprep.mubr.bf16.mxu0 %v1757_v4  ;;  %v1760_v11 = vld [vmem:[%s1985_s29 + $0x48] sm:$0xff]   ;;  %v1762_v13 = vld [vmem:[%s1985_s29 + $0x50] sm:$0xff]  }
  0x13   : > { %1693 = vmatprep.mubr.bf16.mxu1 %v1758_v5  ;;  %v1763_v14 = vld [vmem:[%s1985_s29 + $0x18] sm:$0xff]   ;;  %v1765_v16 = vld [vmem:[%s1985_s29 + $0x20] sm:$0xff]   ;;  %v1767_v18 = vld [vmem:[%s1985_s29 + $0x28] sm:$0xff]  }
  0x14   : > { %1668 = vmatpush3.bf16.msra.mxu0 %v1752_v3  ;;  %1720 = vmatpush3.bf16.msra.mxu1 %v1752_v3  ;;  %v1764_v15 = vld [vmem:[%s1985_s29 + $0x58] sm:$0xff]   ;;  %v1766_v17 = vld [vmem:[%s1985_s29 + $0x60] sm:$0xff]   ;;  %v1768_v19 = vld [vmem:[%s1985_s29 + $0x68] sm:$0xff]  }
  0x15   : > { %1669 = vmatprep.subr.bf16.mxu0 %v1753_v6  ;;  %1713 = vmatprep.subr.bf16.mxu1 %v1753_v6  ;;  %v1769_v20 = vld [vmem:[%s1985_s29 + $0x30] sm:$0xff]   ;;  %v1771_v22 = vld [vmem:[%s1985_s29 + $0x38] sm:$0xff]  }
  0x16   : > { %v1770_v21 = vld [vmem:[%s1985_s29 + $0x70] sm:$0xff]   ;;  %v1772_v23 = vld [vmem:[%s1985_s29 + $0x78] sm:$0xff]  }
  0x18   : > { %1670 = vmatpush3.bf16.msra.mxu0 %v1753_v6  ;;  %1721 = vmatpush3.bf16.msra.mxu1 %v1753_v6 }
  0x19   : > { %1671 = vmatprep.subr.bf16.mxu0 %v1754_v7  ;;  %1714 = vmatprep.subr.bf16.mxu1 %v1754_v7 }
  0x1c   : > { %1672 = vmatpush3.bf16.msra.mxu0 %v1754_v7  ;;  %1722 = vmatpush3.bf16.msra.mxu1 %v1754_v7 }
  0x1d   : > { %1673 = vmatprep.subr.bf16.mxu0 %v1755_v8  ;;  %1715 = vmatprep.subr.bf16.mxu1 %v1755_v8 }
  0x20   : > { %1674 = vmatpush3.bf16.msra.mxu0 %v1755_v8  ;;  %1723 = vmatpush3.bf16.msra.mxu1 %v1755_v8 }
  0x21   : > { %1675 = vmatprep.subr.bf16.mxu0 %v1756_v9  ;;  %1716 = vmatprep.subr.bf16.mxu1 %v1756_v9 }
  0x24   : > { %1676 = vmatpush3.bf16.msra.mxu0 %v1756_v9  ;;  %1724 = vmatpush3.bf16.msra.mxu1 %v1756_v9 }
  0x27   : > { %1678 = vmatmul.mubr.bf16.vlgmr.msra.gmra.mrb[0].mxu0 %v1759_v10  ;;  %1694 = vmatmul.mubr.bf16.vlgmr.msra.gmra.mrb[0].mxu1 %v1760_v11 }
  0x28   : > { %1681 = vmatprep.mubr.bf16.mxu0 %v1761_v12  ;;  %1697 = vmatprep.mubr.bf16.mxu1 %v1762_v13 }
  0x2f   : > { %1682 = vmatmul.mubr.bf16.gmra.mrb[4].mxu0 %v1763_v14  ;;  %1698 = vmatmul.mubr.bf16.gmra.mrb[4].mxu1 %v1764_v15 }
  0x30   : > { %1685 = vmatprep.mubr.bf16.mxu0 %v1765_v16  ;;  %1701 = vmatprep.mubr.bf16.mxu1 %v1766_v17 }
  0x37   : > { %1686 = vmatmul.mubr.bf16.gmra.mrb[8].mxu0 %v1767_v18  ;;  %1702 = vmatmul.mubr.bf16.gmra.mrb[8].mxu1 %v1768_v19 }
  0x38   : > { %1689 = vmatprep.mubr.bf16.mxu0 %v1769_v20  ;;  %1705 = vmatprep.mubr.bf16.mxu1 %v1770_v21 }
  0x3f   : > { %1690 = vmatmul.mubr.bf16.gmra.mrb[12].mxu0 %v1771_v22  ;;  %1706 = vmatmul.mubr.bf16.gmra.mrb[12].mxu1 %v1772_v23 }
  0xfa   : > { %v1679_v25 = vpop.f32.mrb[0].mxu0  ;;  %v1695_v27 = vpop.f32.mrb[0].mxu1 }
  0xfb   : > { %v830_v28 = vmul.f32 %v1679_v25, %v2021_v24  ;;  %v846_v29 = vmul.f32 %v1695_v27, %v2021_v24  ;;  %v595_v30 = vpop.f32.mrb[1].mxu0  ;;  %v659_v31 = vpop.f32.mrb[1].mxu1 }
  0xfc   : > { %v828_v32 = vmul.f32 %v2021_v24, %v595_v30  ;;  %v844_v33 = vmul.f32 %v2021_v24, %v659_v31  ;;  %v1680_v34 = vpop.f32.mrb[2].mxu0  ;;  %v1696_v35 = vpop.f32.mrb[2].mxu1 }
  0xfd   : > { %v2033_v36 = vadd.f32 %v2026_v26, %v830_v28  ;;  %v2036_v37 = vadd.f32 %v2026_v26, %v846_v29  ;;  %v831_v38 = vmul.f32 %v1680_v34, %v2021_v24  ;;  %v847_v39 = vmul.f32 %v1696_v35, %v2021_v24  ;;  %v598_v40 = vpop.f32.mrb[3].mxu0  ;;  %v662_v41 = vpop.f32.mrb[3].mxu1 }
  0xfe   : > { %v2041_v42 = vadd.f32 %v2026_v26, %v828_v32  ;;  %v2044_v43 = vadd.f32 %v2026_v26, %v844_v33  ;;  %v829_v44 = vmul.f32 %v2021_v24, %v598_v40  ;;  %v845_v45 = vmul.f32 %v2021_v24, %v662_v41 }
  0xff   : > { %v1446_v46 = vmul.f32 -1.442695, %v2033_v36  ;;  %v1462_v47 = vmul.f32 -1.442695, %v2036_v37  ;;  %v2051_v48 = vadd.f32 %v2026_v26, %v831_v38  ;;  %v2054_v49 = vadd.f32 %v2026_v26, %v847_v39 }
 0x100   : > { %v1444_v50 = vmul.f32 -1.442695, %v2041_v42  ;;  %v1460_v51 = vmul.f32 -1.442695, %v2044_v43  ;;  %v2059_v52 = vadd.f32 %v2026_v26, %v829_v44  ;;  %v2062_v53 = vadd.f32 %v2026_v26, %v845_v45 }
 0x101   : > { %1773 = vpow2.f32 %v1446_v46  ;;  %v1447_v54 = vmul.f32 -1.442695, %v2051_v48  ;;  %v1463_v55 = vmul.f32 -1.442695, %v2054_v49 }
 0x102   : > { %1775 = vpow2.f32 %v1462_v47  ;;  %v1683_v56 = vpop.f32.mrb[4].mxu0  ;;  %v1699_v57 = vpop.f32.mrb[4].mxu1  ;;  %v1445_v58 = vmul.f32 -1.442695, %v2059_v52  ;;  %v1461_v63 = vmul.f32 -1.442695, %v2062_v53 }
 0x103   : > { %1777 = vpow2.f32 %v1444_v50  ;;  %v834_v59 = vmul.f32 %v1683_v56, %v2021_v24  ;;  %v850_v60 = vmul.f32 %v1699_v57, %v2021_v24  ;;  %v611_v61 = vpop.f32.mrb[5].mxu0  ;;  %v675_v62 = vpop.f32.mrb[5].mxu1 }
 0x104   : > { %1779 = vpow2.f32 %v1460_v51  ;;  %v832_v0 = vmul.f32 %v2021_v24, %v611_v61  ;;  %v848_v1 = vmul.f32 %v2021_v24, %v675_v62  ;;  %v1684_v2 = vpop.f32.mrb[6].mxu0  ;;  %v1700_v3 = vpop.f32.mrb[6].mxu1 }
 0x105   : > { %1781 = vpow2.f32 %v1447_v54  ;;  %v2073_v4 = vadd.f32 %v2026_v26, %v834_v59  ;;  %v2076_v5 = vadd.f32 %v2026_v26, %v850_v60  ;;  %v835_v6 = vmul.f32 %v1684_v2, %v2021_v24  ;;  %v614_v7 = vpop.f32.mrb[7].mxu0  ;;  %v678_v8 = vpop.f32.mrb[7].mxu1 }
 0x106   : > { %1783 = vpow2.f32 %v1463_v55  ;;  %v2080_v9 = vadd.f32 %v2026_v26, %v832_v0  ;;  %v2083_v10 = vadd.f32 %v2026_v26, %v848_v1  ;;  %v851_v11 = vmul.f32 %v1700_v3, %v2021_v24 }
 0x107   : > { %1785 = vpow2.f32 %v1445_v58  ;;  %v1450_v12 = vmul.f32 -1.442695, %v2073_v4  ;;  %v1466_v13 = vmul.f32 -1.442695, %v2076_v5  ;;  %v2089_v14 = vadd.f32 %v2026_v26, %v835_v6 }
 0x108   : > { %1787 = vpow2.f32 %v1461_v63  ;;  %v1448_v15 = vmul.f32 -1.442695, %v2080_v9  ;;  %v1464_v16 = vmul.f32 -1.442695, %v2083_v10  ;;  %v2095_v21 = vadd.f32 %v2026_v26, %v851_v11 }
 0x109   : > { %1789 = vpow2.f32 %v1450_v12  ;;  %v1451_v17 = vmul.f32 -1.442695, %v2089_v14  ;;  %v833_v28 = vmul.f32 %v2021_v24, %v614_v7  ;;  %v849_v29 = vmul.f32 %v2021_v24, %v678_v8 }
 0x10a   : > { %1791 = vpow2.f32 %v1466_v13  ;;  %v1687_v18 = vpop.f32.mrb[8].mxu0  ;;  %v1703_v19 = vpop.f32.mrb[8].mxu1  ;;  %v2100_v44 = vmul.f32 -1.442695, %v2095_v21 }
 0x10b   : > { %v1774_v20 = vpop.eup %1773  ;;  %1793 = vpow2.f32 %v1448_v15  ;;  %v627_v22 = vpop.f32.mrb[9].mxu0  ;;  %v2103_v47 = vadd.f32 %v2026_v26, %v833_v28  ;;  %v2106_v50 = vadd.f32 %v2026_v26, %v849_v29  ;;  %v838_v55 = vmul.f32 %v1687_v18, %v2021_v24 }
 0x10c   : > { %v691_v23 = vpop.f32.mrb[9].mxu1  ;;  %v1776_v25 = vpop.eup %1775  ;;  %v997_v27 = vadd.f32 1.0, %v1774_v20  ;;  %1795 = vpow2.f32 %v1464_v16  ;;  %v854_v56 = vmul.f32 %v1703_v19, %v2021_v24  ;;  %v836_v59 = vmul.f32 %v2021_v24, %v627_v22 }
 0x10d   : > { %v1688_v30 = vpop.f32.mrb[10].mxu0  ;;  %v1704_v31 = vpop.f32.mrb[10].mxu1  ;;  %v1013_v33 = vadd.f32 1.0, %v1776_v25  ;;  %1797 = vpow2.f32 %v1451_v17  ;;  %v852_v60 = vmul.f32 %v2021_v24, %v691_v23  ;;  %v1449_v11 = vmul.f32 -1.442695, %v2103_v47 }
 0x10e   : > { %v1778_v32 = vpop.eup %1777  ;;  %v630_v34 = vpop.f32.mrb[11].mxu0  ;;  %1799 = vrcp.f32 %v997_v27  ;;  %v839_v1 = vmul.f32 %v1688_v30, %v2021_v24  ;;  %v855_v2 = vmul.f32 %v1704_v31, %v2021_v24  ;;  %v2125_v18 = vadd.f32 %v2026_v26, %v838_v55 }
 0x10f   : > { %v1780_v35 = vpop.eup %1779  ;;  %v995_v38 = vadd.f32 1.0, %v1778_v32  ;;  %v694_v39 = vpop.f32.mrb[11].mxu1  ;;  %1801 = vrcp.f32 %v1013_v33  ;;  %v837_v12 = vmul.f32 %v2021_v24, %v630_v34  ;;  %v2128_v19 = vadd.f32 %v2026_v26, %v854_v56 }
 0x110   : > { %v1782_v40 = vpop.eup %1781  ;;  %v1011_v41 = vadd.f32 1.0, %v1780_v35  ;;  %v2135_v27 = vadd.f32 %v2026_v26, %v836_v59  ;;  %v2138_v28 = vadd.f32 %v2026_v26, %v852_v60  ;;  %v2141_v31 = vadd.f32 %v2026_v26, %v839_v1 }
 0x111   : > { %v1784_v45 = vpop.eup %1783  ;;  %1803 = vrcp.f32 %v995_v38  ;;  %v998_v46 = vadd.f32 1.0, %v1782_v40  ;;  %v2144_v32 = vadd.f32 %v2026_v26, %v855_v2  ;;  %v2147_v35 = vadd.f32 %v2026_v26, %v837_v12 }
 0x112   : > { %v1786_v51 = vpop.eup %1785  ;;  %1805 = vrcp.f32 %v1011_v41  ;;  %v1014_v54 = vadd.f32 1.0, %v1784_v45  ;;  %v1691_v61 = vpop.f32.mrb[12].mxu0  ;;  %v853_v38 = vmul.f32 %v2021_v24, %v694_v39  ;;  %v1465_v41 = vmul.f32 -1.442695, %v2106_v50 }
 0x113   : > { %v1788_v57 = vpop.eup %1787  ;;  %1807 = vrcp.f32 %v998_v46  ;;  %v996_v58 = vadd.f32 1.0, %v1786_v51  ;;  %v1707_v62 = vpop.f32.mrb[12].mxu1  ;;  %v1454_v45 = vmul.f32 -1.442695, %v2125_v18  ;;  %v1470_v51 = vmul.f32 -1.442695, %v2128_v19 }
 0x114   : > { %v1790_v63 = vpop.eup %1789  ;;  %1809 = vrcp.f32 %v1014_v54  ;;  %v1012_v0 = vadd.f32 1.0, %v1788_v57  ;;  %v2114_v3 = vpop.f32.mrb[13].mxu0  ;;  %v842_v54 = vmul.f32 %v1691_v61, %v2021_v24  ;;  %v858_v55 = vmul.f32 %v1707_v62, %v2021_v24 }
 0x115   : > { %v2116_v6 = vpop.f32.mrb[13].mxu1  ;;  %v1792_v7 = vpop.eup %1791  ;;  %1811 = vrcp.f32 %v996_v58  ;;  %v1001_v8 = vadd.f32 1.0, %v1790_v63  ;;  %v1452_v39 = vmul.f32 -1.442695, %v2135_v27  ;;  %v1468_v57 = vmul.f32 -1.442695, %v2138_v28 }
 0x116   : > { %v2120_v13 = vpop.f32.mrb[14].mxu0  ;;  %v2122_v15 = vpop.f32.mrb[14].mxu1  ;;  %1813 = vrcp.f32 %v1012_v0  ;;  %v1017_v17 = vadd.f32 1.0, %v1792_v7  ;;  %v1455_v58 = vmul.f32 -1.442695, %v2141_v31  ;;  %v2162_v61 = vadd.f32 %v2026_v26, %v853_v38 }
 0x117   : > { %v1794_v16 = vpop.eup %1793  ;;  %v2130_v20 = vpop.f32.mrb[15].mxu0  ;;  %1815 = vrcp.f32 %v1001_v8  ;;  %v1471_v60 = vmul.f32 -1.442695, %v2144_v32  ;;  %v1453_v63 = vmul.f32 -1.442695, %v2147_v35  ;;  %v2176_v8 = vadd.f32 %v2026_v26, %v842_v54 }
 0x118   : > { %v2132_v22 = vpop.f32.mrb[15].mxu1  ;;  %v1796_v23 = vpop.eup %1795  ;;  %v999_v25 = vadd.f32 1.0, %v1794_v16  ;;  %1817 = vrcp.f32 %v1017_v17 }
 0x119   : > { %v1798_v29 = vpop.eup %1797  ;;  %v1015_v30 = vadd.f32 1.0, %v1796_v23 }
 0x11a   : > { %v1800_v33 = vpop.eup %1799  ;;  %1819 = vrcp.f32 %v999_v25  ;;  %v1002_v34 = vadd.f32 1.0, %v1798_v29 }
 0x11b   : > { %v1802_v40 = vpop.eup %1801  ;;  %1821 = vrcp.f32 %v1015_v30  ;;  %v1093_v0 = vmul.f32 %v1800_v33, %v2033_v36  ;;  %v2179_v36 = vadd.f32 %v2026_v26, %v858_v55  ;;  %v1458_v33 = vmul.f32 -1.442695, %v2176_v8 }
 0x11c   : > { %v1804_v46 = vpop.eup %1803  ;;  %1823 = vrcp.f32 %v1002_v34 }
 0x11d   : > { %v1806_v56 = vpop.eup %1805  ;;  %1825 = vpow2.f32 %v2100_v44  ;;  %v1109_v44 = vmul.f32 %v1802_v40, %v2036_v37 }
 0x11e   : > { %v1808_v59 = vpop.eup %1807  ;;  %1827 = vpow2.f32 %v1449_v11  ;;  %v1107_v17 = vmul.f32 %v1806_v56, %v2044_v43 }
 0x11f   : > { %v1810_v62 = vpop.eup %1809  ;;  %v1094_v1 = vmul.f32 %v1808_v59, %v2051_v48  ;;  %1829 = vpow2.f32 %v1465_v41  ;;  %v1091_v48 = vmul.f32 %v1804_v46, %v2041_v42  ;;  %v1469_v42 = vmul.f32 -1.442695, %v2162_v61 }
 0x120   : > { %v1812_v2 = vpop.eup %1811  ;;  %v1110_v7 = vmul.f32 %v1810_v62, %v2054_v49  ;;  %1831 = vpow2.f32 %v1454_v45 }
 0x121   : > { %v1814_v37 = vpop.eup %1813  ;;  %v1550_v11 = vpack.c.bf16 %v1094_v1, %v1093_v0  ;;  %v1092_v12 = vmul.f32 %v1812_v2, %v2059_v52  ;;  %1833 = vpow2.f32 %v1470_v51  ;;  %v843_v0 = vmul.f32 %v2120_v13, %v2021_v24 }
 0x122   : > { %v1816_v16 = vpop.eup %1815  ;;  %v1590_v49 = vpack.c.bf16 %v1110_v7, %v1109_v44  ;;  %v1108_v23 = vmul.f32 %v1814_v37, %v2062_v53  ;;  %1835 = vpow2.f32 %v1452_v39  ;;  %v1474_v53 = vmul.f32 -1.442695, %v2179_v36 }
 0x123   : > { %v2185_v25 = vpop.eup %1817  ;;  %1622 = vst [vmem:[%s2172_s24 + $0x8] sm:$0xff] %v1550_v11   ;;  %v1545_v29 = vpack.c.bf16 %v1092_v12, %v1091_v48  ;;  %1837 = vpow2.f32 %v1468_v57  ;;  %v1097_v40 = vmul.f32 %v1816_v16, %v2073_v4  ;;  %v840_v4 = vmul.f32 %v2021_v24, %v2114_v3 }
 0x124   : > { %v2189_v30 = vpop.eup %1819  ;;  %1630 = vst [vmem:[%s2172_s24 + $0x48] sm:$0xff] %v1590_v49   ;;  %v1585_v52 = vpack.c.bf16 %v1108_v23, %v1107_v17  ;;  %1839 = vpow2.f32 %v1455_v58  ;;  %v859_v2 = vmul.f32 %v2122_v15, %v2021_v24  ;;  %v857_v12 = vmul.f32 %v2021_v24, %v2132_v22 }
 0x125   : > { %v2193_v43 = vpop.eup %1821  ;;  %1546 = vst [vmem:[%s2172_s24] sm:$0xff] %v1545_v29   ;;  %1841 = vpow2.f32 %v1471_v60  ;;  %v856_v60 = vmul.f32 %v2021_v24, %v2116_v6  ;;  %v2210_v37 = vadd.f32 %v2026_v26, %v840_v4  ;;  %v841_v6 = vmul.f32 %v2021_v24, %v2130_v20 }
 0x126   : > { %v1824_v34 = vpop.eup %1823  ;;  %1629 = vst [vmem:[%s2172_s24 + $0x40] sm:$0xff] %v1585_v52   ;;  %1843 = vpow2.f32 %v1453_v63  ;;  %v2220_v17 = vadd.f32 %v2026_v26, %v843_v0  ;;  %v2223_v20 = vadd.f32 %v2026_v26, %v859_v2 }
 0x127   : > { %v1826_v38 = vpop.eup %1825  ;;  %v1098_v41 = vmul.f32 %v1824_v34, %v2089_v14  ;;  %1845 = vpow2.f32 %v1469_v42  ;;  %v2215_v13 = vadd.f32 %v2026_v26, %v856_v60  ;;  %v1456_v42 = vmul.f32 -1.442695, %v2210_v37 }
 0x128   : > { %v1828_v45 = vpop.eup %1827  ;;  %v1018_v46 = vadd.f32 1.0, %v1826_v38  ;;  %1847 = vpow2.f32 %v1458_v33  ;;  %v2227_v52 = vadd.f32 %v2026_v26, %v841_v6  ;;  %v2231_v33 = vadd.f32 %v2026_v26, %v857_v12 }
 0x129   : > { %v1830_v51 = vpop.eup %1829  ;;  %v1560_v54 = vpack.c.bf16 %v1098_v41, %v1097_v40  ;;  %v1000_v55 = vadd.f32 1.0, %v1828_v45  ;;  %1849 = vpow2.f32 %v1474_v53  ;;  %v1472_v22 = vmul.f32 -1.442695, %v2215_v13 }
 0x12a   : > { %v1832_v56 = vpop.eup %1831  ;;  %1851 = vrcp.f32 %v1018_v46  ;;  %v1016_v39 = vadd.f32 1.0, %v1830_v51  ;;  %v1113_v34 = vmul.f32 %v2185_v25, %v2076_v5  ;;  %v1459_v40 = vmul.f32 -1.442695, %v2220_v17 }
 0x12b   : > { %v1834_v57 = vpop.eup %1833  ;;  %1624 = vst [vmem:[%s2172_s24 + $0x18] sm:$0xff] %v1560_v54   ;;  %1853 = vrcp.f32 %v1000_v55  ;;  %v1005_v58 = vadd.f32 1.0, %v1832_v56  ;;  %v1095_v45 = vmul.f32 %v2189_v30, %v2080_v9  ;;  %v1111_v46 = vmul.f32 %v2193_v43, %v2083_v10 }
 0x12c   : > { %v1836_v59 = vpop.eup %1835  ;;  %1855 = vrcp.f32 %v1016_v39  ;;  %v1021_v14 = vadd.f32 1.0, %v1834_v57  ;;  %v1475_v26 = vmul.f32 -1.442695, %v2223_v20  ;;  %v1473_v9 = vmul.f32 -1.442695, %v2231_v33 }
 0x12d   : > { %v1838_v63 = vpop.eup %1837  ;;  %1857 = vrcp.f32 %v1005_v58  ;;  %v1003_v62 = vadd.f32 1.0, %v1836_v59 }
 0x12e   : > { %v1840_v44 = vpop.eup %1839  ;;  %1859 = vrcp.f32 %v1021_v14  ;;  %v1019_v1 = vadd.f32 1.0, %v1838_v63 }
 0x12f   : > { %v1842_v7 = vpop.eup %1841  ;;  %1861 = vrcp.f32 %v1003_v62  ;;  %v1006_v3 = vadd.f32 1.0, %v1840_v44 }
 0x130   : > { %v1844_v48 = vpop.eup %1843  ;;  %1863 = vrcp.f32 %v1019_v1  ;;  %v1022_v11 = vadd.f32 1.0, %v1842_v7 }
 0x131   : > { %v1846_v16 = vpop.eup %1845  ;;  %1865 = vrcp.f32 %v1006_v3  ;;  %v1004_v15 = vadd.f32 1.0, %v1844_v48 }
 0x132   : > { %v1848_v49 = vpop.eup %1847  ;;  %1867 = vrcp.f32 %v1022_v11  ;;  %v1020_v23 = vadd.f32 1.0, %v1846_v16 }
 0x133   : > { %v1850_v29 = vpop.eup %1849  ;;  %1869 = vrcp.f32 %v1004_v15  ;;  %v1009_v0 = vadd.f32 1.0, %v1848_v49 }
 0x134   : > { %v1852_v24 = vpop.eup %1851  ;;  %1871 = vrcp.f32 %v1020_v23  ;;  %v1025_v1 = vadd.f32 1.0, %v1850_v29 }
 0x135   : > { %v1854_v53 = vpop.eup %1853  ;;  %v1114_v38 = vmul.f32 %v1852_v24, %v2095_v21  ;;  %1873 = vpow2.f32 %v1456_v42  ;;  %v1457_v21 = vmul.f32 -1.442695, %v2227_v52 }
 0x136   : > { %v1856_v41 = vpop.eup %1855  ;;  %v1096_v51 = vmul.f32 %v1854_v53, %v2103_v47  ;;  %1875 = vpow2.f32 %v1472_v22 }
 0x137   : > { %v1858_v54 = vpop.eup %1857  ;;  %v1600_v55 = vpack.c.bf16 %v1114_v38, %v1113_v34  ;;  %v1112_v5 = vmul.f32 %v1856_v41, %v2106_v50  ;;  %1877 = vpow2.f32 %v1459_v40 }
 0x138   : > { %v1860_v25 = vpop.eup %1859  ;;  %v1555_v56 = vpack.c.bf16 %v1096_v51, %v1095_v45  ;;  %1879 = vpow2.f32 %v1475_v26  ;;  %v1101_v50 = vmul.f32 %v1858_v54, %v2125_v18 }
 0x139   : > { %v1862_v30 = vpop.eup %1861  ;;  %1632 = vst [vmem:[%s2172_s24 + $0x58] sm:$0xff] %v1600_v55   ;;  %v1595_v10 = vpack.c.bf16 %v1112_v5, %v1111_v46  ;;  %1881 = vpow2.f32 %v1457_v21  ;;  %v1117_v4 = vmul.f32 %v1860_v25, %v2128_v19 }
 0x13a   : > { %v1864_v47 = vpop.eup %1863  ;;  %1623 = vst [vmem:[%s2172_s24 + $0x10] sm:$0xff] %v1555_v56   ;;  %1883 = vpow2.f32 %v1473_v9  ;;  %v1099_v60 = vmul.f32 %v1862_v30, %v2135_v27 }
 0x13b   : > { %v1866_v43 = vpop.eup %1865  ;;  %1631 = vst [vmem:[%s2172_s24 + $0x50] sm:$0xff] %v1595_v10   ;;  %v1115_v18 = vmul.f32 %v1864_v47, %v2138_v28  ;;  %1885 = vrcp.f32 %v1009_v0 }
 0x13c   : > { %v1868_v39 = vpop.eup %1867  ;;  %v1102_v57 = vmul.f32 %v1866_v43, %v2141_v31  ;;  %1887 = vrcp.f32 %v1025_v1 }
 0x13d   : > { %v1870_v58 = vpop.eup %1869  ;;  %v1118_v59 = vmul.f32 %v1868_v39, %v2144_v32 }
 0x13e   : > { %v1872_v14 = vpop.eup %1871  ;;  %v1570_v63 = vpack.c.bf16 %v1102_v57, %v1101_v50  ;;  %v1100_v62 = vmul.f32 %v1870_v58, %v2147_v35 }
 0x13f   : > { %v1610_v44 = vpack.c.bf16 %v1118_v59, %v1117_v4  ;;  %v1116_v31 = vmul.f32 %v1872_v14, %v2162_v61  ;;  %v1874_v19 = vpop.eup %1873 }
 0x140   : > { %1626 = vst [vmem:[%s2172_s24 + $0x28] sm:$0xff] %v1570_v63   ;;  %v1565_v2 = vpack.c.bf16 %v1100_v62, %v1099_v60  ;;  %v1876_v7 = vpop.eup %1875  ;;  %v1007_v27 = vadd.f32 1.0, %v1874_v19 }
 0x141   : > { %1634 = vst [vmem:[%s2172_s24 + $0x68] sm:$0xff] %v1610_v44   ;;  %v1605_v32 = vpack.c.bf16 %v1116_v31, %v1115_v18  ;;  %v1878_v3 = vpop.eup %1877  ;;  %v1023_v35 = vadd.f32 1.0, %v1876_v7 }
 0x142   : > { %1625 = vst [vmem:[%s2172_s24 + $0x20] sm:$0xff] %v1565_v2   ;;  %v1880_v6 = vpop.eup %1879  ;;  %1889 = vrcp.f32 %v1007_v27  ;;  %v1010_v28 = vadd.f32 1.0, %v1878_v3 }
 0x143   : > { %1633 = vst [vmem:[%s2172_s24 + $0x60] sm:$0xff] %v1605_v32   ;;  %v1882_v48 = vpop.eup %1881  ;;  %1891 = vrcp.f32 %v1023_v35  ;;  %v1026_v61 = vadd.f32 1.0, %v1880_v6 }
 0x144   : > { %v1884_v11 = vpop.eup %1883  ;;  %1893 = vrcp.f32 %v1010_v28  ;;  %v1008_v12 = vadd.f32 1.0, %v1882_v48 }
 0x145   : > { %1895 = vrcp.f32 %v1026_v61  ;;  %v1024_v16 = vadd.f32 1.0, %v1884_v11  ;;  %v1886_v15 = vpop.eup %1885 }
 0x146   : > { %1897 = vrcp.f32 %v1008_v12  ;;  %v1888_v49 = vpop.eup %1887  ;;  %v1105_v22 = vmul.f32 %v1886_v15, %v2176_v8 }
 0x147   : > { %1899 = vrcp.f32 %v1024_v16  ;;  %v1121_v38 = vmul.f32 %v1888_v49, %v2179_v36 }
 0x14c   : > { %v1890_v23 = vpop.eup %1889 }
 0x14d   : > { %v1892_v29 = vpop.eup %1891  ;;  %v1103_v45 = vmul.f32 %v1890_v23, %v2210_v37 }
 0x14e   : > { %v1894_v42 = vpop.eup %1893  ;;  %v1119_v26 = vmul.f32 %v1892_v29, %v2215_v13 }
 0x14f   : > { %v1896_v24 = vpop.eup %1895  ;;  %v1106_v53 = vmul.f32 %v1894_v42, %v2220_v17 }
 0x150   : > { %v1898_v34 = vpop.eup %1897  ;;  %v1122_v40 = vmul.f32 %v1896_v24, %v2223_v20 }
 0x151   : > { %v1900_v41 = vpop.eup %1899  ;;  %v1580_v46 = vpack.c.bf16 %v1106_v53, %v1105_v22  ;;  %v1104_v51 = vmul.f32 %v1898_v34, %v2227_v52 }
 0x152   : > { %v1620_v54 = vpack.c.bf16 %v1122_v40, %v1121_v38  ;;  %v1120_v8 = vmul.f32 %v1900_v41, %v2231_v33 }
 0x153   : > { %1628 = vst [vmem:[%s2172_s24 + $0x38] sm:$0xff] %v1580_v46   ;;  %v1575_v55 = vpack.c.bf16 %v1104_v51, %v1103_v45 }
 0x154   : > { %1636 = vst [vmem:[%s2172_s24 + $0x78] sm:$0xff] %v1620_v54   ;;  %v1615_v17 = vpack.c.bf16 %v1120_v8, %v1119_v26 }
 0x155   : > { %1627 = vst [vmem:[%s2172_s24 + $0x30] sm:$0xff] %v1575_v55  }
 0x156   : > { %1635 = vst [vmem:[%s2172_s24 + $0x70] sm:$0xff] %v1615_v17  }
 0x157 PF: > { %s14_s17 = sadd.s32 1, %s1923_s17   ;;  %s2287_s15 = smov %s1919_s16 }
 0x158   : > { %p11_p5 = scmp.ge.s32.totalorder %s14_s17, 4   ;;  %s2288_s16 = smov %s2290_s18 }
 0x15a   :  { %13 = sbr.rel (!%p11_p5) target bundleno = 2 (0x2), region = 83 }

// kernel: cnn_efficientnet_forward.17
= control target key start
LH: loop header
LB: loop body
LE: loop exit
PB: predicated region body
PF: predicated region fallthrough
CT: control target
= control target key end

     0   :  { %s835_s18 = smov 0   ;;  %s1025_s0 = inlined_call_operand.vmem [shape: bf16[2,64,128], index: 0, kind: input, shape index: {}]   ;;  %s1026_s1 = inlined_call_operand.vmem [shape: f32[128,128], index: 1, kind: input, shape index: {}]   ;;  %s1027_s2 = inlined_call_operand.vmem [shape: f32[1,128], index: 2, kind: input, shape index: {}]   ;;  %s1028_s3 = inlined_call_operand.vmem [shape: f32[128,128], index: 3, kind: input, shape index: {}]   ;;  %s1029_s4 = inlined_call_operand.vmem [shape: f32[1,128], index: 4, kind: input, shape index: {}]   ;;  %s1030_s5 = inlined_call_operand.vmem [shape: bf16[2,64,128], index: 5, kind: output, shape index: {}]  }
   0x1 LB: > { %s550_s19 = sadd.s32 4294967295, %s800_s18   ;;  %p554_p0 = scmp.ge.s32.totalorder %s800_s18, 1  ;;  %s800_s18 = sphi %s835_s18, %s15_s18  }
   0x2   : > { %p187_p1 = scmp.lt.s32.totalorder %s800_s18, 3 }
   0x4   : > { %p188_p2 = pnand %p554_p0, %p187_p1 }
   0x5   : > { %v256_v0 = vld [vmem:[%s1026_s1] sm:$0xff] (!%p188_p2)  ;;  %v257_v1 = vld [vmem:[%s1026_s1 + $0x8] sm:$0xff] (!%p188_p2)  ;;  %v258_v2 = vld [vmem:[%s1026_s1 + $0x10] sm:$0xff] (!%p188_p2)  ;;  %v802_v3 = vmov (!%p188_p2), 0.0|0.0   ;;  %vm803_vm0 = vmmov (!%p188_p2), 0   ;;  %v804_v6 = vmov (!%p188_p2), 0.0  }
   0x6   : > { %191 = sbr.rel (%p188_p2) target bundleno = 537 (0x219), region = 40  ;;  %727 = vmatprep.subr.bf16.mxu0 (!%p188_p2), %v802_v3  ;;  %v728_v4 = vpack.c.bf16 (!%p188_p2), %v257_v1, %v256_v0  ;;  %v259_v5 = vld [vmem:[%s1026_s1 + $0x18] sm:$0xff] (!%p188_p2)  ;;  %689 = vmatprep.mubr.msk.f32.mxu0 (!%p188_p2), %vm803_vm0, %v804_v6  ;;  %p215_p3 = scmp.lt.s32.totalorder (!%p188_p2), %s550_s19, 1  ;;  %v260_v8 = vld [vmem:[%s1026_s1 + $0x20] sm:$0xff] (!%p188_p2)  ;;  %v261_v9 = vld [vmem:[%s1026_s1 + $0x28] sm:$0xff] (!%p188_p2) }
   0x7   : > { %751 = vmatprep.subr.bf16.mxu1 (!%p188_p2), %v802_v3  ;;  %724 = vmatprep.mubr.msk.f32.mxu1 (!%p188_p2), %vm803_vm0, %v804_v6  ;;  %v731_v7 = vpack.c.bf16 (!%p188_p2), %v259_v5, %v258_v2  ;;  %v734_v10 = vpack.c.bf16 (!%p188_p2), %v261_v9, %v260_v8  ;;  %v262_v13 = vld [vmem:[%s1026_s1 + $0x30] sm:$0xff] (!%p188_p2)  ;;  %v263_v14 = vld [vmem:[%s1026_s1 + $0x38] sm:$0xff] (!%p188_p2)  ;;  %v264_v22 = vld [vmem:[%s1026_s1 + $0x40] sm:$0xff] (!%p188_p2) }
   0x8   : > { %729 = vmatpush3.bf16.msra.mxu0 (!%p188_p2), %v728_v4  ;;  %v737_v21 = vpack.c.bf16 (!%p188_p2), %v263_v14, %v262_v13  ;;  %v265_v23 = vld [vmem:[%s1026_s1 + $0x48] sm:$0xff] (!%p188_p2)  ;;  %v266_v30 = vld [vmem:[%s1026_s1 + $0x50] sm:$0xff] (!%p188_p2)  ;;  %v267_v31 = vld [vmem:[%s1026_s1 + $0x58] sm:$0xff] (!%p188_p2) }
   0x9   : > { %730 = vmatprep.subr.bf16.mxu0 (!%p188_p2), %v802_v3  ;;  %v740_v29 = vpack.c.bf16 (!%p188_p2), %v265_v23, %v264_v22  ;;  %v743_v36 = vpack.c.bf16 (!%p188_p2), %v267_v31, %v266_v30  ;;  %v268_v37 = vld [vmem:[%s1026_s1 + $0x60] sm:$0xff] (!%p188_p2)  ;;  %v269_v38 = vld [vmem:[%s1026_s1 + $0x68] sm:$0xff] (!%p188_p2)  ;;  %v270_v42 = vld [vmem:[%s1026_s1 + $0x70] sm:$0xff] (!%p188_p2) }
   0xa   : > { %v746_v41 = vpack.c.bf16 (!%p188_p2), %v269_v38, %v268_v37  ;;  %v271_v43 = vld [vmem:[%s1026_s1 + $0x78] sm:$0xff] (!%p188_p2)  ;;  %v350_v52 = vld [vmem:[%s1028_s3] sm:$0xff] (!%p188_p2)  ;;  %v351_v53 = vld [vmem:[%s1028_s3 + $0x8] sm:$0xff] (!%p188_p2) }
   0xb   : > { %v749_v46 = vpack.c.bf16 (!%p188_p2), %v271_v43, %v270_v42  ;;  %v752_v54 = vpack.c.bf16 (!%p188_p2), %v351_v53, %v350_v52  ;;  %v352_v55 = vld [vmem:[%s1028_s3 + $0x10] sm:$0xff] (!%p188_p2)  ;;  %v353_v56 = vld [vmem:[%s1028_s3 + $0x18] sm:$0xff] (!%p188_p2)  ;;  %v354_v58 = vld [vmem:[%s1028_s3 + $0x20] sm:$0xff] (!%p188_p2) }
   0xc   : > { %732 = vmatpush3.bf16.msra.mxu0 (!%p188_p2), %v731_v7  ;;  %v755_v57 = vpack.c.bf16 (!%p188_p2), %v353_v56, %v352_v55  ;;  %v355_v59 = vld [vmem:[%s1028_s3 + $0x28] sm:$0xff] (!%p188_p2)  ;;  %v356_v61 = vld [vmem:[%s1028_s3 + $0x30] sm:$0xff] (!%p188_p2)  ;;  %v357_v62 = vld [vmem:[%s1028_s3 + $0x38] sm:$0xff] (!%p188_p2) }
   0xd   : > { %s1032_s19 = smov (!%p215_p3, %s550_s19), 1  ;;  %733 = vmatprep.subr.bf16.mxu0 %v802_v3  ;;  %753 = vmatpush3.bf16.msra.mxu1 %v752_v54  ;;  %v758_v60 = vpack.c.bf16 %v355_v59, %v354_v58  ;;  %v761_v63 = vpack.c.bf16 %v357_v62, %v356_v61  ;;  %v358_v0 = vld [vmem:[%s1028_s3 + $0x40] sm:$0xff]  ;;  %v359_v1 = vld [vmem:[%s1028_s3 + $0x48] sm:$0xff]  ;;  %v360_v4 = vld [vmem:[%s1028_s3 + $0x50] sm:$0xff] }
   0xe   : > { %s571_s7 = sshll.u32 %s1032_s19, 5  ;;  %754 = vmatprep.subr.bf16.mxu1 %v802_v3  ;;  %v764_v2 = vpack.c.bf16 %v359_v1, %v358_v0  ;;  %v361_v5 = vld [vmem:[%s1028_s3 + $0x58] sm:$0xff]  ;;  %v362_v7 = vld [vmem:[%s1028_s3 + $0x60] sm:$0xff]  ;;  %v363_v8 = vld [vmem:[%s1028_s3 + $0x68] sm:$0xff] }
   0xf   : > { %s219_s10 = scalar_lea.vmem %s1025_s0, %s571_s7  ;;  %v767_v6 = vpack.c.bf16 %v361_v5, %v360_v4  ;;  %v770_v9 = vpack.c.bf16 %v363_v8, %v362_v7  ;;  %v365_v13 = vld [vmem:[%s1028_s3 + $0x78] sm:$0xff]  ;;  %v366_v31 = vld [vmem:[%s1029_s4] sm:$0x1]  ;;  %s224_s27 = scalar_lea.vmem %s1030_s5, %s571_s7 }
  0x10   : > { %v872_v11 = vld [vmem:[%s219_s10] sm:$0xff]   ;;  %v874_v12 = vld [vmem:[%s219_s10 + $0x8] sm:$0xff]   ;;  %v886_v18 = vld [vmem:[%s219_s10 + $0x10] sm:$0xff]   ;;  %735 = vmatpush3.bf16.msra.mxu0 %v734_v10 }
  0x11   : > { %v583_v15 = vunpack.c.l.bf16 %v872_v11  ;;  %v584_v16 = vunpack.c.h.bf16 %v872_v11  ;;  %v587_v17 = vunpack.c.l.bf16 %v874_v12  ;;  %v588_v19 = vunpack.c.h.bf16 %v874_v12  ;;  %736 = vmatprep.subr.bf16.mxu0 %v802_v3  ;;  %v903_v26 = vld [vmem:[%s219_s10 + $0x18] sm:$0xff]   ;;  %756 = vmatpush3.bf16.msra.mxu1 %v755_v57  ;;  %v364_v10 = vld [vmem:[%s1028_s3 + $0x70] sm:$0xff] }
  0x12   : > { %v591_v24 = vunpack.c.l.bf16 %v886_v18  ;;  %v592_v27 = vunpack.c.h.bf16 %v886_v18  ;;  %v595_v32 = vunpack.c.l.bf16 %v903_v26  ;;  %v596_v34 = vunpack.c.h.bf16 %v903_v26  ;;  %757 = vmatprep.subr.bf16.mxu1 %v802_v3 }
  0x13   : > { %v241_v20 = vadd.f32 %v584_v16, %v583_v15  ;;  %v773_v14 = vpack.c.bf16 %v365_v13, %v364_v10 }
  0x14   : > { %738 = vmatpush3.bf16.msra.mxu0 %v737_v21 }
  0x15   : > { %v242_v25 = vadd.f32 %v587_v17, %v241_v20  ;;  %739 = vmatprep.subr.bf16.mxu0 %v802_v3  ;;  %759 = vmatpush3.bf16.msra.mxu1 %v758_v60  ;;  %v272_v20 = vld [vmem:[%s1027_s2] sm:$0x1] }
  0x16   : > { %760 = vmatprep.subr.bf16.mxu1 %v802_v3 }
  0x17   : > { %v243_v28 = vadd.f32 %v588_v19, %v242_v25 }
  0x18   : > { %741 = vmatpush3.bf16.msra.mxu0 %v740_v29 }
  0x19   : > { %v244_v33 = vadd.f32 %v591_v24, %v243_v28  ;;  %742 = vmatprep.subr.bf16.mxu0 %v802_v3  ;;  %762 = vmatpush3.bf16.msra.mxu1 %v761_v63 }
  0x1a   : > { %763 = vmatprep.subr.bf16.mxu1 %v802_v3 }
  0x1b   : > { %v245_v35 = vadd.f32 %v592_v27, %v244_v33 }
  0x1c   : > { %744 = vmatpush3.bf16.msra.mxu0 %v743_v36 }
  0x1d   : > { %v246_v39 = vadd.f32 %v595_v32, %v245_v35  ;;  %745 = vmatprep.subr.bf16.mxu0 %v802_v3  ;;  %765 = vmatpush3.bf16.msra.mxu1 %v764_v2 }
  0x1e   : > { %766 = vmatprep.subr.bf16.mxu1 %v802_v3 }
  0x1f   : > { %v247_v40 = vadd.f32 %v596_v34, %v246_v39 }
  0x20   : > { %747 = vmatpush3.bf16.msra.mxu0 %v746_v41 }
  0x21   : > { %v248_v44 = vrot.slane %v247_v40, 4  ;;  %748 = vmatprep.subr.bf16.mxu0 %v802_v3  ;;  %768 = vmatpush3.bf16.msra.mxu1 %v767_v6 }
  0x22   : > { %769 = vmatprep.subr.bf16.mxu1 %v802_v3 }
  0x23   : > { %v249_v45 = vadd.f32 %v248_v44, %v247_v40  ;;  %v443_v40 = vlaneseq }
  0x24   : > { %750 = vmatpush3.bf16.msra.mxu0 %v749_v46 }
  0x25   : > { %v250_v47 = vrot.slane %v249_v45, 2  ;;  %771 = vmatpush3.bf16.msra.mxu1 %v770_v9  ;;  %v444_v41 = vshrl.u32 %v443_v40, 7 }
  0x26   : > { %772 = vmatprep.subr.bf16.mxu1 %v802_v3 }
  0x27   : > { %v251_v48 = vadd.f32 %v250_v47, %v249_v45  ;;  %v445_v42 = vsub.s32 0, %v444_v41 }
  0x29   : > { %v252_v49 = vrot.slane %v251_v48, 1  ;;  %774 = vmatpush3.bf16.msra.mxu1 %v773_v14 }
  0x2b   : > { %v253_v50 = vadd.f32 %v252_v49, %v251_v48 }
  0x2d   : > { %v255_v51 = vmul.f32 0.015625, %v253_v50 }
  0x2f   : > { %690 = vmatmul.mubr.f32.vlgmr.msra.gmra.mrb[0].mxu0 %v255_v51 }
 0x102   : > { %v339_v21 = vpop.f32.mrb[0].mxu0 }
 0x103   : > { %v340_v22 = vadd.f32 %v339_v21, %v272_v20  ;;  %v691_v23 = vpop.f32.mrb[1].mxu0 }
 0x105   : > { %v559_v25 = vmul.f32 -1.442695, %v340_v22 }
 0x107   : > { %786 = vpow2.f32 %v559_v25 }
 0x111   : > { %v787_v3 = vpop.eup %786 }
 0x112   : > { %v346_v28 = vadd.f32 1.0, %v787_v3 }
 0x114   : > { %788 = vrcp.f32 %v346_v28 }
 0x11e   : > { %v789_v29 = vpop.eup %788 }
 0x11f   : > { %v349_v30 = vmul.f32 %v789_v29, %v340_v22 }
 0x121   : > { %725 = vmatmul.mubr.f32.vlgmr.msra.gmra.mrb[0].mxu1 %v349_v30 }
 0x1f4   : > { %v433_v33 = vpop.f32.mrb[0].mxu1 }
 0x1f5   : > { %v434_v35 = vadd.f32 %v433_v33, %v366_v31  ;;  %v726_v36 = vpop.f32.mrb[1].mxu1 }
 0x1f7   : > { %v560_v37 = vmul.f32 -1.442695, %v434_v35 }
 0x1f9   : > { %790 = vpow2.f32 %v560_v37 }
 0x203   : > { %v791_v38 = vpop.eup %790 }
 0x204   : > { %v440_v39 = vadd.f32 1.0, %v791_v38 }
 0x206   : > { %792 = vrcp.f32 %v440_v39 }
 0x210   : > { %v793_v43 = vpop.eup %792 }
 0x211   : > { %v446_v44 = vrot.slane %v793_v43, %v445_v42 }
 0x213   : > { %v447_v45 = vmul.f32 %v583_v15, %v446_v44  ;;  %v448_v46 = vmul.f32 %v584_v16, %v446_v44  ;;  %v449_v47 = vmul.f32 %v587_v17, %v446_v44  ;;  %v450_v48 = vmul.f32 %v588_v19, %v446_v44 }
 0x214   : > { %v451_v49 = vmul.f32 %v591_v24, %v446_v44  ;;  %v452_v15 = vmul.f32 %v592_v27, %v446_v44  ;;  %v453_v11 = vmul.f32 %v595_v32, %v446_v44  ;;  %v454_v16 = vmul.f32 %v596_v34, %v446_v44 }
 0x215   : > { %v600_v17 = vpack.c.bf16 %v448_v46, %v447_v45  ;;  %v605_v12 = vpack.c.bf16 %v450_v48, %v449_v47 }
 0x216   : > { %v610_v19 = vpack.c.bf16 %v452_v15, %v451_v49  ;;  %v615_v50 = vpack.c.bf16 %v454_v16, %v453_v11 }
 0x217   : > { %601 = vst [vmem:[%s224_s27] sm:$0xff] %v600_v17   ;;  %620 = vst [vmem:[%s224_s27 + $0x8] sm:$0xff] %v605_v12  }
 0x218   : > { %621 = vst [vmem:[%s224_s27 + $0x10] sm:$0xff] %v610_v19   ;;  %622 = vst [vmem:[%s224_s27 + $0x18] sm:$0xff] %v615_v50  }
 0x219 PF: > { %s15_s18 = sadd.s32 1, %s800_s18  }
 0x21a   : > { %p12_p4 = scmp.ge.s32.totalorder %s15_s18, 4  }
 0x21c   :  { %14 = sbr.rel (!%p12_p4) target bundleno = 1 (0x1), region = 70 }

// kernel: cnn_efficientnet_forward.18
= control target key start
LH: loop header
LB: loop body
LE: loop exit
PB: predicated region body
PF: predicated region fallthrough
CT: control target
= control target key end

     0   :  { %s740_s1 = inlined_call_operand.vmem [shape: bf16[128,128], index: 1, kind: input, shape index: {}]   ;;  %s741_s0 = inlined_call_operand.vmem [shape: bf16[128,128], index: 0, kind: input, shape index: {}]   ;;  %s742_s2 = inlined_call_operand.vmem [shape: f32[1,128], index: 2, kind: input, shape index: {}]   ;;  %s743_s3 = inlined_call_operand.vmem [shape: f32[1,128], index: 3, kind: input, shape index: {}]   ;;  %s744_s4 = inlined_call_operand.vmem [shape: bf16[128,128], index: 4, kind: output, shape index: {}]  }
   0x1   :  { %v621_v0 = vld [vmem:[%s740_s1] sm:$0xff]   ;;  %v622_v1 = vld [vmem:[%s740_s1 + $0x8] sm:$0xff]   ;;  %v623_v2 = vld [vmem:[%s740_s1 + $0x10] sm:$0xff]  }
   0x2   :  { %573 = vmatprep.subr.bf16.mxu0 %v621_v0  ;;  %605 = vmatprep.subr.bf16.mxu1 %v621_v0  ;;  %v624_v3 = vld [vmem:[%s740_s1 + $0x18] sm:$0xff]   ;;  %v629_v4 = vld [vmem:[%s741_s0] sm:$0xff]   ;;  %v626_v7 = vld [vmem:[%s740_s1 + $0x28] sm:$0xff]  }
   0x3   :  { %574 = vmatpush3.bf16.msra.mxu0 %v621_v0  ;;  %613 = vmatpush3.bf16.msra.mxu1 %v621_v0  ;;  %v630_v5 = vld [vmem:[%s741_s0 + $0x20] sm:$0xff]   ;;  %v627_v8 = vld [vmem:[%s740_s1 + $0x30] sm:$0xff]   ;;  %v628_v9 = vld [vmem:[%s740_s1 + $0x38] sm:$0xff]  }
   0x4   :  { %575 = vmatprep.subr.bf16.mxu0 %v622_v1  ;;  %606 = vmatprep.subr.bf16.mxu1 %v622_v1  ;;  %v625_v6 = vld [vmem:[%s740_s1 + $0x20] sm:$0xff]   ;;  %v631_v10 = vld [vmem:[%s741_s0 + $0x8] sm:$0xff]   ;;  %v633_v12 = vld [vmem:[%s741_s0 + $0x10] sm:$0xff]  }
   0x5   :  { %589 = vmatprep.mubr.bf16.mxu0 %v629_v4  ;;  %597 = vmatprep.mubr.bf16.mxu1 %v630_v5  ;;  %v632_v11 = vld [vmem:[%s741_s0 + $0x28] sm:$0xff]   ;;  %v634_v13 = vld [vmem:[%s741_s0 + $0x30] sm:$0xff]   ;;  %v635_v14 = vld [vmem:[%s741_s0 + $0x18] sm:$0xff]  }
   0x6   :  { %v636_v15 = vld [vmem:[%s741_s0 + $0x38] sm:$0xff]   ;;  %v476_v16 = vld [vmem:[%s742_s2] ss:$0 sm:$0xff] }
   0x7   :  { %576 = vmatpush3.bf16.msra.mxu0 %v622_v1  ;;  %614 = vmatpush3.bf16.msra.mxu1 %v622_v1  ;;  %v477_v23 = vld [vmem:[%s743_s3] ss:$0 sm:$0xff] }
   0x8   :  { %577 = vmatprep.subr.bf16.mxu0 %v623_v2  ;;  %607 = vmatprep.subr.bf16.mxu1 %v623_v2 }
   0xb   :  { %578 = vmatpush3.bf16.msra.mxu0 %v623_v2  ;;  %615 = vmatpush3.bf16.msra.mxu1 %v623_v2 }
   0xc   :  { %579 = vmatprep.subr.bf16.mxu0 %v624_v3  ;;  %608 = vmatprep.subr.bf16.mxu1 %v624_v3 }
   0xf   :  { %580 = vmatpush3.bf16.msra.mxu0 %v624_v3  ;;  %616 = vmatpush3.bf16.msra.mxu1 %v624_v3 }
  0x10   :  { %581 = vmatprep.subr.bf16.mxu0 %v625_v6  ;;  %609 = vmatprep.subr.bf16.mxu1 %v625_v6 }
  0x13   :  { %582 = vmatpush3.bf16.msra.mxu0 %v625_v6  ;;  %617 = vmatpush3.bf16.msra.mxu1 %v625_v6 }
  0x14   :  { %583 = vmatprep.subr.bf16.mxu0 %v626_v7  ;;  %610 = vmatprep.subr.bf16.mxu1 %v626_v7 }
  0x17   :  { %584 = vmatpush3.bf16.msra.mxu0 %v626_v7  ;;  %618 = vmatpush3.bf16.msra.mxu1 %v626_v7 }
  0x18   :  { %585 = vmatprep.subr.bf16.mxu0 %v627_v8  ;;  %611 = vmatprep.subr.bf16.mxu1 %v627_v8 }
  0x1b   :  { %586 = vmatpush3.bf16.msra.mxu0 %v627_v8  ;;  %619 = vmatpush3.bf16.msra.mxu1 %v627_v8 }
  0x1c   :  { %587 = vmatprep.subr.bf16.mxu0 %v628_v9  ;;  %612 = vmatprep.subr.bf16.mxu1 %v628_v9 }
  0x1f   :  { %588 = vmatpush3.bf16.msra.mxu0 %v628_v9  ;;  %620 = vmatpush3.bf16.msra.mxu1 %v628_v9 }
  0x22   :  { %590 = vmatmul.mubr.bf16.vlgmr.msra.gmra.mrb[0].mxu0 %v631_v10  ;;  %598 = vmatmul.mubr.bf16.vlgmr.msra.gmra.mrb[0].mxu1 %v632_v11 }
  0x23   :  { %593 = vmatprep.mubr.bf16.mxu0 %v633_v12  ;;  %601 = vmatprep.mubr.bf16.mxu1 %v634_v13 }
  0x2a   :  { %594 = vmatmul.mubr.bf16.gmra.mrb[4].mxu0 %v635_v14  ;;  %602 = vmatmul.mubr.bf16.gmra.mrb[4].mxu1 %v636_v15 }
  0xf5   :  { %v591_v17 = vpop.f32.mrb[0].mxu0  ;;  %v599_v18 = vpop.f32.mrb[0].mxu1 }
  0xf6   :  { %v339_v19 = vmul.f32 %v591_v17, %v476_v16  ;;  %v347_v20 = vmul.f32 %v599_v18, %v476_v16  ;;  %v216_v21 = vpop.f32.mrb[1].mxu0  ;;  %v248_v22 = vpop.f32.mrb[1].mxu1 }
  0xf7   :  { %v337_v24 = vmul.f32 %v476_v16, %v216_v21  ;;  %v345_v25 = vmul.f32 %v476_v16, %v248_v22  ;;  %v592_v26 = vpop.f32.mrb[2].mxu0  ;;  %v600_v27 = vpop.f32.mrb[2].mxu1 }
  0xf8   :  { %v340_v28 = vmul.f32 %v592_v26, %v476_v16  ;;  %v348_v29 = vmul.f32 %v600_v27, %v476_v16  ;;  %v219_v30 = vpop.f32.mrb[3].mxu0  ;;  %v251_v31 = vpop.f32.mrb[3].mxu1  ;;  %v362_v34 = vadd.f32 %v477_v23, %v339_v19  ;;  %v370_v35 = vadd.f32 %v477_v23, %v347_v20 }
  0xf9   :  { %v338_v32 = vmul.f32 %v476_v16, %v219_v30  ;;  %v346_v33 = vmul.f32 %v476_v16, %v251_v31  ;;  %v360_v38 = vadd.f32 %v477_v23, %v337_v24  ;;  %v368_v39 = vadd.f32 %v477_v23, %v345_v25 }
  0xfa   :  { %v363_v36 = vadd.f32 %v477_v23, %v340_v28  ;;  %v371_v37 = vadd.f32 %v477_v23, %v348_v29 }
  0xfb   :  { %v361_v40 = vadd.f32 %v477_v23, %v338_v32  ;;  %v369_v41 = vadd.f32 %v477_v23, %v346_v33 }
  0xfc   :  { %v518_v42 = vpack.c.bf16 %v363_v36, %v362_v34  ;;  %v538_v43 = vpack.c.bf16 %v371_v37, %v370_v35 }
  0xfd   :  { %v513_v44 = vpack.c.bf16 %v361_v40, %v360_v38  ;;  %v533_v45 = vpack.c.bf16 %v369_v41, %v368_v39  ;;  %v595_v46 = vpop.f32.mrb[4].mxu0  ;;  %v603_v47 = vpop.f32.mrb[4].mxu1 }
  0xfe   :  { %550 = vst [vmem:[%s744_s4 + $0x8] sm:$0xff] %v518_v42   ;;  %554 = vst [vmem:[%s744_s4 + $0x28] sm:$0xff] %v538_v43   ;;  %v343_v48 = vmul.f32 %v595_v46, %v476_v16  ;;  %v351_v49 = vmul.f32 %v603_v47, %v476_v16  ;;  %v232_v50 = vpop.f32.mrb[5].mxu0  ;;  %v264_v51 = vpop.f32.mrb[5].mxu1 }
  0xff   :  { %514 = vst [vmem:[%s744_s4] sm:$0xff] %v513_v44   ;;  %553 = vst [vmem:[%s744_s4 + $0x20] sm:$0xff] %v533_v45   ;;  %v341_v52 = vmul.f32 %v476_v16, %v232_v50  ;;  %v349_v53 = vmul.f32 %v476_v16, %v264_v51  ;;  %v596_v54 = vpop.f32.mrb[6].mxu0  ;;  %v604_v55 = vpop.f32.mrb[6].mxu1 }
 0x100   :  { %v344_v56 = vmul.f32 %v596_v54, %v476_v16  ;;  %v352_v57 = vmul.f32 %v604_v55, %v476_v16  ;;  %v235_v58 = vpop.f32.mrb[7].mxu0  ;;  %v267_v59 = vpop.f32.mrb[7].mxu1  ;;  %v366_v62 = vadd.f32 %v477_v23, %v343_v48  ;;  %v374_v63 = vadd.f32 %v477_v23, %v351_v49 }
 0x101   :  { %v342_v60 = vmul.f32 %v476_v16, %v235_v58  ;;  %v350_v61 = vmul.f32 %v476_v16, %v267_v59  ;;  %v364_v2 = vadd.f32 %v477_v23, %v341_v52  ;;  %v372_v3 = vadd.f32 %v477_v23, %v349_v53 }
 0x102   :  { %v367_v0 = vadd.f32 %v477_v23, %v344_v56  ;;  %v375_v1 = vadd.f32 %v477_v23, %v352_v57 }
 0x103   :  { %v365_v4 = vadd.f32 %v477_v23, %v342_v60  ;;  %v373_v5 = vadd.f32 %v477_v23, %v350_v61 }
 0x104   :  { %v528_v6 = vpack.c.bf16 %v367_v0, %v366_v62  ;;  %v548_v7 = vpack.c.bf16 %v375_v1, %v374_v63 }
 0x105   :  { %v523_v8 = vpack.c.bf16 %v365_v4, %v364_v2  ;;  %v543_v9 = vpack.c.bf16 %v373_v5, %v372_v3 }
 0x106   :  { %552 = vst [vmem:[%s744_s4 + $0x18] sm:$0xff] %v528_v6   ;;  %556 = vst [vmem:[%s744_s4 + $0x38] sm:$0xff] %v548_v7  }
 0x107   :  { %551 = vst [vmem:[%s744_s4 + $0x10] sm:$0xff] %v523_v8   ;;  %555 = vst [vmem:[%s744_s4 + $0x30] sm:$0xff] %v543_v9  }

// kernel: cnn_efficientnet_forward.19
= control target key start
LH: loop header
LB: loop body
LE: loop exit
PB: predicated region body
PF: predicated region fallthrough
CT: control target
= control target key end

     0   :  { %s1859_s15 = smov 0   ;;  %s1861_s16 = smov 0   ;;  %s2262_s0 = inlined_call_operand.vmem [shape: bf16[128,128], index: 0, kind: input, shape index: {}]   ;;  %s2263_s1 = inlined_call_operand.vmem [shape: bf16[128,2560], index: 1, kind: input, shape index: {}]   ;;  %s2264_s2 = inlined_call_operand.vmem [shape: f32[1,2560], index: 2, kind: input, shape index: {}]   ;;  %s2265_s3 = inlined_call_operand.vmem [shape: f32[1,2560], index: 3, kind: input, shape index: {}]   ;;  %s2266_s4 = inlined_call_operand.vmem [shape: bf16[128,2560], index: 4, kind: output, shape index: {}]  }
   0x1   :  { %s1863_s17 = smov 0   ;;  %s1865_s18 = smov 0  }
   0x2   :  { %s1867_s19 = smov 0  }
   0x3 LB: > { %s29_s20 = sadd.s32 1, %s1827_s18  ;;  %s1468_s21 = sadd.s32 4294967295, %s1831_s19   ;;  %s1831_s19 = sphi %s1867_s19, %s14_s19   ;;  %s1827_s18 = sphi %s1865_s18, %s2271_s18   ;;  %s1823_s17 = sphi %s1863_s17, %s2270_s17   ;;  %s1819_s16 = sphi %s1861_s16, %s2269_s16   ;;  %s1815_s15 = sphi %s1859_s15, %s2268_s15  }
   0x4   : > { %p31_p0 = scmp.ge.s32.totalorder %s29_s20, 10  ;;  %p77_p1 = scmp.ne.s32.totalorder %s1819_s16, %s1815_s15 }
   0x5   : > { %p78_p2 = scmp.eq.s32.totalorder %s1831_s19, 0  ;;  %p161_p4 = scmp.eq.s32.totalorder %s1468_s21, 9 }
   0x6   : > { %s2273_s20 = smov (%p31_p0, %s29_s20), 0  ;;  %s70_s23 = sadd.s32 1, %s1819_s16 }
   0x7   : > { %p79_p3 = por %p78_p2, %p77_p1  ;;  %s66_s22 = ssub.s32 %s1827_s18, %s2273_s20 }
   0x8   : > { %p68_p5 = scmp.eq.s32.totalorder %s66_s22, 0  ;;  %p1894_p6 = por %p161_p4, %p77_p1 }
   0x9   : > { %p1472_p7 = scmp.ge.s32.totalorder %s1831_s19, 10 }
   0xa   : > { %s1899_s25 = scalar_select %p68_p5, %s1819_s16, %s70_s23  }
   0xb   : > { %195 = sbr.rel (%p1472_p7) target bundleno = 30 (0x1e), region = 20 }
  0x12   : > { %198 = sbr.rel (!%p79_p3) target bundleno = 30 (0x1e), region = 24  ;;  %s200_s26 = sand.u32 (%p79_p3), 1, %s1819_s16  }
  0x13   : > { %s1558_s27 = sshll.u32 (%p79_p3), %s1827_s18, 3  ;;  %s1473_s28 = sshll.u32 (%p79_p3), %s200_s26, 7 }
  0x14   : > { %s1907_s5 = scalar_lea.vmem (%p79_p3), %s2263_s1, %s1558_s27  ;;  %s202_s6 = scalar_lea.vmem (%p79_p3), [#allocation3], %s1473_s28 }
  0x15   : > { %v266_v0 = vld [vmem:[%s1907_s5] sm:$0xff] (%p79_p3)  ;;  %v268_v1 = vld [vmem:[%s1907_s5 + $0x50] sm:$0xff] (%p79_p3) }
  0x16   : > { %v270_v2 = vld [vmem:[%s1907_s5 + $0xa0] sm:$0xff] (%p79_p3)  ;;  %267 = vst [vmem:[%s202_s6] sm:$0xff] (%p79_p3), %v266_v0  ;;  %269 = vst [vmem:[%s202_s6 + $0x8] sm:$0xff] (%p79_p3), %v268_v1  ;;  %v272_v3 = vld [vmem:[%s1907_s5 + $0xf0] sm:$0xff] (%p79_p3) }
  0x17   : > { %271 = vst [vmem:[%s202_s6 + $0x10] sm:$0xff] (%p79_p3), %v270_v2  ;;  %v274_v4 = vld [vmem:[%s1907_s5 + $0x140] sm:$0xff] (%p79_p3)  ;;  %v276_v5 = vld [vmem:[%s1907_s5 + $0x190] sm:$0xff] (%p79_p3)  ;;  %273 = vst [vmem:[%s202_s6 + $0x18] sm:$0xff] (%p79_p3), %v272_v3 }
  0x18   : > { %275 = vst [vmem:[%s202_s6 + $0x20] sm:$0xff] (%p79_p3), %v274_v4  ;;  %277 = vst [vmem:[%s202_s6 + $0x28] sm:$0xff] (%p79_p3), %v276_v5  ;;  %v278_v6 = vld [vmem:[%s1907_s5 + $0x1e0] sm:$0xff] (%p79_p3)  ;;  %v280_v7 = vld [vmem:[%s1907_s5 + $0x230] sm:$0xff] (%p79_p3) }
  0x19   : > { %v282_v8 = vld [vmem:[%s1907_s5 + $0x280] sm:$0xff]  ;;  %279 = vst [vmem:[%s202_s6 + $0x30] sm:$0xff] %v278_v6  ;;  %281 = vst [vmem:[%s202_s6 + $0x38] sm:$0xff] %v280_v7  ;;  %v284_v9 = vld [vmem:[%s1907_s5 + $0x2d0] sm:$0xff] }
  0x1a   : > { %283 = vst [vmem:[%s202_s6 + $0x40] sm:$0xff] %v282_v8  ;;  %v286_v10 = vld [vmem:[%s1907_s5 + $0x320] sm:$0xff]  ;;  %v288_v11 = vld [vmem:[%s1907_s5 + $0x370] sm:$0xff]  ;;  %285 = vst [vmem:[%s202_s6 + $0x48] sm:$0xff] %v284_v9 }
  0x1b   : > { %287 = vst [vmem:[%s202_s6 + $0x50] sm:$0xff] %v286_v10  ;;  %289 = vst [vmem:[%s202_s6 + $0x58] sm:$0xff] %v288_v11  ;;  %v290_v12 = vld [vmem:[%s1907_s5 + $0x3c0] sm:$0xff]  ;;  %v292_v13 = vld [vmem:[%s1907_s5 + $0x410] sm:$0xff] }
  0x1c   : > { %v294_v14 = vld [vmem:[%s1907_s5 + $0x460] sm:$0xff]  ;;  %291 = vst [vmem:[%s202_s6 + $0x60] sm:$0xff] %v290_v12  ;;  %293 = vst [vmem:[%s202_s6 + $0x68] sm:$0xff] %v292_v13  ;;  %v296_v15 = vld [vmem:[%s1907_s5 + $0x4b0] sm:$0xff] }
  0x1d   : > { %295 = vst [vmem:[%s202_s6 + $0x70] sm:$0xff] %v294_v14  ;;  %297 = vst [vmem:[%s202_s6 + $0x78] sm:$0xff] %v296_v15 }
  0x1e PF: > { %p1476_p8 = scmp.ge.s32.totalorder %s1831_s19, 1  ;;  %p318_p9 = scmp.lt.s32.totalorder %s1831_s19, 11 }
  0x20   : > { %p319_p10 = pnand %p1476_p8, %p318_p9 }
  0x21   : > { %s325_s7 = sand.u32 (!%p319_p10), 1, %s1815_s15   ;;  %v1833_v16 = vmov (!%p319_p10), 0   ;;  %v1657_v33 = vld [vmem:[%s2262_s0] sm:$0xff] (!%p319_p10)   ;;  %v1659_v35 = vld [vmem:[%s2262_s0 + $0x8] sm:$0xff] (!%p319_p10)   ;;  %v1661_v37 = vld [vmem:[%s2262_s0 + $0x10] sm:$0xff] (!%p319_p10)   ;;  %v831_v41 = vlaneseq (!%p319_p10) }
  0x22   : > { %322 = sbr.rel (%p319_p10) target bundleno = 381 (0x17d), region = 70  ;;  %s1928_s8 = sshll.u32 (!%p319_p10), %s325_s7, 7  ;;  %649 = vmatprep.mubr.bf16.mxu0 (!%p319_p10), %v1833_v16  ;;  %689 = vmatprep.mubr.bf16.mxu1 (!%p319_p10), %v1833_v16  ;;  %v1658_v34 = vld [vmem:[%s2262_s0 + $0x20] sm:$0xff] (!%p319_p10)   ;;  %v1660_v36 = vld [vmem:[%s2262_s0 + $0x28] sm:$0xff] (!%p319_p10)   ;;  %v1662_v38 = vld [vmem:[%s2262_s0 + $0x30] sm:$0xff] (!%p319_p10)  }
  0x23   : > { %s1933_s9 = scalar_lea.vmem (!%p319_p10), [#allocation3], %s1928_s8  ;;  %v1663_v39 = vld [vmem:[%s2262_s0 + $0x18] sm:$0xff] (!%p319_p10)   ;;  %s1479_s7 = sshll.u32 (!%p319_p10), %s1823_s17, 1  ;;  %v832_v42 = vshrl.u32 (!%p319_p10), %v831_v41, 7 }
  0x24   : > { %v1633_v17 = vld [vmem:[%s1933_s9 + $0x4] ss:$8 sps:$4 sm:$0xff] (!%p319_p10)   ;;  %v1635_v18 = vld [vmem:[%s1933_s9] ss:$8 sps:$4 sm:$0xff] (!%p319_p10)   ;;  %v1636_v19 = vld [vmem:[%s1933_s9 + $0x14] ss:$8 sps:$4 sm:$0xff] (!%p319_p10)  }
  0x25   : > { %617 = vmatprep.subr.bf16.mxu0 (!%p319_p10), %v1633_v17  ;;  %1576 = vmatprep.subr.bf16.mxu1 (!%p319_p10), %v1633_v17  ;;  %v1638_v20 = vld [vmem:[%s1933_s9 + $0x10] ss:$8 sps:$4 sm:$0xff] (!%p319_p10)   ;;  %v1639_v21 = vld [vmem:[%s1933_s9 + $0x24] ss:$8 sps:$4 sm:$0xff] (!%p319_p10)   ;;  %v1641_v22 = vld [vmem:[%s1933_s9 + $0x20] ss:$8 sps:$4 sm:$0xff] (!%p319_p10)  }
  0x26   : > { %618 = vmatpush1.bf16.msra.mxu0 (!%p319_p10), %v1635_v18  ;;  %1584 = vmatpush1.bf16.msra.mxu1 (!%p319_p10), %v1635_v18  ;;  %v1642_v23 = vld [vmem:[%s1933_s9 + $0x34] ss:$8 sps:$4 sm:$0xff] (!%p319_p10)   ;;  %v1644_v24 = vld [vmem:[%s1933_s9 + $0x30] ss:$8 sps:$4 sm:$0xff] (!%p319_p10)   ;;  %v1645_v25 = vld [vmem:[%s1933_s9 + $0x44] ss:$8 sps:$4 sm:$0xff] (!%p319_p10)  }
  0x27   : > { %619 = vmatprep.subr.bf16.mxu0 (!%p319_p10), %v1636_v19  ;;  %1577 = vmatprep.subr.bf16.mxu1 (!%p319_p10), %v1636_v19  ;;  %v1647_v26 = vld [vmem:[%s1933_s9 + $0x40] ss:$8 sps:$4 sm:$0xff] (!%p319_p10)   ;;  %v1648_v27 = vld [vmem:[%s1933_s9 + $0x54] ss:$8 sps:$4 sm:$0xff] (!%p319_p10)   ;;  %v1650_v28 = vld [vmem:[%s1933_s9 + $0x50] ss:$8 sps:$4 sm:$0xff] (!%p319_p10)  }
  0x28   : > { %v1651_v29 = vld [vmem:[%s1933_s9 + $0x64] ss:$8 sps:$4 sm:$0xff] (!%p319_p10)   ;;  %v1653_v30 = vld [vmem:[%s1933_s9 + $0x60] ss:$8 sps:$4 sm:$0xff] (!%p319_p10)   ;;  %v1654_v31 = vld [vmem:[%s1933_s9 + $0x74] ss:$8 sps:$4 sm:$0xff] (!%p319_p10)  }
  0x29   : > { %v1656_v32 = vld [vmem:[%s1933_s9 + $0x70] ss:$8 sps:$4 sm:$0xff]   ;;  %p377_p11 = scmp.lt.s32.totalorder %s1479_s7, 19  ;;  %v833_v43 = vsub.s32 0, %v832_v42  ;;  %v837_v45 = vsub.s32 1, %v832_v42  ;;  %s2137_s15 = scalar_lea.vmem [#allocation4], %s1928_s8 }
  0x2a   : > { %620 = vmatpush1.bf16.msra.mxu0 %v1638_v20  ;;  %1585 = vmatpush1.bf16.msra.mxu1 %v1638_v20  ;;  %v1664_v40 = vld [vmem:[%s2262_s0 + $0x38] sm:$0xff]   ;;  %s1575_s8 = sshll.u32 (%p1894_p6), %s1823_s17, 3 }
  0x2b   : > { %621 = vmatprep.subr.bf16.mxu0 %v1639_v21  ;;  %1578 = vmatprep.subr.bf16.mxu1 %v1639_v21  ;;  %s2275_s7 = smov (!%p377_p11, %s1479_s7), 19  ;;  %s1265_s23 = scalar_lea.vmem (%p1894_p6), %s2266_s4, %s1575_s8 }
  0x2c   : > { %s379_s11 = scalar_lea.vmem %s2264_s2, %s2275_s7  ;;  %s384_s14 = scalar_lea.vmem %s2265_s3, %s2275_s7 }
  0x2d   : > { %v829_v44 = vld [vmem:[%s379_s11] sm:$0x3] }
  0x2e   : > { %622 = vmatpush1.bf16.msra.mxu0 %v1641_v22  ;;  %1586 = vmatpush1.bf16.msra.mxu1 %v1641_v22  ;;  %v873_v46 = vld [vmem:[%s384_s14] sm:$0x3]  ;;  %v1988_v47 = vrot.slane %v829_v44, %v833_v43  ;;  %v1990_v48 = vrot.slane %v829_v44, %v837_v45 }
  0x2f   : > { %623 = vmatprep.subr.bf16.mxu0 %v1642_v23  ;;  %1579 = vmatprep.subr.bf16.mxu1 %v1642_v23  ;;  %v1992_v49 = vrot.slane %v873_v46, %v833_v43  ;;  %v1994_v52 = vrot.slane %v873_v46, %v837_v45 }
  0x32   : > { %624 = vmatpush1.bf16.msra.mxu0 %v1644_v24  ;;  %1587 = vmatpush1.bf16.msra.mxu1 %v1644_v24 }
  0x33   : > { %625 = vmatprep.subr.bf16.mxu0 %v1645_v25  ;;  %1580 = vmatprep.subr.bf16.mxu1 %v1645_v25 }
  0x36   : > { %626 = vmatpush1.bf16.msra.mxu0 %v1647_v26  ;;  %1588 = vmatpush1.bf16.msra.mxu1 %v1647_v26 }
  0x37   : > { %627 = vmatprep.subr.bf16.mxu0 %v1648_v27  ;;  %1581 = vmatprep.subr.bf16.mxu1 %v1648_v27 }
  0x3a   : > { %628 = vmatpush1.bf16.msra.mxu0 %v1650_v28  ;;  %1589 = vmatpush1.bf16.msra.mxu1 %v1650_v28 }
  0x3b   : > { %629 = vmatprep.subr.bf16.mxu0 %v1651_v29  ;;  %1582 = vmatprep.subr.bf16.mxu1 %v1651_v29 }
  0x3e   : > { %630 = vmatpush1.bf16.msra.mxu0 %v1653_v30  ;;  %1590 = vmatpush1.bf16.msra.mxu1 %v1653_v30 }
  0x3f   : > { %631 = vmatprep.subr.bf16.mxu0 %v1654_v31  ;;  %1583 = vmatprep.subr.bf16.mxu1 %v1654_v31 }
  0x42   : > { %632 = vmatpush1.bf16.msra.mxu0 %v1656_v32  ;;  %1591 = vmatpush1.bf16.msra.mxu1 %v1656_v32 }
  0x45   : > { %650 = vmatmul.mubr.bf16.vlgmr.msra.gmra.mrb[0].mxu0 %v1657_v33  ;;  %690 = vmatmul.mubr.bf16.vlgmr.msra.gmra.mrb[0].mxu1 %v1658_v34 }
  0x46   : > { %659 = vmatprep.mubr.bf16.mxu0 %v1833_v16  ;;  %699 = vmatprep.mubr.bf16.mxu1 %v1833_v16 }
  0x4d   : > { %660 = vmatmul.mubr.bf16.gmra.mrb[4].mxu0 %v1659_v35  ;;  %700 = vmatmul.mubr.bf16.gmra.mrb[4].mxu1 %v1660_v36 }
  0x4e   : > { %669 = vmatprep.mubr.bf16.mxu0 %v1833_v16  ;;  %709 = vmatprep.mubr.bf16.mxu1 %v1833_v16 }
  0x55   : > { %670 = vmatmul.mubr.bf16.gmra.mrb[8].mxu0 %v1661_v37  ;;  %710 = vmatmul.mubr.bf16.gmra.mrb[8].mxu1 %v1662_v38 }
  0x56   : > { %679 = vmatprep.mubr.bf16.mxu0 %v1833_v16  ;;  %719 = vmatprep.mubr.bf16.mxu1 %v1833_v16 }
  0x5d   : > { %680 = vmatmul.mubr.bf16.gmra.mrb[12].mxu0 %v1663_v39  ;;  %720 = vmatmul.mubr.bf16.gmra.mrb[12].mxu1 %v1664_v40 }
 0x118   : > { %v651_v50 = vpop.f32.mrb[0].mxu0  ;;  %v691_v51 = vpop.f32.mrb[0].mxu1 }
 0x119   : > { %v841_v53 = vmul.f32 %v1988_v47, %v651_v50  ;;  %v857_v54 = vmul.f32 %v1988_v47, %v691_v51  ;;  %v653_v55 = vpop.f32.mrb[1].mxu0  ;;  %v693_v56 = vpop.f32.mrb[1].mxu1 }
 0x11a   : > { %v842_v57 = vmul.f32 %v1990_v48, %v653_v55  ;;  %v858_v58 = vmul.f32 %v1990_v48, %v693_v56  ;;  %v655_v59 = vpop.f32.mrb[2].mxu0  ;;  %v695_v60 = vpop.f32.mrb[2].mxu1 }
 0x11b   : > { %v2001_v61 = vadd.f32 %v1992_v49, %v841_v53  ;;  %v2004_v62 = vadd.f32 %v1992_v49, %v857_v54  ;;  %v843_v63 = vmul.f32 %v1988_v47, %v655_v59  ;;  %v859_v0 = vmul.f32 %v1988_v47, %v695_v60  ;;  %v657_v1 = vpop.f32.mrb[3].mxu0  ;;  %v697_v2 = vpop.f32.mrb[3].mxu1 }
 0x11c   : > { %v2009_v3 = vadd.f32 %v1994_v52, %v842_v57  ;;  %v2012_v4 = vadd.f32 %v1994_v52, %v858_v58  ;;  %v844_v5 = vmul.f32 %v1990_v48, %v657_v1  ;;  %v860_v6 = vmul.f32 %v1990_v48, %v697_v2 }
 0x11d   : > { %v1505_v7 = vmul.f32 -1.442695, %v2001_v61  ;;  %v1521_v8 = vmul.f32 -1.442695, %v2004_v62  ;;  %v2019_v9 = vadd.f32 %v1992_v49, %v843_v63  ;;  %v2022_v10 = vadd.f32 %v1992_v49, %v859_v0 }
 0x11e   : > { %v1506_v11 = vmul.f32 -1.442695, %v2009_v3  ;;  %v1522_v12 = vmul.f32 -1.442695, %v2012_v4  ;;  %v2027_v13 = vadd.f32 %v1994_v52, %v844_v5  ;;  %v2030_v14 = vadd.f32 %v1994_v52, %v860_v6 }
 0x11f   : > { %1665 = vpow2.f32 %v1505_v7  ;;  %v1507_v15 = vmul.f32 -1.442695, %v2019_v9  ;;  %v1523_v16 = vmul.f32 -1.442695, %v2022_v10 }
 0x120   : > { %1667 = vpow2.f32 %v1521_v8  ;;  %v661_v17 = vpop.f32.mrb[4].mxu0  ;;  %v701_v18 = vpop.f32.mrb[4].mxu1  ;;  %v1508_v19 = vmul.f32 -1.442695, %v2027_v13  ;;  %v1524_v24 = vmul.f32 -1.442695, %v2030_v14 }
 0x121   : > { %1669 = vpow2.f32 %v1506_v11  ;;  %v845_v20 = vmul.f32 %v1988_v47, %v661_v17  ;;  %v861_v21 = vmul.f32 %v1988_v47, %v701_v18  ;;  %v663_v22 = vpop.f32.mrb[5].mxu0  ;;  %v703_v23 = vpop.f32.mrb[5].mxu1 }
 0x122   : > { %1671 = vpow2.f32 %v1522_v12  ;;  %v846_v25 = vmul.f32 %v1990_v48, %v663_v22  ;;  %v862_v26 = vmul.f32 %v1990_v48, %v703_v23  ;;  %v665_v27 = vpop.f32.mrb[6].mxu0  ;;  %v705_v28 = vpop.f32.mrb[6].mxu1 }
 0x123   : > { %1673 = vpow2.f32 %v1507_v15  ;;  %v2041_v29 = vadd.f32 %v1992_v49, %v845_v20  ;;  %v2044_v30 = vadd.f32 %v1992_v49, %v861_v21  ;;  %v847_v31 = vmul.f32 %v1988_v47, %v665_v27  ;;  %v667_v32 = vpop.f32.mrb[7].mxu0  ;;  %v707_v33 = vpop.f32.mrb[7].mxu1 }
 0x124   : > { %1675 = vpow2.f32 %v1523_v16  ;;  %v2048_v34 = vadd.f32 %v1994_v52, %v846_v25  ;;  %v2051_v35 = vadd.f32 %v1994_v52, %v862_v26  ;;  %v863_v45 = vmul.f32 %v1988_v47, %v705_v28 }
 0x125   : > { %1677 = vpow2.f32 %v1508_v19  ;;  %v1509_v36 = vmul.f32 -1.442695, %v2041_v29  ;;  %v1525_v37 = vmul.f32 -1.442695, %v2044_v30  ;;  %v2056_v38 = vadd.f32 %v1992_v49, %v847_v31 }
 0x126   : > { %1679 = vpow2.f32 %v1524_v24  ;;  %v1510_v39 = vmul.f32 -1.442695, %v2048_v34  ;;  %v1526_v40 = vmul.f32 -1.442695, %v2051_v35  ;;  %v848_v54 = vmul.f32 %v1990_v48, %v667_v32 }
 0x127   : > { %1681 = vpow2.f32 %v1509_v36  ;;  %v1511_v41 = vmul.f32 -1.442695, %v2056_v38  ;;  %v864_v59 = vmul.f32 %v1990_v48, %v707_v33  ;;  %v2066_v7 = vadd.f32 %v1992_v49, %v863_v45 }
 0x128   : > { %1683 = vpow2.f32 %v1525_v37  ;;  %v671_v42 = vpop.f32.mrb[8].mxu0  ;;  %v711_v43 = vpop.f32.mrb[8].mxu1  ;;  %v2070_v15 = vadd.f32 %v1994_v52, %v848_v54 }
 0x129   : > { %v1666_v44 = vpop.eup %1665  ;;  %1685 = vpow2.f32 %v1510_v39  ;;  %v673_v46 = vpop.f32.mrb[9].mxu0  ;;  %v849_v1 = vmul.f32 %v1988_v47, %v671_v42  ;;  %v865_v8 = vmul.f32 %v1988_v47, %v711_v43  ;;  %v2073_v18 = vadd.f32 %v1994_v52, %v864_v59 }
 0x12a   : > { %v713_v50 = vpop.f32.mrb[9].mxu1  ;;  %v1668_v51 = vpop.eup %1667  ;;  %v1013_v53 = vadd.f32 1.0, %v1666_v44  ;;  %1687 = vpow2.f32 %v1526_v40  ;;  %v850_v19 = vmul.f32 %v1990_v48, %v673_v46  ;;  %v1527_v28 = vmul.f32 -1.442695, %v2066_v7 }
 0x12b   : > { %v675_v55 = vpop.f32.mrb[10].mxu0  ;;  %v715_v56 = vpop.f32.mrb[10].mxu1  ;;  %v1029_v58 = vadd.f32 1.0, %v1668_v51  ;;  %1689 = vpow2.f32 %v1511_v41  ;;  %v2077_v22 = vadd.f32 %v1992_v49, %v849_v1  ;;  %v866_v23 = vmul.f32 %v1990_v48, %v713_v50 }
 0x12c   : > { %v1670_v57 = vpop.eup %1669  ;;  %v677_v60 = vpop.f32.mrb[11].mxu0  ;;  %1691 = vrcp.f32 %v1013_v53  ;;  %v2082_v31 = vadd.f32 %v1992_v49, %v865_v8  ;;  %v1512_v39 = vmul.f32 -1.442695, %v2070_v15  ;;  %v851_v40 = vmul.f32 %v1988_v47, %v675_v55 }
 0x12d   : > { %v1672_v63 = vpop.eup %1671  ;;  %v1014_v0 = vadd.f32 1.0, %v1670_v57  ;;  %v717_v2 = vpop.f32.mrb[11].mxu1  ;;  %1693 = vrcp.f32 %v1029_v58  ;;  %v1528_v45 = vmul.f32 -1.442695, %v2073_v18  ;;  %v2096_v46 = vadd.f32 %v1994_v52, %v850_v19 }
 0x12e   : > { %v1674_v5 = vpop.eup %1673  ;;  %v1030_v6 = vadd.f32 1.0, %v1672_v63  ;;  %v1513_v55 = vmul.f32 -1.442695, %v2077_v22  ;;  %v2104_v57 = vadd.f32 %v1994_v52, %v866_v23  ;;  %v1529_v63 = vmul.f32 -1.442695, %v2082_v31 }
 0x12f   : > { %v1676_v11 = vpop.eup %1675  ;;  %1695 = vrcp.f32 %v1014_v0  ;;  %v1015_v12 = vadd.f32 1.0, %v1674_v5  ;;  %v867_v0 = vmul.f32 %v1988_v47, %v715_v56  ;;  %v852_v8 = vmul.f32 %v1990_v48, %v677_v60 }
 0x130   : > { %v1678_v16 = vpop.eup %1677  ;;  %1697 = vrcp.f32 %v1030_v6  ;;  %v1031_v17 = vadd.f32 1.0, %v1676_v11  ;;  %v681_v24 = vpop.f32.mrb[12].mxu0  ;;  %v2109_v6 = vadd.f32 %v1992_v49, %v851_v40  ;;  %v1530_v56 = vmul.f32 -1.442695, %v2104_v57 }
 0x131   : > { %v1680_v20 = vpop.eup %1679  ;;  %1699 = vrcp.f32 %v1015_v12  ;;  %v1016_v21 = vadd.f32 1.0, %v1678_v16  ;;  %v721_v25 = vpop.f32.mrb[12].mxu1  ;;  %v1514_v16 = vmul.f32 -1.442695, %v2096_v46  ;;  %v2120_v60 = vadd.f32 %v1992_v49, %v867_v0 }
 0x132   : > { %v1682_v26 = vpop.eup %1681  ;;  %1701 = vrcp.f32 %v1031_v17  ;;  %v1032_v27 = vadd.f32 1.0, %v1680_v20  ;;  %v2084_v32 = vpop.f32.mrb[13].mxu0  ;;  %v868_v17 = vmul.f32 %v1990_v48, %v717_v2 }
 0x133   : > { %v2086_v33 = vpop.f32.mrb[13].mxu1  ;;  %v1684_v36 = vpop.eup %1683  ;;  %1703 = vrcp.f32 %v1016_v21  ;;  %v1017_v37 = vadd.f32 1.0, %v1682_v26  ;;  %v853_v21 = vmul.f32 %v1988_v47, %v681_v24 }
 0x134   : > { %v2090_v41 = vpop.f32.mrb[14].mxu0  ;;  %v2092_v42 = vpop.f32.mrb[14].mxu1  ;;  %1705 = vrcp.f32 %v1032_v27  ;;  %v1033_v44 = vadd.f32 1.0, %v1684_v36  ;;  %v2126_v36 = vadd.f32 %v1994_v52, %v852_v8 }
 0x135   : > { %v1686_v43 = vpop.eup %1685  ;;  %v2098_v50 = vpop.f32.mrb[15].mxu0  ;;  %1707 = vrcp.f32 %v1017_v37 }
 0x136   : > { %v2100_v51 = vpop.f32.mrb[15].mxu1  ;;  %v1688_v53 = vpop.eup %1687  ;;  %v1018_v54 = vadd.f32 1.0, %v1686_v43  ;;  %1709 = vrcp.f32 %v1033_v44  ;;  %v1531_v44 = vmul.f32 -1.442695, %v2120_v60 }
 0x137   : > { %v1690_v58 = vpop.eup %1689  ;;  %v1034_v59 = vadd.f32 1.0, %v1688_v53 }
 0x138   : > { %v1692_v1 = vpop.eup %1691  ;;  %1711 = vrcp.f32 %v1018_v54  ;;  %v1019_v5 = vadd.f32 1.0, %v1690_v58  ;;  %v1516_v54 = vmul.f32 -1.442695, %v2126_v36 }
 0x139   : > { %v1694_v11 = vpop.eup %1693  ;;  %v1109_v12 = vmul.f32 %v1692_v1, %v2001_v61  ;;  %1713 = vrcp.f32 %v1034_v59  ;;  %v869_v61 = vmul.f32 %v1988_v47, %v721_v25 }
 0x13a   : > { %v1696_v19 = vpop.eup %1695  ;;  %v1125_v20 = vmul.f32 %v1694_v11, %v2004_v62  ;;  %1715 = vrcp.f32 %v1019_v5  ;;  %v1515_v62 = vmul.f32 -1.442695, %v2109_v6 }
 0x13b   : > { %v1698_v23 = vpop.eup %1697  ;;  %v1110_v26 = vmul.f32 %v1696_v19, %v2009_v3  ;;  %1717 = vpow2.f32 %v1527_v28  ;;  %v2130_v28 = vadd.f32 %v1994_v52, %v868_v17 }
 0x13c   : > { %v1700_v27 = vpop.eup %1699  ;;  %v1126_v2 = vmul.f32 %v1698_v23, %v2012_v4  ;;  %1719 = vpow2.f32 %v1512_v39  ;;  %v2134_v4 = vadd.f32 %v1992_v49, %v853_v21 }
 0x13d   : > { %v1702_v24 = vpop.eup %1701  ;;  %v1559_v37 = vpack.c.bf16 %v1110_v26, %v1109_v12  ;;  %v1111_v3 = vmul.f32 %v1700_v27, %v2019_v9  ;;  %1721 = vpow2.f32 %v1528_v45  ;;  %v2143_v45 = vadd.f32 %v1992_v49, %v869_v61 }
 0x13e   : > { %v1704_v40 = vpop.eup %1703  ;;  %v1567_v25 = vpack.c.bf16 %v1126_v2, %v1125_v20  ;;  %v1127_v43 = vmul.f32 %v1702_v24, %v2022_v10  ;;  %1723 = vpow2.f32 %v1513_v55  ;;  %v1517_v5 = vmul.f32 -1.442695, %v2134_v4 }
 0x13f   : > { %v1706_v39 = vpop.eup %1705  ;;  %1237 = vst [vmem:[%s2137_s15] sm:$0xff] %v1559_v37  ;;  %v1112_v9 = vmul.f32 %v1704_v40, %v2027_v13  ;;  %1725 = vpow2.f32 %v1529_v63  ;;  %v1532_v13 = vmul.f32 -1.442695, %v2130_v28  ;;  %v1533_v11 = vmul.f32 -1.442695, %v2143_v45 }
 0x140   : > { %v1708_v53 = vpop.eup %1707  ;;  %1245 = vst [vmem:[%s2137_s15 + $0x40] sm:$0xff] %v1567_v25  ;;  %v1128_v10 = vmul.f32 %v1706_v39, %v2030_v14  ;;  %1727 = vpow2.f32 %v1514_v16 }
 0x141   : > { %v1710_v55 = vpop.eup %1709  ;;  %v1560_v58 = vpack.c.bf16 %v1112_v9, %v1111_v3  ;;  %v1113_v59 = vmul.f32 %v1708_v53, %v2041_v29  ;;  %1729 = vpow2.f32 %v1530_v56  ;;  %v855_v3 = vmul.f32 %v1988_v47, %v2090_v41 }
 0x142   : > { %v1712_v63 = vpop.eup %1711  ;;  %v1568_v0 = vpack.c.bf16 %v1128_v10, %v1127_v43  ;;  %v1129_v1 = vmul.f32 %v1710_v55, %v2044_v30  ;;  %1731 = vpow2.f32 %v1515_v62  ;;  %v870_v62 = vmul.f32 %v1990_v48, %v2086_v33 }
 0x143   : > { %v1714_v8 = vpop.eup %1713  ;;  %1238 = vst [vmem:[%s2137_s15 + $0x8] sm:$0xff] %v1560_v58  ;;  %v1114_v14 = vmul.f32 %v1712_v63, %v2048_v34  ;;  %1733 = vpow2.f32 %v1531_v44  ;;  %v871_v43 = vmul.f32 %v1988_v47, %v2092_v42  ;;  %v856_v33 = vmul.f32 %v1990_v48, %v2098_v50 }
 0x144   : > { %v1716_v12 = vpop.eup %1715  ;;  %1246 = vst [vmem:[%s2137_s15 + $0x48] sm:$0xff] %v1568_v0  ;;  %v1130_v29 = vmul.f32 %v1714_v8, %v2051_v35  ;;  %1735 = vpow2.f32 %v1516_v54  ;;  %v854_v35 = vmul.f32 %v1990_v48, %v2084_v32  ;;  %v2173_v41 = vadd.f32 %v1994_v52, %v870_v62 }
 0x145   : > { %v1718_v16 = vpop.eup %1717  ;;  %v1561_v17 = vpack.c.bf16 %v1114_v14, %v1113_v59  ;;  %1737 = vpow2.f32 %v1532_v13  ;;  %v872_v10 = vmul.f32 %v1990_v48, %v2100_v51  ;;  %v2178_v42 = vadd.f32 %v1992_v49, %v855_v3 }
 0x146   : > { %v1720_v30 = vpop.eup %1719  ;;  %v1569_v19 = vpack.c.bf16 %v1130_v29, %v1129_v1  ;;  %v1035_v20 = vadd.f32 1.0, %v1718_v16  ;;  %1739 = vpow2.f32 %v1517_v5  ;;  %v2168_v9 = vadd.f32 %v1994_v52, %v854_v35 }
 0x147   : > { %v1722_v56 = vpop.eup %1721  ;;  %1239 = vst [vmem:[%s2137_s15 + $0x10] sm:$0xff] %v1561_v17  ;;  %v1020_v21 = vadd.f32 1.0, %v1720_v30  ;;  %1741 = vpow2.f32 %v1533_v11  ;;  %v2181_v50 = vadd.f32 %v1992_v49, %v871_v43  ;;  %v2185_v63 = vadd.f32 %v1994_v52, %v856_v33 }
 0x148   : > { %v1724_v34 = vpop.eup %1723  ;;  %1247 = vst [vmem:[%s2137_s15 + $0x50] sm:$0xff] %v1569_v19  ;;  %1743 = vrcp.f32 %v1035_v20  ;;  %v1036_v23 = vadd.f32 1.0, %v1722_v56  ;;  %v1518_v13 = vmul.f32 -1.442695, %v2168_v9  ;;  %v1115_v51 = vmul.f32 %v1716_v12, %v2056_v38 }
 0x149   : > { %v1726_v26 = vpop.eup %1725  ;;  %1745 = vrcp.f32 %v1020_v21  ;;  %v1021_v61 = vadd.f32 1.0, %v1724_v34  ;;  %v1534_v0 = vmul.f32 -1.442695, %v2173_v41  ;;  %v2190_v1 = vadd.f32 %v1994_v52, %v872_v10 }
 0x14a   : > { %v1728_v27 = vpop.eup %1727  ;;  %1747 = vrcp.f32 %v1036_v23  ;;  %v1037_v2 = vadd.f32 1.0, %v1726_v26  ;;  %v1519_v8 = vmul.f32 -1.442695, %v2178_v42  ;;  %v1535_v29 = vmul.f32 -1.442695, %v2181_v50 }
 0x14b   : > { %v1730_v24 = vpop.eup %1729  ;;  %1749 = vrcp.f32 %v1021_v61  ;;  %v1022_v37 = vadd.f32 1.0, %v1728_v27  ;;  %v1520_v12 = vmul.f32 -1.442695, %v2185_v63 }
 0x14c   : > { %v1732_v40 = vpop.eup %1731  ;;  %1751 = vrcp.f32 %v1037_v2  ;;  %v1038_v25 = vadd.f32 1.0, %v1730_v24 }
 0x14d   : > { %v1734_v39 = vpop.eup %1733  ;;  %1753 = vrcp.f32 %v1022_v37  ;;  %v1023_v32 = vadd.f32 1.0, %v1732_v40 }
 0x14e   : > { %v1736_v44 = vpop.eup %1735  ;;  %1755 = vrcp.f32 %v1038_v25  ;;  %v1039_v53 = vadd.f32 1.0, %v1734_v39 }
 0x14f   : > { %v1738_v54 = vpop.eup %1737  ;;  %1757 = vrcp.f32 %v1023_v32  ;;  %v1024_v47 = vadd.f32 1.0, %v1736_v44 }
 0x150   : > { %v1740_v55 = vpop.eup %1739  ;;  %1759 = vrcp.f32 %v1039_v53  ;;  %v1040_v58 = vadd.f32 1.0, %v1738_v54 }
 0x151   : > { %v1742_v59 = vpop.eup %1741  ;;  %1761 = vrcp.f32 %v1024_v47  ;;  %v1025_v61 = vadd.f32 1.0, %v1740_v55 }
 0x152   : > { %v1744_v48 = vpop.eup %1743  ;;  %1763 = vrcp.f32 %v1040_v58 }
 0x153   : > { %v1746_v5 = vpop.eup %1745  ;;  %v1131_v49 = vmul.f32 %v1744_v48, %v2066_v7  ;;  %1765 = vpow2.f32 %v1518_v13  ;;  %v1536_v7 = vmul.f32 -1.442695, %v2190_v1 }
 0x154   : > { %v1748_v14 = vpop.eup %1747  ;;  %v1116_v11 = vmul.f32 %v1746_v5, %v2070_v15  ;;  %1767 = vpow2.f32 %v1534_v0 }
 0x155   : > { %v1750_v16 = vpop.eup %1749  ;;  %v1132_v38 = vmul.f32 %v1748_v14, %v2073_v18  ;;  %1769 = vpow2.f32 %v1519_v8 }
 0x156   : > { %v1752_v52 = vpop.eup %1751  ;;  %v1562_v17 = vpack.c.bf16 %v1116_v11, %v1115_v51  ;;  %v1117_v30 = vmul.f32 %v1750_v16, %v2077_v22  ;;  %1771 = vpow2.f32 %v1535_v29 }
 0x157   : > { %v1754_v19 = vpop.eup %1753  ;;  %v1570_v20 = vpack.c.bf16 %v1132_v38, %v1131_v49  ;;  %v1133_v15 = vmul.f32 %v1752_v52, %v2082_v31  ;;  %1773 = vpow2.f32 %v1520_v12  ;;  %v1339_v52 = vld [vmem:[%s2137_s15 + $0x40] sm:$0xff] (%p1894_p6) }
 0x158   : > { %v1756_v56 = vpop.eup %1755  ;;  %1240 = vst [vmem:[%s2137_s15 + $0x18] sm:$0xff] %v1562_v17  ;;  %v1118_v18 = vmul.f32 %v1754_v19, %v2096_v46  ;;  %1775 = vpow2.f32 %v1536_v7  ;;  %v1041_v46 = vadd.f32 1.0, %v1742_v59  ;;  %1340 = vst [vmem:[%s1265_s23 + $0x280] sm:$0xff] (%p1894_p6), %v1339_v52  ;;  %v1341_v17 = vld [vmem:[%s2137_s15 + $0x48] sm:$0xff] (%p1894_p6) }
 0x159   : > { %v1758_v21 = vpop.eup %1757  ;;  %1248 = vst [vmem:[%s2137_s15 + $0x58] sm:$0xff] %v1570_v20  ;;  %v1134_v34 = vmul.f32 %v1756_v56, %v2104_v57  ;;  %1777 = vrcp.f32 %v1025_v61  ;;  %1342 = vst [vmem:[%s1265_s23 + $0x2d0] sm:$0xff] (%p1894_p6), %v1341_v17 }
 0x15a   : > { %v1760_v22 = vpop.eup %1759  ;;  %v1563_v23 = vpack.c.bf16 %v1118_v18, %v1117_v30  ;;  %v1119_v26 = vmul.f32 %v1758_v21, %v2109_v6  ;;  %1779 = vrcp.f32 %v1041_v46  ;;  %v1343_v30 = vld [vmem:[%s2137_s15 + $0x50] sm:$0xff] (%p1894_p6) }
 0x15b   : > { %v1762_v31 = vpop.eup %1761  ;;  %v1571_v35 = vpack.c.bf16 %v1134_v34, %v1133_v15  ;;  %v1135_v27 = vmul.f32 %v1760_v22, %v2120_v60  ;;  %1344 = vst [vmem:[%s1265_s23 + $0x320] sm:$0xff] (%p1894_p6), %v1343_v30 }
 0x15c   : > { %v1764_v2 = vpop.eup %1763  ;;  %1241 = vst [vmem:[%s2137_s15 + $0x20] sm:$0xff] %v1563_v23  ;;  %v1120_v62 = vmul.f32 %v1762_v31, %v2126_v36 }
 0x15d   : > { %1249 = vst [vmem:[%s2137_s15 + $0x60] sm:$0xff] %v1571_v35  ;;  %v1136_v57 = vmul.f32 %v1764_v2, %v2130_v28  ;;  %v1766_v37 = vpop.eup %1765 }
 0x15e   : > { %v1564_v24 = vpack.c.bf16 %v1120_v62, %v1119_v26  ;;  %v1768_v3 = vpop.eup %1767  ;;  %v1026_v40 = vadd.f32 1.0, %v1766_v37 }
 0x15f   : > { %v1572_v6 = vpack.c.bf16 %v1136_v57, %v1135_v27  ;;  %v1770_v25 = vpop.eup %1769  ;;  %v1042_v60 = vadd.f32 1.0, %v1768_v3 }
 0x160   : > { %1242 = vst [vmem:[%s2137_s15 + $0x28] sm:$0xff] %v1564_v24  ;;  %v1772_v43 = vpop.eup %1771  ;;  %1781 = vrcp.f32 %v1026_v40  ;;  %v1027_v39 = vadd.f32 1.0, %v1770_v25  ;;  %v1345_v7 = vld [vmem:[%s2137_s15 + $0x58] sm:$0xff] (%p1894_p6) }
 0x161   : > { %1250 = vst [vmem:[%s2137_s15 + $0x68] sm:$0xff] %v1572_v6  ;;  %v1774_v32 = vpop.eup %1773  ;;  %1783 = vrcp.f32 %v1042_v60  ;;  %v1043_v36 = vadd.f32 1.0, %v1772_v43  ;;  %1346 = vst [vmem:[%s1265_s23 + $0x370] sm:$0xff] (%p1894_p6), %v1345_v7 }
 0x162   : > { %v1776_v33 = vpop.eup %1775  ;;  %1785 = vrcp.f32 %v1027_v39  ;;  %v1028_v28 = vadd.f32 1.0, %v1774_v32 }
 0x163   : > { %1787 = vrcp.f32 %v1043_v36  ;;  %v1044_v44 = vadd.f32 1.0, %v1776_v33  ;;  %v1778_v53 = vpop.eup %1777 }
 0x164   : > { %1789 = vrcp.f32 %v1028_v28  ;;  %v1780_v10 = vpop.eup %1779  ;;  %v1121_v54 = vmul.f32 %v1778_v53, %v2134_v4  ;;  %v1347_v19 = vld [vmem:[%s2137_s15 + $0x60] sm:$0xff] (%p1894_p6) }
 0x165   : > { %1791 = vrcp.f32 %v1044_v44  ;;  %v1137_v55 = vmul.f32 %v1780_v10, %v2143_v45  ;;  %1348 = vst [vmem:[%s1265_s23 + $0x3c0] sm:$0xff] (%p1894_p6), %v1347_v19 }
 0x167   : > { %v1333_v16 = vld [vmem:[%s2137_s15 + $0x28] sm:$0xff] (%p1894_p6) }
 0x168   : > { %1334 = vst [vmem:[%s1265_s23 + $0x190] sm:$0xff] (%p1894_p6), %v1333_v16  ;;  %v1349_v20 = vld [vmem:[%s2137_s15 + $0x68] sm:$0xff] (%p1894_p6) }
 0x169   : > { %1350 = vst [vmem:[%s1265_s23 + $0x410] sm:$0xff] (%p1894_p6), %v1349_v20 }
 0x16a   : > { %v1782_v47 = vpop.eup %1781 }
 0x16b   : > { %v1784_v58 = vpop.eup %1783  ;;  %v1122_v59 = vmul.f32 %v1782_v47, %v2168_v9 }
 0x16c   : > { %v1786_v13 = vpop.eup %1785  ;;  %v1138_v48 = vmul.f32 %v1784_v58, %v2173_v41  ;;  %v1323_v41 = vld [vmem:[%s2137_s15] sm:$0xff] (%p1894_p6) }
 0x16d   : > { %v1788_v51 = vpop.eup %1787  ;;  %v1565_v0 = vpack.c.bf16 %v1122_v59, %v1121_v54  ;;  %v1123_v5 = vmul.f32 %v1786_v13, %v2178_v42  ;;  %v1325_v42 = vld [vmem:[%s2137_s15 + $0x8] sm:$0xff] (%p1894_p6)  ;;  %1324 = vst [vmem:[%s1265_s23] sm:$0xff] (%p1894_p6), %v1323_v41 }
 0x16e   : > { %v1790_v49 = vpop.eup %1789  ;;  %v1573_v8 = vpack.c.bf16 %v1138_v48, %v1137_v55  ;;  %v1139_v4 = vmul.f32 %v1788_v51, %v2181_v50  ;;  %1259 = sbr.rel (!%p1894_p6) target bundleno = 381 (0x17d), region = 86  ;;  %v1327_v50 = vld [vmem:[%s2137_s15 + $0x10] sm:$0xff] (%p1894_p6)  ;;  %1326 = vst [vmem:[%s1265_s23 + $0x50] sm:$0xff] (%p1894_p6), %v1325_v42 }
 0x16f   : > { %v1792_v14 = vpop.eup %1791  ;;  %1243 = vst [vmem:[%s2137_s15 + $0x30] sm:$0xff] %v1565_v0  ;;  %v1124_v45 = vmul.f32 %v1790_v49, %v2185_v63  ;;  %v1329_v63 = vld [vmem:[%s2137_s15 + $0x18] sm:$0xff] (%p1894_p6)  ;;  %1328 = vst [vmem:[%s1265_s23 + $0xa0] sm:$0xff] (%p1894_p6), %v1327_v50 }
 0x170   : > { %1251 = vst [vmem:[%s2137_s15 + $0x70] sm:$0xff] %v1573_v8  ;;  %v1140_v9 = vmul.f32 %v1792_v14, %v2190_v1  ;;  %v1331_v1 = vld [vmem:[%s2137_s15 + $0x20] sm:$0xff] (%p1894_p6)  ;;  %1330 = vst [vmem:[%s1265_s23 + $0xf0] sm:$0xff] (%p1894_p6), %v1329_v63 }
 0x171   : > { %v1566_v11 = vpack.c.bf16 %v1124_v45, %v1123_v5  ;;  %1332 = vst [vmem:[%s1265_s23 + $0x140] sm:$0xff] (%p1894_p6), %v1331_v1 }
 0x172   : > { %v1574_v29 = vpack.c.bf16 %v1140_v9, %v1139_v4 }
 0x173   : > { %1244 = vst [vmem:[%s2137_s15 + $0x38] sm:$0xff] %v1566_v11 }
 0x174   : > { %1252 = vst [vmem:[%s2137_s15 + $0x78] sm:$0xff] %v1574_v29 }
 0x176   : > { %v1335_v38 = vld [vmem:[%s2137_s15 + $0x30] sm:$0xff] }
 0x177   : > { %1336 = vst [vmem:[%s1265_s23 + $0x1e0] sm:$0xff] %v1335_v38  ;;  %v1351_v15 = vld [vmem:[%s2137_s15 + $0x70] sm:$0xff] }
 0x178   : > { %1352 = vst [vmem:[%s1265_s23 + $0x460] sm:$0xff] %v1351_v15 }
 0x17a   : > { %v1337_v12 = vld [vmem:[%s2137_s15 + $0x38] sm:$0xff] }
 0x17b   : > { %1338 = vst [vmem:[%s1265_s23 + $0x230] sm:$0xff] %v1337_v12  ;;  %v1353_v56 = vld [vmem:[%s2137_s15 + $0x78] sm:$0xff] }
 0x17c   : > { %1354 = vst [vmem:[%s1265_s23 + $0x4b0] sm:$0xff] %v1353_v56 }
 0x17d PF: > { %s14_s19 = sadd.s32 1, %s1831_s19   ;;  %s2268_s15 = smov %s1819_s16 }
 0x17e   : > { %p11_p12 = scmp.ge.s32.totalorder %s14_s19, 12   ;;  %s2269_s16 = smov %s1899_s25 }
 0x17f   : > { %s2270_s17 = smov %s1827_s18  ;;  %s2271_s18 = smov %s2273_s20 }
 0x180   :  { %13 = sbr.rel (!%p11_p12) target bundleno = 3 (0x3), region = 164 }

// kernel: cnn_efficientnet_forward.20
= control target key start
LH: loop header
LB: loop body
LE: loop exit
PB: predicated region body
PF: predicated region fallthrough
CT: control target
= control target key end

     0   :  { %s879_s6 = smov 0   ;;  %s1670_s0 = inlined_call_operand.vmem [shape: bf16[2,64,2560], index: 0, kind: input, shape index: {}]   ;;  %s1671_s1 = inlined_call_operand.vmem [shape: f32[2,1,2560], index: 1, kind: output, shape index: {}]  }
   0x1 LB: > { %s841_s7 = sadd.s32 4294967295, %s866_s6   ;;  %p845_p0 = scmp.ge.s32.totalorder %s866_s6, 1  ;;  %s866_s6 = sphi %s879_s6, %s11_s6  }
   0x2   : > { %p87_p1 = scmp.lt.s32.totalorder %s866_s6, 3 }
   0x4   : > { %p88_p2 = pnand %p845_p0, %p87_p1 }
   0x6   : > { %91 = sbr.rel (%p88_p2) target bundleno = 174 (0xae), region = 24 }
   0xd   : > { %p106_p3 = scmp.lt.s32.totalorder %s841_s7, 1  ;;  %v1672_v0 = vlaneseq  ;;  %v868_v1 = vmov 1966171168  }
   0xe   : > { %v661_v2 = vunpack.c.l.s4 %v868_v1 }
   0xf   : > { %s1962_s7 = smov (!%p106_p3, %s841_s7), 1  ;;  %v664_v4 = vshrl.u32 %v1672_v0, 7 }
  0x10   : > { %v662_v3 = vunpack.c.0.s8 %v661_v2  ;;  %s849_s8 = smul.u32 640, %s1962_s7 }
  0x11   : > { %s850_s12 = smul.u32 20, %s1962_s7 }
  0x12   : > { %s894_s11 = scalar_lea.vmem %s1670_s0, %s849_s8  ;;  %v905_v8 = vsub.s32 %v662_v3, %v664_v4 }
  0x13   : > { %v897_v5 = vld [vmem:[%s894_s11] sm:$0xff]  ;;  %v900_v6 = vld [vmem:[%s894_s11 + $0x8] sm:$0xff]  ;;  %v903_v7 = vld [vmem:[%s894_s11 + $0x10] sm:$0xff]  ;;  %s1652_s15 = scalar_lea.vmem %s1671_s1, %s850_s12 }
  0x14   : > { %1736 = vst [vmem:[#allocation2_spill] sm:$0xff] %v905_v8  ;;  %v908_v9 = vld [vmem:[%s894_s11 + $0x18] sm:$0xff]  ;;  %v911_v10 = vld [vmem:[%s894_s11 + $0x20] sm:$0xff]  ;;  %v914_v11 = vld [vmem:[%s894_s11 + $0x28] sm:$0xff] }
  0x15   : > { %v921_v16 = vld [vmem:[%s894_s11 + $0x30] sm:$0xff]  ;;  %v924_v17 = vld [vmem:[%s894_s11 + $0x38] sm:$0xff]  ;;  %v927_v18 = vld [vmem:[%s894_s11 + $0x40] sm:$0xff] }
  0x16   : > { %1737 = vst [vmem:[#allocation3_spill] sm:$0xff] %v927_v18  ;;  %v934_v23 = vld [vmem:[%s894_s11 + $0x48] sm:$0xff]  ;;  %v937_v24 = vld [vmem:[%s894_s11 + $0x50] sm:$0xff]  ;;  %v940_v25 = vld [vmem:[%s894_s11 + $0x58] sm:$0xff] }
  0x17   : > { %1738 = vst [vmem:[#allocation4_spill] sm:$0xff] %v934_v23  ;;  %v947_v30 = vld [vmem:[%s894_s11 + $0x60] sm:$0xff]  ;;  %v950_v31 = vld [vmem:[%s894_s11 + $0x68] sm:$0xff]  ;;  %v957_v36 = vld [vmem:[%s894_s11 + $0x70] sm:$0xff] }
  0x18   : > { %v960_v37 = vld [vmem:[%s894_s11 + $0x78] sm:$0xff]  ;;  %v967_v42 = vld [vmem:[%s894_s11 + $0x80] sm:$0xff]  ;;  %v970_v43 = vld [vmem:[%s894_s11 + $0x88] sm:$0xff] }
  0x19   : > { %v977_v48 = vld [vmem:[%s894_s11 + $0x90] sm:$0xff]  ;;  %v980_v49 = vld [vmem:[%s894_s11 + $0x98] sm:$0xff]  ;;  %v987_v54 = vld [vmem:[%s894_s11 + $0xa0] sm:$0xff] }
  0x1a   : > { %1739 = vst [vmem:[#allocation5_spill] sm:$0xff] %v977_v48  ;;  %1740 = vst [vmem:[#allocation6_spill] sm:$0xff] %v980_v49  ;;  %v990_v55 = vld [vmem:[%s894_s11 + $0xa8] sm:$0xff]  ;;  %v997_v60 = vld [vmem:[%s894_s11 + $0xb0] sm:$0xff]  ;;  %v1773_v48 = vunpack.c.l.bf16 %v940_v25 }
  0x1b   : > { %v1000_v61 = vld [vmem:[%s894_s11 + $0xb8] sm:$0xff]  ;;  %v1007_v3 = vld [vmem:[%s894_s11 + $0xc0] sm:$0xff]  ;;  %v1010_v4 = vld [vmem:[%s894_s11 + $0xc8] sm:$0xff] }
  0x1c   : > { %v1017_v38 = vld [vmem:[%s894_s11 + $0xd0] sm:$0xff]  ;;  %v1020_v35 = vld [vmem:[%s894_s11 + $0xd8] sm:$0xff]  ;;  %v1027_v41 = vld [vmem:[%s894_s11 + $0xe0] sm:$0xff] }
  0x1d   : > { %1741 = vst [vmem:[#allocation7_spill] sm:$0xff] %v1027_v41  ;;  %v1030_v63 = vld [vmem:[%s894_s11 + $0xe8] sm:$0xff]  ;;  %v1037_v32 = vld [vmem:[%s894_s11 + $0xf0] sm:$0xff]  ;;  %v1040_v59 = vld [vmem:[%s894_s11 + $0xf8] sm:$0xff] }
  0x1e   : > { %1742 = vst [vmem:[#allocation8_spill] sm:$0xff] %v1030_v63  ;;  %v1047_v27 = vld [vmem:[%s894_s11 + $0x100] sm:$0xff]  ;;  %v1050_v56 = vld [vmem:[%s894_s11 + $0x108] sm:$0xff]  ;;  %v1057_v58 = vld [vmem:[%s894_s11 + $0x110] sm:$0xff] }
  0x1f   : > { %v1060_v40 = vld [vmem:[%s894_s11 + $0x118] sm:$0xff]  ;;  %v1067_v62 = vld [vmem:[%s894_s11 + $0x120] sm:$0xff]  ;;  %v1070_v34 = vld [vmem:[%s894_s11 + $0x128] sm:$0xff] }
  0x20   : > { %v1077_v28 = vld [vmem:[%s894_s11 + $0x130] sm:$0xff]  ;;  %v1080_v1 = vld [vmem:[%s894_s11 + $0x138] sm:$0xff]  ;;  %v1087_v29 = vld [vmem:[%s894_s11 + $0x140] sm:$0xff] }
  0x21   : > { %1743 = vst [vmem:[#allocation9_spill] sm:$0xff] %v1077_v28  ;;  %1744 = vst [vmem:[#allocation10_spill] sm:$0xff] %v1080_v1  ;;  %v1090_v53 = vld [vmem:[%s894_s11 + $0x148] sm:$0xff]  ;;  %v1097_v26 = vld [vmem:[%s894_s11 + $0x150] sm:$0xff] }
  0x22   : > { %v1100_v52 = vld [vmem:[%s894_s11 + $0x158] sm:$0xff]  ;;  %v1107_v57 = vld [vmem:[%s894_s11 + $0x160] sm:$0xff]  ;;  %v1110_v51 = vld [vmem:[%s894_s11 + $0x168] sm:$0xff] }
  0x23   : > { %1745 = vst [vmem:[#allocation11_spill] sm:$0xff] %v1107_v57  ;;  %1746 = vst [vmem:[#allocation12_spill] sm:$0xff] %v1110_v51  ;;  %v1117_v33 = vld [vmem:[%s894_s11 + $0x170] sm:$0xff]  ;;  %v1120_v50 = vld [vmem:[%s894_s11 + $0x178] sm:$0xff]  ;;  %v1771_v57 = vunpack.c.h.bf16 %v937_v24 }
  0x24   : > { %1747 = vst [vmem:[#allocation13_spill] sm:$0xff] %v1117_v33  ;;  %1748 = vst [vmem:[#allocation14_spill] sm:$0xff] %v1120_v50  ;;  %v1127_v39 = vld [vmem:[%s894_s11 + $0x180] sm:$0xff]  ;;  %v1130_v47 = vld [vmem:[%s894_s11 + $0x188] sm:$0xff] }
  0x25   : > { %1749 = vst [vmem:[#allocation15_spill] sm:$0xff] %v1127_v39  ;;  %1750 = vst [vmem:[#allocation16_spill] sm:$0xff] %v1130_v47  ;;  %v1137_v0 = vld [vmem:[%s894_s11 + $0x190] sm:$0xff]  ;;  %v1140_v46 = vld [vmem:[%s894_s11 + $0x198] sm:$0xff] }
  0x26   : > { %v1147_v2 = vld [vmem:[%s894_s11 + $0x1a0] sm:$0xff]  ;;  %v1150_v45 = vld [vmem:[%s894_s11 + $0x1a8] sm:$0xff]  ;;  %v1157_v22 = vld [vmem:[%s894_s11 + $0x1b0] sm:$0xff] }
  0x27   : > { %1751 = vst [vmem:[#allocation17_spill] sm:$0xff] %v1157_v22  ;;  %v1160_v44 = vld [vmem:[%s894_s11 + $0x1b8] sm:$0xff]  ;;  %v1167_v21 = vld [vmem:[%s894_s11 + $0x1c0] sm:$0xff]  ;;  %v1170_v8 = vld [vmem:[%s894_s11 + $0x1c8] sm:$0xff] }
  0x28   : > { %1752 = vst [vmem:[#allocation18_spill] sm:$0xff] %v1160_v44  ;;  %1753 = vst [vmem:[#allocation19_spill] sm:$0xff] %v1167_v21  ;;  %v1177_v20 = vld [vmem:[%s894_s11 + $0x1d0] sm:$0xff]  ;;  %v1180_v39 = vld [vmem:[%s894_s11 + $0x1d8] sm:$0xff] }
  0x29   : > { %1754 = vst [vmem:[#allocation20_spill] sm:$0xff] %v1170_v8  ;;  %1755 = vst [vmem:[#allocation21_spill] sm:$0xff] %v1177_v20  ;;  %v1187_v19 = vld [vmem:[%s894_s11 + $0x1e0] sm:$0xff]  ;;  %v1190_v28 = vld [vmem:[%s894_s11 + $0x1e8] sm:$0xff]  ;;  %v1775_v8 = vunpack.c.h.bf16 %v940_v25  ;;  %v1783_v25 = vunpack.c.h.bf16 %v950_v31 }
  0x2a   : > { %1756 = vst [vmem:[#allocation22_spill] sm:$0xff] %v1180_v39  ;;  %v1197_v15 = vld [vmem:[%s894_s11 + $0x1f0] sm:$0xff]  ;;  %v1200_v41 = vld [vmem:[%s894_s11 + $0x1f8] sm:$0xff]  ;;  %v1207_v14 = vld [vmem:[%s894_s11 + $0x200] sm:$0xff]  ;;  %v1772_v39 = vunpack.c.l.bf16 %v900_v6 }
  0x2b   : > { %1757 = vst [vmem:[#allocation23_spill] sm:$0xff] %v1207_v14  ;;  %v1210_v23 = vld [vmem:[%s894_s11 + $0x208] sm:$0xff]  ;;  %v1217_v13 = vld [vmem:[%s894_s11 + $0x210] sm:$0xff]  ;;  %v1220_v18 = vld [vmem:[%s894_s11 + $0x218] sm:$0xff] }
  0x2c   : > { %1758 = vst [vmem:[#allocation24_spill] sm:$0xff] %v1210_v23  ;;  %1759 = vst [vmem:[#allocation25_spill] sm:$0xff] %v1217_v13  ;;  %v1227_v12 = vld [vmem:[%s894_s11 + $0x220] sm:$0xff]  ;;  %v1230_v20 = vld [vmem:[%s894_s11 + $0x228] sm:$0xff]  ;;  %v1769_v13 = vunpack.c.l.bf16 %v937_v24  ;;  %v1780_v24 = vunpack.c.l.bf16 %v908_v9 }
  0x2d   : > { %1760 = vst [vmem:[#allocation26_spill] sm:$0xff] %v1220_v18  ;;  %1761 = vst [vmem:[#allocation27_spill] sm:$0xff] %v1227_v12  ;;  %v1237_v1 = vld [vmem:[%s894_s11 + $0x230] sm:$0xff]  ;;  %v1240_v21 = vld [vmem:[%s894_s11 + $0x238] sm:$0xff]  ;;  %v1768_v18 = vunpack.c.l.bf16 %v897_v5  ;;  %v1770_v12 = vunpack.c.h.bf16 %v897_v5  ;;  %v1778_v5 = vunpack.c.h.bf16 %v903_v7 }
  0x2e   : > { %1762 = vst [vmem:[#allocation28_spill] sm:$0xff] %v1230_v20  ;;  %v1247_v47 = vld [vmem:[%s894_s11 + $0x240] sm:$0xff]  ;;  %v1250_v22 = vld [vmem:[%s894_s11 + $0x248] sm:$0xff]  ;;  %v1257_v63 = vld [vmem:[%s894_s11 + $0x250] sm:$0xff]  ;;  %v1774_v20 = vunpack.c.h.bf16 %v900_v6  ;;  %v1782_v6 = vunpack.c.h.bf16 %v908_v9  ;;  %v1789_v9 = vunpack.c.h.bf16 %v997_v60 }
  0x2f   : > { %v1260_v14 = vld [vmem:[%s894_s11 + $0x258] sm:$0xff]  ;;  %v1267_v33 = vld [vmem:[%s894_s11 + $0x260] sm:$0xff]  ;;  %v1270_v49 = vld [vmem:[%s894_s11 + $0x268] sm:$0xff]  ;;  %v368_v23 = vadd.f32 %v1771_v57, %v1770_v12  ;;  %v1781_v57 = vunpack.c.l.bf16 %v950_v31  ;;  %v1790_v31 = vunpack.c.l.bf16 %v1000_v61 }
  0x30   : > { %1763 = vst [vmem:[#allocation29_spill] sm:$0xff] %v1260_v14  ;;  %1764 = vst [vmem:[#allocation30_spill] sm:$0xff] %v1267_v33  ;;  %v1277_v51 = vld [vmem:[%s894_s11 + $0x270] sm:$0xff]  ;;  %v1280_v44 = vld [vmem:[%s894_s11 + $0x278] sm:$0xff]  ;;  %v355_v14 = vadd.f32 %v1769_v13, %v1768_v18  ;;  %v394_v50 = vadd.f32 %v1775_v8, %v1774_v20  ;;  %v1779_v18 = vunpack.c.h.bf16 %v947_v30  ;;  %v446_v8 = vadd.f32 %v1783_v25, %v1782_v6 }
  0x31   : > { %1765 = vst [vmem:[#allocation31_spill] sm:$0xff] %v1270_v49  ;;  %1766 = vst [vmem:[#allocation32_spill] sm:$0xff] %v1277_v51  ;;  %v381_v49 = vadd.f32 %v1773_v48, %v1772_v39  ;;  %v1777_v51 = vunpack.c.l.bf16 %v947_v30  ;;  %v433_v39 = vadd.f32 %v1781_v57, %v1780_v24  ;;  %v1784_v20 = vunpack.c.l.bf16 %v987_v54 }
  0x32   : > { %1767 = vst [vmem:[#allocation33_spill] sm:$0xff] %v1280_v44  ;;  %v1776_v44 = vunpack.c.l.bf16 %v903_v7  ;;  %v420_v12 = vadd.f32 %v1779_v18, %v1778_v5  ;;  %v1786_v7 = vunpack.c.l.bf16 %v990_v55  ;;  %v1787_v5 = vunpack.c.h.bf16 %v990_v55 }
  0x33   : > { %v356_v48 = vadd.f32 %v355_v14, %v1784_v20  ;;  %v1788_v33 = vunpack.c.l.bf16 %v997_v60  ;;  %v434_v6 = vadd.f32 %v433_v39, %v1790_v31  ;;  %v1791_v14 = vunpack.c.h.bf16 %v1000_v61 }
  0x34   : > { %v407_v13 = vadd.f32 %v1777_v51, %v1776_v44  ;;  %v1785_v44 = vunpack.c.h.bf16 %v987_v54  ;;  %v382_v30 = vadd.f32 %v381_v49, %v1786_v7  ;;  %v395_v18 = vadd.f32 %v394_v50, %v1787_v5 }
  0x35   : > { %v421_v57 = vadd.f32 %v420_v12, %v1789_v9  ;;  %v447_v25 = vadd.f32 %v446_v8, %v1791_v14  ;;  %v1793_v49 = vunpack.c.h.bf16 %v1037_v32  ;;  %v1794_v50 = vunpack.c.l.bf16 %v1040_v59 }
  0x36   : > { %v369_v51 = vadd.f32 %v368_v23, %v1785_v44  ;;  %v408_v24 = vadd.f32 %v407_v13, %v1788_v33  ;;  %v1792_v23 = vunpack.c.l.bf16 %v1037_v32  ;;  %v1795_v33 = vunpack.c.h.bf16 %v1040_v59 }
  0x37   : > { %v383_v55 = vadd.f32 %v382_v30, %v1794_v50  ;;  %v1796_v60 = vunpack.c.l.bf16 %v1047_v27  ;;  %v1797_v39 = vunpack.c.h.bf16 %v1047_v27  ;;  %v1798_v61 = vunpack.c.l.bf16 %v1050_v56 }
  0x38   : > { %v357_v54 = vadd.f32 %v356_v48, %v1792_v23  ;;  %v370_v20 = vadd.f32 %v369_v51, %v1793_v49  ;;  %v396_v13 = vadd.f32 %v395_v18, %v1795_v33  ;;  %v1799_v48 = vunpack.c.h.bf16 %v1050_v56 }
  0x39   : > { %v409_v12 = vadd.f32 %v408_v24, %v1796_v60  ;;  %v422_v44 = vadd.f32 %v421_v57, %v1797_v39  ;;  %v435_v8 = vadd.f32 %v434_v6, %v1798_v61  ;;  %v1800_v32 = vunpack.c.l.bf16 %v1087_v29 }
  0x3a   : > { %v448_v7 = vadd.f32 %v447_v25, %v1799_v48  ;;  %v1801_v30 = vunpack.c.h.bf16 %v1087_v29  ;;  %v1802_v59 = vunpack.c.l.bf16 %v1090_v53  ;;  %v1803_v24 = vunpack.c.h.bf16 %v1090_v53 }
  0x3b   : > { %v358_v51 = vadd.f32 %v357_v54, %v1800_v32  ;;  %v1804_v27 = vunpack.c.l.bf16 %v1097_v26  ;;  %v1805_v31 = vunpack.c.h.bf16 %v1097_v26  ;;  %v1806_v56 = vunpack.c.l.bf16 %v1100_v52 }
  0x3c   : > { %v371_v5 = vadd.f32 %v370_v20, %v1801_v30  ;;  %v384_v18 = vadd.f32 %v383_v55, %v1802_v59  ;;  %v397_v9 = vadd.f32 %v396_v13, %v1803_v24  ;;  %v1807_v25 = vunpack.c.h.bf16 %v1100_v52 }
  0x3d   : > { %v410_v57 = vadd.f32 %v409_v12, %v1804_v27  ;;  %v423_v6 = vadd.f32 %v422_v44, %v1805_v31  ;;  %v436_v14 = vadd.f32 %v435_v8, %v1806_v56  ;;  %v1808_v29 = vunpack.c.l.bf16 %v1137_v0 }
  0x3e   : > { %v449_v23 = vadd.f32 %v448_v7, %v1807_v25  ;;  %v1809_v49 = vunpack.c.h.bf16 %v1137_v0  ;;  %v1810_v53 = vunpack.c.l.bf16 %v1140_v46  ;;  %v1811_v55 = vunpack.c.h.bf16 %v1140_v46 }
  0x3f   : > { %v359_v54 = vadd.f32 %v358_v51, %v1808_v29  ;;  %v1812_v26 = vunpack.c.l.bf16 %v1147_v2  ;;  %v1813_v60 = vunpack.c.h.bf16 %v1147_v2  ;;  %v1814_v52 = vunpack.c.l.bf16 %v1150_v45 }
  0x40   : > { %v372_v20 = vadd.f32 %v371_v5, %v1809_v49  ;;  %v385_v50 = vadd.f32 %v384_v18, %v1810_v53  ;;  %v398_v33 = vadd.f32 %v397_v9, %v1811_v55  ;;  %v1815_v44 = vunpack.c.h.bf16 %v1150_v45 }
  0x41   : > { %v411_v13 = vadd.f32 %v410_v57, %v1812_v26  ;;  %v424_v12 = vadd.f32 %v423_v6, %v1813_v60  ;;  %v437_v39 = vadd.f32 %v436_v14, %v1814_v52  ;;  %v1816_v0 = vunpack.c.l.bf16 %v1187_v19 }
  0x42   : > { %v450_v61 = vadd.f32 %v449_v23, %v1815_v44  ;;  %v1817_v48 = vunpack.c.h.bf16 %v1187_v19  ;;  %v1818_v46 = vunpack.c.l.bf16 %v1190_v28  ;;  %v1819_v51 = vunpack.c.h.bf16 %v1190_v28 }
  0x43   : > { %v360_v8 = vadd.f32 %v359_v54, %v1816_v0  ;;  %v1820_v2 = vunpack.c.l.bf16 %v1197_v15  ;;  %v1821_v59 = vunpack.c.h.bf16 %v1197_v15  ;;  %v1822_v45 = vunpack.c.l.bf16 %v1200_v41 }
  0x44   : > { %v373_v7 = vadd.f32 %v372_v20, %v1817_v48  ;;  %v386_v32 = vadd.f32 %v385_v50, %v1818_v46  ;;  %v399_v30 = vadd.f32 %v398_v33, %v1819_v51  ;;  %v1823_v9 = vunpack.c.h.bf16 %v1200_v41 }
  0x45   : > { %v412_v5 = vadd.f32 %v411_v13, %v1820_v2  ;;  %v425_v18 = vadd.f32 %v424_v12, %v1821_v59  ;;  %v438_v24 = vadd.f32 %v437_v39, %v1822_v45  ;;  %v1824_v19 = vunpack.c.l.bf16 %v1237_v1 }
  0x46   : > { %v451_v27 = vadd.f32 %v450_v61, %v1823_v9  ;;  %v1825_v31 = vunpack.c.h.bf16 %v1237_v1  ;;  %v1826_v28 = vunpack.c.l.bf16 %v1240_v21  ;;  %v1827_v14 = vunpack.c.h.bf16 %v1240_v21 }
  0x47   : > { %v361_v57 = vadd.f32 %v360_v8, %v1824_v19  ;;  %v1828_v15 = vunpack.c.l.bf16 %v1247_v47  ;;  %v1829_v29 = vunpack.c.h.bf16 %v1247_v47  ;;  %v1830_v41 = vunpack.c.l.bf16 %v1250_v22 }
  0x48   : > { %v374_v6 = vadd.f32 %v373_v7, %v1825_v31  ;;  %v387_v56 = vadd.f32 %v386_v32, %v1826_v28  ;;  %v400_v25 = vadd.f32 %v399_v30, %v1827_v14  ;;  %v1831_v20 = vunpack.c.h.bf16 %v1250_v22 }
  0x49   : > { %v413_v23 = vadd.f32 %v412_v5, %v1828_v15  ;;  %v426_v54 = vadd.f32 %v425_v18, %v1829_v29  ;;  %v439_v49 = vadd.f32 %v438_v24, %v1830_v41  ;;  %v362_v1 = vrot.slane %v361_v57, 4 }
  0x4a   : > { %v452_v53 = vadd.f32 %v451_v27, %v1831_v20  ;;  %v375_v50 = vrot.slane %v374_v6, 4  ;;  %v388_v55 = vrot.slane %v387_v56, 4  ;;  %v401_v33 = vrot.slane %v400_v25, 4 }
  0x4b   : > { %v414_v26 = vrot.slane %v413_v23, 4  ;;  %v427_v13 = vrot.slane %v426_v54, 4  ;;  %v440_v21 = vrot.slane %v439_v49, 4  ;;  %v363_v12 = vadd.f32 %v362_v1, %v361_v57 }
  0x4c   : > { %v453_v60 = vrot.slane %v452_v53, 4  ;;  %v376_v52 = vadd.f32 %v375_v50, %v374_v6  ;;  %v389_v39 = vadd.f32 %v388_v55, %v387_v56  ;;  %v402_v44 = vadd.f32 %v401_v33, %v400_v25 }
  0x4d   : > { %v415_v47 = vadd.f32 %v414_v26, %v413_v23  ;;  %v428_v61 = vadd.f32 %v427_v13, %v426_v54  ;;  %v441_v0 = vadd.f32 %v440_v21, %v439_v49  ;;  %v364_v48 = vrot.slane %v363_v12, 2 }
  0x4e   : > { %v454_v8 = vadd.f32 %v453_v60, %v452_v53  ;;  %v377_v7 = vrot.slane %v376_v52, 2  ;;  %v390_v22 = vrot.slane %v389_v39, 2  ;;  %v403_v46 = vrot.slane %v402_v44, 2 }
  0x4f   : > { %v416_v32 = vrot.slane %v415_v47, 2  ;;  %v429_v51 = vrot.slane %v428_v61, 2  ;;  %v442_v30 = vrot.slane %v441_v0, 2  ;;  %v365_v5 = vadd.f32 %v364_v48, %v363_v12 }
  0x50   : > { %v455_v2 = vrot.slane %v454_v8, 2  ;;  %v378_v59 = vadd.f32 %v377_v7, %v376_v52  ;;  %v391_v18 = vadd.f32 %v390_v22, %v389_v39  ;;  %v404_v45 = vadd.f32 %v403_v46, %v402_v44 }
  0x51   : > { %v417_v24 = vadd.f32 %v416_v32, %v415_v47  ;;  %v430_v9 = vadd.f32 %v429_v51, %v428_v61  ;;  %v443_v27 = vadd.f32 %v442_v30, %v441_v0  ;;  %v366_v57 = vrot.slane %v365_v5, 1 }
  0x52   : > { %v456_v19 = vadd.f32 %v455_v2, %v454_v8  ;;  %v379_v31 = vrot.slane %v378_v59, 1  ;;  %v392_v6 = vrot.slane %v391_v18, 1  ;;  %v405_v28 = vrot.slane %v404_v45, 1 }
  0x53   : > { %v418_v56 = vrot.slane %v417_v24, 1  ;;  %v431_v14 = vrot.slane %v430_v9, 1  ;;  %v444_v25 = vrot.slane %v443_v27, 1  ;;  %v1426_v23 = vadd.f32 %v366_v57, %v365_v5 }
  0x54   : > { %v457_v15 = vrot.slane %v456_v19, 1  ;;  %v1428_v29 = vadd.f32 %v379_v31, %v378_v59  ;;  %v1430_v54 = vadd.f32 %v392_v6, %v391_v18  ;;  %v1432_v41 = vadd.f32 %v405_v28, %v404_v45 }
  0x55   : > { %v1434_v49 = vadd.f32 %v418_v56, %v417_v24  ;;  %v1436_v20 = vadd.f32 %v431_v14, %v430_v9  ;;  %v1438_v53 = vadd.f32 %v444_v25, %v443_v27  ;;  %v1832_v50 = vunpack.c.l.bf16 %v911_v10 }
  0x56   : > { %v1440_v1 = vadd.f32 %v457_v15, %v456_v19  ;;  %v1833_v55 = vunpack.c.l.bf16 %v957_v36  ;;  %v1834_v26 = vunpack.c.h.bf16 %v911_v10  ;;  %v1835_v13 = vunpack.c.h.bf16 %v957_v36 }
  0x57   : > { %v1836_v60 = vunpack.c.l.bf16 %v914_v11  ;;  %v1837_v12 = vunpack.c.l.bf16 %v960_v37  ;;  %v1838_v39 = vunpack.c.h.bf16 %v914_v11  ;;  %v1839_v44 = vunpack.c.h.bf16 %v960_v37 }
  0x58   : > { %v459_v33 = vadd.f32 %v1833_v55, %v1832_v50  ;;  %v472_v21 = vadd.f32 %v1835_v13, %v1834_v26  ;;  %v1840_v61 = vunpack.c.l.bf16 %v921_v16  ;;  %v1841_v0 = vunpack.c.l.bf16 %v967_v42 }
  0x59   : > { %v485_v52 = vadd.f32 %v1837_v12, %v1836_v60  ;;  %v498_v47 = vadd.f32 %v1839_v44, %v1838_v39  ;;  %v1842_v10 = vunpack.c.h.bf16 %v921_v16  ;;  %v1843_v36 = vunpack.c.h.bf16 %v967_v42 }
  0x5a   : > { %v511_v8 = vadd.f32 %v1841_v0, %v1840_v61  ;;  %v1844_v7 = vunpack.c.l.bf16 %v924_v17  ;;  %v1845_v22 = vunpack.c.l.bf16 %v970_v43  ;;  %v1846_v11 = vunpack.c.h.bf16 %v924_v17 }
  0x5b   : > { %v524_v48 = vadd.f32 %v1843_v36, %v1842_v10  ;;  %v1847_v37 = vunpack.c.h.bf16 %v970_v43  ;;  %v1848_v51 = vunpack.c.l.bf16 %v1007_v3  ;;  %v1849_v2 = vunpack.c.h.bf16 %v1007_v3 }
  0x5c   : > { %v537_v46 = vadd.f32 %v1845_v22, %v1844_v7  ;;  %v1850_v16 = vunpack.c.l.bf16 %v1010_v4  ;;  %v1851_v59 = vunpack.c.h.bf16 %v1010_v4  ;;  %v1852_v45 = vunpack.c.l.bf16 %v1017_v38 }
  0x5d   : > { %v550_v32 = vadd.f32 %v1847_v37, %v1846_v11  ;;  %v460_v30 = vadd.f32 %v459_v33, %v1848_v51  ;;  %v473_v5 = vadd.f32 %v472_v21, %v1849_v2  ;;  %v1853_v17 = vunpack.c.h.bf16 %v1017_v38  ;;  %v1876_v11 = vld [vmem:[#allocation17_spill] sm:$0xff]  ;;  %v1879_v2 = vld [vmem:[#allocation18_spill] sm:$0xff] }
  0x5e   : > { %v486_v42 = vadd.f32 %v485_v52, %v1850_v16  ;;  %v499_v18 = vadd.f32 %v498_v47, %v1851_v59  ;;  %v512_v24 = vadd.f32 %v511_v8, %v1852_v45  ;;  %v1854_v43 = vunpack.c.l.bf16 %v1020_v35 }
  0x5f   : > { %v525_v9 = vadd.f32 %v524_v48, %v1853_v17  ;;  %v1855_v19 = vunpack.c.h.bf16 %v1020_v35  ;;  %v1856_v3 = vunpack.c.l.bf16 %v1057_v58  ;;  %v1857_v6 = vunpack.c.h.bf16 %v1057_v58  ;;  %v1864_v58 = vld [vmem:[#allocation11_spill] sm:$0xff] }
  0x60   : > { %v538_v27 = vadd.f32 %v537_v46, %v1854_v43  ;;  %v1858_v4 = vunpack.c.l.bf16 %v1060_v40  ;;  %v1859_v14 = vunpack.c.h.bf16 %v1060_v40  ;;  %v1860_v38 = vunpack.c.l.bf16 %v1067_v62  ;;  %v1867_v40 = vld [vmem:[#allocation12_spill] sm:$0xff] }
  0x61   : > { %v551_v57 = vadd.f32 %v550_v32, %v1855_v19  ;;  %v461_v31 = vadd.f32 %v460_v30, %v1856_v3  ;;  %v474_v28 = vadd.f32 %v473_v5, %v1857_v6  ;;  %v1861_v50 = vunpack.c.h.bf16 %v1067_v62  ;;  %v1870_v62 = vld [vmem:[#allocation13_spill] sm:$0xff]  ;;  %v1885_v43 = vld [vmem:[#allocation20_spill] sm:$0xff] }
  0x62   : > { %v487_v56 = vadd.f32 %v486_v42, %v1858_v4  ;;  %v500_v25 = vadd.f32 %v499_v18, %v1859_v14  ;;  %v513_v15 = vadd.f32 %v512_v24, %v1860_v38  ;;  %v1862_v35 = vunpack.c.l.bf16 %v1070_v34  ;;  %v1882_v18 = vld [vmem:[#allocation19_spill] sm:$0xff]  ;;  %v1891_v14 = vld [vmem:[#allocation24_spill] sm:$0xff] }
  0x63   : > { %v526_v55 = vadd.f32 %v525_v9, %v1861_v50  ;;  %v1863_v26 = vunpack.c.h.bf16 %v1070_v34  ;;  %v1865_v21 = vunpack.c.l.bf16 %v1864_v58  ;;  %v1866_v12 = vunpack.c.h.bf16 %v1864_v58  ;;  %v1873_v34 = vld [vmem:[#allocation14_spill] sm:$0xff] }
  0x64   : > { %v539_v33 = vadd.f32 %v538_v27, %v1862_v35  ;;  %v1868_v39 = vunpack.c.l.bf16 %v1867_v40  ;;  %v1869_v47 = vunpack.c.h.bf16 %v1867_v40  ;;  %v1871_v0 = vunpack.c.l.bf16 %v1870_v62  ;;  %v1897_v58 = vld [vmem:[#allocation26_spill] sm:$0xff] }
  0x65   : > { %v552_v13 = vadd.f32 %v551_v57, %v1863_v26  ;;  %v462_v60 = vadd.f32 %v461_v31, %v1865_v21  ;;  %v475_v52 = vadd.f32 %v474_v28, %v1866_v12  ;;  %v1872_v10 = vunpack.c.h.bf16 %v1870_v62  ;;  %v1888_v31 = vld [vmem:[#allocation23_spill] sm:$0xff] }
  0x66   : > { %v488_v44 = vadd.f32 %v487_v56, %v1868_v39  ;;  %v501_v61 = vadd.f32 %v500_v25, %v1869_v47  ;;  %v514_v8 = vadd.f32 %v513_v15, %v1871_v0  ;;  %v1874_v48 = vunpack.c.l.bf16 %v1873_v34 }
  0x67   : > { %v527_v36 = vadd.f32 %v526_v55, %v1872_v10  ;;  %v1875_v22 = vunpack.c.h.bf16 %v1873_v34  ;;  %v1877_v37 = vunpack.c.l.bf16 %v1876_v11  ;;  %v1878_v51 = vunpack.c.h.bf16 %v1876_v11  ;;  %v1894_v55 = vld [vmem:[#allocation25_spill] sm:$0xff] }
  0x68   : > { %v540_v7 = vadd.f32 %v539_v33, %v1874_v48  ;;  %v1880_v5 = vunpack.c.l.bf16 %v1879_v2  ;;  %v1881_v42 = vunpack.c.h.bf16 %v1879_v2  ;;  %v1883_v45 = vunpack.c.l.bf16 %v1882_v18 }
  0x69   : > { %v553_v46 = vadd.f32 %v552_v13, %v1875_v22  ;;  %v463_v32 = vadd.f32 %v462_v60, %v1877_v37  ;;  %v476_v30 = vadd.f32 %v475_v52, %v1878_v51  ;;  %v1884_v17 = vunpack.c.h.bf16 %v1882_v18 }
  0x6a   : > { %v489_v16 = vadd.f32 %v488_v44, %v1880_v5  ;;  %v502_v59 = vadd.f32 %v501_v61, %v1881_v42  ;;  %v515_v24 = vadd.f32 %v514_v8, %v1883_v45  ;;  %v1886_v27 = vunpack.c.l.bf16 %v1885_v43  ;;  %v1902_v61 = vld [vmem:[#allocation29_spill] sm:$0xff] }
  0x6b   : > { %v528_v9 = vadd.f32 %v527_v36, %v1884_v17  ;;  %v1887_v57 = vunpack.c.h.bf16 %v1885_v43  ;;  %v1889_v6 = vunpack.c.l.bf16 %v1888_v31  ;;  %v1890_v4 = vunpack.c.h.bf16 %v1888_v31  ;;  %v1905_v36 = vld [vmem:[#allocation30_spill] sm:$0xff] }
  0x6c   : > { %v541_v19 = vadd.f32 %v540_v7, %v1886_v27  ;;  %v1892_v25 = vunpack.c.l.bf16 %v1891_v14  ;;  %v1893_v15 = vunpack.c.h.bf16 %v1891_v14  ;;  %v1895_v35 = vunpack.c.l.bf16 %v1894_v55 }
  0x6d   : > { %v554_v3 = vadd.f32 %v553_v46, %v1887_v57  ;;  %v464_v28 = vadd.f32 %v463_v32, %v1889_v6  ;;  %v477_v56 = vadd.f32 %v476_v30, %v1890_v4  ;;  %v1896_v26 = vunpack.c.h.bf16 %v1894_v55  ;;  %v1908_v46 = vld [vmem:[#allocation31_spill] sm:$0xff] }
  0x6e   : > { %v490_v38 = vadd.f32 %v489_v16, %v1892_v25  ;;  %v503_v50 = vadd.f32 %v502_v59, %v1893_v15  ;;  %v516_v33 = vadd.f32 %v515_v24, %v1895_v35  ;;  %v1898_v21 = vunpack.c.l.bf16 %v1897_v58 }
  0x6f   : > { %v529_v13 = vadd.f32 %v528_v9, %v1896_v26  ;;  %v1899_v12 = vunpack.c.h.bf16 %v1897_v58  ;;  %v1900_v40 = vunpack.c.l.bf16 %v1257_v63  ;;  %v1901_v44 = vunpack.c.h.bf16 %v1257_v63 }
  0x70   : > { %v542_v60 = vadd.f32 %v541_v19, %v1898_v21  ;;  %v1903_v62 = vunpack.c.l.bf16 %v1902_v61  ;;  %v1904_v8 = vunpack.c.h.bf16 %v1902_v61  ;;  %v1906_v34 = vunpack.c.l.bf16 %v1905_v36 }
  0x71   : > { %v555_v52 = vadd.f32 %v554_v3, %v1899_v12  ;;  %v465_v39 = vadd.f32 %v464_v28, %v1900_v40  ;;  %v478_v47 = vadd.f32 %v477_v56, %v1901_v44  ;;  %v1907_v7 = vunpack.c.h.bf16 %v1905_v36 }
  0x72   : > { %v491_v0 = vadd.f32 %v490_v38, %v1903_v62  ;;  %v504_v10 = vadd.f32 %v503_v50, %v1904_v8  ;;  %v517_v48 = vadd.f32 %v516_v33, %v1906_v34  ;;  %v1909_v11 = vunpack.c.l.bf16 %v1908_v46 }
  0x73   : > { %v530_v22 = vadd.f32 %v529_v13, %v1907_v7  ;;  %v1910_v32 = vunpack.c.h.bf16 %v1908_v46  ;;  %v466_v63 = vrot.slane %v465_v39, 4  ;;  %v479_v30 = vrot.slane %v478_v47, 4 }
  0x74   : > { %v543_v37 = vadd.f32 %v542_v60, %v1909_v11  ;;  %v492_v2 = vrot.slane %v491_v0, 4  ;;  %v505_v5 = vrot.slane %v504_v10, 4  ;;  %v518_v16 = vrot.slane %v517_v48, 4 }
  0x75   : > { %v556_v51 = vadd.f32 %v555_v52, %v1910_v32  ;;  %v531_v42 = vrot.slane %v530_v22, 4  ;;  %v467_v45 = vadd.f32 %v466_v63, %v465_v39  ;;  %v480_v24 = vadd.f32 %v479_v30, %v478_v47  ;;  %v1917_v63 = vld [vmem:[#allocation4_spill] sm:$0xff] }
  0x76   : > { %v544_v59 = vrot.slane %v543_v37, 4  ;;  %v493_v17 = vadd.f32 %v492_v2, %v491_v0  ;;  %v506_v9 = vadd.f32 %v505_v5, %v504_v10  ;;  %v519_v43 = vadd.f32 %v518_v16, %v517_v48  ;;  %v1911_v48 = vld [vmem:[#allocation3_spill] sm:$0xff]  ;;  %v1919_v2 = vld [vmem:[#allocation6_spill] sm:$0xff] }
  0x77   : > { %v557_v18 = vrot.slane %v556_v51, 4  ;;  %v532_v27 = vadd.f32 %v531_v42, %v530_v22  ;;  %v468_v3 = vrot.slane %v467_v45, 2  ;;  %v481_v31 = vrot.slane %v480_v24, 2  ;;  %v1913_v22 = vld [vmem:[#allocation5_spill] sm:$0xff] }
  0x78   : > { %v545_v19 = vadd.f32 %v544_v59, %v543_v37  ;;  %v494_v6 = vrot.slane %v493_v17, 2  ;;  %v507_v28 = vrot.slane %v506_v9, 2  ;;  %v520_v4 = vrot.slane %v519_v43, 2 }
  0x79   : > { %v558_v57 = vadd.f32 %v557_v18, %v556_v51  ;;  %v533_v56 = vrot.slane %v532_v27, 2  ;;  %v469_v38 = vadd.f32 %v468_v3, %v467_v45  ;;  %v482_v15 = vadd.f32 %v481_v31, %v480_v24  ;;  %v1926_v31 = vld [vmem:[#allocation8_spill] sm:$0xff] }
  0x7a   : > { %v546_v14 = vrot.slane %v545_v19, 2  ;;  %v495_v50 = vadd.f32 %v494_v6, %v493_v17  ;;  %v508_v55 = vadd.f32 %v507_v28, %v506_v9  ;;  %v521_v35 = vadd.f32 %v520_v4, %v519_v43  ;;  %v1923_v43 = vld [vmem:[#allocation7_spill] sm:$0xff] }
  0x7b   : > { %v559_v25 = vrot.slane %v558_v57, 2  ;;  %v534_v33 = vadd.f32 %v533_v56, %v532_v27  ;;  %v470_v58 = vrot.slane %v469_v38, 1  ;;  %v483_v21 = vrot.slane %v482_v15, 1 }
  0x7c   : > { %v547_v26 = vadd.f32 %v546_v14, %v545_v19  ;;  %v496_v60 = vrot.slane %v495_v50, 1  ;;  %v509_v12 = vrot.slane %v508_v55, 1  ;;  %v522_v52 = vrot.slane %v521_v35, 1  ;;  %v1929_v14 = vld [vmem:[#allocation9_spill] sm:$0xff] }
  0x7d   : > { %v560_v13 = vadd.f32 %v559_v25, %v558_v57  ;;  %v535_v40 = vrot.slane %v534_v33, 1  ;;  %v471_v47 = vadd.f32 %v470_v58, %v469_v38  ;;  %v484_v61 = vadd.f32 %v483_v21, %v482_v15 }
  0x7e   : > { %v548_v39 = vrot.slane %v547_v26, 1  ;;  %v497_v62 = vadd.f32 %v496_v60, %v495_v50  ;;  %v510_v0 = vadd.f32 %v509_v12, %v508_v55  ;;  %v523_v8 = vadd.f32 %v522_v52, %v521_v35  ;;  %v1932_v55 = vld [vmem:[#allocation10_spill] sm:$0xff]  ;;  %v1935_v60 = vld [vmem:[#allocation15_spill] sm:$0xff] }
  0x7f   : > { %v561_v44 = vrot.slane %v560_v13, 1  ;;  %v536_v10 = vadd.f32 %v535_v40, %v534_v33  ;;  %v1912_v7 = vunpack.c.l.bf16 %v1911_v48  ;;  %v1914_v46 = vunpack.c.l.bf16 %v1913_v22  ;;  %v1938_v40 = vld [vmem:[#allocation16_spill] sm:$0xff] }
  0x80   : > { %v549_v36 = vadd.f32 %v548_v39, %v547_v26  ;;  %v1915_v37 = vunpack.c.h.bf16 %v1911_v48  ;;  %v1916_v32 = vunpack.c.h.bf16 %v1913_v22  ;;  %v1918_v30 = vunpack.c.l.bf16 %v1917_v63 }
  0x81   : > { %v562_v34 = vadd.f32 %v561_v44, %v560_v13  ;;  %v563_v11 = vadd.f32 %v1914_v46, %v1912_v7  ;;  %v1920_v5 = vunpack.c.l.bf16 %v1919_v2  ;;  %v1921_v42 = vunpack.c.h.bf16 %v1917_v63 }
  0x82   : > { %v576_v51 = vadd.f32 %v1916_v32, %v1915_v37  ;;  %v1922_v59 = vunpack.c.h.bf16 %v1919_v2  ;;  %v616_v45 = vmul.f32 0.015625, %v1426_v23  ;;  %v617_v24 = vmul.f32 0.015625, %v1428_v29 }
  0x83   : > { %v589_v16 = vadd.f32 %v1920_v5, %v1918_v30  ;;  %v618_v17 = vmul.f32 0.015625, %v1430_v54  ;;  %v619_v9 = vmul.f32 0.015625, %v1432_v41  ;;  %v1924_v27 = vunpack.c.l.bf16 %v1923_v43 }
  0x84   : > { %v602_v18 = vadd.f32 %v1922_v59, %v1921_v42  ;;  %v1925_v57 = vunpack.c.h.bf16 %v1923_v43  ;;  %v1927_v6 = vunpack.c.l.bf16 %v1926_v31  ;;  %v1928_v4 = vunpack.c.h.bf16 %v1926_v31 }
  0x85   : > { %v564_v19 = vadd.f32 %v563_v11, %v1924_v27  ;;  %v620_v23 = vmul.f32 0.015625, %v1434_v49  ;;  %v621_v29 = vmul.f32 0.015625, %v1436_v20  ;;  %v622_v54 = vmul.f32 0.015625, %v1438_v53  ;;  %v1950_v27 = vld [vmem:[#allocation28_spill] sm:$0xff] }
  0x86   : > { %v577_v3 = vadd.f32 %v576_v51, %v1925_v57  ;;  %v590_v28 = vadd.f32 %v589_v16, %v1927_v6  ;;  %v603_v56 = vadd.f32 %v602_v18, %v1928_v4  ;;  %v623_v41 = vmul.f32 0.015625, %v1440_v1  ;;  %v1944_v51 = vld [vmem:[#allocation22_spill] sm:$0xff] }
  0x87   : > { %v1930_v25 = vunpack.c.l.bf16 %v1929_v14  ;;  %v1931_v15 = vunpack.c.h.bf16 %v1929_v14  ;;  %v1933_v35 = vunpack.c.l.bf16 %v1932_v55  ;;  %v1934_v26 = vunpack.c.h.bf16 %v1932_v55  ;;  %v1953_v6 = vld [vmem:[#allocation2_spill] sm:$0xff] }
  0x88   : > { %v624_v58 = vmul.f32 0.015625, %v471_v47  ;;  %v625_v49 = vmul.f32 0.015625, %v484_v61  ;;  %v626_v21 = vmul.f32 0.015625, %v497_v62  ;;  %v627_v20 = vmul.f32 0.015625, %v510_v0  ;;  %v1941_v47 = vld [vmem:[#allocation21_spill] sm:$0xff] }
  0x89   : > { %v565_v38 = vadd.f32 %v564_v19, %v1930_v25  ;;  %v578_v50 = vadd.f32 %v577_v3, %v1931_v15  ;;  %v591_v33 = vadd.f32 %v590_v28, %v1933_v35  ;;  %v604_v13 = vadd.f32 %v603_v56, %v1934_v26 }
  0x8a   : > { %v1936_v53 = vunpack.c.l.bf16 %v1935_v60  ;;  %v1937_v1 = vunpack.c.h.bf16 %v1935_v60  ;;  %v1939_v39 = vunpack.c.l.bf16 %v1938_v40  ;;  %v1940_v48 = vunpack.c.h.bf16 %v1938_v40 }
  0x8b   : > { %v628_v22 = vmul.f32 0.015625, %v523_v8  ;;  %v629_v46 = vmul.f32 0.015625, %v536_v10  ;;  %v630_v11 = vmul.f32 0.015625, %v549_v36  ;;  %v631_v37 = vmul.f32 0.015625, %v562_v34  ;;  %v1947_v10 = vld [vmem:[#allocation27_spill] sm:$0xff] }
  0x8c   : > { %v566_v12 = vadd.f32 %v565_v38, %v1936_v53  ;;  %v579_v52 = vadd.f32 %v578_v50, %v1937_v1  ;;  %v592_v44 = vadd.f32 %v591_v33, %v1939_v39  ;;  %v605_v7 = vadd.f32 %v604_v13, %v1940_v48 }
  0x8d   : > { %v1942_v61 = vunpack.c.l.bf16 %v1941_v47  ;;  %v1943_v0 = vunpack.c.h.bf16 %v1941_v47  ;;  %v1945_v63 = vunpack.c.l.bf16 %v1944_v51  ;;  %v1946_v2 = vunpack.c.h.bf16 %v1944_v51 }
  0x8e   : > { %v656_v16 = vcombine.low %v616_v45, %v617_v24  ;;  %v657_v42 = vcombine.low %v618_v17, %v619_v9  ;;  %v658_v59 = vcombine.low %v620_v23, %v621_v29  ;;  %v659_v8 = vcombine.low %v622_v54, %v623_v41  ;;  %v1954_v17 = vld [vmem:[#allocation32_spill] sm:$0xff]  ;;  %v1957_v54 = vld [vmem:[#allocation33_spill] sm:$0xff] }
  0x8f   : > { %v567_v62 = vadd.f32 %v566_v12, %v1942_v61  ;;  %v580_v32 = vadd.f32 %v579_v52, %v1943_v0  ;;  %v593_v30 = vadd.f32 %v592_v44, %v1945_v63  ;;  %v606_v5 = vadd.f32 %v605_v7, %v1946_v2 }
  0x90   : > { %v1948_v36 = vunpack.c.l.bf16 %v1947_v10  ;;  %v1949_v18 = vunpack.c.h.bf16 %v1947_v10  ;;  %v1951_v19 = vunpack.c.l.bf16 %v1950_v27  ;;  %v1952_v3 = vunpack.c.h.bf16 %v1950_v27 }
  0x91   : > { %v666_v28 = vrot.slane %v656_v16, %v1953_v6  ;;  %v673_v4 = vrot.slane %v657_v42, %v1953_v6  ;;  %v680_v45 = vrot.slane %v658_v59, %v1953_v6  ;;  %v687_v24 = vrot.slane %v659_v8, %v1953_v6 }
  0x92   : > { %v568_v34 = vadd.f32 %v567_v62, %v1948_v36  ;;  %v581_v43 = vadd.f32 %v580_v32, %v1949_v18  ;;  %v594_v57 = vadd.f32 %v593_v30, %v1951_v19  ;;  %v607_v31 = vadd.f32 %v606_v5, %v1952_v3 }
  0x93   : > { %v1955_v9 = vunpack.c.l.bf16 %v1954_v17  ;;  %v1956_v23 = vunpack.c.h.bf16 %v1954_v17  ;;  %v1958_v41 = vunpack.c.l.bf16 %v1957_v54  ;;  %v1959_v25 = vunpack.c.h.bf16 %v1957_v54 }
  0x94   : > { %v688_v15 = vcombine.low %v666_v28, %v673_v4  ;;  %v689_v50 = vcombine.low %v680_v45, %v687_v24  ;;  %v705_v55 = vcombine.low %v624_v58, %v625_v49  ;;  %v706_v35 = vcombine.low %v626_v21, %v627_v20 }
  0x95   : > { %v569_v56 = vadd.f32 %v568_v34, %v1955_v9  ;;  %v582_v29 = vadd.f32 %v581_v43, %v1956_v23  ;;  %v595_v14 = vadd.f32 %v594_v57, %v1958_v41  ;;  %v608_v38 = vadd.f32 %v607_v31, %v1959_v25 }
  0x96   : > { %v696_v53 = vrot.slane %v688_v15, %v1953_v6  ;;  %v703_v12 = vrot.slane %v689_v50, %v1953_v6  ;;  %v707_v1 = vcombine.low %v628_v22, %v629_v46  ;;  %v708_v52 = vcombine.low %v630_v11, %v631_v37 }
  0x97   : > { %v570_v33 = vrot.slane %v569_v56, 4  ;;  %v583_v26 = vrot.slane %v582_v29, 4  ;;  %v596_v13 = vrot.slane %v595_v14, 4  ;;  %v609_v60 = vrot.slane %v608_v38, 4 }
  0x98   : > { %v704_v21 = vcombine.low %v696_v53, %v703_v12  ;;  %v715_v20 = vrot.slane %v705_v55, %v1953_v6  ;;  %v722_v44 = vrot.slane %v706_v35, %v1953_v6  ;;  %v729_v48 = vrot.slane %v707_v1, %v1953_v6 }
  0x99   : > { %v571_v40 = vadd.f32 %v570_v33, %v569_v56  ;;  %v584_v39 = vadd.f32 %v583_v26, %v582_v29  ;;  %v597_v58 = vadd.f32 %v596_v13, %v595_v14  ;;  %v610_v49 = vadd.f32 %v609_v60, %v608_v38 }
  0x9a   : > { %v736_v37 = vrot.slane %v708_v52, %v1953_v6  ;;  %v737_v47 = vcombine.low %v715_v20, %v722_v44  ;;  %781 = vst [vmem:[%s1652_s15] sm:$0xff] %v704_v21  ;;  %v1960_v45 = vlaneseq }
  0x9b   : > { %v572_v7 = vrot.slane %v571_v40, 2  ;;  %v585_v22 = vrot.slane %v584_v39, 2  ;;  %v598_v46 = vrot.slane %v597_v58, 2  ;;  %v611_v11 = vrot.slane %v610_v49, 2 }
  0x9c   : > { %v738_v51 = vcombine.low %v729_v48, %v736_v37  ;;  %v745_v63 = vrot.slane %v737_v47, %v1953_v6  ;;  %vm785_vm0 = vcmp.lt.s32.totalorder %v1960_v45, 512 }
  0x9d   : > { %v573_v61 = vadd.f32 %v572_v7, %v571_v40  ;;  %v586_v62 = vadd.f32 %v585_v22, %v584_v39  ;;  %v599_v0 = vadd.f32 %v598_v46, %v597_v58  ;;  %v612_v32 = vadd.f32 %v611_v11, %v610_v49 }
  0x9e   : > { %v752_v42 = vrot.slane %v738_v51, %v1953_v6 }
  0x9f   : > { %v574_v30 = vrot.slane %v573_v61, 1  ;;  %v587_v2 = vrot.slane %v586_v62, 1  ;;  %v600_v5 = vrot.slane %v599_v0, 1  ;;  %v613_v16 = vrot.slane %v612_v32, 1 }
  0xa0   : > { %v753_v34 = vcombine.low %v745_v63, %v752_v42 }
  0xa1   : > { %v575_v59 = vadd.f32 %v574_v30, %v573_v61  ;;  %v588_v8 = vadd.f32 %v587_v2, %v586_v62  ;;  %v601_v10 = vadd.f32 %v600_v5, %v599_v0  ;;  %v614_v36 = vadd.f32 %v613_v16, %v612_v32 }
  0xa2   : > { %782 = vst [vmem:[%s1652_s15 + $0x8] sm:$0xff] %v753_v34 }
  0xa3   : > { %v632_v18 = vmul.f32 0.015625, %v575_v59  ;;  %v633_v43 = vmul.f32 0.015625, %v588_v8  ;;  %v634_v27 = vmul.f32 0.015625, %v601_v10  ;;  %v635_v19 = vmul.f32 0.015625, %v614_v36 }
  0xa5   : > { %v754_v57 = vcombine.low %v632_v18, %v633_v43  ;;  %v755_v3 = vcombine.low %v634_v27, %v635_v19 }
  0xa7   : > { %v762_v31 = vrot.slane %v754_v57, %v1953_v6  ;;  %v769_v28 = vrot.slane %v755_v3, %v1953_v6 }
  0xa9   : > { %v770_v4 = vcombine.low %v762_v31, %v769_v28 }
  0xab   : > { %v777_v24 = vrot.slane %v770_v4, %v1953_v6 }
  0xad   : > { %787 = vst.msk [vmem:[%s1652_s15 + $0x10] sm:$0xf] %vm785_vm0, %v777_v24 }
  0xae PF: > { %s11_s6 = sadd.s32 1, %s866_s6  }
  0xaf   : > { %p8_p4 = scmp.ge.s32.totalorder %s11_s6, 4  }
  0xb1   :  { %10 = sbr.rel (!%p8_p4) target bundleno = 1 (0x1), region = 54 }

// kernel: cnn_efficientnet_forward.21
= control target key start
LH: loop header
LB: loop body
LE: loop exit
PB: predicated region body
PF: predicated region fallthrough
CT: control target
= control target key end

     0   :  { %9 = vsyncpa [#allocation4], 0  ;;  %s1028_s15 = smov 0   ;;  %s1030_s16 = smov 0   ;;  %s1144_s0 = inlined_call_operand.vmem [shape: bf16[2,2560], index: 0, kind: input, shape index: {}]   ;;  %s1145_s1 = inlined_call_operand.vmem [shape: bf16[2560,128], index: 1, kind: input, shape index: {}]   ;;  %s1146_s2 = inlined_call_operand.vmem [shape: f32[1,128], index: 2, kind: input, shape index: {}]   ;;  %s1147_s3 = inlined_call_operand.vmem [shape: f32[1,128], index: 3, kind: input, shape index: {}]   ;;  %s1148_s4 = inlined_call_operand.hbm [shape: f32[2,128], index: 4, kind: output, shape index: {}]  }
   0x1   :  { %s1032_s17 = smov 0  }
   0x2 LB: > { %s787_s18 = sadd.s32 4294967295, %s998_s17   ;;  %s27_s19 = sadd.s32 1, %s994_s16  ;;  %s998_s17 = sphi %s1032_s17, %s15_s17   ;;  %s994_s16 = sphi %s1030_s16, %s1151_s16   ;;  %s990_s15 = sphi %s1028_s15, %s1150_s15  }
   0x3   : > { %p28_p0 = scmp.ge.s32.totalorder %s27_s19, 5  ;;  %p792_p1 = scmp.ge.s32.totalorder %s998_s17, 1 }
   0x4   : > { %p222_p2 = scmp.lt.s32.totalorder %s998_s17, 6 }
   0x5   : > { %s1153_s19 = smov (%p28_p0, %s27_s19), 0 }
   0x6   : > { %p223_p3 = pnand %p792_p1, %p222_p2 }
   0x7   : > { %s793_s20 = sshll.u32 (!%p223_p3), %s990_s15, 2  ;;  %s794_s21 = sshll.u32 (!%p223_p3), %s990_s15, 6 }
   0x8   : > { %226 = sbr.rel (%p223_p3) target bundleno = 316 (0x13c), region = 36  ;;  %p263_p4 = scmp.lt.s32.totalorder (!%p223_p3), %s793_s20, 19 }
   0x9   : > { %p270_p5 = scmp.lt.s32.totalorder (!%p223_p3), %s794_s21, 319  ;;  %p796_p6 = scmp.ne.s32.totalorder (!%p223_p3), %s990_s15, 0 }
   0xf   : > { %s1155_s20 = smov (!%p263_p4, %s793_s20), 19  ;;  %s1157_s21 = smov (!%p270_p5, %s794_s21), 319 }
  0x10   : > { %s267_s24 = scalar_lea.vmem %s1144_s0, %s1155_s20  ;;  %s795_s25 = sshll.u32 %s1157_s21, 2  ;;  %v1000_v0 = vmov (!%p796_p6), 0.0  }
  0x11   : > { %s1060_s28 = scalar_lea.vmem %s1145_s1, %s795_s25  ;;  %288 = sbr.rel (%p796_p6) target bundleno = 24 (0x18), region = 40  ;;  %289 = vst [vmem:[#allocation2] sm:$0x3] (!%p796_p6), %v1000_v0 }
  0x18 PF: > { %v914_v1 = vld [vmem:[%s1060_s28 + $0x40] sm:$0xff]   ;;  %v918_v5 = vld [vmem:[%s1060_s28 + $0x48] sm:$0xff]   ;;  %v922_v9 = vld [vmem:[%s1060_s28 + $0x50] sm:$0xff]   ;;  %v368_v31 = vlaneseq  ;;  %v1001_v35 = vmov 1966171168   ;;  %p830_p7 = scmp.ne.s32.totalorder %s990_s15, 4 }
  0x19   : > { %v915_v2 = vld [vmem:[%s1060_s28 + $0xc0] sm:$0xff]   ;;  %837 = vmatprep.subr.bf16.mxu0 %v914_v1  ;;  %v919_v6 = vld [vmem:[%s1060_s28 + $0xc8] sm:$0xff]   ;;  %v923_v10 = vld [vmem:[%s1060_s28 + $0xd0] sm:$0xff]   ;;  %v366_v36 = vunpack.c.l.s4 %v1001_v35 }
  0x1a   : > { %v916_v3 = vld [vmem:[%s1060_s28] sm:$0xff]   ;;  %859 = vmatprep.subr.bf16.mxu1 %v915_v2  ;;  %v920_v7 = vld [vmem:[%s1060_s28 + $0x8] sm:$0xff]   ;;  %v924_v11 = vld [vmem:[%s1060_s28 + $0x10] sm:$0xff]   ;;  %v369_v37 = vshrl.u32 %v368_v31, 7 }
  0x1b   : > { %v917_v4 = vld [vmem:[%s1060_s28 + $0x80] sm:$0xff]   ;;  %838 = vmatpush3.bf16.msra.mxu0 %v916_v3  ;;  %v921_v8 = vld [vmem:[%s1060_s28 + $0x88] sm:$0xff]   ;;  %v925_v12 = vld [vmem:[%s1060_s28 + $0x90] sm:$0xff]   ;;  %v367_v39 = vunpack.c.0.s8 %v366_v36 }
  0x1c   : > { %860 = vmatpush3.bf16.msra.mxu1 %v917_v4  ;;  %839 = vmatprep.subr.bf16.mxu0 %v918_v5  ;;  %v926_v13 = vld [vmem:[%s1060_s28 + $0x58] sm:$0xff]   ;;  %v930_v17 = vld [vmem:[%s1060_s28 + $0x60] sm:$0xff]   ;;  %v934_v21 = vld [vmem:[%s1060_s28 + $0x68] sm:$0xff]  }
  0x1d   : > { %861 = vmatprep.subr.bf16.mxu1 %v919_v6  ;;  %v927_v14 = vld [vmem:[%s1060_s28 + $0xd8] sm:$0xff]   ;;  %v931_v18 = vld [vmem:[%s1060_s28 + $0xe0] sm:$0xff]   ;;  %v935_v22 = vld [vmem:[%s1060_s28 + $0xe8] sm:$0xff]   ;;  %v370_v40 = vsub.s32 %v367_v39, %v369_v37 }
  0x1e   : > { %v928_v15 = vld [vmem:[%s1060_s28 + $0x18] sm:$0xff]   ;;  %v932_v19 = vld [vmem:[%s1060_s28 + $0x20] sm:$0xff]   ;;  %v936_v23 = vld [vmem:[%s1060_s28 + $0x28] sm:$0xff]  }
  0x1f   : > { %840 = vmatpush3.bf16.msra.mxu0 %v920_v7  ;;  %v929_v16 = vld [vmem:[%s1060_s28 + $0x98] sm:$0xff]   ;;  %v933_v20 = vld [vmem:[%s1060_s28 + $0xa0] sm:$0xff]   ;;  %v937_v24 = vld [vmem:[%s1060_s28 + $0xa8] sm:$0xff]  }
  0x20   : > { %862 = vmatpush3.bf16.msra.mxu1 %v921_v8  ;;  %841 = vmatprep.subr.bf16.mxu0 %v922_v9  ;;  %v938_v25 = vld [vmem:[%s1060_s28 + $0x70] sm:$0xff]   ;;  %v942_v29 = vld [vmem:[%s1060_s28 + $0x78] sm:$0xff]   ;;  %v797_v34 = vld.sshfl [vmem:[%s267_s24] sm:$0x33 pattern:$0x75316420] }
  0x21   : > { %863 = vmatprep.subr.bf16.mxu1 %v923_v10  ;;  %v939_v26 = vld [vmem:[%s1060_s28 + $0xf0] sm:$0xff]   ;;  %v943_v30 = vld [vmem:[%s1060_s28 + $0xf8] sm:$0xff]   ;;  %v364_v38 = vcombine.high %v797_v34, %v797_v34  ;;  %v371_v42 = vrot.slane %v797_v34, %v370_v40  ;;  %v290_v54 = vld [vmem:[#allocation2] sm:$0x3] }
  0x22   : > { %v940_v27 = vld [vmem:[%s1060_s28 + $0x30] sm:$0xff]   ;;  %v944_v32 = vld [vmem:[%s1060_s28 + $0x38] sm:$0xff]   ;;  %v831_v59 = vld [vmem:[%s1146_s2] ss:$0 sm:$0xff] (!%p830_p7) }
  0x23   : > { %842 = vmatpush3.bf16.msra.mxu0 %v924_v11  ;;  %v941_v28 = vld [vmem:[%s1060_s28 + $0xb0] sm:$0xff]   ;;  %v945_v33 = vld [vmem:[%s1060_s28 + $0xb8] sm:$0xff]   ;;  %v378_v41 = vrot.slane %v364_v38, %v370_v40  ;;  %v379_v44 = vcombine.high %v371_v42, %v371_v42  ;;  %v832_v60 = vld [vmem:[%s1147_s3] ss:$0 sm:$0xff] (!%p830_p7) }
  0x24   : > { %864 = vmatpush3.bf16.msra.mxu1 %v925_v12  ;;  %843 = vmatprep.subr.bf16.mxu0 %v926_v13 }
  0x25   : > { %865 = vmatprep.subr.bf16.mxu1 %v927_v14  ;;  %609 = vmatprep.mubr.bf16.mxu0 %v378_v41  ;;  %v380_v43 = vcombine.high %v378_v41, %v378_v41 }
  0x27   : > { %844 = vmatpush3.bf16.msra.mxu0 %v928_v15  ;;  %649 = vmatprep.mubr.bf16.mxu1 %v380_v43 }
  0x28   : > { %866 = vmatpush3.bf16.msra.mxu1 %v929_v16  ;;  %845 = vmatprep.subr.bf16.mxu0 %v930_v17 }
  0x29   : > { %867 = vmatprep.subr.bf16.mxu1 %v931_v18 }
  0x2b   : > { %846 = vmatpush3.bf16.msra.mxu0 %v932_v19 }
  0x2c   : > { %868 = vmatpush3.bf16.msra.mxu1 %v933_v20  ;;  %847 = vmatprep.subr.bf16.mxu0 %v934_v21 }
  0x2d   : > { %869 = vmatprep.subr.bf16.mxu1 %v935_v22 }
  0x2f   : > { %848 = vmatpush3.bf16.msra.mxu0 %v936_v23 }
  0x30   : > { %870 = vmatpush3.bf16.msra.mxu1 %v937_v24  ;;  %849 = vmatprep.subr.bf16.mxu0 %v938_v25 }
  0x31   : > { %871 = vmatprep.subr.bf16.mxu1 %v939_v26 }
  0x33   : > { %850 = vmatpush3.bf16.msra.mxu0 %v940_v27 }
  0x34   : > { %872 = vmatpush3.bf16.msra.mxu1 %v941_v28  ;;  %851 = vmatprep.subr.bf16.mxu0 %v942_v29 }
  0x35   : > { %873 = vmatprep.subr.bf16.mxu1 %v943_v30 }
  0x37   : > { %852 = vmatpush3.bf16.msra.mxu0 %v944_v32 }
  0x38   : > { %874 = vmatpush3.bf16.msra.mxu1 %v945_v33 }
  0x3a   : > { %610 = vmatmul.mubr.bf16.vlgmr.msra.gmra.mrb[0].mxu0 %v371_v42 }
  0x3b   : > { %650 = vmatmul.mubr.bf16.vlgmr.msra.gmra.mrb[0].mxu1 %v379_v44 }
 0x10d   : > { %v853_v45 = vpop.f32.mrb[0].mxu0 }
 0x10e   : > { %v854_v46 = vpop.f32.mrb[1].mxu0  ;;  %v875_v47 = vpop.f32.mrb[0].mxu1 }
 0x10f   : > { %v855_v48 = vadd.f32 %v854_v46, %v853_v45  ;;  %v856_v49 = vpop.f32.mrb[2].mxu0  ;;  %v876_v50 = vpop.f32.mrb[1].mxu1 }
 0x110   : > { %v857_v51 = vpop.f32.mrb[3].mxu0  ;;  %v877_v52 = vadd.f32 %v876_v50, %v875_v47  ;;  %v878_v53 = vpop.f32.mrb[2].mxu1  ;;  %662 = sbr.rel (%p830_p7) target bundleno = 291 (0x123), region = 44 }
 0x111   : > { %v879_v55 = vpop.f32.mrb[3].mxu1 }
 0x112   : > { %v652_v56 = vadd.f32 %v877_v52, %v855_v48 }
 0x114   : > { %v657_v57 = vadd.f32 %v652_v56, %v290_v54 }
 0x116   : > { %658 = vst [vmem:[#allocation2] sm:$0x3] %v657_v57 }
 0x11d   : > { %v663_v58 = vld [vmem:[#allocation2] sm:$0x3] }
 0x11e   : > { %v671_v61 = vmul.f32 %v831_v59, %v663_v58 }
 0x120   : > { %v679_v62 = vadd.f32 %v832_v60, %v671_v61 }
 0x122   : > { %680 = vst [vmem:[#allocation3] sm:$0x3] %v679_v62 }
 0x123 PF: > { %p1109_p8 = scmp.eq.s32.totalorder %s787_s18, 4  ;;  %s1002_s10 = smov [#allocation3]  }
 0x124   : > { %s691_s11 = sshll.u32 %s1002_s10, 4  ;;  %s692_s11 = int_to_ptr.vmem [resolvable:$true] %s691_s11 }
 0x125   : > { %s946_s12 = scalar_lea.vmem %s692_s11, 32  ;;  %p953_p12 = scmp.lt.s32.totalorder %s692_s11, %s692_s11 }
 0x126   : > { %p947_p9 = scmp.ne.s32.totalorder %s692_s11, %s946_s12  ;;  %p954_p13 = scmp.lt.s32.totalorder %s946_s12, %s946_s12 }
 0x128   : > { %p948_p10 = pnand %p947_p9, %p1109_p8  ;;  %p955_p0 = por %p954_p13, %p953_p12 }
 0x12a   : > { %p949_p11 = pneg %p948_p10 }
 0x12c   : > { %p956_p1 = pnand %p955_p0, %p949_p11 }
 0x12e   : > { %959 = shalt.err (!%p956_p1)
}
 0x12f   : > { %s960_s15 = scalar_lea.hbm %s1148_s4, 32 }
 0x130   : > { %p961_p2 = scmp.ne.s32.totalorder %s1148_s4, %s960_s15  ;;  %p966_p5 = scmp.lt.u32.totalorder %s960_s15, %s1148_s4 }
 0x132   : > { %p962_p3 = pnand %p961_p2, %p1109_p8 }
 0x134   : > { %p963_p4 = pneg %p962_p3 }
 0x136   : > { %p968_p6 = pnand %p966_p5, %p963_p4 }
 0x138   : > { %971 = shalt.err (!%p968_p6)
}
 0x139   : > { %882 = dma.vmem_to_hbm [thread:$0]  (%p1109_p8), %s692_s11, 32, %s1148_s4, [#allocation4]  }
 0x13a   : > { %985 = dma.done.wait (%p1109_p8), [#allocation4], 32  }
 0x13b   : > { %987 = vsyncadd (%p1109_p8), [#allocation4], 4294967264 }
 0x13c PF: > { %s15_s17 = sadd.s32 1, %s998_s17   ;;  %s1150_s15 = smov %s994_s16 }
 0x13d   : > { %p12_p7 = scmp.ge.s32.totalorder %s15_s17, 7   ;;  %s1151_s16 = smov %s1153_s19 }
 0x13f   :  { %14 = sbr.rel (!%p12_p7) target bundleno = 2 (0x2), region = 81 }
 0x146   :  { %704 = vsyncpa [#allocation4], 1 }
 0x147   :  { %706 = vsyncpa [#allocation4 + $0x1], 1 }

</bundles_post_ra>
